<compile_context>
chip_gen: v7x
topology: tpu7x:2x2x1
jax: 0.10.0
libtpu: 0.0.40
codegen_flags: <defaults>
</compile_context>

<pallas_src>
import functools

import jax
import jax.numpy as jnp
from jax import lax
from jax.experimental import pallas as pl
from jax.experimental.pallas import tpu as pltpu

# ---------------- configuration (scaled-down resnet50 + parsingNet head) ----
BASE = 8                       # resnet50 uses 64
BLOCKS = (3, 4, 6, 3)          # resnet50 layer depths
PLANES = (BASE, BASE * 2, BASE * 4, BASE * 8)
STRIDES = (1, 2, 2, 2)
EXPANSION = 4                  # Bottleneck expansion
POOL_CH = 8                    # parsingNet: Conv2d(2048, 8, 1)
HIDDEN = 64                    # parsingNet uses 2048
CLS_DIM = (5, 4, 4)            # parsingNet uses (37, 10, 4)
TOTAL_DIM = CLS_DIM[0] * CLS_DIM[1] * CLS_DIM[2]

LANE = 128                     # TPU lane width: channel dims padded to this
ACT_DTYPE = jnp.bfloat16       # MXU-native operand / activation dtype

VMEM_SPEC = pl.BlockSpec(memory_space=pltpu.MemorySpace.VMEM)


def _round_up(x, m):
    return (x + m - 1) // m * m


def _cp(c):
    """Channel count padded to a lane-dense multiple of 128."""
    return _round_up(c, LANE)


# ---------------- Pallas kernels --------------------------------------------
def _mm_bias_kernel(*refs, relu, has_res):
    """Tiled  out = [relu]( x @ w + bias [+ residual] )  with f32 accumulator.

    Grid = (M tiles, N tiles, K tiles); K is the reduction ("arbitrary") axis.
    BN scale is pre-folded into w, so the epilogue is bias(+res)(+relu) only.
    """
    if has_res:
        x_ref, w_ref, b_ref, r_ref, o_ref, acc_ref = refs
    else:
        x_ref, w_ref, b_ref, o_ref, acc_ref = refs
        r_ref = None

    @pl.when(pl.program_id(2) == 0)
    def _():
        acc_ref[...] = jnp.zeros_like(acc_ref)

    acc_ref[...] += jnp.dot(x_ref[...], w_ref[...],
                            preferred_element_type=jnp.float32)

    @pl.when(pl.program_id(2) == pl.num_programs(2) - 1)
    def _():
        y = acc_ref[...] + b_ref[...]
        if r_ref is not None:
            y = y + r_ref[...].astype(jnp.float32)
        if relu:
            y = jnp.maximum(y, 0.0)
        o_ref[...] = y.astype(o_ref.dtype)


def _head_kernel(x_ref, w1_ref, b1_ref, w2_ref, b2_ref, o_ref):
    """Fused classifier head: Linear -> ReLU -> Linear, hidden stays in VMEM."""
    h = jnp.dot(x_ref[...], w1_ref[...], preferred_element_type=jnp.float32)
    h = jnp.maximum(h + b1_ref[...], 0.0)
    y = jnp.dot(h.astype(w2_ref.dtype), w2_ref[...],
                preferred_element_type=jnp.float32)
    o_ref[...] = (y + b2_ref[...]).astype(o_ref.dtype)


# ---------------- tiled matmul wrapper ---------------------------------------
def matmul_bias(x, w, b, *, relu, residual=None, out_dtype=ACT_DTYPE):
    """x:(M,K<=Kp) bf16, w:(Kp,Np) bf16 (Np % 128 == 0), b:(1,Np) f32."""
    m, k = x.shape
    kp, n_pad = w.shape
    assert n_pad % LANE == 0 and k <= kp

    # Tile choices: lane-dense N tile, biggest M tile that divides padded M.
    tn = LANE
    if m >= 512:
        tm = 512
    elif m >= 256:
        tm = 256
    else:
        tm = _round_up(m, 16)          # bf16 sublane packing
    mp = _round_up(m, tm)
    tk = kp if kp <= 1024 else 512
    kpad = _round_up(kp, tk)

    x = x.astype(ACT_DTYPE)
    if mp != m or kpad != k:
        x = jnp.pad(x, ((0, mp - m), (0, kpad - k)))
    if kpad != kp:
        w = jnp.pad(w, ((0, kpad - kp), (0, 0)))

    args = [x, w, b.astype(jnp.float32)]
    in_specs = [
        pl.BlockSpec((tm, tk), lambda i, j, kk: (i, kk)),
        pl.BlockSpec((tk, tn), lambda i, j, kk: (kk, j)),
        pl.BlockSpec((1, tn), lambda i, j, kk: (0, j)),
    ]
    if residual is not None:
        r = residual.astype(ACT_DTYPE)
        if mp != m:
            r = jnp.pad(r, ((0, mp - m), (0, 0)))
        args.append(r)
        in_specs.append(pl.BlockSpec((tm, tn), lambda i, j, kk: (i, j)))

    grid = (mp // tm, n_pad // tn, kpad // tk)
    kern = functools.partial(_mm_bias_kernel, relu=relu,
                             has_res=residual is not None)
    out = pl.pallas_call(
        kern,
        out_shape=jax.ShapeDtypeStruct((mp, n_pad), out_dtype),
        grid_spec=pltpu.PrefetchScalarGridSpec(
            num_scalar_prefetch=0,
            grid=grid,
            in_specs=in_specs,
            out_specs=pl.BlockSpec((tm, tn), lambda i, j, kk: (i, j)),
            scratch_shapes=[pltpu.VMEM((tm, tn), jnp.float32)],
        ),
        compiler_params=pltpu.CompilerParams(
            dimension_semantics=("parallel", "parallel", "arbitrary"),
            vmem_limit_bytes=32 * 1024 * 1024),
    )(*args)
    if mp != m:
        out = out[:m]
    return out


# ---------------- conv / pool wrappers (glue: padding, im2col, reshape) -----
def _extract_patches(x, kh, kw, stride, padding):
    # TODO(synk): fuse im2col into the matmul kernel (grid axis over taps with
    #             halo'd spatial tiles) to avoid the kh*kw-expanded HBM copy.
    n, h, w, c = x.shape
    xp = jnp.pad(x, ((0, 0), (padding, padding), (padding, padding), (0, 0)))
    ho = (h + 2 * padding - kh) // stride + 1
    wo = (w + 2 * padding - kw) // stride + 1
    cols = []
    for i in range(kh):
        for j in range(kw):
            cols.append(xp[:, i:i + (ho - 1) * stride + 1:stride,
                           j:j + (wo - 1) * stride + 1:stride, :])
    return jnp.concatenate(cols, axis=-1), ho, wo


def conv2d_block(x, w2d, bias, *, kh, kw, cin, stride=1, padding=0,
                 relu=True, residual=None):
    """Conv2d (+folded BN, +optional residual, +optional ReLU) on lane-padded
    NHWC activations.  x: (N,H,W,Cp) bf16;  w2d: (Kp, Np) bf16;  bias: (1,Np).
    1x1 convs consume the padded channels directly (no im2col, no slicing)."""
    n = x.shape[0]
    if kh == 1 and kw == 1:
        xs = x if stride == 1 else x[:, ::stride, ::stride, :]
        ho, wo = xs.shape[1], xs.shape[2]
        x2d = xs.reshape(n * ho * wo, xs.shape[3])
    else:
        xs = x[..., :cin]                       # drop zero lane padding
        patches, ho, wo = _extract_patches(xs, kh, kw, stride, padding)
        x2d = patches.reshape(n * ho * wo, kh * kw * cin)

    n_pad = w2d.shape[1]
    res2d = None
    if residual is not None:
        res2d = residual.reshape(n * ho * wo, n_pad)
    y = matmul_bias(x2d, w2d, bias, relu=relu, residual=res2d)
    return y.reshape(n, ho, wo, n_pad)


def maxpool_3x3_s2(x):
    """MaxPool2d(kernel_size=3, stride=2, padding=1) on lane-padded NHWC."""
    # TODO(synk): fold this reduction into the stem conv's Pallas epilogue to
    #             avoid one HBM round trip of the stem activation.
    return lax.reduce_window(
        x, jnp.array(-jnp.inf, x.dtype), lax.max,
        window_dimensions=(1, 3, 3, 1), window_strides=(1, 2, 2, 1),
        padding=((0, 0), (1, 1), (1, 1), (0, 0)))


# ---------------- parameters (deterministic, synthetic) ---------------------
def make_params(key, fh, fw):
    key_iter = iter(jax.random.split(key, 256))

    def conv_pack(kh, kw, cin, cout, bn_scale=None, conv_bias=None):
        """Kaiming conv weight with eval-mode BN folded in, packed as a
        lane-padded (Kp, Np) bf16 matrix + (1, Np) f32 bias."""
        k = next(key_iter)
        std = (2.0 / (kh * kw * cin)) ** 0.5
        w = jax.random.normal(k, (kh, kw, cin, cout), jnp.float32) * std
        if bn_scale is None:
            bn_scale = jnp.ones((cout,), jnp.float32)     # BN weight=1, var=1
        if conv_bias is None:
            conv_bias = jnp.zeros((cout,), jnp.float32)   # BN bias=0 / conv 0
        w2d = w.reshape(kh * kw * cin, cout) * bn_scale[None, :]  # fold BN
        krows = _cp(kh * kw * cin)
        nout = _cp(cout)
        w2d = jnp.pad(w2d, ((0, krows - kh * kw * cin), (0, nout - cout)))
        b = jnp.pad(conv_bias, (0, nout - cout)).reshape(1, nout)
        return dict(w=w2d.astype(ACT_DTYPE), b=b.astype(jnp.float32))

    params = {}
    # stem: Conv2d(3, BASE, 7, stride=2, padding=3, bias=False) + BN + ReLU
    params['conv1'] = conv_pack(7, 7, 3, BASE)

    inplanes = BASE
    for li, (planes, blocks) in enumerate(zip(PLANES, BLOCKS)):
        layer = []
        for bi in range(blocks):
            stride = STRIDES[li] if bi == 0 else 1
            blk = {
                'c1': conv_pack(1, 1, inplanes, planes),
                'c2': conv_pack(3, 3, planes, planes),
                'c3': conv_pack(1, 1, planes, planes * EXPANSION),
            }
            if stride != 1 or inplanes != planes * EXPANSION:
                blk['cd'] = conv_pack(1, 1, inplanes, planes * EXPANSION)
            layer.append(blk)
            inplanes = planes * EXPANSION
        params[f'layer{li + 1}'] = layer

    # parsingNet head: self.pool = Conv2d(2048, 8, 1)  (conv bias init 0)
    params['pool'] = conv_pack(1, 1, inplanes, POOL_CH)

    # self.cls = Linear(flat, HIDDEN) -> ReLU -> Linear(HIDDEN, TOTAL_DIM)
    # torch flattens the pooled map in NCHW (c,h,w) order; fold that
    # permutation (and the lane padding) into fc1's weight rows once here.
    w1 = jax.random.normal(next(key_iter), (POOL_CH, fh, fw, HIDDEN),
                           jnp.float32) * 0.01            # rows in (c,h,w)
    w1 = jnp.transpose(w1, (1, 2, 0, 3))                  # -> (h,w,c,HIDDEN)
    w1p = jnp.zeros((fh, fw, _cp(POOL_CH), HIDDEN), jnp.float32)
    w1p = w1p.at[:, :, :POOL_CH, :].set(w1)
    params['fc1'] = dict(
        w=w1p.reshape(fh * fw * _cp(POOL_CH), HIDDEN).astype(ACT_DTYPE),
        b=(jax.random.normal(next(key_iter), (1, HIDDEN), jnp.float32) * 0.01))
    params['fc2'] = dict(
        w=(jax.random.normal(next(key_iter), (HIDDEN, TOTAL_DIM),
                             jnp.float32) * 0.01).astype(ACT_DTYPE),
        b=(jax.random.normal(next(key_iter), (1, TOTAL_DIM),
                             jnp.float32) * 0.01))
    return params


# ---------------- forward pass ----------------------------------------------
def head_mlp(flat, fc1, fc2):
    """Fused  Linear -> ReLU -> Linear  (single Pallas call, tiny operands)."""
    n = flat.shape[0]
    npad = _round_up(n, 8)
    x = flat.astype(ACT_DTYPE)
    if npad != n:
        x = jnp.pad(x, ((0, npad - n), (0, 0)))
    out = pl.pallas_call(
        _head_kernel,
        out_shape=jax.ShapeDtypeStruct((npad, TOTAL_DIM), jnp.float32),
        in_specs=[VMEM_SPEC] * 5,
        out_specs=VMEM_SPEC,
    )(x, fc1['w'], fc1['b'], fc2['w'], fc2['b'])
    return out[:n]


def forward(params, x_nchw):
    x = jnp.transpose(x_nchw, (0, 2, 3, 1)).astype(ACT_DTYPE)  # NCHW -> NHWC

    c1 = params['conv1']
    x = conv2d_block(x, c1['w'], c1['b'], kh=7, kw=7, cin=3,
                     stride=2, padding=3, relu=True)
    x = maxpool_3x3_s2(x)

    inplanes = BASE
    feats = []
    for li in range(4):
        planes = PLANES[li]
        for bi, blk in enumerate(params[f'layer{li + 1}']):
            stride = STRIDES[li] if bi == 0 else 1
            identity = x
            out = conv2d_block(x, blk['c1']['w'], blk['c1']['b'],
                               kh=1, kw=1, cin=inplanes, relu=True)
            out = conv2d_block(out, blk['c2']['w'], blk['c2']['b'],
                               kh=3, kw=3, cin=planes, stride=stride,
                               padding=1, relu=True)
            if 'cd' in blk:
                identity = conv2d_block(x, blk['cd']['w'], blk['cd']['b'],
                                        kh=1, kw=1, cin=inplanes,
                                        stride=stride, relu=False)
            # out = relu(bn3(conv3(out)) + identity) — residual fused in-kernel
            out = conv2d_block(out, blk['c3']['w'], blk['c3']['b'],
                               kh=1, kw=1, cin=planes, relu=True,
                               residual=identity)
            x = out
            inplanes = planes * EXPANSION
        feats.append(x)
    # backbone returns (x2, x3, x4); use_aux=False so only fea=x4 is consumed.
    # TODO(synk): aux_header2/3/4 + bilinear interpolate + aux_combine path
    #             (use_aux=True) not implemented; dead code for this forward.
    fea = feats[3]

    p = params['pool']
    pooled = conv2d_block(fea, p['w'], p['b'], kh=1, kw=1, cin=inplanes,
                          relu=False)
    n = pooled.shape[0]
    # torch: self.pool(fea).view(-1, 1800) flattens in (C,H,W) order; that
    # permutation is folded into fc1's weight rows, so the lane-padded NHWC
    # map flattens with a free reshape (padded lanes are exact zeros and hit
    # zero rows of fc1).
    flat = pooled.reshape(n, -1)

    out = head_mlp(flat, params['fc1'], params['fc2'])
    return out.reshape(n, *CLS_DIM)  # group_cls


# ---------------- main -------------------------------------------------------
if __name__ == "__main__":
    key = jax.random.PRNGKey(0)
    k_params, k_x = jax.random.split(key)

    N, H, W = 2, 64, 64                      # small, /32-divisible spatial
    x = jax.random.normal(k_x, (N, 3, H, W), jnp.float32)  # NCHW like PyTorch

    fh, fw = H // 32, W // 32                # layer4 output spatial
    params = make_params(k_params, fh, fw)

    fwd = jax.jit(forward)
    group_cls = fwd(params, x)
    jax.block_until_ready(group_cls)

    assert group_cls.shape == (N,) + CLS_DIM, group_cls.shape
    assert group_cls.dtype == jnp.float32
    print("KERNEL_OK")
</pallas_src>

<mosaic_0001>
module attributes {stable_mosaic.version = 11 : i64} {
  func.func @_mm_bias_kernel(%arg0: i32, %arg1: i32, %arg2: i32, %arg3: memref<512x256xbf16, #tpu.memory_space<vmem>>, %arg4: memref<256x128xbf16, #tpu.memory_space<vmem>>, %arg5: memref<1x128xf32, #tpu.memory_space<vmem>>, %arg6: memref<512x128xbf16, #tpu.memory_space<vmem>>, %arg7: memref<512x128xf32, #tpu.memory_space<vmem>>) attributes {dimension_semantics = [#tpu.dimension_semantics<parallel>, #tpu.dimension_semantics<parallel>, #tpu.dimension_semantics<arbitrary>], iteration_bounds = array<i64: 4, 1, 1>, scalar_prefetch = 0 : i64, scratch_operands = 1 : i64, tpu.core_type = #tpu.core_type<tc>, window_params = [{transform_indices = @transform_0, window_bounds = array<i64: 512, 256>}, {transform_indices = @transform_1, window_bounds = array<i64: 256, 128>}, {transform_indices = @transform_2, window_bounds = array<i64: 1, 128>}, {transform_indices = @transform_3, window_bounds = array<i64: 512, 128>}]} {
    %c0_i32 = arith.constant 0 : i32
    %0 = arith.cmpi eq, %arg2, %c0_i32 : i32
    %1 = arith.extui %0 : i1 to i32
    %c0_i32_0 = arith.constant 0 : i32
    %2 = arith.cmpi ne, %1, %c0_i32_0 : i32
    scf.if %2 {
      %cst_10 = arith.constant 0.000000e+00 : f32
      %12 = vector.broadcast %cst_10 : f32 to vector<512x128xf32>
      %c0_11 = arith.constant 0 : index
      %c0_12 = arith.constant 0 : index
      %13 = vector.load %arg7[%c0_11, %c0_12] : memref<512x128xf32, #tpu.memory_space<vmem>>, vector<512x128xf32>
      tpu.vector_store %arg7[%c0_11, %c0_12], %12 {strides = array<i32>} : memref<512x128xf32, #tpu.memory_space<vmem>>, vector<512x128xf32>,
    } else {
    }
    %c0 = arith.constant 0 : index
    %c0_1 = arith.constant 0 : index
    %3 = vector.load %arg7[%c0, %c0_1] : memref<512x128xf32, #tpu.memory_space<vmem>>, vector<512x128xf32>
    %c0_2 = arith.constant 0 : index
    %c0_3 = arith.constant 0 : index
    %4 = vector.load %arg3[%c0_2, %c0_3] : memref<512x256xbf16, #tpu.memory_space<vmem>>, vector<512x256xbf16>
    %c0_4 = arith.constant 0 : index
    %c0_5 = arith.constant 0 : index
    %5 = vector.load %arg4[%c0_4, %c0_5] : memref<256x128xbf16, #tpu.memory_space<vmem>>, vector<256x128xbf16>
    %cst = arith.constant dense<0.000000e+00> : vector<512x128xf32>
    %6 = tpu.matmul %4, %5, %cst {dimension_numbers = #tpu.dot_dimension_numbers<[1], [0], [0], [1], [0, 0, 1, 1], [], []>} : vector<512x256xbf16>, vector<256x128xbf16>, vector<512x128xf32> -> vector<512x128xf32>
    %7 = arith.addf %3, %6 : vector<512x128xf32>
    %c0_6 = arith.constant 0 : index
    %c0_7 = arith.constant 0 : index
    %8 = vector.load %arg7[%c0_6, %c0_7] : memref<512x128xf32, #tpu.memory_space<vmem>>, vector<512x128xf32>
    tpu.vector_store %arg7[%c0_6, %c0_7], %7 {strides = array<i32>} : memref<512x128xf32, #tpu.memory_space<vmem>>, vector<512x128xf32>,
    %c0_i32_8 = arith.constant 0 : i32
    %9 = arith.cmpi eq, %arg2, %c0_i32_8 : i32
    %10 = arith.extui %9 : i1 to i32
    %c0_i32_9 = arith.constant 0 : i32
    %11 = arith.cmpi ne, %10, %c0_i32_9 : i32
    scf.if %11 {
      %c0_10 = arith.constant 0 : index
      %c0_11 = arith.constant 0 : index
      %12 = vector.load %arg7[%c0_10, %c0_11] : memref<512x128xf32, #tpu.memory_space<vmem>>, vector<512x128xf32>
      %c0_12 = arith.constant 0 : index
      %c0_13 = arith.constant 0 : index
      %13 = vector.load %arg5[%c0_12, %c0_13] : memref<1x128xf32, #tpu.memory_space<vmem>>, vector<1x128xf32>
      %14 = vector.broadcast %13 : vector<1x128xf32> to vector<512x128xf32>
      %15 = arith.addf %12, %14 : vector<512x128xf32>
      %cst_14 = arith.constant 0.000000e+00 : f32
      %16 = vector.broadcast %cst_14 : f32 to vector<512x128xf32>
      %17 = arith.maximumf %15, %16 : vector<512x128xf32>
      %18 = arith.truncf %17 : vector<512x128xf32> to vector<512x128xbf16>
      %c0_15 = arith.constant 0 : index
      %c0_16 = arith.constant 0 : index
      %19 = vector.load %arg6[%c0_15, %c0_16] : memref<512x128xbf16, #tpu.memory_space<vmem>>, vector<512x128xbf16>
      tpu.vector_store %arg6[%c0_15, %c0_16], %18 {strides = array<i32>} : memref<512x128xbf16, #tpu.memory_space<vmem>>, vector<512x128xbf16>,
    } else {
    }
    return
  }
  func.func @transform_0(%arg0: i32, %arg1: i32, %arg2: i32) -> (i32, i32) {
    %c0_i32 = arith.constant 0 : i32
    return %arg0, %arg2 : i32, i32
  }
  func.func @transform_1(%arg0: i32, %arg1: i32, %arg2: i32) -> (i32, i32) {
    %c0_i32 = arith.constant 0 : i32
    return %arg2, %arg1 : i32, i32
  }
  func.func @transform_2(%arg0: i32, %arg1: i32, %arg2: i32) -> (i32, i32) {
    %c0_i32 = arith.constant 0 : i32
    %c0_i32_0 = arith.constant 0 : i32
    return %c0_i32, %arg1 : i32, i32
  }
  func.func @transform_3(%arg0: i32, %arg1: i32, %arg2: i32) -> (i32, i32) {
    %c0_i32 = arith.constant 0 : i32
    return %arg0, %arg1 : i32, i32
  }
}

module attributes {stable_mosaic.version = 11 : i64} {
  func.func @_mm_bias_kernel(%arg0: i32, %arg1: i32, %arg2: i32, %arg3: memref<512x128xbf16, #tpu.memory_space<vmem>>, %arg4: memref<128x128xbf16, #tpu.memory_space<vmem>>, %arg5: memref<1x128xf32, #tpu.memory_space<vmem>>, %arg6: memref<512x128xbf16, #tpu.memory_space<vmem>>, %arg7: memref<512x128xf32, #tpu.memory_space<vmem>>) attributes {dimension_semantics = [#tpu.dimension_semantics<parallel>, #tpu.dimension_semantics<parallel>, #tpu.dimension_semantics<arbitrary>], iteration_bounds = array<i64: 1, 1, 1>, scalar_prefetch = 0 : i64, scratch_operands = 1 : i64, tpu.core_type = #tpu.core_type<tc>, window_params = [{transform_indices = @transform_0, window_bounds = array<i64: 512, 128>}, {transform_indices = @transform_1, window_bounds = array<i64: 128, 128>}, {transform_indices = @transform_2, window_bounds = array<i64: 1, 128>}, {transform_indices = @transform_3, window_bounds = array<i64: 512, 128>}]} {
    %c0_i32 = arith.constant 0 : i32
    %0 = arith.cmpi eq, %arg2, %c0_i32 : i32
    %1 = arith.extui %0 : i1 to i32
    %c0_i32_0 = arith.constant 0 : i32
    %2 = arith.cmpi ne, %1, %c0_i32_0 : i32
    scf.if %2 {
      %cst_10 = arith.constant 0.000000e+00 : f32
      %12 = vector.broadcast %cst_10 : f32 to vector<512x128xf32>
      %c0_11 = arith.constant 0 : index
      %c0_12 = arith.constant 0 : index
      %13 = vector.load %arg7[%c0_11, %c0_12] : memref<512x128xf32, #tpu.memory_space<vmem>>, vector<512x128xf32>
      tpu.vector_store %arg7[%c0_11, %c0_12], %12 {strides = array<i32>} : memref<512x128xf32, #tpu.memory_space<vmem>>, vector<512x128xf32>,
    } else {
    }
    %c0 = arith.constant 0 : index
    %c0_1 = arith.constant 0 : index
    %3 = vector.load %arg7[%c0, %c0_1] : memref<512x128xf32, #tpu.memory_space<vmem>>, vector<512x128xf32>
    %c0_2 = arith.constant 0 : index
    %c0_3 = arith.constant 0 : index
    %4 = vector.load %arg3[%c0_2, %c0_3] : memref<512x128xbf16, #tpu.memory_space<vmem>>, vector<512x128xbf16>
    %c0_4 = arith.constant 0 : index
    %c0_5 = arith.constant 0 : index
    %5 = vector.load %arg4[%c0_4, %c0_5] : memref<128x128xbf16, #tpu.memory_space<vmem>>, vector<128x128xbf16>
    %cst = arith.constant dense<0.000000e+00> : vector<512x128xf32>
    %6 = tpu.matmul %4, %5, %cst {dimension_numbers = #tpu.dot_dimension_numbers<[1], [0], [0], [1], [0, 0, 1, 1], [], []>} : vector<512x128xbf16>, vector<128x128xbf16>, vector<512x128xf32> -> vector<512x128xf32>
    %7 = arith.addf %3, %6 : vector<512x128xf32>
    %c0_6 = arith.constant 0 : index
    %c0_7 = arith.constant 0 : index
    %8 = vector.load %arg7[%c0_6, %c0_7] : memref<512x128xf32, #tpu.memory_space<vmem>>, vector<512x128xf32>
    tpu.vector_store %arg7[%c0_6, %c0_7], %7 {strides = array<i32>} : memref<512x128xf32, #tpu.memory_space<vmem>>, vector<512x128xf32>,
    %c0_i32_8 = arith.constant 0 : i32
    %9 = arith.cmpi eq, %arg2, %c0_i32_8 : i32
    %10 = arith.extui %9 : i1 to i32
    %c0_i32_9 = arith.constant 0 : i32
    %11 = arith.cmpi ne, %10, %c0_i32_9 : i32
    scf.if %11 {
      %c0_10 = arith.constant 0 : index
      %c0_11 = arith.constant 0 : index
      %12 = vector.load %arg7[%c0_10, %c0_11] : memref<512x128xf32, #tpu.memory_space<vmem>>, vector<512x128xf32>
      %c0_12 = arith.constant 0 : index
      %c0_13 = arith.constant 0 : index
      %13 = vector.load %arg5[%c0_12, %c0_13] : memref<1x128xf32, #tpu.memory_space<vmem>>, vector<1x128xf32>
      %14 = vector.broadcast %13 : vector<1x128xf32> to vector<512x128xf32>
      %15 = arith.addf %12, %14 : vector<512x128xf32>
      %cst_14 = arith.constant 0.000000e+00 : f32
      %16 = vector.broadcast %cst_14 : f32 to vector<512x128xf32>
      %17 = arith.maximumf %15, %16 : vector<512x128xf32>
      %18 = arith.truncf %17 : vector<512x128xf32> to vector<512x128xbf16>
      %c0_15 = arith.constant 0 : index
      %c0_16 = arith.constant 0 : index
      %19 = vector.load %arg6[%c0_15, %c0_16] : memref<512x128xbf16, #tpu.memory_space<vmem>>, vector<512x128xbf16>
      tpu.vector_store %arg6[%c0_15, %c0_16], %18 {strides = array<i32>} : memref<512x128xbf16, #tpu.memory_space<vmem>>, vector<512x128xbf16>,
    } else {
    }
    return
  }
  func.func @transform_0(%arg0: i32, %arg1: i32, %arg2: i32) -> (i32, i32) {
    %c0_i32 = arith.constant 0 : i32
    return %arg0, %arg2 : i32, i32
  }
  func.func @transform_1(%arg0: i32, %arg1: i32, %arg2: i32) -> (i32, i32) {
    %c0_i32 = arith.constant 0 : i32
    return %arg2, %arg1 : i32, i32
  }
  func.func @transform_2(%arg0: i32, %arg1: i32, %arg2: i32) -> (i32, i32) {
    %c0_i32 = arith.constant 0 : i32
    %c0_i32_0 = arith.constant 0 : i32
    return %c0_i32, %arg1 : i32, i32
  }
  func.func @transform_3(%arg0: i32, %arg1: i32, %arg2: i32) -> (i32, i32) {
    %c0_i32 = arith.constant 0 : i32
    return %arg0, %arg1 : i32, i32
  }
}

module attributes {stable_mosaic.version = 11 : i64} {
  func.func @_mm_bias_kernel(%arg0: i32, %arg1: i32, %arg2: i32, %arg3: memref<512x128xbf16, #tpu.memory_space<vmem>>, %arg4: memref<128x128xbf16, #tpu.memory_space<vmem>>, %arg5: memref<1x128xf32, #tpu.memory_space<vmem>>, %arg6: memref<512x128xbf16, #tpu.memory_space<vmem>>, %arg7: memref<512x128xf32, #tpu.memory_space<vmem>>) attributes {dimension_semantics = [#tpu.dimension_semantics<parallel>, #tpu.dimension_semantics<parallel>, #tpu.dimension_semantics<arbitrary>], iteration_bounds = array<i64: 1, 1, 1>, scalar_prefetch = 0 : i64, scratch_operands = 1 : i64, tpu.core_type = #tpu.core_type<tc>, window_params = [{transform_indices = @transform_0, window_bounds = array<i64: 512, 128>}, {transform_indices = @transform_1, window_bounds = array<i64: 128, 128>}, {transform_indices = @transform_2, window_bounds = array<i64: 1, 128>}, {transform_indices = @transform_3, window_bounds = array<i64: 512, 128>}]} {
    %c0_i32 = arith.constant 0 : i32
    %0 = arith.cmpi eq, %arg2, %c0_i32 : i32
    %1 = arith.extui %0 : i1 to i32
    %c0_i32_0 = arith.constant 0 : i32
    %2 = arith.cmpi ne, %1, %c0_i32_0 : i32
    scf.if %2 {
      %cst_10 = arith.constant 0.000000e+00 : f32
      %12 = vector.broadcast %cst_10 : f32 to vector<512x128xf32>
      %c0_11 = arith.constant 0 : index
      %c0_12 = arith.constant 0 : index
      %13 = vector.load %arg7[%c0_11, %c0_12] : memref<512x128xf32, #tpu.memory_space<vmem>>, vector<512x128xf32>
      tpu.vector_store %arg7[%c0_11, %c0_12], %12 {strides = array<i32>} : memref<512x128xf32, #tpu.memory_space<vmem>>, vector<512x128xf32>,
    } else {
    }
    %c0 = arith.constant 0 : index
    %c0_1 = arith.constant 0 : index
    %3 = vector.load %arg7[%c0, %c0_1] : memref<512x128xf32, #tpu.memory_space<vmem>>, vector<512x128xf32>
    %c0_2 = arith.constant 0 : index
    %c0_3 = arith.constant 0 : index
    %4 = vector.load %arg3[%c0_2, %c0_3] : memref<512x128xbf16, #tpu.memory_space<vmem>>, vector<512x128xbf16>
    %c0_4 = arith.constant 0 : index
    %c0_5 = arith.constant 0 : index
    %5 = vector.load %arg4[%c0_4, %c0_5] : memref<128x128xbf16, #tpu.memory_space<vmem>>, vector<128x128xbf16>
    %cst = arith.constant dense<0.000000e+00> : vector<512x128xf32>
    %6 = tpu.matmul %4, %5, %cst {dimension_numbers = #tpu.dot_dimension_numbers<[1], [0], [0], [1], [0, 0, 1, 1], [], []>} : vector<512x128xbf16>, vector<128x128xbf16>, vector<512x128xf32> -> vector<512x128xf32>
    %7 = arith.addf %3, %6 : vector<512x128xf32>
    %c0_6 = arith.constant 0 : index
    %c0_7 = arith.constant 0 : index
    %8 = vector.load %arg7[%c0_6, %c0_7] : memref<512x128xf32, #tpu.memory_space<vmem>>, vector<512x128xf32>
    tpu.vector_store %arg7[%c0_6, %c0_7], %7 {strides = array<i32>} : memref<512x128xf32, #tpu.memory_space<vmem>>, vector<512x128xf32>,
    %c0_i32_8 = arith.constant 0 : i32
    %9 = arith.cmpi eq, %arg2, %c0_i32_8 : i32
    %10 = arith.extui %9 : i1 to i32
    %c0_i32_9 = arith.constant 0 : i32
    %11 = arith.cmpi ne, %10, %c0_i32_9 : i32
    scf.if %11 {
      %c0_10 = arith.constant 0 : index
      %c0_11 = arith.constant 0 : index
      %12 = vector.load %arg7[%c0_10, %c0_11] : memref<512x128xf32, #tpu.memory_space<vmem>>, vector<512x128xf32>
      %c0_12 = arith.constant 0 : index
      %c0_13 = arith.constant 0 : index
      %13 = vector.load %arg5[%c0_12, %c0_13] : memref<1x128xf32, #tpu.memory_space<vmem>>, vector<1x128xf32>
      %14 = vector.broadcast %13 : vector<1x128xf32> to vector<512x128xf32>
      %15 = arith.addf %12, %14 : vector<512x128xf32>
      %16 = arith.truncf %15 : vector<512x128xf32> to vector<512x128xbf16>
      %c0_14 = arith.constant 0 : index
      %c0_15 = arith.constant 0 : index
      %17 = vector.load %arg6[%c0_14, %c0_15] : memref<512x128xbf16, #tpu.memory_space<vmem>>, vector<512x128xbf16>
      tpu.vector_store %arg6[%c0_14, %c0_15], %16 {strides = array<i32>} : memref<512x128xbf16, #tpu.memory_space<vmem>>, vector<512x128xbf16>,
    } else {
    }
    return
  }
  func.func @transform_0(%arg0: i32, %arg1: i32, %arg2: i32) -> (i32, i32) {
    %c0_i32 = arith.constant 0 : i32
    return %arg0, %arg2 : i32, i32
  }
  func.func @transform_1(%arg0: i32, %arg1: i32, %arg2: i32) -> (i32, i32) {
    %c0_i32 = arith.constant 0 : i32
    return %arg2, %arg1 : i32, i32
  }
  func.func @transform_2(%arg0: i32, %arg1: i32, %arg2: i32) -> (i32, i32) {
    %c0_i32 = arith.constant 0 : i32
    %c0_i32_0 = arith.constant 0 : i32
    return %c0_i32, %arg1 : i32, i32
  }
  func.func @transform_3(%arg0: i32, %arg1: i32, %arg2: i32) -> (i32, i32) {
    %c0_i32 = arith.constant 0 : i32
    return %arg0, %arg1 : i32, i32
  }
}

module attributes {stable_mosaic.version = 11 : i64} {
  func.func @_mm_bias_kernel(%arg0: i32, %arg1: i32, %arg2: i32, %arg3: memref<512x128xbf16, #tpu.memory_space<vmem>>, %arg4: memref<128x128xbf16, #tpu.memory_space<vmem>>, %arg5: memref<1x128xf32, #tpu.memory_space<vmem>>, %arg6: memref<512x128xbf16, #tpu.memory_space<vmem>>, %arg7: memref<512x128xbf16, #tpu.memory_space<vmem>>, %arg8: memref<512x128xf32, #tpu.memory_space<vmem>>) attributes {dimension_semantics = [#tpu.dimension_semantics<parallel>, #tpu.dimension_semantics<parallel>, #tpu.dimension_semantics<arbitrary>], iteration_bounds = array<i64: 1, 1, 1>, scalar_prefetch = 0 : i64, scratch_operands = 1 : i64, tpu.core_type = #tpu.core_type<tc>, window_params = [{transform_indices = @transform_0, window_bounds = array<i64: 512, 128>}, {transform_indices = @transform_1, window_bounds = array<i64: 128, 128>}, {transform_indices = @transform_2, window_bounds = array<i64: 1, 128>}, {transform_indices = @transform_3, window_bounds = array<i64: 512, 128>}, {transform_indices = @transform_4, window_bounds = array<i64: 512, 128>}]} {
    %c0_i32 = arith.constant 0 : i32
    %0 = arith.cmpi eq, %arg2, %c0_i32 : i32
    %1 = arith.extui %0 : i1 to i32
    %c0_i32_0 = arith.constant 0 : i32
    %2 = arith.cmpi ne, %1, %c0_i32_0 : i32
    scf.if %2 {
      %cst_10 = arith.constant 0.000000e+00 : f32
      %12 = vector.broadcast %cst_10 : f32 to vector<512x128xf32>
      %c0_11 = arith.constant 0 : index
      %c0_12 = arith.constant 0 : index
      %13 = vector.load %arg8[%c0_11, %c0_12] : memref<512x128xf32, #tpu.memory_space<vmem>>, vector<512x128xf32>
      tpu.vector_store %arg8[%c0_11, %c0_12], %12 {strides = array<i32>} : memref<512x128xf32, #tpu.memory_space<vmem>>, vector<512x128xf32>,
    } else {
    }
    %c0 = arith.constant 0 : index
    %c0_1 = arith.constant 0 : index
    %3 = vector.load %arg8[%c0, %c0_1] : memref<512x128xf32, #tpu.memory_space<vmem>>, vector<512x128xf32>
    %c0_2 = arith.constant 0 : index
    %c0_3 = arith.constant 0 : index
    %4 = vector.load %arg3[%c0_2, %c0_3] : memref<512x128xbf16, #tpu.memory_space<vmem>>, vector<512x128xbf16>
    %c0_4 = arith.constant 0 : index
    %c0_5 = arith.constant 0 : index
    %5 = vector.load %arg4[%c0_4, %c0_5] : memref<128x128xbf16, #tpu.memory_space<vmem>>, vector<128x128xbf16>
    %cst = arith.constant dense<0.000000e+00> : vector<512x128xf32>
    %6 = tpu.matmul %4, %5, %cst {dimension_numbers = #tpu.dot_dimension_numbers<[1], [0], [0], [1], [0, 0, 1, 1], [], []>} : vector<512x128xbf16>, vector<128x128xbf16>, vector<512x128xf32> -> vector<512x128xf32>
    %7 = arith.addf %3, %6 : vector<512x128xf32>
    %c0_6 = arith.constant 0 : index
    %c0_7 = arith.constant 0 : index
    %8 = vector.load %arg8[%c0_6, %c0_7] : memref<512x128xf32, #tpu.memory_space<vmem>>, vector<512x128xf32>
    tpu.vector_store %arg8[%c0_6, %c0_7], %7 {strides = array<i32>} : memref<512x128xf32, #tpu.memory_space<vmem>>, vector<512x128xf32>,
    %c0_i32_8 = arith.constant 0 : i32
    %9 = arith.cmpi eq, %arg2, %c0_i32_8 : i32
    %10 = arith.extui %9 : i1 to i32
    %c0_i32_9 = arith.constant 0 : i32
    %11 = arith.cmpi ne, %10, %c0_i32_9 : i32
    scf.if %11 {
      %c0_10 = arith.constant 0 : index
      %c0_11 = arith.constant 0 : index
      %12 = vector.load %arg8[%c0_10, %c0_11] : memref<512x128xf32, #tpu.memory_space<vmem>>, vector<512x128xf32>
      %c0_12 = arith.constant 0 : index
      %c0_13 = arith.constant 0 : index
      %13 = vector.load %arg5[%c0_12, %c0_13] : memref<1x128xf32, #tpu.memory_space<vmem>>, vector<1x128xf32>
      %14 = vector.broadcast %13 : vector<1x128xf32> to vector<512x128xf32>
      %15 = arith.addf %12, %14 : vector<512x128xf32>
      %c0_14 = arith.constant 0 : index
      %c0_15 = arith.constant 0 : index
      %16 = vector.load %arg6[%c0_14, %c0_15] : memref<512x128xbf16, #tpu.memory_space<vmem>>, vector<512x128xbf16>
      %17 = arith.extf %16 : vector<512x128xbf16> to vector<512x128xf32>
      %18 = arith.addf %15, %17 : vector<512x128xf32>
      %cst_16 = arith.constant 0.000000e+00 : f32
      %19 = vector.broadcast %cst_16 : f32 to vector<512x128xf32>
      %20 = arith.maximumf %18, %19 : vector<512x128xf32>
      %21 = arith.truncf %20 : vector<512x128xf32> to vector<512x128xbf16>
      %c0_17 = arith.constant 0 : index
      %c0_18 = arith.constant 0 : index
      %22 = vector.load %arg7[%c0_17, %c0_18] : memref<512x128xbf16, #tpu.memory_space<vmem>>, vector<512x128xbf16>
      tpu.vector_store %arg7[%c0_17, %c0_18], %21 {strides = array<i32>} : memref<512x128xbf16, #tpu.memory_space<vmem>>, vector<512x128xbf16>,
    } else {
    }
    return
  }
  func.func @transform_0(%arg0: i32, %arg1: i32, %arg2: i32) -> (i32, i32) {
    %c0_i32 = arith.constant 0 : i32
    return %arg0, %arg2 : i32, i32
  }
  func.func @transform_1(%arg0: i32, %arg1: i32, %arg2: i32) -> (i32, i32) {
    %c0_i32 = arith.constant 0 : i32
    return %arg2, %arg1 : i32, i32
  }
  func.func @transform_2(%arg0: i32, %arg1: i32, %arg2: i32) -> (i32, i32) {
    %c0_i32 = arith.constant 0 : i32
    %c0_i32_0 = arith.constant 0 : i32
    return %c0_i32, %arg1 : i32, i32
  }
  func.func @transform_3(%arg0: i32, %arg1: i32, %arg2: i32) -> (i32, i32) {
    %c0_i32 = arith.constant 0 : i32
    return %arg0, %arg1 : i32, i32
  }
  func.func @transform_4(%arg0: i32, %arg1: i32, %arg2: i32) -> (i32, i32) {
    %c0_i32 = arith.constant 0 : i32
    return %arg0, %arg1 : i32, i32
  }
}

module attributes {stable_mosaic.version = 11 : i64} {
  func.func @_mm_bias_kernel(%arg0: i32, %arg1: i32, %arg2: i32, %arg3: memref<128x256xbf16, #tpu.memory_space<vmem>>, %arg4: memref<256x128xbf16, #tpu.memory_space<vmem>>, %arg5: memref<1x128xf32, #tpu.memory_space<vmem>>, %arg6: memref<128x128xbf16, #tpu.memory_space<vmem>>, %arg7: memref<128x128xf32, #tpu.memory_space<vmem>>) attributes {dimension_semantics = [#tpu.dimension_semantics<parallel>, #tpu.dimension_semantics<parallel>, #tpu.dimension_semantics<arbitrary>], iteration_bounds = array<i64: 1, 1, 1>, scalar_prefetch = 0 : i64, scratch_operands = 1 : i64, tpu.core_type = #tpu.core_type<tc>, window_params = [{transform_indices = @transform_0, window_bounds = array<i64: 128, 256>}, {transform_indices = @transform_1, window_bounds = array<i64: 256, 128>}, {transform_indices = @transform_2, window_bounds = array<i64: 1, 128>}, {transform_indices = @transform_3, window_bounds = array<i64: 128, 128>}]} {
    %c0_i32 = arith.constant 0 : i32
    %0 = arith.cmpi eq, %arg2, %c0_i32 : i32
    %1 = arith.extui %0 : i1 to i32
    %c0_i32_0 = arith.constant 0 : i32
    %2 = arith.cmpi ne, %1, %c0_i32_0 : i32
    scf.if %2 {
      %cst_10 = arith.constant 0.000000e+00 : f32
      %12 = vector.broadcast %cst_10 : f32 to vector<128x128xf32>
      %c0_11 = arith.constant 0 : index
      %c0_12 = arith.constant 0 : index
      %13 = vector.load %arg7[%c0_11, %c0_12] : memref<128x128xf32, #tpu.memory_space<vmem>>, vector<128x128xf32>
      tpu.vector_store %arg7[%c0_11, %c0_12], %12 {strides = array<i32>} : memref<128x128xf32, #tpu.memory_space<vmem>>, vector<128x128xf32>,
    } else {
    }
    %c0 = arith.constant 0 : index
    %c0_1 = arith.constant 0 : index
    %3 = vector.load %arg7[%c0, %c0_1] : memref<128x128xf32, #tpu.memory_space<vmem>>, vector<128x128xf32>
    %c0_2 = arith.constant 0 : index
    %c0_3 = arith.constant 0 : index
    %4 = vector.load %arg3[%c0_2, %c0_3] : memref<128x256xbf16, #tpu.memory_space<vmem>>, vector<128x256xbf16>
    %c0_4 = arith.constant 0 : index
    %c0_5 = arith.constant 0 : index
    %5 = vector.load %arg4[%c0_4, %c0_5] : memref<256x128xbf16, #tpu.memory_space<vmem>>, vector<256x128xbf16>
    %cst = arith.constant dense<0.000000e+00> : vector<128x128xf32>
    %6 = tpu.matmul %4, %5, %cst {dimension_numbers = #tpu.dot_dimension_numbers<[1], [0], [0], [1], [0, 0, 1, 1], [], []>} : vector<128x256xbf16>, vector<256x128xbf16>, vector<128x128xf32> -> vector<128x128xf32>
    %7 = arith.addf %3, %6 : vector<128x128xf32>
    %c0_6 = arith.constant 0 : index
    %c0_7 = arith.constant 0 : index
    %8 = vector.load %arg7[%c0_6, %c0_7] : memref<128x128xf32, #tpu.memory_space<vmem>>, vector<128x128xf32>
    tpu.vector_store %arg7[%c0_6, %c0_7], %7 {strides = array<i32>} : memref<128x128xf32, #tpu.memory_space<vmem>>, vector<128x128xf32>,
    %c0_i32_8 = arith.constant 0 : i32
    %9 = arith.cmpi eq, %arg2, %c0_i32_8 : i32
    %10 = arith.extui %9 : i1 to i32
    %c0_i32_9 = arith.constant 0 : i32
    %11 = arith.cmpi ne, %10, %c0_i32_9 : i32
    scf.if %11 {
      %c0_10 = arith.constant 0 : index
      %c0_11 = arith.constant 0 : index
      %12 = vector.load %arg7[%c0_10, %c0_11] : memref<128x128xf32, #tpu.memory_space<vmem>>, vector<128x128xf32>
      %c0_12 = arith.constant 0 : index
      %c0_13 = arith.constant 0 : index
      %13 = vector.load %arg5[%c0_12, %c0_13] : memref<1x128xf32, #tpu.memory_space<vmem>>, vector<1x128xf32>
      %14 = vector.broadcast %13 : vector<1x128xf32> to vector<128x128xf32>
      %15 = arith.addf %12, %14 : vector<128x128xf32>
      %cst_14 = arith.constant 0.000000e+00 : f32
      %16 = vector.broadcast %cst_14 : f32 to vector<128x128xf32>
      %17 = arith.maximumf %15, %16 : vector<128x128xf32>
      %18 = arith.truncf %17 : vector<128x128xf32> to vector<128x128xbf16>
      %c0_15 = arith.constant 0 : index
      %c0_16 = arith.constant 0 : index
      %19 = vector.load %arg6[%c0_15, %c0_16] : memref<128x128xbf16, #tpu.memory_space<vmem>>, vector<128x128xbf16>
      tpu.vector_store %arg6[%c0_15, %c0_16], %18 {strides = array<i32>} : memref<128x128xbf16, #tpu.memory_space<vmem>>, vector<128x128xbf16>,
    } else {
    }
    return
  }
  func.func @transform_0(%arg0: i32, %arg1: i32, %arg2: i32) -> (i32, i32) {
    %c0_i32 = arith.constant 0 : i32
    return %arg0, %arg2 : i32, i32
  }
  func.func @transform_1(%arg0: i32, %arg1: i32, %arg2: i32) -> (i32, i32) {
    %c0_i32 = arith.constant 0 : i32
    return %arg2, %arg1 : i32, i32
  }
  func.func @transform_2(%arg0: i32, %arg1: i32, %arg2: i32) -> (i32, i32) {
    %c0_i32 = arith.constant 0 : i32
    %c0_i32_0 = arith.constant 0 : i32
    return %c0_i32, %arg1 : i32, i32
  }
  func.func @transform_3(%arg0: i32, %arg1: i32, %arg2: i32) -> (i32, i32) {
    %c0_i32 = arith.constant 0 : i32
    return %arg0, %arg1 : i32, i32
  }
}

module attributes {stable_mosaic.version = 11 : i64} {
  func.func @_mm_bias_kernel(%arg0: i32, %arg1: i32, %arg2: i32, %arg3: memref<128x128xbf16, #tpu.memory_space<vmem>>, %arg4: memref<128x128xbf16, #tpu.memory_space<vmem>>, %arg5: memref<1x128xf32, #tpu.memory_space<vmem>>, %arg6: memref<128x128xbf16, #tpu.memory_space<vmem>>, %arg7: memref<128x128xf32, #tpu.memory_space<vmem>>) attributes {dimension_semantics = [#tpu.dimension_semantics<parallel>, #tpu.dimension_semantics<parallel>, #tpu.dimension_semantics<arbitrary>], iteration_bounds = array<i64: 1, 1, 1>, scalar_prefetch = 0 : i64, scratch_operands = 1 : i64, tpu.core_type = #tpu.core_type<tc>, window_params = [{transform_indices = @transform_0, window_bounds = array<i64: 128, 128>}, {transform_indices = @transform_1, window_bounds = array<i64: 128, 128>}, {transform_indices = @transform_2, window_bounds = array<i64: 1, 128>}, {transform_indices = @transform_3, window_bounds = array<i64: 128, 128>}]} {
    %c0_i32 = arith.constant 0 : i32
    %0 = arith.cmpi eq, %arg2, %c0_i32 : i32
    %1 = arith.extui %0 : i1 to i32
    %c0_i32_0 = arith.constant 0 : i32
    %2 = arith.cmpi ne, %1, %c0_i32_0 : i32
    scf.if %2 {
      %cst_10 = arith.constant 0.000000e+00 : f32
      %12 = vector.broadcast %cst_10 : f32 to vector<128x128xf32>
      %c0_11 = arith.constant 0 : index
      %c0_12 = arith.constant 0 : index
      %13 = vector.load %arg7[%c0_11, %c0_12] : memref<128x128xf32, #tpu.memory_space<vmem>>, vector<128x128xf32>
      tpu.vector_store %arg7[%c0_11, %c0_12], %12 {strides = array<i32>} : memref<128x128xf32, #tpu.memory_space<vmem>>, vector<128x128xf32>,
    } else {
    }
    %c0 = arith.constant 0 : index
    %c0_1 = arith.constant 0 : index
    %3 = vector.load %arg7[%c0, %c0_1] : memref<128x128xf32, #tpu.memory_space<vmem>>, vector<128x128xf32>
    %c0_2 = arith.constant 0 : index
    %c0_3 = arith.constant 0 : index
    %4 = vector.load %arg3[%c0_2, %c0_3] : memref<128x128xbf16, #tpu.memory_space<vmem>>, vector<128x128xbf16>
    %c0_4 = arith.constant 0 : index
    %c0_5 = arith.constant 0 : index
    %5 = vector.load %arg4[%c0_4, %c0_5] : memref<128x128xbf16, #tpu.memory_space<vmem>>, vector<128x128xbf16>
    %cst = arith.constant dense<0.000000e+00> : vector<128x128xf32>
    %6 = tpu.matmul %4, %5, %cst {dimension_numbers = #tpu.dot_dimension_numbers<[1], [0], [0], [1], [0, 0, 1, 1], [], []>} : vector<128x128xbf16>, vector<128x128xbf16>, vector<128x128xf32> -> vector<128x128xf32>
    %7 = arith.addf %3, %6 : vector<128x128xf32>
    %c0_6 = arith.constant 0 : index
    %c0_7 = arith.constant 0 : index
    %8 = vector.load %arg7[%c0_6, %c0_7] : memref<128x128xf32, #tpu.memory_space<vmem>>, vector<128x128xf32>
    tpu.vector_store %arg7[%c0_6, %c0_7], %7 {strides = array<i32>} : memref<128x128xf32, #tpu.memory_space<vmem>>, vector<128x128xf32>,
    %c0_i32_8 = arith.constant 0 : i32
    %9 = arith.cmpi eq, %arg2, %c0_i32_8 : i32
    %10 = arith.extui %9 : i1 to i32
    %c0_i32_9 = arith.constant 0 : i32
    %11 = arith.cmpi ne, %10, %c0_i32_9 : i32
    scf.if %11 {
      %c0_10 = arith.constant 0 : index
      %c0_11 = arith.constant 0 : index
      %12 = vector.load %arg7[%c0_10, %c0_11] : memref<128x128xf32, #tpu.memory_space<vmem>>, vector<128x128xf32>
      %c0_12 = arith.constant 0 : index
      %c0_13 = arith.constant 0 : index
      %13 = vector.load %arg5[%c0_12, %c0_13] : memref<1x128xf32, #tpu.memory_space<vmem>>, vector<1x128xf32>
      %14 = vector.broadcast %13 : vector<1x128xf32> to vector<128x128xf32>
      %15 = arith.addf %12, %14 : vector<128x128xf32>
      %16 = arith.truncf %15 : vector<128x128xf32> to vector<128x128xbf16>
      %c0_14 = arith.constant 0 : index
      %c0_15 = arith.constant 0 : index
      %17 = vector.load %arg6[%c0_14, %c0_15] : memref<128x128xbf16, #tpu.memory_space<vmem>>, vector<128x128xbf16>
      tpu.vector_store %arg6[%c0_14, %c0_15], %16 {strides = array<i32>} : memref<128x128xbf16, #tpu.memory_space<vmem>>, vector<128x128xbf16>,
    } else {
    }
    return
  }
  func.func @transform_0(%arg0: i32, %arg1: i32, %arg2: i32) -> (i32, i32) {
    %c0_i32 = arith.constant 0 : i32
    return %arg0, %arg2 : i32, i32
  }
  func.func @transform_1(%arg0: i32, %arg1: i32, %arg2: i32) -> (i32, i32) {
    %c0_i32 = arith.constant 0 : i32
    return %arg2, %arg1 : i32, i32
  }
  func.func @transform_2(%arg0: i32, %arg1: i32, %arg2: i32) -> (i32, i32) {
    %c0_i32 = arith.constant 0 : i32
    %c0_i32_0 = arith.constant 0 : i32
    return %c0_i32, %arg1 : i32, i32
  }
  func.func @transform_3(%arg0: i32, %arg1: i32, %arg2: i32) -> (i32, i32) {
    %c0_i32 = arith.constant 0 : i32
    return %arg0, %arg1 : i32, i32
  }
}

module attributes {stable_mosaic.version = 11 : i64} {
  func.func @_mm_bias_kernel(%arg0: i32, %arg1: i32, %arg2: i32, %arg3: memref<128x128xbf16, #tpu.memory_space<vmem>>, %arg4: memref<128x128xbf16, #tpu.memory_space<vmem>>, %arg5: memref<1x128xf32, #tpu.memory_space<vmem>>, %arg6: memref<128x128xbf16, #tpu.memory_space<vmem>>, %arg7: memref<128x128xbf16, #tpu.memory_space<vmem>>, %arg8: memref<128x128xf32, #tpu.memory_space<vmem>>) attributes {dimension_semantics = [#tpu.dimension_semantics<parallel>, #tpu.dimension_semantics<parallel>, #tpu.dimension_semantics<arbitrary>], iteration_bounds = array<i64: 1, 1, 1>, scalar_prefetch = 0 : i64, scratch_operands = 1 : i64, tpu.core_type = #tpu.core_type<tc>, window_params = [{transform_indices = @transform_0, window_bounds = array<i64: 128, 128>}, {transform_indices = @transform_1, window_bounds = array<i64: 128, 128>}, {transform_indices = @transform_2, window_bounds = array<i64: 1, 128>}, {transform_indices = @transform_3, window_bounds = array<i64: 128, 128>}, {transform_indices = @transform_4, window_bounds = array<i64: 128, 128>}]} {
    %c0_i32 = arith.constant 0 : i32
    %0 = arith.cmpi eq, %arg2, %c0_i32 : i32
    %1 = arith.extui %0 : i1 to i32
    %c0_i32_0 = arith.constant 0 : i32
    %2 = arith.cmpi ne, %1, %c0_i32_0 : i32
    scf.if %2 {
      %cst_10 = arith.constant 0.000000e+00 : f32
      %12 = vector.broadcast %cst_10 : f32 to vector<128x128xf32>
      %c0_11 = arith.constant 0 : index
      %c0_12 = arith.constant 0 : index
      %13 = vector.load %arg8[%c0_11, %c0_12] : memref<128x128xf32, #tpu.memory_space<vmem>>, vector<128x128xf32>
      tpu.vector_store %arg8[%c0_11, %c0_12], %12 {strides = array<i32>} : memref<128x128xf32, #tpu.memory_space<vmem>>, vector<128x128xf32>,
    } else {
    }
    %c0 = arith.constant 0 : index
    %c0_1 = arith.constant 0 : index
    %3 = vector.load %arg8[%c0, %c0_1] : memref<128x128xf32, #tpu.memory_space<vmem>>, vector<128x128xf32>
    %c0_2 = arith.constant 0 : index
    %c0_3 = arith.constant 0 : index
    %4 = vector.load %arg3[%c0_2, %c0_3] : memref<128x128xbf16, #tpu.memory_space<vmem>>, vector<128x128xbf16>
    %c0_4 = arith.constant 0 : index
    %c0_5 = arith.constant 0 : index
    %5 = vector.load %arg4[%c0_4, %c0_5] : memref<128x128xbf16, #tpu.memory_space<vmem>>, vector<128x128xbf16>
    %cst = arith.constant dense<0.000000e+00> : vector<128x128xf32>
    %6 = tpu.matmul %4, %5, %cst {dimension_numbers = #tpu.dot_dimension_numbers<[1], [0], [0], [1], [0, 0, 1, 1], [], []>} : vector<128x128xbf16>, vector<128x128xbf16>, vector<128x128xf32> -> vector<128x128xf32>
    %7 = arith.addf %3, %6 : vector<128x128xf32>
    %c0_6 = arith.constant 0 : index
    %c0_7 = arith.constant 0 : index
    %8 = vector.load %arg8[%c0_6, %c0_7] : memref<128x128xf32, #tpu.memory_space<vmem>>, vector<128x128xf32>
    tpu.vector_store %arg8[%c0_6, %c0_7], %7 {strides = array<i32>} : memref<128x128xf32, #tpu.memory_space<vmem>>, vector<128x128xf32>,
    %c0_i32_8 = arith.constant 0 : i32
    %9 = arith.cmpi eq, %arg2, %c0_i32_8 : i32
    %10 = arith.extui %9 : i1 to i32
    %c0_i32_9 = arith.constant 0 : i32
    %11 = arith.cmpi ne, %10, %c0_i32_9 : i32
    scf.if %11 {
      %c0_10 = arith.constant 0 : index
      %c0_11 = arith.constant 0 : index
      %12 = vector.load %arg8[%c0_10, %c0_11] : memref<128x128xf32, #tpu.memory_space<vmem>>, vector<128x128xf32>
      %c0_12 = arith.constant 0 : index
      %c0_13 = arith.constant 0 : index
      %13 = vector.load %arg5[%c0_12, %c0_13] : memref<1x128xf32, #tpu.memory_space<vmem>>, vector<1x128xf32>
      %14 = vector.broadcast %13 : vector<1x128xf32> to vector<128x128xf32>
      %15 = arith.addf %12, %14 : vector<128x128xf32>
      %c0_14 = arith.constant 0 : index
      %c0_15 = arith.constant 0 : index
      %16 = vector.load %arg6[%c0_14, %c0_15] : memref<128x128xbf16, #tpu.memory_space<vmem>>, vector<128x128xbf16>
      %17 = arith.extf %16 : vector<128x128xbf16> to vector<128x128xf32>
      %18 = arith.addf %15, %17 : vector<128x128xf32>
      %cst_16 = arith.constant 0.000000e+00 : f32
      %19 = vector.broadcast %cst_16 : f32 to vector<128x128xf32>
      %20 = arith.maximumf %18, %19 : vector<128x128xf32>
      %21 = arith.truncf %20 : vector<128x128xf32> to vector<128x128xbf16>
      %c0_17 = arith.constant 0 : index
      %c0_18 = arith.constant 0 : index
      %22 = vector.load %arg7[%c0_17, %c0_18] : memref<128x128xbf16, #tpu.memory_space<vmem>>, vector<128x128xbf16>
      tpu.vector_store %arg7[%c0_17, %c0_18], %21 {strides = array<i32>} : memref<128x128xbf16, #tpu.memory_space<vmem>>, vector<128x128xbf16>,
    } else {
    }
    return
  }
  func.func @transform_0(%arg0: i32, %arg1: i32, %arg2: i32) -> (i32, i32) {
    %c0_i32 = arith.constant 0 : i32
    return %arg0, %arg2 : i32, i32
  }
  func.func @transform_1(%arg0: i32, %arg1: i32, %arg2: i32) -> (i32, i32) {
    %c0_i32 = arith.constant 0 : i32
    return %arg2, %arg1 : i32, i32
  }
  func.func @transform_2(%arg0: i32, %arg1: i32, %arg2: i32) -> (i32, i32) {
    %c0_i32 = arith.constant 0 : i32
    %c0_i32_0 = arith.constant 0 : i32
    return %c0_i32, %arg1 : i32, i32
  }
  func.func @transform_3(%arg0: i32, %arg1: i32, %arg2: i32) -> (i32, i32) {
    %c0_i32 = arith.constant 0 : i32
    return %arg0, %arg1 : i32, i32
  }
  func.func @transform_4(%arg0: i32, %arg1: i32, %arg2: i32) -> (i32, i32) {
    %c0_i32 = arith.constant 0 : i32
    return %arg0, %arg1 : i32, i32
  }
}

module attributes {stable_mosaic.version = 11 : i64} {
  func.func @_mm_bias_kernel(%arg0: i32, %arg1: i32, %arg2: i32, %arg3: memref<128x128xbf16, #tpu.memory_space<vmem>>, %arg4: memref<128x128xbf16, #tpu.memory_space<vmem>>, %arg5: memref<1x128xf32, #tpu.memory_space<vmem>>, %arg6: memref<128x128xbf16, #tpu.memory_space<vmem>>, %arg7: memref<128x128xf32, #tpu.memory_space<vmem>>) attributes {dimension_semantics = [#tpu.dimension_semantics<parallel>, #tpu.dimension_semantics<parallel>, #tpu.dimension_semantics<arbitrary>], iteration_bounds = array<i64: 1, 1, 1>, scalar_prefetch = 0 : i64, scratch_operands = 1 : i64, tpu.core_type = #tpu.core_type<tc>, window_params = [{transform_indices = @transform_0, window_bounds = array<i64: 128, 128>}, {transform_indices = @transform_1, window_bounds = array<i64: 128, 128>}, {transform_indices = @transform_2, window_bounds = array<i64: 1, 128>}, {transform_indices = @transform_3, window_bounds = array<i64: 128, 128>}]} {
    %c0_i32 = arith.constant 0 : i32
    %0 = arith.cmpi eq, %arg2, %c0_i32 : i32
    %1 = arith.extui %0 : i1 to i32
    %c0_i32_0 = arith.constant 0 : i32
    %2 = arith.cmpi ne, %1, %c0_i32_0 : i32
    scf.if %2 {
      %cst_10 = arith.constant 0.000000e+00 : f32
      %12 = vector.broadcast %cst_10 : f32 to vector<128x128xf32>
      %c0_11 = arith.constant 0 : index
      %c0_12 = arith.constant 0 : index
      %13 = vector.load %arg7[%c0_11, %c0_12] : memref<128x128xf32, #tpu.memory_space<vmem>>, vector<128x128xf32>
      tpu.vector_store %arg7[%c0_11, %c0_12], %12 {strides = array<i32>} : memref<128x128xf32, #tpu.memory_space<vmem>>, vector<128x128xf32>,
    } else {
    }
    %c0 = arith.constant 0 : index
    %c0_1 = arith.constant 0 : index
    %3 = vector.load %arg7[%c0, %c0_1] : memref<128x128xf32, #tpu.memory_space<vmem>>, vector<128x128xf32>
    %c0_2 = arith.constant 0 : index
    %c0_3 = arith.constant 0 : index
    %4 = vector.load %arg3[%c0_2, %c0_3] : memref<128x128xbf16, #tpu.memory_space<vmem>>, vector<128x128xbf16>
    %c0_4 = arith.constant 0 : index
    %c0_5 = arith.constant 0 : index
    %5 = vector.load %arg4[%c0_4, %c0_5] : memref<128x128xbf16, #tpu.memory_space<vmem>>, vector<128x128xbf16>
    %cst = arith.constant dense<0.000000e+00> : vector<128x128xf32>
    %6 = tpu.matmul %4, %5, %cst {dimension_numbers = #tpu.dot_dimension_numbers<[1], [0], [0], [1], [0, 0, 1, 1], [], []>} : vector<128x128xbf16>, vector<128x128xbf16>, vector<128x128xf32> -> vector<128x128xf32>
    %7 = arith.addf %3, %6 : vector<128x128xf32>
    %c0_6 = arith.constant 0 : index
    %c0_7 = arith.constant 0 : index
    %8 = vector.load %arg7[%c0_6, %c0_7] : memref<128x128xf32, #tpu.memory_space<vmem>>, vector<128x128xf32>
    tpu.vector_store %arg7[%c0_6, %c0_7], %7 {strides = array<i32>} : memref<128x128xf32, #tpu.memory_space<vmem>>, vector<128x128xf32>,
    %c0_i32_8 = arith.constant 0 : i32
    %9 = arith.cmpi eq, %arg2, %c0_i32_8 : i32
    %10 = arith.extui %9 : i1 to i32
    %c0_i32_9 = arith.constant 0 : i32
    %11 = arith.cmpi ne, %10, %c0_i32_9 : i32
    scf.if %11 {
      %c0_10 = arith.constant 0 : index
      %c0_11 = arith.constant 0 : index
      %12 = vector.load %arg7[%c0_10, %c0_11] : memref<128x128xf32, #tpu.memory_space<vmem>>, vector<128x128xf32>
      %c0_12 = arith.constant 0 : index
      %c0_13 = arith.constant 0 : index
      %13 = vector.load %arg5[%c0_12, %c0_13] : memref<1x128xf32, #tpu.memory_space<vmem>>, vector<1x128xf32>
      %14 = vector.broadcast %13 : vector<1x128xf32> to vector<128x128xf32>
      %15 = arith.addf %12, %14 : vector<128x128xf32>
      %cst_14 = arith.constant 0.000000e+00 : f32
      %16 = vector.broadcast %cst_14 : f32 to vector<128x128xf32>
      %17 = arith.maximumf %15, %16 : vector<128x128xf32>
      %18 = arith.truncf %17 : vector<128x128xf32> to vector<128x128xbf16>
      %c0_15 = arith.constant 0 : index
      %c0_16 = arith.constant 0 : index
      %19 = vector.load %arg6[%c0_15, %c0_16] : memref<128x128xbf16, #tpu.memory_space<vmem>>, vector<128x128xbf16>
      tpu.vector_store %arg6[%c0_15, %c0_16], %18 {strides = array<i32>} : memref<128x128xbf16, #tpu.memory_space<vmem>>, vector<128x128xbf16>,
    } else {
    }
    return
  }
  func.func @transform_0(%arg0: i32, %arg1: i32, %arg2: i32) -> (i32, i32) {
    %c0_i32 = arith.constant 0 : i32
    return %arg0, %arg2 : i32, i32
  }
  func.func @transform_1(%arg0: i32, %arg1: i32, %arg2: i32) -> (i32, i32) {
    %c0_i32 = arith.constant 0 : i32
    return %arg2, %arg1 : i32, i32
  }
  func.func @transform_2(%arg0: i32, %arg1: i32, %arg2: i32) -> (i32, i32) {
    %c0_i32 = arith.constant 0 : i32
    %c0_i32_0 = arith.constant 0 : i32
    return %c0_i32, %arg1 : i32, i32
  }
  func.func @transform_3(%arg0: i32, %arg1: i32, %arg2: i32) -> (i32, i32) {
    %c0_i32 = arith.constant 0 : i32
    return %arg0, %arg1 : i32, i32
  }
}

module attributes {stable_mosaic.version = 11 : i64} {
  func.func @_mm_bias_kernel(%arg0: i32, %arg1: i32, %arg2: i32, %arg3: memref<128x256xbf16, #tpu.memory_space<vmem>>, %arg4: memref<256x128xbf16, #tpu.memory_space<vmem>>, %arg5: memref<1x128xf32, #tpu.memory_space<vmem>>, %arg6: memref<128x128xbf16, #tpu.memory_space<vmem>>, %arg7: memref<128x128xf32, #tpu.memory_space<vmem>>) attributes {dimension_semantics = [#tpu.dimension_semantics<parallel>, #tpu.dimension_semantics<parallel>, #tpu.dimension_semantics<arbitrary>], iteration_bounds = array<i64: 1, 1, 1>, scalar_prefetch = 0 : i64, scratch_operands = 1 : i64, tpu.core_type = #tpu.core_type<tc>, window_params = [{transform_indices = @transform_0, window_bounds = array<i64: 128, 256>}, {transform_indices = @transform_1, window_bounds = array<i64: 256, 128>}, {transform_indices = @transform_2, window_bounds = array<i64: 1, 128>}, {transform_indices = @transform_3, window_bounds = array<i64: 128, 128>}]} {
    %c0_i32 = arith.constant 0 : i32
    %0 = arith.cmpi eq, %arg2, %c0_i32 : i32
    %1 = arith.extui %0 : i1 to i32
    %c0_i32_0 = arith.constant 0 : i32
    %2 = arith.cmpi ne, %1, %c0_i32_0 : i32
    scf.if %2 {
      %cst_10 = arith.constant 0.000000e+00 : f32
      %12 = vector.broadcast %cst_10 : f32 to vector<128x128xf32>
      %c0_11 = arith.constant 0 : index
      %c0_12 = arith.constant 0 : index
      %13 = vector.load %arg7[%c0_11, %c0_12] : memref<128x128xf32, #tpu.memory_space<vmem>>, vector<128x128xf32>
      tpu.vector_store %arg7[%c0_11, %c0_12], %12 {strides = array<i32>} : memref<128x128xf32, #tpu.memory_space<vmem>>, vector<128x128xf32>,
    } else {
    }
    %c0 = arith.constant 0 : index
    %c0_1 = arith.constant 0 : index
    %3 = vector.load %arg7[%c0, %c0_1] : memref<128x128xf32, #tpu.memory_space<vmem>>, vector<128x128xf32>
    %c0_2 = arith.constant 0 : index
    %c0_3 = arith.constant 0 : index
    %4 = vector.load %arg3[%c0_2, %c0_3] : memref<128x256xbf16, #tpu.memory_space<vmem>>, vector<128x256xbf16>
    %c0_4 = arith.constant 0 : index
    %c0_5 = arith.constant 0 : index
    %5 = vector.load %arg4[%c0_4, %c0_5] : memref<256x128xbf16, #tpu.memory_space<vmem>>, vector<256x128xbf16>
    %cst = arith.constant dense<0.000000e+00> : vector<128x128xf32>
    %6 = tpu.matmul %4, %5, %cst {dimension_numbers = #tpu.dot_dimension_numbers<[1], [0], [0], [1], [0, 0, 1, 1], [], []>} : vector<128x256xbf16>, vector<256x128xbf16>, vector<128x128xf32> -> vector<128x128xf32>
    %7 = arith.addf %3, %6 : vector<128x128xf32>
    %c0_6 = arith.constant 0 : index
    %c0_7 = arith.constant 0 : index
    %8 = vector.load %arg7[%c0_6, %c0_7] : memref<128x128xf32, #tpu.memory_space<vmem>>, vector<128x128xf32>
    tpu.vector_store %arg7[%c0_6, %c0_7], %7 {strides = array<i32>} : memref<128x128xf32, #tpu.memory_space<vmem>>, vector<128x128xf32>,
    %c0_i32_8 = arith.constant 0 : i32
    %9 = arith.cmpi eq, %arg2, %c0_i32_8 : i32
    %10 = arith.extui %9 : i1 to i32
    %c0_i32_9 = arith.constant 0 : i32
    %11 = arith.cmpi ne, %10, %c0_i32_9 : i32
    scf.if %11 {
      %c0_10 = arith.constant 0 : index
      %c0_11 = arith.constant 0 : index
      %12 = vector.load %arg7[%c0_10, %c0_11] : memref<128x128xf32, #tpu.memory_space<vmem>>, vector<128x128xf32>
      %c0_12 = arith.constant 0 : index
      %c0_13 = arith.constant 0 : index
      %13 = vector.load %arg5[%c0_12, %c0_13] : memref<1x128xf32, #tpu.memory_space<vmem>>, vector<1x128xf32>
      %14 = vector.broadcast %13 : vector<1x128xf32> to vector<128x128xf32>
      %15 = arith.addf %12, %14 : vector<128x128xf32>
      %cst_14 = arith.constant 0.000000e+00 : f32
      %16 = vector.broadcast %cst_14 : f32 to vector<128x128xf32>
      %17 = arith.maximumf %15, %16 : vector<128x128xf32>
      %18 = arith.truncf %17 : vector<128x128xf32> to vector<128x128xbf16>
      %c0_15 = arith.constant 0 : index
      %c0_16 = arith.constant 0 : index
      %19 = vector.load %arg6[%c0_15, %c0_16] : memref<128x128xbf16, #tpu.memory_space<vmem>>, vector<128x128xbf16>
      tpu.vector_store %arg6[%c0_15, %c0_16], %18 {strides = array<i32>} : memref<128x128xbf16, #tpu.memory_space<vmem>>, vector<128x128xbf16>,
    } else {
    }
    return
  }
  func.func @transform_0(%arg0: i32, %arg1: i32, %arg2: i32) -> (i32, i32) {
    %c0_i32 = arith.constant 0 : i32
    return %arg0, %arg2 : i32, i32
  }
  func.func @transform_1(%arg0: i32, %arg1: i32, %arg2: i32) -> (i32, i32) {
    %c0_i32 = arith.constant 0 : i32
    return %arg2, %arg1 : i32, i32
  }
  func.func @transform_2(%arg0: i32, %arg1: i32, %arg2: i32) -> (i32, i32) {
    %c0_i32 = arith.constant 0 : i32
    %c0_i32_0 = arith.constant 0 : i32
    return %c0_i32, %arg1 : i32, i32
  }
  func.func @transform_3(%arg0: i32, %arg1: i32, %arg2: i32) -> (i32, i32) {
    %c0_i32 = arith.constant 0 : i32
    return %arg0, %arg1 : i32, i32
  }
}

module attributes {stable_mosaic.version = 11 : i64} {
  func.func @_mm_bias_kernel(%arg0: i32, %arg1: i32, %arg2: i32, %arg3: memref<128x128xbf16, #tpu.memory_space<vmem>>, %arg4: memref<128x128xbf16, #tpu.memory_space<vmem>>, %arg5: memref<1x128xf32, #tpu.memory_space<vmem>>, %arg6: memref<128x128xbf16, #tpu.memory_space<vmem>>, %arg7: memref<128x128xbf16, #tpu.memory_space<vmem>>, %arg8: memref<128x128xf32, #tpu.memory_space<vmem>>) attributes {dimension_semantics = [#tpu.dimension_semantics<parallel>, #tpu.dimension_semantics<parallel>, #tpu.dimension_semantics<arbitrary>], iteration_bounds = array<i64: 1, 1, 1>, scalar_prefetch = 0 : i64, scratch_operands = 1 : i64, tpu.core_type = #tpu.core_type<tc>, window_params = [{transform_indices = @transform_0, window_bounds = array<i64: 128, 128>}, {transform_indices = @transform_1, window_bounds = array<i64: 128, 128>}, {transform_indices = @transform_2, window_bounds = array<i64: 1, 128>}, {transform_indices = @transform_3, window_bounds = array<i64: 128, 128>}, {transform_indices = @transform_4, window_bounds = array<i64: 128, 128>}]} {
    %c0_i32 = arith.constant 0 : i32
    %0 = arith.cmpi eq, %arg2, %c0_i32 : i32
    %1 = arith.extui %0 : i1 to i32
    %c0_i32_0 = arith.constant 0 : i32
    %2 = arith.cmpi ne, %1, %c0_i32_0 : i32
    scf.if %2 {
      %cst_10 = arith.constant 0.000000e+00 : f32
      %12 = vector.broadcast %cst_10 : f32 to vector<128x128xf32>
      %c0_11 = arith.constant 0 : index
      %c0_12 = arith.constant 0 : index
      %13 = vector.load %arg8[%c0_11, %c0_12] : memref<128x128xf32, #tpu.memory_space<vmem>>, vector<128x128xf32>
      tpu.vector_store %arg8[%c0_11, %c0_12], %12 {strides = array<i32>} : memref<128x128xf32, #tpu.memory_space<vmem>>, vector<128x128xf32>,
    } else {
    }
    %c0 = arith.constant 0 : index
    %c0_1 = arith.constant 0 : index
    %3 = vector.load %arg8[%c0, %c0_1] : memref<128x128xf32, #tpu.memory_space<vmem>>, vector<128x128xf32>
    %c0_2 = arith.constant 0 : index
    %c0_3 = arith.constant 0 : index
    %4 = vector.load %arg3[%c0_2, %c0_3] : memref<128x128xbf16, #tpu.memory_space<vmem>>, vector<128x128xbf16>
    %c0_4 = arith.constant 0 : index
    %c0_5 = arith.constant 0 : index
    %5 = vector.load %arg4[%c0_4, %c0_5] : memref<128x128xbf16, #tpu.memory_space<vmem>>, vector<128x128xbf16>
    %cst = arith.constant dense<0.000000e+00> : vector<128x128xf32>
    %6 = tpu.matmul %4, %5, %cst {dimension_numbers = #tpu.dot_dimension_numbers<[1], [0], [0], [1], [0, 0, 1, 1], [], []>} : vector<128x128xbf16>, vector<128x128xbf16>, vector<128x128xf32> -> vector<128x128xf32>
    %7 = arith.addf %3, %6 : vector<128x128xf32>
    %c0_6 = arith.constant 0 : index
    %c0_7 = arith.constant 0 : index
    %8 = vector.load %arg8[%c0_6, %c0_7] : memref<128x128xf32, #tpu.memory_space<vmem>>, vector<128x128xf32>
    tpu.vector_store %arg8[%c0_6, %c0_7], %7 {strides = array<i32>} : memref<128x128xf32, #tpu.memory_space<vmem>>, vector<128x128xf32>,
    %c0_i32_8 = arith.constant 0 : i32
    %9 = arith.cmpi eq, %arg2, %c0_i32_8 : i32
    %10 = arith.extui %9 : i1 to i32
    %c0_i32_9 = arith.constant 0 : i32
    %11 = arith.cmpi ne, %10, %c0_i32_9 : i32
    scf.if %11 {
      %c0_10 = arith.constant 0 : index
      %c0_11 = arith.constant 0 : index
      %12 = vector.load %arg8[%c0_10, %c0_11] : memref<128x128xf32, #tpu.memory_space<vmem>>, vector<128x128xf32>
      %c0_12 = arith.constant 0 : index
      %c0_13 = arith.constant 0 : index
      %13 = vector.load %arg5[%c0_12, %c0_13] : memref<1x128xf32, #tpu.memory_space<vmem>>, vector<1x128xf32>
      %14 = vector.broadcast %13 : vector<1x128xf32> to vector<128x128xf32>
      %15 = arith.addf %12, %14 : vector<128x128xf32>
      %c0_14 = arith.constant 0 : index
      %c0_15 = arith.constant 0 : index
      %16 = vector.load %arg6[%c0_14, %c0_15] : memref<128x128xbf16, #tpu.memory_space<vmem>>, vector<128x128xbf16>
      %17 = arith.extf %16 : vector<128x128xbf16> to vector<128x128xf32>
      %18 = arith.addf %15, %17 : vector<128x128xf32>
      %cst_16 = arith.constant 0.000000e+00 : f32
      %19 = vector.broadcast %cst_16 : f32 to vector<128x128xf32>
      %20 = arith.maximumf %18, %19 : vector<128x128xf32>
      %21 = arith.truncf %20 : vector<128x128xf32> to vector<128x128xbf16>
      %c0_17 = arith.constant 0 : index
      %c0_18 = arith.constant 0 : index
      %22 = vector.load %arg7[%c0_17, %c0_18] : memref<128x128xbf16, #tpu.memory_space<vmem>>, vector<128x128xbf16>
      tpu.vector_store %arg7[%c0_17, %c0_18], %21 {strides = array<i32>} : memref<128x128xbf16, #tpu.memory_space<vmem>>, vector<128x128xbf16>,
    } else {
    }
    return
  }
  func.func @transform_0(%arg0: i32, %arg1: i32, %arg2: i32) -> (i32, i32) {
    %c0_i32 = arith.constant 0 : i32
    return %arg0, %arg2 : i32, i32
  }
  func.func @transform_1(%arg0: i32, %arg1: i32, %arg2: i32) -> (i32, i32) {
    %c0_i32 = arith.constant 0 : i32
    return %arg2, %arg1 : i32, i32
  }
  func.func @transform_2(%arg0: i32, %arg1: i32, %arg2: i32) -> (i32, i32) {
    %c0_i32 = arith.constant 0 : i32
    %c0_i32_0 = arith.constant 0 : i32
    return %c0_i32, %arg1 : i32, i32
  }
  func.func @transform_3(%arg0: i32, %arg1: i32, %arg2: i32) -> (i32, i32) {
    %c0_i32 = arith.constant 0 : i32
    return %arg0, %arg1 : i32, i32
  }
  func.func @transform_4(%arg0: i32, %arg1: i32, %arg2: i32) -> (i32, i32) {
    %c0_i32 = arith.constant 0 : i32
    return %arg0, %arg1 : i32, i32
  }
}

module attributes {stable_mosaic.version = 11 : i64} {
  func.func @_mm_bias_kernel(%arg0: i32, %arg1: i32, %arg2: i32, %arg3: memref<128x128xbf16, #tpu.memory_space<vmem>>, %arg4: memref<128x128xbf16, #tpu.memory_space<vmem>>, %arg5: memref<1x128xf32, #tpu.memory_space<vmem>>, %arg6: memref<128x128xbf16, #tpu.memory_space<vmem>>, %arg7: memref<128x128xf32, #tpu.memory_space<vmem>>) attributes {dimension_semantics = [#tpu.dimension_semantics<parallel>, #tpu.dimension_semantics<parallel>, #tpu.dimension_semantics<arbitrary>], iteration_bounds = array<i64: 1, 1, 1>, scalar_prefetch = 0 : i64, scratch_operands = 1 : i64, tpu.core_type = #tpu.core_type<tc>, window_params = [{transform_indices = @transform_0, window_bounds = array<i64: 128, 128>}, {transform_indices = @transform_1, window_bounds = array<i64: 128, 128>}, {transform_indices = @transform_2, window_bounds = array<i64: 1, 128>}, {transform_indices = @transform_3, window_bounds = array<i64: 128, 128>}]} {
    %c0_i32 = arith.constant 0 : i32
    %0 = arith.cmpi eq, %arg2, %c0_i32 : i32
    %1 = arith.extui %0 : i1 to i32
    %c0_i32_0 = arith.constant 0 : i32
    %2 = arith.cmpi ne, %1, %c0_i32_0 : i32
    scf.if %2 {
      %cst_10 = arith.constant 0.000000e+00 : f32
      %12 = vector.broadcast %cst_10 : f32 to vector<128x128xf32>
      %c0_11 = arith.constant 0 : index
      %c0_12 = arith.constant 0 : index
      %13 = vector.load %arg7[%c0_11, %c0_12] : memref<128x128xf32, #tpu.memory_space<vmem>>, vector<128x128xf32>
      tpu.vector_store %arg7[%c0_11, %c0_12], %12 {strides = array<i32>} : memref<128x128xf32, #tpu.memory_space<vmem>>, vector<128x128xf32>,
    } else {
    }
    %c0 = arith.constant 0 : index
    %c0_1 = arith.constant 0 : index
    %3 = vector.load %arg7[%c0, %c0_1] : memref<128x128xf32, #tpu.memory_space<vmem>>, vector<128x128xf32>
    %c0_2 = arith.constant 0 : index
    %c0_3 = arith.constant 0 : index
    %4 = vector.load %arg3[%c0_2, %c0_3] : memref<128x128xbf16, #tpu.memory_space<vmem>>, vector<128x128xbf16>
    %c0_4 = arith.constant 0 : index
    %c0_5 = arith.constant 0 : index
    %5 = vector.load %arg4[%c0_4, %c0_5] : memref<128x128xbf16, #tpu.memory_space<vmem>>, vector<128x128xbf16>
    %cst = arith.constant dense<0.000000e+00> : vector<128x128xf32>
    %6 = tpu.matmul %4, %5, %cst {dimension_numbers = #tpu.dot_dimension_numbers<[1], [0], [0], [1], [0, 0, 1, 1], [], []>} : vector<128x128xbf16>, vector<128x128xbf16>, vector<128x128xf32> -> vector<128x128xf32>
    %7 = arith.addf %3, %6 : vector<128x128xf32>
    %c0_6 = arith.constant 0 : index
    %c0_7 = arith.constant 0 : index
    %8 = vector.load %arg7[%c0_6, %c0_7] : memref<128x128xf32, #tpu.memory_space<vmem>>, vector<128x128xf32>
    tpu.vector_store %arg7[%c0_6, %c0_7], %7 {strides = array<i32>} : memref<128x128xf32, #tpu.memory_space<vmem>>, vector<128x128xf32>,
    %c0_i32_8 = arith.constant 0 : i32
    %9 = arith.cmpi eq, %arg2, %c0_i32_8 : i32
    %10 = arith.extui %9 : i1 to i32
    %c0_i32_9 = arith.constant 0 : i32
    %11 = arith.cmpi ne, %10, %c0_i32_9 : i32
    scf.if %11 {
      %c0_10 = arith.constant 0 : index
      %c0_11 = arith.constant 0 : index
      %12 = vector.load %arg7[%c0_10, %c0_11] : memref<128x128xf32, #tpu.memory_space<vmem>>, vector<128x128xf32>
      %c0_12 = arith.constant 0 : index
      %c0_13 = arith.constant 0 : index
      %13 = vector.load %arg5[%c0_12, %c0_13] : memref<1x128xf32, #tpu.memory_space<vmem>>, vector<1x128xf32>
      %14 = vector.broadcast %13 : vector<1x128xf32> to vector<128x128xf32>
      %15 = arith.addf %12, %14 : vector<128x128xf32>
      %cst_14 = arith.constant 0.000000e+00 : f32
      %16 = vector.broadcast %cst_14 : f32 to vector<128x128xf32>
      %17 = arith.maximumf %15, %16 : vector<128x128xf32>
      %18 = arith.truncf %17 : vector<128x128xf32> to vector<128x128xbf16>
      %c0_15 = arith.constant 0 : index
      %c0_16 = arith.constant 0 : index
      %19 = vector.load %arg6[%c0_15, %c0_16] : memref<128x128xbf16, #tpu.memory_space<vmem>>, vector<128x128xbf16>
      tpu.vector_store %arg6[%c0_15, %c0_16], %18 {strides = array<i32>} : memref<128x128xbf16, #tpu.memory_space<vmem>>, vector<128x128xbf16>,
    } else {
    }
    return
  }
  func.func @transform_0(%arg0: i32, %arg1: i32, %arg2: i32) -> (i32, i32) {
    %c0_i32 = arith.constant 0 : i32
    return %arg0, %arg2 : i32, i32
  }
  func.func @transform_1(%arg0: i32, %arg1: i32, %arg2: i32) -> (i32, i32) {
    %c0_i32 = arith.constant 0 : i32
    return %arg2, %arg1 : i32, i32
  }
  func.func @transform_2(%arg0: i32, %arg1: i32, %arg2: i32) -> (i32, i32) {
    %c0_i32 = arith.constant 0 : i32
    %c0_i32_0 = arith.constant 0 : i32
    return %c0_i32, %arg1 : i32, i32
  }
  func.func @transform_3(%arg0: i32, %arg1: i32, %arg2: i32) -> (i32, i32) {
    %c0_i32 = arith.constant 0 : i32
    return %arg0, %arg1 : i32, i32
  }
}

module attributes {stable_mosaic.version = 11 : i64} {
  func.func @_mm_bias_kernel(%arg0: i32, %arg1: i32, %arg2: i32, %arg3: memref<32x384xbf16, #tpu.memory_space<vmem>>, %arg4: memref<384x128xbf16, #tpu.memory_space<vmem>>, %arg5: memref<1x128xf32, #tpu.memory_space<vmem>>, %arg6: memref<32x128xbf16, #tpu.memory_space<vmem>>, %arg7: memref<32x128xf32, #tpu.memory_space<vmem>>) attributes {dimension_semantics = [#tpu.dimension_semantics<parallel>, #tpu.dimension_semantics<parallel>, #tpu.dimension_semantics<arbitrary>], iteration_bounds = array<i64: 1, 1, 1>, scalar_prefetch = 0 : i64, scratch_operands = 1 : i64, tpu.core_type = #tpu.core_type<tc>, window_params = [{transform_indices = @transform_0, window_bounds = array<i64: 32, 384>}, {transform_indices = @transform_1, window_bounds = array<i64: 384, 128>}, {transform_indices = @transform_2, window_bounds = array<i64: 1, 128>}, {transform_indices = @transform_3, window_bounds = array<i64: 32, 128>}]} {
    %c0_i32 = arith.constant 0 : i32
    %0 = arith.cmpi eq, %arg2, %c0_i32 : i32
    %1 = arith.extui %0 : i1 to i32
    %c0_i32_0 = arith.constant 0 : i32
    %2 = arith.cmpi ne, %1, %c0_i32_0 : i32
    scf.if %2 {
      %cst_10 = arith.constant 0.000000e+00 : f32
      %12 = vector.broadcast %cst_10 : f32 to vector<32x128xf32>
      %c0_11 = arith.constant 0 : index
      %c0_12 = arith.constant 0 : index
      %13 = vector.load %arg7[%c0_11, %c0_12] : memref<32x128xf32, #tpu.memory_space<vmem>>, vector<32x128xf32>
      tpu.vector_store %arg7[%c0_11, %c0_12], %12 {strides = array<i32>} : memref<32x128xf32, #tpu.memory_space<vmem>>, vector<32x128xf32>,
    } else {
    }
    %c0 = arith.constant 0 : index
    %c0_1 = arith.constant 0 : index
    %3 = vector.load %arg7[%c0, %c0_1] : memref<32x128xf32, #tpu.memory_space<vmem>>, vector<32x128xf32>
    %c0_2 = arith.constant 0 : index
    %c0_3 = arith.constant 0 : index
    %4 = vector.load %arg3[%c0_2, %c0_3] : memref<32x384xbf16, #tpu.memory_space<vmem>>, vector<32x384xbf16>
    %c0_4 = arith.constant 0 : index
    %c0_5 = arith.constant 0 : index
    %5 = vector.load %arg4[%c0_4, %c0_5] : memref<384x128xbf16, #tpu.memory_space<vmem>>, vector<384x128xbf16>
    %cst = arith.constant dense<0.000000e+00> : vector<32x128xf32>
    %6 = tpu.matmul %4, %5, %cst {dimension_numbers = #tpu.dot_dimension_numbers<[1], [0], [0], [1], [0, 0, 1, 1], [], []>} : vector<32x384xbf16>, vector<384x128xbf16>, vector<32x128xf32> -> vector<32x128xf32>
    %7 = arith.addf %3, %6 : vector<32x128xf32>
    %c0_6 = arith.constant 0 : index
    %c0_7 = arith.constant 0 : index
    %8 = vector.load %arg7[%c0_6, %c0_7] : memref<32x128xf32, #tpu.memory_space<vmem>>, vector<32x128xf32>
    tpu.vector_store %arg7[%c0_6, %c0_7], %7 {strides = array<i32>} : memref<32x128xf32, #tpu.memory_space<vmem>>, vector<32x128xf32>,
    %c0_i32_8 = arith.constant 0 : i32
    %9 = arith.cmpi eq, %arg2, %c0_i32_8 : i32
    %10 = arith.extui %9 : i1 to i32
    %c0_i32_9 = arith.constant 0 : i32
    %11 = arith.cmpi ne, %10, %c0_i32_9 : i32
    scf.if %11 {
      %c0_10 = arith.constant 0 : index
      %c0_11 = arith.constant 0 : index
      %12 = vector.load %arg7[%c0_10, %c0_11] : memref<32x128xf32, #tpu.memory_space<vmem>>, vector<32x128xf32>
      %c0_12 = arith.constant 0 : index
      %c0_13 = arith.constant 0 : index
      %13 = vector.load %arg5[%c0_12, %c0_13] : memref<1x128xf32, #tpu.memory_space<vmem>>, vector<1x128xf32>
      %14 = vector.broadcast %13 : vector<1x128xf32> to vector<32x128xf32>
      %15 = arith.addf %12, %14 : vector<32x128xf32>
      %cst_14 = arith.constant 0.000000e+00 : f32
      %16 = vector.broadcast %cst_14 : f32 to vector<32x128xf32>
      %17 = arith.maximumf %15, %16 : vector<32x128xf32>
      %18 = arith.truncf %17 : vector<32x128xf32> to vector<32x128xbf16>
      %c0_15 = arith.constant 0 : index
      %c0_16 = arith.constant 0 : index
      %19 = vector.load %arg6[%c0_15, %c0_16] : memref<32x128xbf16, #tpu.memory_space<vmem>>, vector<32x128xbf16>
      tpu.vector_store %arg6[%c0_15, %c0_16], %18 {strides = array<i32>} : memref<32x128xbf16, #tpu.memory_space<vmem>>, vector<32x128xbf16>,
    } else {
    }
    return
  }
  func.func @transform_0(%arg0: i32, %arg1: i32, %arg2: i32) -> (i32, i32) {
    %c0_i32 = arith.constant 0 : i32
    return %arg0, %arg2 : i32, i32
  }
  func.func @transform_1(%arg0: i32, %arg1: i32, %arg2: i32) -> (i32, i32) {
    %c0_i32 = arith.constant 0 : i32
    return %arg2, %arg1 : i32, i32
  }
  func.func @transform_2(%arg0: i32, %arg1: i32, %arg2: i32) -> (i32, i32) {
    %c0_i32 = arith.constant 0 : i32
    %c0_i32_0 = arith.constant 0 : i32
    return %c0_i32, %arg1 : i32, i32
  }
  func.func @transform_3(%arg0: i32, %arg1: i32, %arg2: i32) -> (i32, i32) {
    %c0_i32 = arith.constant 0 : i32
    return %arg0, %arg1 : i32, i32
  }
}

module attributes {stable_mosaic.version = 11 : i64} {
  func.func @_mm_bias_kernel(%arg0: i32, %arg1: i32, %arg2: i32, %arg3: memref<32x128xbf16, #tpu.memory_space<vmem>>, %arg4: memref<128x128xbf16, #tpu.memory_space<vmem>>, %arg5: memref<1x128xf32, #tpu.memory_space<vmem>>, %arg6: memref<32x128xbf16, #tpu.memory_space<vmem>>, %arg7: memref<32x128xf32, #tpu.memory_space<vmem>>) attributes {dimension_semantics = [#tpu.dimension_semantics<parallel>, #tpu.dimension_semantics<parallel>, #tpu.dimension_semantics<arbitrary>], iteration_bounds = array<i64: 1, 1, 1>, scalar_prefetch = 0 : i64, scratch_operands = 1 : i64, tpu.core_type = #tpu.core_type<tc>, window_params = [{transform_indices = @transform_0, window_bounds = array<i64: 32, 128>}, {transform_indices = @transform_1, window_bounds = array<i64: 128, 128>}, {transform_indices = @transform_2, window_bounds = array<i64: 1, 128>}, {transform_indices = @transform_3, window_bounds = array<i64: 32, 128>}]} {
    %c0_i32 = arith.constant 0 : i32
    %0 = arith.cmpi eq, %arg2, %c0_i32 : i32
    %1 = arith.extui %0 : i1 to i32
    %c0_i32_0 = arith.constant 0 : i32
    %2 = arith.cmpi ne, %1, %c0_i32_0 : i32
    scf.if %2 {
      %cst_10 = arith.constant 0.000000e+00 : f32
      %12 = vector.broadcast %cst_10 : f32 to vector<32x128xf32>
      %c0_11 = arith.constant 0 : index
      %c0_12 = arith.constant 0 : index
      %13 = vector.load %arg7[%c0_11, %c0_12] : memref<32x128xf32, #tpu.memory_space<vmem>>, vector<32x128xf32>
      tpu.vector_store %arg7[%c0_11, %c0_12], %12 {strides = array<i32>} : memref<32x128xf32, #tpu.memory_space<vmem>>, vector<32x128xf32>,
    } else {
    }
    %c0 = arith.constant 0 : index
    %c0_1 = arith.constant 0 : index
    %3 = vector.load %arg7[%c0, %c0_1] : memref<32x128xf32, #tpu.memory_space<vmem>>, vector<32x128xf32>
    %c0_2 = arith.constant 0 : index
    %c0_3 = arith.constant 0 : index
    %4 = vector.load %arg3[%c0_2, %c0_3] : memref<32x128xbf16, #tpu.memory_space<vmem>>, vector<32x128xbf16>
    %c0_4 = arith.constant 0 : index
    %c0_5 = arith.constant 0 : index
    %5 = vector.load %arg4[%c0_4, %c0_5] : memref<128x128xbf16, #tpu.memory_space<vmem>>, vector<128x128xbf16>
    %cst = arith.constant dense<0.000000e+00> : vector<32x128xf32>
    %6 = tpu.matmul %4, %5, %cst {dimension_numbers = #tpu.dot_dimension_numbers<[1], [0], [0], [1], [0, 0, 1, 1], [], []>} : vector<32x128xbf16>, vector<128x128xbf16>, vector<32x128xf32> -> vector<32x128xf32>
    %7 = arith.addf %3, %6 : vector<32x128xf32>
    %c0_6 = arith.constant 0 : index
    %c0_7 = arith.constant 0 : index
    %8 = vector.load %arg7[%c0_6, %c0_7] : memref<32x128xf32, #tpu.memory_space<vmem>>, vector<32x128xf32>
    tpu.vector_store %arg7[%c0_6, %c0_7], %7 {strides = array<i32>} : memref<32x128xf32, #tpu.memory_space<vmem>>, vector<32x128xf32>,
    %c0_i32_8 = arith.constant 0 : i32
    %9 = arith.cmpi eq, %arg2, %c0_i32_8 : i32
    %10 = arith.extui %9 : i1 to i32
    %c0_i32_9 = arith.constant 0 : i32
    %11 = arith.cmpi ne, %10, %c0_i32_9 : i32
    scf.if %11 {
      %c0_10 = arith.constant 0 : index
      %c0_11 = arith.constant 0 : index
      %12 = vector.load %arg7[%c0_10, %c0_11] : memref<32x128xf32, #tpu.memory_space<vmem>>, vector<32x128xf32>
      %c0_12 = arith.constant 0 : index
      %c0_13 = arith.constant 0 : index
      %13 = vector.load %arg5[%c0_12, %c0_13] : memref<1x128xf32, #tpu.memory_space<vmem>>, vector<1x128xf32>
      %14 = vector.broadcast %13 : vector<1x128xf32> to vector<32x128xf32>
      %15 = arith.addf %12, %14 : vector<32x128xf32>
      %16 = arith.truncf %15 : vector<32x128xf32> to vector<32x128xbf16>
      %c0_14 = arith.constant 0 : index
      %c0_15 = arith.constant 0 : index
      %17 = vector.load %arg6[%c0_14, %c0_15] : memref<32x128xbf16, #tpu.memory_space<vmem>>, vector<32x128xbf16>
      tpu.vector_store %arg6[%c0_14, %c0_15], %16 {strides = array<i32>} : memref<32x128xbf16, #tpu.memory_space<vmem>>, vector<32x128xbf16>,
    } else {
    }
    return
  }
  func.func @transform_0(%arg0: i32, %arg1: i32, %arg2: i32) -> (i32, i32) {
    %c0_i32 = arith.constant 0 : i32
    return %arg0, %arg2 : i32, i32
  }
  func.func @transform_1(%arg0: i32, %arg1: i32, %arg2: i32) -> (i32, i32) {
    %c0_i32 = arith.constant 0 : i32
    return %arg2, %arg1 : i32, i32
  }
  func.func @transform_2(%arg0: i32, %arg1: i32, %arg2: i32) -> (i32, i32) {
    %c0_i32 = arith.constant 0 : i32
    %c0_i32_0 = arith.constant 0 : i32
    return %c0_i32, %arg1 : i32, i32
  }
  func.func @transform_3(%arg0: i32, %arg1: i32, %arg2: i32) -> (i32, i32) {
    %c0_i32 = arith.constant 0 : i32
    return %arg0, %arg1 : i32, i32
  }
}

module attributes {stable_mosaic.version = 11 : i64} {
  func.func @_mm_bias_kernel(%arg0: i32, %arg1: i32, %arg2: i32, %arg3: memref<32x128xbf16, #tpu.memory_space<vmem>>, %arg4: memref<128x128xbf16, #tpu.memory_space<vmem>>, %arg5: memref<1x128xf32, #tpu.memory_space<vmem>>, %arg6: memref<32x128xbf16, #tpu.memory_space<vmem>>, %arg7: memref<32x128xbf16, #tpu.memory_space<vmem>>, %arg8: memref<32x128xf32, #tpu.memory_space<vmem>>) attributes {dimension_semantics = [#tpu.dimension_semantics<parallel>, #tpu.dimension_semantics<parallel>, #tpu.dimension_semantics<arbitrary>], iteration_bounds = array<i64: 1, 1, 1>, scalar_prefetch = 0 : i64, scratch_operands = 1 : i64, tpu.core_type = #tpu.core_type<tc>, window_params = [{transform_indices = @transform_0, window_bounds = array<i64: 32, 128>}, {transform_indices = @transform_1, window_bounds = array<i64: 128, 128>}, {transform_indices = @transform_2, window_bounds = array<i64: 1, 128>}, {transform_indices = @transform_3, window_bounds = array<i64: 32, 128>}, {transform_indices = @transform_4, window_bounds = array<i64: 32, 128>}]} {
    %c0_i32 = arith.constant 0 : i32
    %0 = arith.cmpi eq, %arg2, %c0_i32 : i32
    %1 = arith.extui %0 : i1 to i32
    %c0_i32_0 = arith.constant 0 : i32
    %2 = arith.cmpi ne, %1, %c0_i32_0 : i32
    scf.if %2 {
      %cst_10 = arith.constant 0.000000e+00 : f32
      %12 = vector.broadcast %cst_10 : f32 to vector<32x128xf32>
      %c0_11 = arith.constant 0 : index
      %c0_12 = arith.constant 0 : index
      %13 = vector.load %arg8[%c0_11, %c0_12] : memref<32x128xf32, #tpu.memory_space<vmem>>, vector<32x128xf32>
      tpu.vector_store %arg8[%c0_11, %c0_12], %12 {strides = array<i32>} : memref<32x128xf32, #tpu.memory_space<vmem>>, vector<32x128xf32>,
    } else {
    }
    %c0 = arith.constant 0 : index
    %c0_1 = arith.constant 0 : index
    %3 = vector.load %arg8[%c0, %c0_1] : memref<32x128xf32, #tpu.memory_space<vmem>>, vector<32x128xf32>
    %c0_2 = arith.constant 0 : index
    %c0_3 = arith.constant 0 : index
    %4 = vector.load %arg3[%c0_2, %c0_3] : memref<32x128xbf16, #tpu.memory_space<vmem>>, vector<32x128xbf16>
    %c0_4 = arith.constant 0 : index
    %c0_5 = arith.constant 0 : index
    %5 = vector.load %arg4[%c0_4, %c0_5] : memref<128x128xbf16, #tpu.memory_space<vmem>>, vector<128x128xbf16>
    %cst = arith.constant dense<0.000000e+00> : vector<32x128xf32>
    %6 = tpu.matmul %4, %5, %cst {dimension_numbers = #tpu.dot_dimension_numbers<[1], [0], [0], [1], [0, 0, 1, 1], [], []>} : vector<32x128xbf16>, vector<128x128xbf16>, vector<32x128xf32> -> vector<32x128xf32>
    %7 = arith.addf %3, %6 : vector<32x128xf32>
    %c0_6 = arith.constant 0 : index
    %c0_7 = arith.constant 0 : index
    %8 = vector.load %arg8[%c0_6, %c0_7] : memref<32x128xf32, #tpu.memory_space<vmem>>, vector<32x128xf32>
    tpu.vector_store %arg8[%c0_6, %c0_7], %7 {strides = array<i32>} : memref<32x128xf32, #tpu.memory_space<vmem>>, vector<32x128xf32>,
    %c0_i32_8 = arith.constant 0 : i32
    %9 = arith.cmpi eq, %arg2, %c0_i32_8 : i32
    %10 = arith.extui %9 : i1 to i32
    %c0_i32_9 = arith.constant 0 : i32
    %11 = arith.cmpi ne, %10, %c0_i32_9 : i32
    scf.if %11 {
      %c0_10 = arith.constant 0 : index
      %c0_11 = arith.constant 0 : index
      %12 = vector.load %arg8[%c0_10, %c0_11] : memref<32x128xf32, #tpu.memory_space<vmem>>, vector<32x128xf32>
      %c0_12 = arith.constant 0 : index
      %c0_13 = arith.constant 0 : index
      %13 = vector.load %arg5[%c0_12, %c0_13] : memref<1x128xf32, #tpu.memory_space<vmem>>, vector<1x128xf32>
      %14 = vector.broadcast %13 : vector<1x128xf32> to vector<32x128xf32>
      %15 = arith.addf %12, %14 : vector<32x128xf32>
      %c0_14 = arith.constant 0 : index
      %c0_15 = arith.constant 0 : index
      %16 = vector.load %arg6[%c0_14, %c0_15] : memref<32x128xbf16, #tpu.memory_space<vmem>>, vector<32x128xbf16>
      %17 = arith.extf %16 : vector<32x128xbf16> to vector<32x128xf32>
      %18 = arith.addf %15, %17 : vector<32x128xf32>
      %cst_16 = arith.constant 0.000000e+00 : f32
      %19 = vector.broadcast %cst_16 : f32 to vector<32x128xf32>
      %20 = arith.maximumf %18, %19 : vector<32x128xf32>
      %21 = arith.truncf %20 : vector<32x128xf32> to vector<32x128xbf16>
      %c0_17 = arith.constant 0 : index
      %c0_18 = arith.constant 0 : index
      %22 = vector.load %arg7[%c0_17, %c0_18] : memref<32x128xbf16, #tpu.memory_space<vmem>>, vector<32x128xbf16>
      tpu.vector_store %arg7[%c0_17, %c0_18], %21 {strides = array<i32>} : memref<32x128xbf16, #tpu.memory_space<vmem>>, vector<32x128xbf16>,
    } else {
    }
    return
  }
  func.func @transform_0(%arg0: i32, %arg1: i32, %arg2: i32) -> (i32, i32) {
    %c0_i32 = arith.constant 0 : i32
    return %arg0, %arg2 : i32, i32
  }
  func.func @transform_1(%arg0: i32, %arg1: i32, %arg2: i32) -> (i32, i32) {
    %c0_i32 = arith.constant 0 : i32
    return %arg2, %arg1 : i32, i32
  }
  func.func @transform_2(%arg0: i32, %arg1: i32, %arg2: i32) -> (i32, i32) {
    %c0_i32 = arith.constant 0 : i32
    %c0_i32_0 = arith.constant 0 : i32
    return %c0_i32, %arg1 : i32, i32
  }
  func.func @transform_3(%arg0: i32, %arg1: i32, %arg2: i32) -> (i32, i32) {
    %c0_i32 = arith.constant 0 : i32
    return %arg0, %arg1 : i32, i32
  }
  func.func @transform_4(%arg0: i32, %arg1: i32, %arg2: i32) -> (i32, i32) {
    %c0_i32 = arith.constant 0 : i32
    return %arg0, %arg1 : i32, i32
  }
}

module attributes {stable_mosaic.version = 11 : i64} {
  func.func @_mm_bias_kernel(%arg0: i32, %arg1: i32, %arg2: i32, %arg3: memref<32x128xbf16, #tpu.memory_space<vmem>>, %arg4: memref<128x128xbf16, #tpu.memory_space<vmem>>, %arg5: memref<1x128xf32, #tpu.memory_space<vmem>>, %arg6: memref<32x128xbf16, #tpu.memory_space<vmem>>, %arg7: memref<32x128xf32, #tpu.memory_space<vmem>>) attributes {dimension_semantics = [#tpu.dimension_semantics<parallel>, #tpu.dimension_semantics<parallel>, #tpu.dimension_semantics<arbitrary>], iteration_bounds = array<i64: 1, 1, 1>, scalar_prefetch = 0 : i64, scratch_operands = 1 : i64, tpu.core_type = #tpu.core_type<tc>, window_params = [{transform_indices = @transform_0, window_bounds = array<i64: 32, 128>}, {transform_indices = @transform_1, window_bounds = array<i64: 128, 128>}, {transform_indices = @transform_2, window_bounds = array<i64: 1, 128>}, {transform_indices = @transform_3, window_bounds = array<i64: 32, 128>}]} {
    %c0_i32 = arith.constant 0 : i32
    %0 = arith.cmpi eq, %arg2, %c0_i32 : i32
    %1 = arith.extui %0 : i1 to i32
    %c0_i32_0 = arith.constant 0 : i32
    %2 = arith.cmpi ne, %1, %c0_i32_0 : i32
    scf.if %2 {
      %cst_10 = arith.constant 0.000000e+00 : f32
      %12 = vector.broadcast %cst_10 : f32 to vector<32x128xf32>
      %c0_11 = arith.constant 0 : index
      %c0_12 = arith.constant 0 : index
      %13 = vector.load %arg7[%c0_11, %c0_12] : memref<32x128xf32, #tpu.memory_space<vmem>>, vector<32x128xf32>
      tpu.vector_store %arg7[%c0_11, %c0_12], %12 {strides = array<i32>} : memref<32x128xf32, #tpu.memory_space<vmem>>, vector<32x128xf32>,
    } else {
    }
    %c0 = arith.constant 0 : index
    %c0_1 = arith.constant 0 : index
    %3 = vector.load %arg7[%c0, %c0_1] : memref<32x128xf32, #tpu.memory_space<vmem>>, vector<32x128xf32>
    %c0_2 = arith.constant 0 : index
    %c0_3 = arith.constant 0 : index
    %4 = vector.load %arg3[%c0_2, %c0_3] : memref<32x128xbf16, #tpu.memory_space<vmem>>, vector<32x128xbf16>
    %c0_4 = arith.constant 0 : index
    %c0_5 = arith.constant 0 : index
    %5 = vector.load %arg4[%c0_4, %c0_5] : memref<128x128xbf16, #tpu.memory_space<vmem>>, vector<128x128xbf16>
    %cst = arith.constant dense<0.000000e+00> : vector<32x128xf32>
    %6 = tpu.matmul %4, %5, %cst {dimension_numbers = #tpu.dot_dimension_numbers<[1], [0], [0], [1], [0, 0, 1, 1], [], []>} : vector<32x128xbf16>, vector<128x128xbf16>, vector<32x128xf32> -> vector<32x128xf32>
    %7 = arith.addf %3, %6 : vector<32x128xf32>
    %c0_6 = arith.constant 0 : index
    %c0_7 = arith.constant 0 : index
    %8 = vector.load %arg7[%c0_6, %c0_7] : memref<32x128xf32, #tpu.memory_space<vmem>>, vector<32x128xf32>
    tpu.vector_store %arg7[%c0_6, %c0_7], %7 {strides = array<i32>} : memref<32x128xf32, #tpu.memory_space<vmem>>, vector<32x128xf32>,
    %c0_i32_8 = arith.constant 0 : i32
    %9 = arith.cmpi eq, %arg2, %c0_i32_8 : i32
    %10 = arith.extui %9 : i1 to i32
    %c0_i32_9 = arith.constant 0 : i32
    %11 = arith.cmpi ne, %10, %c0_i32_9 : i32
    scf.if %11 {
      %c0_10 = arith.constant 0 : index
      %c0_11 = arith.constant 0 : index
      %12 = vector.load %arg7[%c0_10, %c0_11] : memref<32x128xf32, #tpu.memory_space<vmem>>, vector<32x128xf32>
      %c0_12 = arith.constant 0 : index
      %c0_13 = arith.constant 0 : index
      %13 = vector.load %arg5[%c0_12, %c0_13] : memref<1x128xf32, #tpu.memory_space<vmem>>, vector<1x128xf32>
      %14 = vector.broadcast %13 : vector<1x128xf32> to vector<32x128xf32>
      %15 = arith.addf %12, %14 : vector<32x128xf32>
      %cst_14 = arith.constant 0.000000e+00 : f32
      %16 = vector.broadcast %cst_14 : f32 to vector<32x128xf32>
      %17 = arith.maximumf %15, %16 : vector<32x128xf32>
      %18 = arith.truncf %17 : vector<32x128xf32> to vector<32x128xbf16>
      %c0_15 = arith.constant 0 : index
      %c0_16 = arith.constant 0 : index
      %19 = vector.load %arg6[%c0_15, %c0_16] : memref<32x128xbf16, #tpu.memory_space<vmem>>, vector<32x128xbf16>
      tpu.vector_store %arg6[%c0_15, %c0_16], %18 {strides = array<i32>} : memref<32x128xbf16, #tpu.memory_space<vmem>>, vector<32x128xbf16>,
    } else {
    }
    return
  }
  func.func @transform_0(%arg0: i32, %arg1: i32, %arg2: i32) -> (i32, i32) {
    %c0_i32 = arith.constant 0 : i32
    return %arg0, %arg2 : i32, i32
  }
  func.func @transform_1(%arg0: i32, %arg1: i32, %arg2: i32) -> (i32, i32) {
    %c0_i32 = arith.constant 0 : i32
    return %arg2, %arg1 : i32, i32
  }
  func.func @transform_2(%arg0: i32, %arg1: i32, %arg2: i32) -> (i32, i32) {
    %c0_i32 = arith.constant 0 : i32
    %c0_i32_0 = arith.constant 0 : i32
    return %c0_i32, %arg1 : i32, i32
  }
  func.func @transform_3(%arg0: i32, %arg1: i32, %arg2: i32) -> (i32, i32) {
    %c0_i32 = arith.constant 0 : i32
    return %arg0, %arg1 : i32, i32
  }
}

module attributes {stable_mosaic.version = 11 : i64} {
  func.func @_mm_bias_kernel(%arg0: i32, %arg1: i32, %arg2: i32, %arg3: memref<32x384xbf16, #tpu.memory_space<vmem>>, %arg4: memref<384x128xbf16, #tpu.memory_space<vmem>>, %arg5: memref<1x128xf32, #tpu.memory_space<vmem>>, %arg6: memref<32x128xbf16, #tpu.memory_space<vmem>>, %arg7: memref<32x128xf32, #tpu.memory_space<vmem>>) attributes {dimension_semantics = [#tpu.dimension_semantics<parallel>, #tpu.dimension_semantics<parallel>, #tpu.dimension_semantics<arbitrary>], iteration_bounds = array<i64: 1, 1, 1>, scalar_prefetch = 0 : i64, scratch_operands = 1 : i64, tpu.core_type = #tpu.core_type<tc>, window_params = [{transform_indices = @transform_0, window_bounds = array<i64: 32, 384>}, {transform_indices = @transform_1, window_bounds = array<i64: 384, 128>}, {transform_indices = @transform_2, window_bounds = array<i64: 1, 128>}, {transform_indices = @transform_3, window_bounds = array<i64: 32, 128>}]} {
    %c0_i32 = arith.constant 0 : i32
    %0 = arith.cmpi eq, %arg2, %c0_i32 : i32
    %1 = arith.extui %0 : i1 to i32
    %c0_i32_0 = arith.constant 0 : i32
    %2 = arith.cmpi ne, %1, %c0_i32_0 : i32
    scf.if %2 {
      %cst_10 = arith.constant 0.000000e+00 : f32
      %12 = vector.broadcast %cst_10 : f32 to vector<32x128xf32>
      %c0_11 = arith.constant 0 : index
      %c0_12 = arith.constant 0 : index
      %13 = vector.load %arg7[%c0_11, %c0_12] : memref<32x128xf32, #tpu.memory_space<vmem>>, vector<32x128xf32>
      tpu.vector_store %arg7[%c0_11, %c0_12], %12 {strides = array<i32>} : memref<32x128xf32, #tpu.memory_space<vmem>>, vector<32x128xf32>,
    } else {
    }
    %c0 = arith.constant 0 : index
    %c0_1 = arith.constant 0 : index
    %3 = vector.load %arg7[%c0, %c0_1] : memref<32x128xf32, #tpu.memory_space<vmem>>, vector<32x128xf32>
    %c0_2 = arith.constant 0 : index
    %c0_3 = arith.constant 0 : index
    %4 = vector.load %arg3[%c0_2, %c0_3] : memref<32x384xbf16, #tpu.memory_space<vmem>>, vector<32x384xbf16>
    %c0_4 = arith.constant 0 : index
    %c0_5 = arith.constant 0 : index
    %5 = vector.load %arg4[%c0_4, %c0_5] : memref<384x128xbf16, #tpu.memory_space<vmem>>, vector<384x128xbf16>
    %cst = arith.constant dense<0.000000e+00> : vector<32x128xf32>
    %6 = tpu.matmul %4, %5, %cst {dimension_numbers = #tpu.dot_dimension_numbers<[1], [0], [0], [1], [0, 0, 1, 1], [], []>} : vector<32x384xbf16>, vector<384x128xbf16>, vector<32x128xf32> -> vector<32x128xf32>
    %7 = arith.addf %3, %6 : vector<32x128xf32>
    %c0_6 = arith.constant 0 : index
    %c0_7 = arith.constant 0 : index
    %8 = vector.load %arg7[%c0_6, %c0_7] : memref<32x128xf32, #tpu.memory_space<vmem>>, vector<32x128xf32>
    tpu.vector_store %arg7[%c0_6, %c0_7], %7 {strides = array<i32>} : memref<32x128xf32, #tpu.memory_space<vmem>>, vector<32x128xf32>,
    %c0_i32_8 = arith.constant 0 : i32
    %9 = arith.cmpi eq, %arg2, %c0_i32_8 : i32
    %10 = arith.extui %9 : i1 to i32
    %c0_i32_9 = arith.constant 0 : i32
    %11 = arith.cmpi ne, %10, %c0_i32_9 : i32
    scf.if %11 {
      %c0_10 = arith.constant 0 : index
      %c0_11 = arith.constant 0 : index
      %12 = vector.load %arg7[%c0_10, %c0_11] : memref<32x128xf32, #tpu.memory_space<vmem>>, vector<32x128xf32>
      %c0_12 = arith.constant 0 : index
      %c0_13 = arith.constant 0 : index
      %13 = vector.load %arg5[%c0_12, %c0_13] : memref<1x128xf32, #tpu.memory_space<vmem>>, vector<1x128xf32>
      %14 = vector.broadcast %13 : vector<1x128xf32> to vector<32x128xf32>
      %15 = arith.addf %12, %14 : vector<32x128xf32>
      %cst_14 = arith.constant 0.000000e+00 : f32
      %16 = vector.broadcast %cst_14 : f32 to vector<32x128xf32>
      %17 = arith.maximumf %15, %16 : vector<32x128xf32>
      %18 = arith.truncf %17 : vector<32x128xf32> to vector<32x128xbf16>
      %c0_15 = arith.constant 0 : index
      %c0_16 = arith.constant 0 : index
      %19 = vector.load %arg6[%c0_15, %c0_16] : memref<32x128xbf16, #tpu.memory_space<vmem>>, vector<32x128xbf16>
      tpu.vector_store %arg6[%c0_15, %c0_16], %18 {strides = array<i32>} : memref<32x128xbf16, #tpu.memory_space<vmem>>, vector<32x128xbf16>,
    } else {
    }
    return
  }
  func.func @transform_0(%arg0: i32, %arg1: i32, %arg2: i32) -> (i32, i32) {
    %c0_i32 = arith.constant 0 : i32
    return %arg0, %arg2 : i32, i32
  }
  func.func @transform_1(%arg0: i32, %arg1: i32, %arg2: i32) -> (i32, i32) {
    %c0_i32 = arith.constant 0 : i32
    return %arg2, %arg1 : i32, i32
  }
  func.func @transform_2(%arg0: i32, %arg1: i32, %arg2: i32) -> (i32, i32) {
    %c0_i32 = arith.constant 0 : i32
    %c0_i32_0 = arith.constant 0 : i32
    return %c0_i32, %arg1 : i32, i32
  }
  func.func @transform_3(%arg0: i32, %arg1: i32, %arg2: i32) -> (i32, i32) {
    %c0_i32 = arith.constant 0 : i32
    return %arg0, %arg1 : i32, i32
  }
}

module attributes {stable_mosaic.version = 11 : i64} {
  func.func @_mm_bias_kernel(%arg0: i32, %arg1: i32, %arg2: i32, %arg3: memref<32x128xbf16, #tpu.memory_space<vmem>>, %arg4: memref<128x128xbf16, #tpu.memory_space<vmem>>, %arg5: memref<1x128xf32, #tpu.memory_space<vmem>>, %arg6: memref<32x128xbf16, #tpu.memory_space<vmem>>, %arg7: memref<32x128xbf16, #tpu.memory_space<vmem>>, %arg8: memref<32x128xf32, #tpu.memory_space<vmem>>) attributes {dimension_semantics = [#tpu.dimension_semantics<parallel>, #tpu.dimension_semantics<parallel>, #tpu.dimension_semantics<arbitrary>], iteration_bounds = array<i64: 1, 1, 1>, scalar_prefetch = 0 : i64, scratch_operands = 1 : i64, tpu.core_type = #tpu.core_type<tc>, window_params = [{transform_indices = @transform_0, window_bounds = array<i64: 32, 128>}, {transform_indices = @transform_1, window_bounds = array<i64: 128, 128>}, {transform_indices = @transform_2, window_bounds = array<i64: 1, 128>}, {transform_indices = @transform_3, window_bounds = array<i64: 32, 128>}, {transform_indices = @transform_4, window_bounds = array<i64: 32, 128>}]} {
    %c0_i32 = arith.constant 0 : i32
    %0 = arith.cmpi eq, %arg2, %c0_i32 : i32
    %1 = arith.extui %0 : i1 to i32
    %c0_i32_0 = arith.constant 0 : i32
    %2 = arith.cmpi ne, %1, %c0_i32_0 : i32
    scf.if %2 {
      %cst_10 = arith.constant 0.000000e+00 : f32
      %12 = vector.broadcast %cst_10 : f32 to vector<32x128xf32>
      %c0_11 = arith.constant 0 : index
      %c0_12 = arith.constant 0 : index
      %13 = vector.load %arg8[%c0_11, %c0_12] : memref<32x128xf32, #tpu.memory_space<vmem>>, vector<32x128xf32>
      tpu.vector_store %arg8[%c0_11, %c0_12], %12 {strides = array<i32>} : memref<32x128xf32, #tpu.memory_space<vmem>>, vector<32x128xf32>,
    } else {
    }
    %c0 = arith.constant 0 : index
    %c0_1 = arith.constant 0 : index
    %3 = vector.load %arg8[%c0, %c0_1] : memref<32x128xf32, #tpu.memory_space<vmem>>, vector<32x128xf32>
    %c0_2 = arith.constant 0 : index
    %c0_3 = arith.constant 0 : index
    %4 = vector.load %arg3[%c0_2, %c0_3] : memref<32x128xbf16, #tpu.memory_space<vmem>>, vector<32x128xbf16>
    %c0_4 = arith.constant 0 : index
    %c0_5 = arith.constant 0 : index
    %5 = vector.load %arg4[%c0_4, %c0_5] : memref<128x128xbf16, #tpu.memory_space<vmem>>, vector<128x128xbf16>
    %cst = arith.constant dense<0.000000e+00> : vector<32x128xf32>
    %6 = tpu.matmul %4, %5, %cst {dimension_numbers = #tpu.dot_dimension_numbers<[1], [0], [0], [1], [0, 0, 1, 1], [], []>} : vector<32x128xbf16>, vector<128x128xbf16>, vector<32x128xf32> -> vector<32x128xf32>
    %7 = arith.addf %3, %6 : vector<32x128xf32>
    %c0_6 = arith.constant 0 : index
    %c0_7 = arith.constant 0 : index
    %8 = vector.load %arg8[%c0_6, %c0_7] : memref<32x128xf32, #tpu.memory_space<vmem>>, vector<32x128xf32>
    tpu.vector_store %arg8[%c0_6, %c0_7], %7 {strides = array<i32>} : memref<32x128xf32, #tpu.memory_space<vmem>>, vector<32x128xf32>,
    %c0_i32_8 = arith.constant 0 : i32
    %9 = arith.cmpi eq, %arg2, %c0_i32_8 : i32
    %10 = arith.extui %9 : i1 to i32
    %c0_i32_9 = arith.constant 0 : i32
    %11 = arith.cmpi ne, %10, %c0_i32_9 : i32
    scf.if %11 {
      %c0_10 = arith.constant 0 : index
      %c0_11 = arith.constant 0 : index
      %12 = vector.load %arg8[%c0_10, %c0_11] : memref<32x128xf32, #tpu.memory_space<vmem>>, vector<32x128xf32>
      %c0_12 = arith.constant 0 : index
      %c0_13 = arith.constant 0 : index
      %13 = vector.load %arg5[%c0_12, %c0_13] : memref<1x128xf32, #tpu.memory_space<vmem>>, vector<1x128xf32>
      %14 = vector.broadcast %13 : vector<1x128xf32> to vector<32x128xf32>
      %15 = arith.addf %12, %14 : vector<32x128xf32>
      %c0_14 = arith.constant 0 : index
      %c0_15 = arith.constant 0 : index
      %16 = vector.load %arg6[%c0_14, %c0_15] : memref<32x128xbf16, #tpu.memory_space<vmem>>, vector<32x128xbf16>
      %17 = arith.extf %16 : vector<32x128xbf16> to vector<32x128xf32>
      %18 = arith.addf %15, %17 : vector<32x128xf32>
      %cst_16 = arith.constant 0.000000e+00 : f32
      %19 = vector.broadcast %cst_16 : f32 to vector<32x128xf32>
      %20 = arith.maximumf %18, %19 : vector<32x128xf32>
      %21 = arith.truncf %20 : vector<32x128xf32> to vector<32x128xbf16>
      %c0_17 = arith.constant 0 : index
      %c0_18 = arith.constant 0 : index
      %22 = vector.load %arg7[%c0_17, %c0_18] : memref<32x128xbf16, #tpu.memory_space<vmem>>, vector<32x128xbf16>
      tpu.vector_store %arg7[%c0_17, %c0_18], %21 {strides = array<i32>} : memref<32x128xbf16, #tpu.memory_space<vmem>>, vector<32x128xbf16>,
    } else {
    }
    return
  }
  func.func @transform_0(%arg0: i32, %arg1: i32, %arg2: i32) -> (i32, i32) {
    %c0_i32 = arith.constant 0 : i32
    return %arg0, %arg2 : i32, i32
  }
  func.func @transform_1(%arg0: i32, %arg1: i32, %arg2: i32) -> (i32, i32) {
    %c0_i32 = arith.constant 0 : i32
    return %arg2, %arg1 : i32, i32
  }
  func.func @transform_2(%arg0: i32, %arg1: i32, %arg2: i32) -> (i32, i32) {
    %c0_i32 = arith.constant 0 : i32
    %c0_i32_0 = arith.constant 0 : i32
    return %c0_i32, %arg1 : i32, i32
  }
  func.func @transform_3(%arg0: i32, %arg1: i32, %arg2: i32) -> (i32, i32) {
    %c0_i32 = arith.constant 0 : i32
    return %arg0, %arg1 : i32, i32
  }
  func.func @transform_4(%arg0: i32, %arg1: i32, %arg2: i32) -> (i32, i32) {
    %c0_i32 = arith.constant 0 : i32
    return %arg0, %arg1 : i32, i32
  }
}

module attributes {stable_mosaic.version = 11 : i64} {
  func.func @_mm_bias_kernel(%arg0: i32, %arg1: i32, %arg2: i32, %arg3: memref<32x128xbf16, #tpu.memory_space<vmem>>, %arg4: memref<128x128xbf16, #tpu.memory_space<vmem>>, %arg5: memref<1x128xf32, #tpu.memory_space<vmem>>, %arg6: memref<32x128xbf16, #tpu.memory_space<vmem>>, %arg7: memref<32x128xf32, #tpu.memory_space<vmem>>) attributes {dimension_semantics = [#tpu.dimension_semantics<parallel>, #tpu.dimension_semantics<parallel>, #tpu.dimension_semantics<arbitrary>], iteration_bounds = array<i64: 1, 1, 1>, scalar_prefetch = 0 : i64, scratch_operands = 1 : i64, tpu.core_type = #tpu.core_type<tc>, window_params = [{transform_indices = @transform_0, window_bounds = array<i64: 32, 128>}, {transform_indices = @transform_1, window_bounds = array<i64: 128, 128>}, {transform_indices = @transform_2, window_bounds = array<i64: 1, 128>}, {transform_indices = @transform_3, window_bounds = array<i64: 32, 128>}]} {
    %c0_i32 = arith.constant 0 : i32
    %0 = arith.cmpi eq, %arg2, %c0_i32 : i32
    %1 = arith.extui %0 : i1 to i32
    %c0_i32_0 = arith.constant 0 : i32
    %2 = arith.cmpi ne, %1, %c0_i32_0 : i32
    scf.if %2 {
      %cst_10 = arith.constant 0.000000e+00 : f32
      %12 = vector.broadcast %cst_10 : f32 to vector<32x128xf32>
      %c0_11 = arith.constant 0 : index
      %c0_12 = arith.constant 0 : index
      %13 = vector.load %arg7[%c0_11, %c0_12] : memref<32x128xf32, #tpu.memory_space<vmem>>, vector<32x128xf32>
      tpu.vector_store %arg7[%c0_11, %c0_12], %12 {strides = array<i32>} : memref<32x128xf32, #tpu.memory_space<vmem>>, vector<32x128xf32>,
    } else {
    }
    %c0 = arith.constant 0 : index
    %c0_1 = arith.constant 0 : index
    %3 = vector.load %arg7[%c0, %c0_1] : memref<32x128xf32, #tpu.memory_space<vmem>>, vector<32x128xf32>
    %c0_2 = arith.constant 0 : index
    %c0_3 = arith.constant 0 : index
    %4 = vector.load %arg3[%c0_2, %c0_3] : memref<32x128xbf16, #tpu.memory_space<vmem>>, vector<32x128xbf16>
    %c0_4 = arith.constant 0 : index
    %c0_5 = arith.constant 0 : index
    %5 = vector.load %arg4[%c0_4, %c0_5] : memref<128x128xbf16, #tpu.memory_space<vmem>>, vector<128x128xbf16>
    %cst = arith.constant dense<0.000000e+00> : vector<32x128xf32>
    %6 = tpu.matmul %4, %5, %cst {dimension_numbers = #tpu.dot_dimension_numbers<[1], [0], [0], [1], [0, 0, 1, 1], [], []>} : vector<32x128xbf16>, vector<128x128xbf16>, vector<32x128xf32> -> vector<32x128xf32>
    %7 = arith.addf %3, %6 : vector<32x128xf32>
    %c0_6 = arith.constant 0 : index
    %c0_7 = arith.constant 0 : index
    %8 = vector.load %arg7[%c0_6, %c0_7] : memref<32x128xf32, #tpu.memory_space<vmem>>, vector<32x128xf32>
    tpu.vector_store %arg7[%c0_6, %c0_7], %7 {strides = array<i32>} : memref<32x128xf32, #tpu.memory_space<vmem>>, vector<32x128xf32>,
    %c0_i32_8 = arith.constant 0 : i32
    %9 = arith.cmpi eq, %arg2, %c0_i32_8 : i32
    %10 = arith.extui %9 : i1 to i32
    %c0_i32_9 = arith.constant 0 : i32
    %11 = arith.cmpi ne, %10, %c0_i32_9 : i32
    scf.if %11 {
      %c0_10 = arith.constant 0 : index
      %c0_11 = arith.constant 0 : index
      %12 = vector.load %arg7[%c0_10, %c0_11] : memref<32x128xf32, #tpu.memory_space<vmem>>, vector<32x128xf32>
      %c0_12 = arith.constant 0 : index
      %c0_13 = arith.constant 0 : index
      %13 = vector.load %arg5[%c0_12, %c0_13] : memref<1x128xf32, #tpu.memory_space<vmem>>, vector<1x128xf32>
      %14 = vector.broadcast %13 : vector<1x128xf32> to vector<32x128xf32>
      %15 = arith.addf %12, %14 : vector<32x128xf32>
      %cst_14 = arith.constant 0.000000e+00 : f32
      %16 = vector.broadcast %cst_14 : f32 to vector<32x128xf32>
      %17 = arith.maximumf %15, %16 : vector<32x128xf32>
      %18 = arith.truncf %17 : vector<32x128xf32> to vector<32x128xbf16>
      %c0_15 = arith.constant 0 : index
      %c0_16 = arith.constant 0 : index
      %19 = vector.load %arg6[%c0_15, %c0_16] : memref<32x128xbf16, #tpu.memory_space<vmem>>, vector<32x128xbf16>
      tpu.vector_store %arg6[%c0_15, %c0_16], %18 {strides = array<i32>} : memref<32x128xbf16, #tpu.memory_space<vmem>>, vector<32x128xbf16>,
    } else {
    }
    return
  }
  func.func @transform_0(%arg0: i32, %arg1: i32, %arg2: i32) -> (i32, i32) {
    %c0_i32 = arith.constant 0 : i32
    return %arg0, %arg2 : i32, i32
  }
  func.func @transform_1(%arg0: i32, %arg1: i32, %arg2: i32) -> (i32, i32) {
    %c0_i32 = arith.constant 0 : i32
    return %arg2, %arg1 : i32, i32
  }
  func.func @transform_2(%arg0: i32, %arg1: i32, %arg2: i32) -> (i32, i32) {
    %c0_i32 = arith.constant 0 : i32
    %c0_i32_0 = arith.constant 0 : i32
    return %c0_i32, %arg1 : i32, i32
  }
  func.func @transform_3(%arg0: i32, %arg1: i32, %arg2: i32) -> (i32, i32) {
    %c0_i32 = arith.constant 0 : i32
    return %arg0, %arg1 : i32, i32
  }
}

module attributes {stable_mosaic.version = 11 : i64} {
  func.func @_mm_bias_kernel(%arg0: i32, %arg1: i32, %arg2: i32, %arg3: memref<16x640xbf16, #tpu.memory_space<vmem>>, %arg4: memref<640x128xbf16, #tpu.memory_space<vmem>>, %arg5: memref<1x128xf32, #tpu.memory_space<vmem>>, %arg6: memref<16x128xbf16, #tpu.memory_space<vmem>>, %arg7: memref<16x128xf32, #tpu.memory_space<vmem>>) attributes {dimension_semantics = [#tpu.dimension_semantics<parallel>, #tpu.dimension_semantics<parallel>, #tpu.dimension_semantics<arbitrary>], iteration_bounds = array<i64: 1, 1, 1>, scalar_prefetch = 0 : i64, scratch_operands = 1 : i64, tpu.core_type = #tpu.core_type<tc>, window_params = [{transform_indices = @transform_0, window_bounds = array<i64: 16, 640>}, {transform_indices = @transform_1, window_bounds = array<i64: 640, 128>}, {transform_indices = @transform_2, window_bounds = array<i64: 1, 128>}, {transform_indices = @transform_3, window_bounds = array<i64: 16, 128>}]} {
    %c0_i32 = arith.constant 0 : i32
    %0 = arith.cmpi eq, %arg2, %c0_i32 : i32
    %1 = arith.extui %0 : i1 to i32
    %c0_i32_0 = arith.constant 0 : i32
    %2 = arith.cmpi ne, %1, %c0_i32_0 : i32
    scf.if %2 {
      %cst_10 = arith.constant 0.000000e+00 : f32
      %12 = vector.broadcast %cst_10 : f32 to vector<16x128xf32>
      %c0_11 = arith.constant 0 : index
      %c0_12 = arith.constant 0 : index
      %13 = vector.load %arg7[%c0_11, %c0_12] : memref<16x128xf32, #tpu.memory_space<vmem>>, vector<16x128xf32>
      tpu.vector_store %arg7[%c0_11, %c0_12], %12 {strides = array<i32>} : memref<16x128xf32, #tpu.memory_space<vmem>>, vector<16x128xf32>,
    } else {
    }
    %c0 = arith.constant 0 : index
    %c0_1 = arith.constant 0 : index
    %3 = vector.load %arg7[%c0, %c0_1] : memref<16x128xf32, #tpu.memory_space<vmem>>, vector<16x128xf32>
    %c0_2 = arith.constant 0 : index
    %c0_3 = arith.constant 0 : index
    %4 = vector.load %arg3[%c0_2, %c0_3] : memref<16x640xbf16, #tpu.memory_space<vmem>>, vector<16x640xbf16>
    %c0_4 = arith.constant 0 : index
    %c0_5 = arith.constant 0 : index
    %5 = vector.load %arg4[%c0_4, %c0_5] : memref<640x128xbf16, #tpu.memory_space<vmem>>, vector<640x128xbf16>
    %cst = arith.constant dense<0.000000e+00> : vector<16x128xf32>
    %6 = tpu.matmul %4, %5, %cst {dimension_numbers = #tpu.dot_dimension_numbers<[1], [0], [0], [1], [0, 0, 1, 1], [], []>} : vector<16x640xbf16>, vector<640x128xbf16>, vector<16x128xf32> -> vector<16x128xf32>
    %7 = arith.addf %3, %6 : vector<16x128xf32>
    %c0_6 = arith.constant 0 : index
    %c0_7 = arith.constant 0 : index
    %8 = vector.load %arg7[%c0_6, %c0_7] : memref<16x128xf32, #tpu.memory_space<vmem>>, vector<16x128xf32>
    tpu.vector_store %arg7[%c0_6, %c0_7], %7 {strides = array<i32>} : memref<16x128xf32, #tpu.memory_space<vmem>>, vector<16x128xf32>,
    %c0_i32_8 = arith.constant 0 : i32
    %9 = arith.cmpi eq, %arg2, %c0_i32_8 : i32
    %10 = arith.extui %9 : i1 to i32
    %c0_i32_9 = arith.constant 0 : i32
    %11 = arith.cmpi ne, %10, %c0_i32_9 : i32
    scf.if %11 {
      %c0_10 = arith.constant 0 : index
      %c0_11 = arith.constant 0 : index
      %12 = vector.load %arg7[%c0_10, %c0_11] : memref<16x128xf32, #tpu.memory_space<vmem>>, vector<16x128xf32>
      %c0_12 = arith.constant 0 : index
      %c0_13 = arith.constant 0 : index
      %13 = vector.load %arg5[%c0_12, %c0_13] : memref<1x128xf32, #tpu.memory_space<vmem>>, vector<1x128xf32>
      %14 = vector.broadcast %13 : vector<1x128xf32> to vector<16x128xf32>
      %15 = arith.addf %12, %14 : vector<16x128xf32>
      %cst_14 = arith.constant 0.000000e+00 : f32
      %16 = vector.broadcast %cst_14 : f32 to vector<16x128xf32>
      %17 = arith.maximumf %15, %16 : vector<16x128xf32>
      %18 = arith.truncf %17 : vector<16x128xf32> to vector<16x128xbf16>
      %c0_15 = arith.constant 0 : index
      %c0_16 = arith.constant 0 : index
      %19 = vector.load %arg6[%c0_15, %c0_16] : memref<16x128xbf16, #tpu.memory_space<vmem>>, vector<16x128xbf16>
      tpu.vector_store %arg6[%c0_15, %c0_16], %18 {strides = array<i32>} : memref<16x128xbf16, #tpu.memory_space<vmem>>, vector<16x128xbf16>,
    } else {
    }
    return
  }
  func.func @transform_0(%arg0: i32, %arg1: i32, %arg2: i32) -> (i32, i32) {
    %c0_i32 = arith.constant 0 : i32
    return %arg0, %arg2 : i32, i32
  }
  func.func @transform_1(%arg0: i32, %arg1: i32, %arg2: i32) -> (i32, i32) {
    %c0_i32 = arith.constant 0 : i32
    return %arg2, %arg1 : i32, i32
  }
  func.func @transform_2(%arg0: i32, %arg1: i32, %arg2: i32) -> (i32, i32) {
    %c0_i32 = arith.constant 0 : i32
    %c0_i32_0 = arith.constant 0 : i32
    return %c0_i32, %arg1 : i32, i32
  }
  func.func @transform_3(%arg0: i32, %arg1: i32, %arg2: i32) -> (i32, i32) {
    %c0_i32 = arith.constant 0 : i32
    return %arg0, %arg1 : i32, i32
  }
}

module attributes {stable_mosaic.version = 11 : i64} {
  func.func @_mm_bias_kernel(%arg0: i32, %arg1: i32, %arg2: i32, %arg3: memref<16x128xbf16, #tpu.memory_space<vmem>>, %arg4: memref<128x128xbf16, #tpu.memory_space<vmem>>, %arg5: memref<1x128xf32, #tpu.memory_space<vmem>>, %arg6: memref<16x128xbf16, #tpu.memory_space<vmem>>, %arg7: memref<16x128xbf16, #tpu.memory_space<vmem>>, %arg8: memref<16x128xf32, #tpu.memory_space<vmem>>) attributes {dimension_semantics = [#tpu.dimension_semantics<parallel>, #tpu.dimension_semantics<parallel>, #tpu.dimension_semantics<arbitrary>], iteration_bounds = array<i64: 1, 2, 1>, scalar_prefetch = 0 : i64, scratch_operands = 1 : i64, tpu.core_type = #tpu.core_type<tc>, window_params = [{transform_indices = @transform_0, window_bounds = array<i64: 16, 128>}, {transform_indices = @transform_1, window_bounds = array<i64: 128, 128>}, {transform_indices = @transform_2, window_bounds = array<i64: 1, 128>}, {transform_indices = @transform_3, window_bounds = array<i64: 16, 128>}, {transform_indices = @transform_4, window_bounds = array<i64: 16, 128>}]} {
    %c0_i32 = arith.constant 0 : i32
    %0 = arith.cmpi eq, %arg2, %c0_i32 : i32
    %1 = arith.extui %0 : i1 to i32
    %c0_i32_0 = arith.constant 0 : i32
    %2 = arith.cmpi ne, %1, %c0_i32_0 : i32
    scf.if %2 {
      %cst_10 = arith.constant 0.000000e+00 : f32
      %12 = vector.broadcast %cst_10 : f32 to vector<16x128xf32>
      %c0_11 = arith.constant 0 : index
      %c0_12 = arith.constant 0 : index
      %13 = vector.load %arg8[%c0_11, %c0_12] : memref<16x128xf32, #tpu.memory_space<vmem>>, vector<16x128xf32>
      tpu.vector_store %arg8[%c0_11, %c0_12], %12 {strides = array<i32>} : memref<16x128xf32, #tpu.memory_space<vmem>>, vector<16x128xf32>,
    } else {
    }
    %c0 = arith.constant 0 : index
    %c0_1 = arith.constant 0 : index
    %3 = vector.load %arg8[%c0, %c0_1] : memref<16x128xf32, #tpu.memory_space<vmem>>, vector<16x128xf32>
    %c0_2 = arith.constant 0 : index
    %c0_3 = arith.constant 0 : index
    %4 = vector.load %arg3[%c0_2, %c0_3] : memref<16x128xbf16, #tpu.memory_space<vmem>>, vector<16x128xbf16>
    %c0_4 = arith.constant 0 : index
    %c0_5 = arith.constant 0 : index
    %5 = vector.load %arg4[%c0_4, %c0_5] : memref<128x128xbf16, #tpu.memory_space<vmem>>, vector<128x128xbf16>
    %cst = arith.constant dense<0.000000e+00> : vector<16x128xf32>
    %6 = tpu.matmul %4, %5, %cst {dimension_numbers = #tpu.dot_dimension_numbers<[1], [0], [0], [1], [0, 0, 1, 1], [], []>} : vector<16x128xbf16>, vector<128x128xbf16>, vector<16x128xf32> -> vector<16x128xf32>
    %7 = arith.addf %3, %6 : vector<16x128xf32>
    %c0_6 = arith.constant 0 : index
    %c0_7 = arith.constant 0 : index
    %8 = vector.load %arg8[%c0_6, %c0_7] : memref<16x128xf32, #tpu.memory_space<vmem>>, vector<16x128xf32>
    tpu.vector_store %arg8[%c0_6, %c0_7], %7 {strides = array<i32>} : memref<16x128xf32, #tpu.memory_space<vmem>>, vector<16x128xf32>,
    %c0_i32_8 = arith.constant 0 : i32
    %9 = arith.cmpi eq, %arg2, %c0_i32_8 : i32
    %10 = arith.extui %9 : i1 to i32
    %c0_i32_9 = arith.constant 0 : i32
    %11 = arith.cmpi ne, %10, %c0_i32_9 : i32
    scf.if %11 {
      %c0_10 = arith.constant 0 : index
      %c0_11 = arith.constant 0 : index
      %12 = vector.load %arg8[%c0_10, %c0_11] : memref<16x128xf32, #tpu.memory_space<vmem>>, vector<16x128xf32>
      %c0_12 = arith.constant 0 : index
      %c0_13 = arith.constant 0 : index
      %13 = vector.load %arg5[%c0_12, %c0_13] : memref<1x128xf32, #tpu.memory_space<vmem>>, vector<1x128xf32>
      %14 = vector.broadcast %13 : vector<1x128xf32> to vector<16x128xf32>
      %15 = arith.addf %12, %14 : vector<16x128xf32>
      %c0_14 = arith.constant 0 : index
      %c0_15 = arith.constant 0 : index
      %16 = vector.load %arg6[%c0_14, %c0_15] : memref<16x128xbf16, #tpu.memory_space<vmem>>, vector<16x128xbf16>
      %17 = arith.extf %16 : vector<16x128xbf16> to vector<16x128xf32>
      %18 = arith.addf %15, %17 : vector<16x128xf32>
      %cst_16 = arith.constant 0.000000e+00 : f32
      %19 = vector.broadcast %cst_16 : f32 to vector<16x128xf32>
      %20 = arith.maximumf %18, %19 : vector<16x128xf32>
      %21 = arith.truncf %20 : vector<16x128xf32> to vector<16x128xbf16>
      %c0_17 = arith.constant 0 : index
      %c0_18 = arith.constant 0 : index
      %22 = vector.load %arg7[%c0_17, %c0_18] : memref<16x128xbf16, #tpu.memory_space<vmem>>, vector<16x128xbf16>
      tpu.vector_store %arg7[%c0_17, %c0_18], %21 {strides = array<i32>} : memref<16x128xbf16, #tpu.memory_space<vmem>>, vector<16x128xbf16>,
    } else {
    }
    return
  }
  func.func @transform_0(%arg0: i32, %arg1: i32, %arg2: i32) -> (i32, i32) {
    %c0_i32 = arith.constant 0 : i32
    return %arg0, %arg2 : i32, i32
  }
  func.func @transform_1(%arg0: i32, %arg1: i32, %arg2: i32) -> (i32, i32) {
    %c0_i32 = arith.constant 0 : i32
    return %arg2, %arg1 : i32, i32
  }
  func.func @transform_2(%arg0: i32, %arg1: i32, %arg2: i32) -> (i32, i32) {
    %c0_i32 = arith.constant 0 : i32
    %c0_i32_0 = arith.constant 0 : i32
    return %c0_i32, %arg1 : i32, i32
  }
  func.func @transform_3(%arg0: i32, %arg1: i32, %arg2: i32) -> (i32, i32) {
    %c0_i32 = arith.constant 0 : i32
    return %arg0, %arg1 : i32, i32
  }
  func.func @transform_4(%arg0: i32, %arg1: i32, %arg2: i32) -> (i32, i32) {
    %c0_i32 = arith.constant 0 : i32
    return %arg0, %arg1 : i32, i32
  }
}

module attributes {stable_mosaic.version = 11 : i64} {
  func.func @_mm_bias_kernel(%arg0: i32, %arg1: i32, %arg2: i32, %arg3: memref<16x256xbf16, #tpu.memory_space<vmem>>, %arg4: memref<256x128xbf16, #tpu.memory_space<vmem>>, %arg5: memref<1x128xf32, #tpu.memory_space<vmem>>, %arg6: memref<16x128xbf16, #tpu.memory_space<vmem>>, %arg7: memref<16x128xf32, #tpu.memory_space<vmem>>) attributes {dimension_semantics = [#tpu.dimension_semantics<parallel>, #tpu.dimension_semantics<parallel>, #tpu.dimension_semantics<arbitrary>], iteration_bounds = array<i64: 1, 1, 1>, scalar_prefetch = 0 : i64, scratch_operands = 1 : i64, tpu.core_type = #tpu.core_type<tc>, window_params = [{transform_indices = @transform_0, window_bounds = array<i64: 16, 256>}, {transform_indices = @transform_1, window_bounds = array<i64: 256, 128>}, {transform_indices = @transform_2, window_bounds = array<i64: 1, 128>}, {transform_indices = @transform_3, window_bounds = array<i64: 16, 128>}]} {
    %c0_i32 = arith.constant 0 : i32
    %0 = arith.cmpi eq, %arg2, %c0_i32 : i32
    %1 = arith.extui %0 : i1 to i32
    %c0_i32_0 = arith.constant 0 : i32
    %2 = arith.cmpi ne, %1, %c0_i32_0 : i32
    scf.if %2 {
      %cst_10 = arith.constant 0.000000e+00 : f32
      %12 = vector.broadcast %cst_10 : f32 to vector<16x128xf32>
      %c0_11 = arith.constant 0 : index
      %c0_12 = arith.constant 0 : index
      %13 = vector.load %arg7[%c0_11, %c0_12] : memref<16x128xf32, #tpu.memory_space<vmem>>, vector<16x128xf32>
      tpu.vector_store %arg7[%c0_11, %c0_12], %12 {strides = array<i32>} : memref<16x128xf32, #tpu.memory_space<vmem>>, vector<16x128xf32>,
    } else {
    }
    %c0 = arith.constant 0 : index
    %c0_1 = arith.constant 0 : index
    %3 = vector.load %arg7[%c0, %c0_1] : memref<16x128xf32, #tpu.memory_space<vmem>>, vector<16x128xf32>
    %c0_2 = arith.constant 0 : index
    %c0_3 = arith.constant 0 : index
    %4 = vector.load %arg3[%c0_2, %c0_3] : memref<16x256xbf16, #tpu.memory_space<vmem>>, vector<16x256xbf16>
    %c0_4 = arith.constant 0 : index
    %c0_5 = arith.constant 0 : index
    %5 = vector.load %arg4[%c0_4, %c0_5] : memref<256x128xbf16, #tpu.memory_space<vmem>>, vector<256x128xbf16>
    %cst = arith.constant dense<0.000000e+00> : vector<16x128xf32>
    %6 = tpu.matmul %4, %5, %cst {dimension_numbers = #tpu.dot_dimension_numbers<[1], [0], [0], [1], [0, 0, 1, 1], [], []>} : vector<16x256xbf16>, vector<256x128xbf16>, vector<16x128xf32> -> vector<16x128xf32>
    %7 = arith.addf %3, %6 : vector<16x128xf32>
    %c0_6 = arith.constant 0 : index
    %c0_7 = arith.constant 0 : index
    %8 = vector.load %arg7[%c0_6, %c0_7] : memref<16x128xf32, #tpu.memory_space<vmem>>, vector<16x128xf32>
    tpu.vector_store %arg7[%c0_6, %c0_7], %7 {strides = array<i32>} : memref<16x128xf32, #tpu.memory_space<vmem>>, vector<16x128xf32>,
    %c0_i32_8 = arith.constant 0 : i32
    %9 = arith.cmpi eq, %arg2, %c0_i32_8 : i32
    %10 = arith.extui %9 : i1 to i32
    %c0_i32_9 = arith.constant 0 : i32
    %11 = arith.cmpi ne, %10, %c0_i32_9 : i32
    scf.if %11 {
      %c0_10 = arith.constant 0 : index
      %c0_11 = arith.constant 0 : index
      %12 = vector.load %arg7[%c0_10, %c0_11] : memref<16x128xf32, #tpu.memory_space<vmem>>, vector<16x128xf32>
      %c0_12 = arith.constant 0 : index
      %c0_13 = arith.constant 0 : index
      %13 = vector.load %arg5[%c0_12, %c0_13] : memref<1x128xf32, #tpu.memory_space<vmem>>, vector<1x128xf32>
      %14 = vector.broadcast %13 : vector<1x128xf32> to vector<16x128xf32>
      %15 = arith.addf %12, %14 : vector<16x128xf32>
      %cst_14 = arith.constant 0.000000e+00 : f32
      %16 = vector.broadcast %cst_14 : f32 to vector<16x128xf32>
      %17 = arith.maximumf %15, %16 : vector<16x128xf32>
      %18 = arith.truncf %17 : vector<16x128xf32> to vector<16x128xbf16>
      %c0_15 = arith.constant 0 : index
      %c0_16 = arith.constant 0 : index
      %19 = vector.load %arg6[%c0_15, %c0_16] : memref<16x128xbf16, #tpu.memory_space<vmem>>, vector<16x128xbf16>
      tpu.vector_store %arg6[%c0_15, %c0_16], %18 {strides = array<i32>} : memref<16x128xbf16, #tpu.memory_space<vmem>>, vector<16x128xbf16>,
    } else {
    }
    return
  }
  func.func @transform_0(%arg0: i32, %arg1: i32, %arg2: i32) -> (i32, i32) {
    %c0_i32 = arith.constant 0 : i32
    return %arg0, %arg2 : i32, i32
  }
  func.func @transform_1(%arg0: i32, %arg1: i32, %arg2: i32) -> (i32, i32) {
    %c0_i32 = arith.constant 0 : i32
    return %arg2, %arg1 : i32, i32
  }
  func.func @transform_2(%arg0: i32, %arg1: i32, %arg2: i32) -> (i32, i32) {
    %c0_i32 = arith.constant 0 : i32
    %c0_i32_0 = arith.constant 0 : i32
    return %c0_i32, %arg1 : i32, i32
  }
  func.func @transform_3(%arg0: i32, %arg1: i32, %arg2: i32) -> (i32, i32) {
    %c0_i32 = arith.constant 0 : i32
    return %arg0, %arg1 : i32, i32
  }
}

module attributes {stable_mosaic.version = 11 : i64} {
  func.func @_mm_bias_kernel(%arg0: i32, %arg1: i32, %arg2: i32, %arg3: memref<16x128xbf16, #tpu.memory_space<vmem>>, %arg4: memref<128x128xbf16, #tpu.memory_space<vmem>>, %arg5: memref<1x128xf32, #tpu.memory_space<vmem>>, %arg6: memref<16x128xbf16, #tpu.memory_space<vmem>>, %arg7: memref<16x128xf32, #tpu.memory_space<vmem>>) attributes {dimension_semantics = [#tpu.dimension_semantics<parallel>, #tpu.dimension_semantics<parallel>, #tpu.dimension_semantics<arbitrary>], iteration_bounds = array<i64: 1, 2, 1>, scalar_prefetch = 0 : i64, scratch_operands = 1 : i64, tpu.core_type = #tpu.core_type<tc>, window_params = [{transform_indices = @transform_0, window_bounds = array<i64: 16, 128>}, {transform_indices = @transform_1, window_bounds = array<i64: 128, 128>}, {transform_indices = @transform_2, window_bounds = array<i64: 1, 128>}, {transform_indices = @transform_3, window_bounds = array<i64: 16, 128>}]} {
    %c0_i32 = arith.constant 0 : i32
    %0 = arith.cmpi eq, %arg2, %c0_i32 : i32
    %1 = arith.extui %0 : i1 to i32
    %c0_i32_0 = arith.constant 0 : i32
    %2 = arith.cmpi ne, %1, %c0_i32_0 : i32
    scf.if %2 {
      %cst_10 = arith.constant 0.000000e+00 : f32
      %12 = vector.broadcast %cst_10 : f32 to vector<16x128xf32>
      %c0_11 = arith.constant 0 : index
      %c0_12 = arith.constant 0 : index
      %13 = vector.load %arg7[%c0_11, %c0_12] : memref<16x128xf32, #tpu.memory_space<vmem>>, vector<16x128xf32>
      tpu.vector_store %arg7[%c0_11, %c0_12], %12 {strides = array<i32>} : memref<16x128xf32, #tpu.memory_space<vmem>>, vector<16x128xf32>,
    } else {
    }
    %c0 = arith.constant 0 : index
    %c0_1 = arith.constant 0 : index
    %3 = vector.load %arg7[%c0, %c0_1] : memref<16x128xf32, #tpu.memory_space<vmem>>, vector<16x128xf32>
    %c0_2 = arith.constant 0 : index
    %c0_3 = arith.constant 0 : index
    %4 = vector.load %arg3[%c0_2, %c0_3] : memref<16x128xbf16, #tpu.memory_space<vmem>>, vector<16x128xbf16>
    %c0_4 = arith.constant 0 : index
    %c0_5 = arith.constant 0 : index
    %5 = vector.load %arg4[%c0_4, %c0_5] : memref<128x128xbf16, #tpu.memory_space<vmem>>, vector<128x128xbf16>
    %cst = arith.constant dense<0.000000e+00> : vector<16x128xf32>
    %6 = tpu.matmul %4, %5, %cst {dimension_numbers = #tpu.dot_dimension_numbers<[1], [0], [0], [1], [0, 0, 1, 1], [], []>} : vector<16x128xbf16>, vector<128x128xbf16>, vector<16x128xf32> -> vector<16x128xf32>
    %7 = arith.addf %3, %6 : vector<16x128xf32>
    %c0_6 = arith.constant 0 : index
    %c0_7 = arith.constant 0 : index
    %8 = vector.load %arg7[%c0_6, %c0_7] : memref<16x128xf32, #tpu.memory_space<vmem>>, vector<16x128xf32>
    tpu.vector_store %arg7[%c0_6, %c0_7], %7 {strides = array<i32>} : memref<16x128xf32, #tpu.memory_space<vmem>>, vector<16x128xf32>,
    %c0_i32_8 = arith.constant 0 : i32
    %9 = arith.cmpi eq, %arg2, %c0_i32_8 : i32
    %10 = arith.extui %9 : i1 to i32
    %c0_i32_9 = arith.constant 0 : i32
    %11 = arith.cmpi ne, %10, %c0_i32_9 : i32
    scf.if %11 {
      %c0_10 = arith.constant 0 : index
      %c0_11 = arith.constant 0 : index
      %12 = vector.load %arg7[%c0_10, %c0_11] : memref<16x128xf32, #tpu.memory_space<vmem>>, vector<16x128xf32>
      %c0_12 = arith.constant 0 : index
      %c0_13 = arith.constant 0 : index
      %13 = vector.load %arg5[%c0_12, %c0_13] : memref<1x128xf32, #tpu.memory_space<vmem>>, vector<1x128xf32>
      %14 = vector.broadcast %13 : vector<1x128xf32> to vector<16x128xf32>
      %15 = arith.addf %12, %14 : vector<16x128xf32>
      %16 = arith.truncf %15 : vector<16x128xf32> to vector<16x128xbf16>
      %c0_14 = arith.constant 0 : index
      %c0_15 = arith.constant 0 : index
      %17 = vector.load %arg6[%c0_14, %c0_15] : memref<16x128xbf16, #tpu.memory_space<vmem>>, vector<16x128xbf16>
      tpu.vector_store %arg6[%c0_14, %c0_15], %16 {strides = array<i32>} : memref<16x128xbf16, #tpu.memory_space<vmem>>, vector<16x128xbf16>,
    } else {
    }
    return
  }
  func.func @transform_0(%arg0: i32, %arg1: i32, %arg2: i32) -> (i32, i32) {
    %c0_i32 = arith.constant 0 : i32
    return %arg0, %arg2 : i32, i32
  }
  func.func @transform_1(%arg0: i32, %arg1: i32, %arg2: i32) -> (i32, i32) {
    %c0_i32 = arith.constant 0 : i32
    return %arg2, %arg1 : i32, i32
  }
  func.func @transform_2(%arg0: i32, %arg1: i32, %arg2: i32) -> (i32, i32) {
    %c0_i32 = arith.constant 0 : i32
    %c0_i32_0 = arith.constant 0 : i32
    return %c0_i32, %arg1 : i32, i32
  }
  func.func @transform_3(%arg0: i32, %arg1: i32, %arg2: i32) -> (i32, i32) {
    %c0_i32 = arith.constant 0 : i32
    return %arg0, %arg1 : i32, i32
  }
}

module attributes {stable_mosaic.version = 11 : i64} {
  func.func @_mm_bias_kernel(%arg0: i32, %arg1: i32, %arg2: i32, %arg3: memref<16x256xbf16, #tpu.memory_space<vmem>>, %arg4: memref<256x128xbf16, #tpu.memory_space<vmem>>, %arg5: memref<1x128xf32, #tpu.memory_space<vmem>>, %arg6: memref<16x128xbf16, #tpu.memory_space<vmem>>, %arg7: memref<16x128xf32, #tpu.memory_space<vmem>>) attributes {dimension_semantics = [#tpu.dimension_semantics<parallel>, #tpu.dimension_semantics<parallel>, #tpu.dimension_semantics<arbitrary>], iteration_bounds = array<i64: 1, 1, 1>, scalar_prefetch = 0 : i64, scratch_operands = 1 : i64, tpu.core_type = #tpu.core_type<tc>, window_params = [{transform_indices = @transform_0, window_bounds = array<i64: 16, 256>}, {transform_indices = @transform_1, window_bounds = array<i64: 256, 128>}, {transform_indices = @transform_2, window_bounds = array<i64: 1, 128>}, {transform_indices = @transform_3, window_bounds = array<i64: 16, 128>}]} {
    %c0_i32 = arith.constant 0 : i32
    %0 = arith.cmpi eq, %arg2, %c0_i32 : i32
    %1 = arith.extui %0 : i1 to i32
    %c0_i32_0 = arith.constant 0 : i32
    %2 = arith.cmpi ne, %1, %c0_i32_0 : i32
    scf.if %2 {
      %cst_10 = arith.constant 0.000000e+00 : f32
      %12 = vector.broadcast %cst_10 : f32 to vector<16x128xf32>
      %c0_11 = arith.constant 0 : index
      %c0_12 = arith.constant 0 : index
      %13 = vector.load %arg7[%c0_11, %c0_12] : memref<16x128xf32, #tpu.memory_space<vmem>>, vector<16x128xf32>
      tpu.vector_store %arg7[%c0_11, %c0_12], %12 {strides = array<i32>} : memref<16x128xf32, #tpu.memory_space<vmem>>, vector<16x128xf32>,
    } else {
    }
    %c0 = arith.constant 0 : index
    %c0_1 = arith.constant 0 : index
    %3 = vector.load %arg7[%c0, %c0_1] : memref<16x128xf32, #tpu.memory_space<vmem>>, vector<16x128xf32>
    %c0_2 = arith.constant 0 : index
    %c0_3 = arith.constant 0 : index
    %4 = vector.load %arg3[%c0_2, %c0_3] : memref<16x256xbf16, #tpu.memory_space<vmem>>, vector<16x256xbf16>
    %c0_4 = arith.constant 0 : index
    %c0_5 = arith.constant 0 : index
    %5 = vector.load %arg4[%c0_4, %c0_5] : memref<256x128xbf16, #tpu.memory_space<vmem>>, vector<256x128xbf16>
    %cst = arith.constant dense<0.000000e+00> : vector<16x128xf32>
    %6 = tpu.matmul %4, %5, %cst {dimension_numbers = #tpu.dot_dimension_numbers<[1], [0], [0], [1], [0, 0, 1, 1], [], []>} : vector<16x256xbf16>, vector<256x128xbf16>, vector<16x128xf32> -> vector<16x128xf32>
    %7 = arith.addf %3, %6 : vector<16x128xf32>
    %c0_6 = arith.constant 0 : index
    %c0_7 = arith.constant 0 : index
    %8 = vector.load %arg7[%c0_6, %c0_7] : memref<16x128xf32, #tpu.memory_space<vmem>>, vector<16x128xf32>
    tpu.vector_store %arg7[%c0_6, %c0_7], %7 {strides = array<i32>} : memref<16x128xf32, #tpu.memory_space<vmem>>, vector<16x128xf32>,
    %c0_i32_8 = arith.constant 0 : i32
    %9 = arith.cmpi eq, %arg2, %c0_i32_8 : i32
    %10 = arith.extui %9 : i1 to i32
    %c0_i32_9 = arith.constant 0 : i32
    %11 = arith.cmpi ne, %10, %c0_i32_9 : i32
    scf.if %11 {
      %c0_10 = arith.constant 0 : index
      %c0_11 = arith.constant 0 : index
      %12 = vector.load %arg7[%c0_10, %c0_11] : memref<16x128xf32, #tpu.memory_space<vmem>>, vector<16x128xf32>
      %c0_12 = arith.constant 0 : index
      %c0_13 = arith.constant 0 : index
      %13 = vector.load %arg5[%c0_12, %c0_13] : memref<1x128xf32, #tpu.memory_space<vmem>>, vector<1x128xf32>
      %14 = vector.broadcast %13 : vector<1x128xf32> to vector<16x128xf32>
      %15 = arith.addf %12, %14 : vector<16x128xf32>
      %16 = arith.truncf %15 : vector<16x128xf32> to vector<16x128xbf16>
      %c0_14 = arith.constant 0 : index
      %c0_15 = arith.constant 0 : index
      %17 = vector.load %arg6[%c0_14, %c0_15] : memref<16x128xbf16, #tpu.memory_space<vmem>>, vector<16x128xbf16>
      tpu.vector_store %arg6[%c0_14, %c0_15], %16 {strides = array<i32>} : memref<16x128xbf16, #tpu.memory_space<vmem>>, vector<16x128xbf16>,
    } else {
    }
    return
  }
  func.func @transform_0(%arg0: i32, %arg1: i32, %arg2: i32) -> (i32, i32) {
    %c0_i32 = arith.constant 0 : i32
    return %arg0, %arg2 : i32, i32
  }
  func.func @transform_1(%arg0: i32, %arg1: i32, %arg2: i32) -> (i32, i32) {
    %c0_i32 = arith.constant 0 : i32
    return %arg2, %arg1 : i32, i32
  }
  func.func @transform_2(%arg0: i32, %arg1: i32, %arg2: i32) -> (i32, i32) {
    %c0_i32 = arith.constant 0 : i32
    %c0_i32_0 = arith.constant 0 : i32
    return %c0_i32, %arg1 : i32, i32
  }
  func.func @transform_3(%arg0: i32, %arg1: i32, %arg2: i32) -> (i32, i32) {
    %c0_i32 = arith.constant 0 : i32
    return %arg0, %arg1 : i32, i32
  }
}

module attributes {stable_mosaic.version = 11 : i64} {
  func.func @_head_kernel(%arg0: memref<8x512xbf16, #tpu.memory_space<vmem>>, %arg1: memref<512x64xbf16, #tpu.memory_space<vmem>>, %arg2: memref<1x64xf32, #tpu.memory_space<vmem>>, %arg3: memref<64x80xbf16, #tpu.memory_space<vmem>>, %arg4: memref<1x80xf32, #tpu.memory_space<vmem>>, %arg5: memref<8x80xf32, #tpu.memory_space<vmem>>) attributes {dimension_semantics = [], scalar_prefetch = 0 : i64, scratch_operands = 0 : i64, tpu.core_type = #tpu.core_type<tc>} {
    %c0 = arith.constant 0 : index
    %c0_0 = arith.constant 0 : index
    %0 = vector.load %arg0[%c0, %c0_0] : memref<8x512xbf16, #tpu.memory_space<vmem>>, vector<8x512xbf16>
    %c0_1 = arith.constant 0 : index
    %c0_2 = arith.constant 0 : index
    %1 = vector.load %arg1[%c0_1, %c0_2] : memref<512x64xbf16, #tpu.memory_space<vmem>>, vector<512x64xbf16>
    %cst = arith.constant dense<0.000000e+00> : vector<8x64xf32>
    %2 = tpu.matmul %0, %1, %cst {dimension_numbers = #tpu.dot_dimension_numbers<[1], [0], [0], [1], [0, 0, 1, 1], [], []>} : vector<8x512xbf16>, vector<512x64xbf16>, vector<8x64xf32> -> vector<8x64xf32>
    %c0_3 = arith.constant 0 : index
    %c0_4 = arith.constant 0 : index
    %3 = vector.load %arg2[%c0_3, %c0_4] : memref<1x64xf32, #tpu.memory_space<vmem>>, vector<1x64xf32>
    %4 = vector.broadcast %3 : vector<1x64xf32> to vector<8x64xf32>
    %5 = arith.addf %2, %4 : vector<8x64xf32>
    %cst_5 = arith.constant 0.000000e+00 : f32
    %6 = vector.broadcast %cst_5 : f32 to vector<8x64xf32>
    %7 = arith.maximumf %5, %6 : vector<8x64xf32>
    %8 = arith.truncf %7 : vector<8x64xf32> to vector<8x64xbf16>
    %c0_6 = arith.constant 0 : index
    %c0_7 = arith.constant 0 : index
    %9 = vector.load %arg3[%c0_6, %c0_7] : memref<64x80xbf16, #tpu.memory_space<vmem>>, vector<64x80xbf16>
    %cst_8 = arith.constant dense<0.000000e+00> : vector<8x80xf32>
    %10 = tpu.matmul %8, %9, %cst_8 {dimension_numbers = #tpu.dot_dimension_numbers<[1], [0], [0], [1], [0, 0, 1, 1], [], []>} : vector<8x64xbf16>, vector<64x80xbf16>, vector<8x80xf32> -> vector<8x80xf32>
    %c0_9 = arith.constant 0 : index
    %c0_10 = arith.constant 0 : index
    %11 = vector.load %arg4[%c0_9, %c0_10] : memref<1x80xf32, #tpu.memory_space<vmem>>, vector<1x80xf32>
    %12 = vector.broadcast %11 : vector<1x80xf32> to vector<8x80xf32>
    %13 = arith.addf %10, %12 : vector<8x80xf32>
    %c0_11 = arith.constant 0 : index
    %c0_12 = arith.constant 0 : index
    %14 = vector.load %arg5[%c0_11, %c0_12] : memref<8x80xf32, #tpu.memory_space<vmem>>, vector<8x80xf32>
    tpu.vector_store %arg5[%c0_11, %c0_12], %13 {strides = array<i32>} : memref<8x80xf32, #tpu.memory_space<vmem>>, vector<8x80xf32>,
    return
  }
}

</mosaic_0001>

<bundles_post_ra>
// kernel: forward.55
= control target key start
LH: loop header
LB: loop body
LE: loop exit
PB: predicated region body
PF: predicated region fallthrough
CT: control target
= control target key end

     0   :  { %s2594_s12 = smov 0   ;;  %s2596_s13 = smov 0   ;;  %s2880_s0 = inlined_call_operand.vmem [shape: bf16[2048,256], index: 0, kind: input, shape index: {}]   ;;  %s2881_s1 = inlined_call_operand.vmem [shape: bf16[256,128], index: 1, kind: input, shape index: {}]   ;;  %s2882_s2 = inlined_call_operand.vmem [shape: f32[1,128], index: 2, kind: input, shape index: {}]   ;;  %s2883_s3 = inlined_call_operand.vmem [shape: bf16[2048,128], index: 3, kind: output, shape index: {}]  }
   0x1   :  { %s2598_s14 = smov 0  }
   0x2 LB: > { %s32_s15 = sadd.s32 1, %s2567_s13  ;;  %p1971_p0 = scmp.ge.s32.totalorder %s2571_s14, 1  ;;  %s2571_s14 = sphi %s2598_s14, %s13_s14   ;;  %s2567_s13 = sphi %s2596_s13, %s2885_s13   ;;  %s2563_s12 = sphi %s2594_s12, %s2884_s12  }
   0x3   : > { %p34_p1 = scmp.ge.s32.totalorder %s32_s15, 4  ;;  %p191_p2 = scmp.lt.s32.totalorder %s2571_s14, 5 }
   0x5   : > { %s2887_s15 = smov (%p34_p1, %s32_s15), 0  ;;  %p192_p3 = pnand %p1971_p0, %p191_p2 }
   0x6   : > { %v2437_v0 = vld [vmem:[%s2881_s1] sm:$0xff] (!%p192_p3)   ;;  %v2573_v1 = vmov (!%p192_p3), 0   ;;  %s1972_s18 = sshll.u32 (!%p192_p3), %s2563_s12, 6  ;;  %v2438_v2 = vld [vmem:[%s2881_s1 + $0x8] sm:$0xff] (!%p192_p3)   ;;  %v2439_v3 = vld [vmem:[%s2881_s1 + $0x10] sm:$0xff] (!%p192_p3)  }
   0x7   : > { %195 = sbr.rel (%p192_p3) target bundleno = 412 (0x19c), region = 32  ;;  %912 = vmatprep.subr.bf16.mxu0 (!%p192_p3), %v2573_v1  ;;  %2380 = vmatprep.subr.bf16.mxu1 (!%p192_p3), %v2573_v1  ;;  %p236_p4 = scmp.lt.s32.totalorder (!%p192_p3), %s1972_s18, 255  ;;  %v2440_v4 = vld [vmem:[%s2881_s1 + $0x18] sm:$0xff] (!%p192_p3)   ;;  %v2441_v5 = vld [vmem:[%s2881_s1 + $0x20] sm:$0xff] (!%p192_p3)   ;;  %v2442_v7 = vld [vmem:[%s2881_s1 + $0x28] sm:$0xff] (!%p192_p3)  }
   0x8   : > { %913 = vmatpush1.bf16.msra.mxu0 (!%p192_p3), %v2437_v0  ;;  %2396 = vmatpush1.bf16.msra.mxu1 (!%p192_p3), %v2437_v0  ;;  %v2443_v9 = vld [vmem:[%s2881_s1 + $0x30] sm:$0xff] (!%p192_p3)   ;;  %v2444_v10 = vld [vmem:[%s2881_s1 + $0x38] sm:$0xff] (!%p192_p3)   ;;  %v2445_v11 = vld [vmem:[%s2881_s1 + $0x40] sm:$0xff] (!%p192_p3)  }
   0x9   : > { %914 = vmatprep.subr.bf16.mxu0 (!%p192_p3), %v2573_v1  ;;  %2381 = vmatprep.subr.bf16.mxu1 (!%p192_p3), %v2573_v1  ;;  %v2446_v12 = vld [vmem:[%s2881_s1 + $0x48] sm:$0xff] (!%p192_p3)   ;;  %v2447_v13 = vld [vmem:[%s2881_s1 + $0x50] sm:$0xff] (!%p192_p3)   ;;  %v2448_v14 = vld [vmem:[%s2881_s1 + $0x58] sm:$0xff] (!%p192_p3)  }
   0xa   : > { %v2449_v15 = vld [vmem:[%s2881_s1 + $0x60] sm:$0xff] (!%p192_p3)   ;;  %v2450_v16 = vld [vmem:[%s2881_s1 + $0x68] sm:$0xff] (!%p192_p3)   ;;  %v2451_v17 = vld [vmem:[%s2881_s1 + $0x70] sm:$0xff] (!%p192_p3)  }
   0xb   : > { %v2452_v18 = vld [vmem:[%s2881_s1 + $0x78] sm:$0xff] (!%p192_p3)  }
   0xc   : > { %915 = vmatpush1.bf16.msra.mxu0 (!%p192_p3), %v2438_v2  ;;  %2397 = vmatpush1.bf16.msra.mxu1 (!%p192_p3), %v2438_v2 }
   0xd   : > { %916 = vmatprep.subr.bf16.mxu0 (!%p192_p3), %v2573_v1  ;;  %2382 = vmatprep.subr.bf16.mxu1 (!%p192_p3), %v2573_v1 }
   0xe   : > { %s2889_s18 = smov (!%p236_p4, %s1972_s18), 255 }
   0xf   : > { %s2124_s25 = sshll.u32 %s2889_s18, 3  ;;  %s1976_s6 = sshll.u32 %s2889_s18, 2 }
  0x10   : > { %917 = vmatpush1.bf16.msra.mxu0 %v2439_v3  ;;  %2398 = vmatpush1.bf16.msra.mxu1 %v2439_v3  ;;  %s2641_s30 = scalar_lea.vmem %s2880_s0, %s2124_s25  ;;  %s2777_s8 = scalar_lea.vmem %s2883_s3, %s1976_s6 }
  0x11   : > { %918 = vmatprep.subr.bf16.mxu0 %v2573_v1  ;;  %2383 = vmatprep.subr.bf16.mxu1 %v2573_v1  ;;  %v2455_v6 = vld [vmem:[%s2641_s30 + $0x4] ss:$8 sps:$4 sm:$0xff]   ;;  %v2453_v19 = vld [vmem:[%s2641_s30] ss:$8 sps:$4 sm:$0xff]   ;;  %v2459_v21 = vld [vmem:[%s2641_s30 + $0x14] ss:$8 sps:$4 sm:$0xff]  }
  0x12   : > { %v2458_v8 = vld [vmem:[%s2641_s30 + $0x104] ss:$8 sps:$4 sm:$0xff]   ;;  %944 = vmatprep.mubr.bf16.mxu0 %v2455_v6  ;;  %v2456_v20 = vld [vmem:[%s2641_s30 + $0x100] ss:$8 sps:$4 sm:$0xff]   ;;  %v2461_v22 = vld [vmem:[%s2641_s30 + $0x114] ss:$8 sps:$4 sm:$0xff]  }
  0x13   : > { %1072 = vmatprep.mubr.bf16.mxu1 %v2458_v8  ;;  %v2463_v23 = vld [vmem:[%s2641_s30 + $0x10] ss:$8 sps:$4 sm:$0xff]   ;;  %v2465_v25 = vld [vmem:[%s2641_s30 + $0x24] ss:$8 sps:$4 sm:$0xff]   ;;  %v2469_v27 = vld [vmem:[%s2641_s30 + $0x20] ss:$8 sps:$4 sm:$0xff]  }
  0x14   : > { %919 = vmatpush1.bf16.msra.mxu0 %v2440_v4  ;;  %2399 = vmatpush1.bf16.msra.mxu1 %v2440_v4  ;;  %v2464_v24 = vld [vmem:[%s2641_s30 + $0x110] ss:$8 sps:$4 sm:$0xff]   ;;  %v2467_v26 = vld [vmem:[%s2641_s30 + $0x124] ss:$8 sps:$4 sm:$0xff]   ;;  %v2470_v28 = vld [vmem:[%s2641_s30 + $0x120] ss:$8 sps:$4 sm:$0xff]  }
  0x15   : > { %920 = vmatprep.subr.bf16.mxu0 %v2573_v1  ;;  %2384 = vmatprep.subr.bf16.mxu1 %v2573_v1  ;;  %v2471_v29 = vld [vmem:[%s2641_s30 + $0x34] ss:$8 sps:$4 sm:$0xff]   ;;  %v2475_v31 = vld [vmem:[%s2641_s30 + $0x30] ss:$8 sps:$4 sm:$0xff]   ;;  %v2477_v33 = vld [vmem:[%s2641_s30 + $0x44] ss:$8 sps:$4 sm:$0xff]  }
  0x16   : > { %v2473_v30 = vld [vmem:[%s2641_s30 + $0x134] ss:$8 sps:$4 sm:$0xff]   ;;  %v2476_v32 = vld [vmem:[%s2641_s30 + $0x130] ss:$8 sps:$4 sm:$0xff]   ;;  %v2479_v34 = vld [vmem:[%s2641_s30 + $0x144] ss:$8 sps:$4 sm:$0xff]  }
  0x17   : > { %v2481_v35 = vld [vmem:[%s2641_s30 + $0x40] ss:$8 sps:$4 sm:$0xff]   ;;  %v2483_v37 = vld [vmem:[%s2641_s30 + $0x54] ss:$8 sps:$4 sm:$0xff]   ;;  %v2487_v39 = vld [vmem:[%s2641_s30 + $0x50] ss:$8 sps:$4 sm:$0xff]  }
  0x18   : > { %921 = vmatpush1.bf16.msra.mxu0 %v2441_v5  ;;  %2400 = vmatpush1.bf16.msra.mxu1 %v2441_v5  ;;  %v2482_v36 = vld [vmem:[%s2641_s30 + $0x140] ss:$8 sps:$4 sm:$0xff]   ;;  %v2485_v38 = vld [vmem:[%s2641_s30 + $0x154] ss:$8 sps:$4 sm:$0xff]   ;;  %v2488_v40 = vld [vmem:[%s2641_s30 + $0x150] ss:$8 sps:$4 sm:$0xff]  }
  0x19   : > { %922 = vmatprep.subr.bf16.mxu0 %v2573_v1  ;;  %2385 = vmatprep.subr.bf16.mxu1 %v2573_v1  ;;  %v2489_v41 = vld [vmem:[%s2641_s30 + $0x64] ss:$8 sps:$4 sm:$0xff]   ;;  %v2493_v43 = vld [vmem:[%s2641_s30 + $0x60] ss:$8 sps:$4 sm:$0xff]   ;;  %v2495_v45 = vld [vmem:[%s2641_s30 + $0x74] ss:$8 sps:$4 sm:$0xff]  }
  0x1a   : > { %v2491_v42 = vld [vmem:[%s2641_s30 + $0x164] ss:$8 sps:$4 sm:$0xff]   ;;  %v2494_v44 = vld [vmem:[%s2641_s30 + $0x160] ss:$8 sps:$4 sm:$0xff]   ;;  %v2497_v46 = vld [vmem:[%s2641_s30 + $0x174] ss:$8 sps:$4 sm:$0xff]  }
  0x1b   : > { %v2499_v47 = vld [vmem:[%s2641_s30 + $0x70] ss:$8 sps:$4 sm:$0xff]   ;;  %v2501_v49 = vld [vmem:[%s2641_s30 + $0x84] ss:$8 sps:$4 sm:$0xff]   ;;  %v2505_v51 = vld [vmem:[%s2641_s30 + $0x80] ss:$8 sps:$4 sm:$0xff]  }
  0x1c   : > { %923 = vmatpush1.bf16.msra.mxu0 %v2442_v7  ;;  %2401 = vmatpush1.bf16.msra.mxu1 %v2442_v7  ;;  %v2500_v48 = vld [vmem:[%s2641_s30 + $0x170] ss:$8 sps:$4 sm:$0xff]   ;;  %v2503_v50 = vld [vmem:[%s2641_s30 + $0x184] ss:$8 sps:$4 sm:$0xff]   ;;  %v2506_v52 = vld [vmem:[%s2641_s30 + $0x180] ss:$8 sps:$4 sm:$0xff]  }
  0x1d   : > { %924 = vmatprep.subr.bf16.mxu0 %v2573_v1  ;;  %2386 = vmatprep.subr.bf16.mxu1 %v2573_v1  ;;  %v2507_v53 = vld [vmem:[%s2641_s30 + $0x94] ss:$8 sps:$4 sm:$0xff]   ;;  %v2511_v55 = vld [vmem:[%s2641_s30 + $0x90] ss:$8 sps:$4 sm:$0xff]   ;;  %v2513_v57 = vld [vmem:[%s2641_s30 + $0xa4] ss:$8 sps:$4 sm:$0xff]  }
  0x1e   : > { %v2509_v54 = vld [vmem:[%s2641_s30 + $0x194] ss:$8 sps:$4 sm:$0xff]   ;;  %v2512_v56 = vld [vmem:[%s2641_s30 + $0x190] ss:$8 sps:$4 sm:$0xff]   ;;  %v2515_v58 = vld [vmem:[%s2641_s30 + $0x1a4] ss:$8 sps:$4 sm:$0xff]  }
  0x1f   : > { %v2517_v59 = vld [vmem:[%s2641_s30 + $0xa0] ss:$8 sps:$4 sm:$0xff]   ;;  %v2519_v61 = vld [vmem:[%s2641_s30 + $0xb4] ss:$8 sps:$4 sm:$0xff]   ;;  %v2523_v63 = vld [vmem:[%s2641_s30 + $0xb0] ss:$8 sps:$4 sm:$0xff]  }
  0x20   : > { %925 = vmatpush1.bf16.msra.mxu0 %v2443_v9  ;;  %2402 = vmatpush1.bf16.msra.mxu1 %v2443_v9  ;;  %v2518_v60 = vld [vmem:[%s2641_s30 + $0x1a0] ss:$8 sps:$4 sm:$0xff]   ;;  %v2521_v62 = vld [vmem:[%s2641_s30 + $0x1b4] ss:$8 sps:$4 sm:$0xff]   ;;  %v2524_v0 = vld [vmem:[%s2641_s30 + $0x1b0] ss:$8 sps:$4 sm:$0xff]  }
  0x21   : > { %926 = vmatprep.subr.bf16.mxu0 %v2573_v1  ;;  %2387 = vmatprep.subr.bf16.mxu1 %v2573_v1  ;;  %v2527_v2 = vld [vmem:[%s2641_s30 + $0x1c4] ss:$8 sps:$4 sm:$0xff]   ;;  %v2529_v3 = vld [vmem:[%s2641_s30 + $0xc0] ss:$8 sps:$4 sm:$0xff]   ;;  %v2531_v5 = vld [vmem:[%s2641_s30 + $0xd4] ss:$8 sps:$4 sm:$0xff]  }
  0x22   : > { %v2530_v4 = vld [vmem:[%s2641_s30 + $0x1c0] ss:$8 sps:$4 sm:$0xff]   ;;  %v2533_v6 = vld [vmem:[%s2641_s30 + $0x1d4] ss:$8 sps:$4 sm:$0xff]   ;;  %v2535_v7 = vld [vmem:[%s2641_s30 + $0xd0] ss:$8 sps:$4 sm:$0xff]  }
  0x23   : > { %v2536_v8 = vld [vmem:[%s2641_s30 + $0x1d0] ss:$8 sps:$4 sm:$0xff]   ;;  %v2537_v9 = vld [vmem:[%s2641_s30 + $0xe4] ss:$8 sps:$4 sm:$0xff]  }
  0x24   : > { %927 = vmatpush1.bf16.msra.mxu0 %v2444_v10  ;;  %2403 = vmatpush1.bf16.msra.mxu1 %v2444_v10  ;;  %v2539_v10 = vld [vmem:[%s2641_s30 + $0x1e4] ss:$8 sps:$4 sm:$0xff]  }
  0x25   : > { %928 = vmatprep.subr.bf16.mxu0 %v2573_v1  ;;  %2388 = vmatprep.subr.bf16.mxu1 %v2573_v1 }
  0x28   : > { %929 = vmatpush1.bf16.msra.mxu0 %v2445_v11  ;;  %2404 = vmatpush1.bf16.msra.mxu1 %v2445_v11  ;;  %v2541_v11 = vld [vmem:[%s2641_s30 + $0xe0] ss:$8 sps:$4 sm:$0xff]  }
  0x29   : > { %930 = vmatprep.subr.bf16.mxu0 %v2573_v1  ;;  %2389 = vmatprep.subr.bf16.mxu1 %v2573_v1 }
  0x2c   : > { %931 = vmatpush1.bf16.msra.mxu0 %v2446_v12  ;;  %2405 = vmatpush1.bf16.msra.mxu1 %v2446_v12  ;;  %v2542_v12 = vld [vmem:[%s2641_s30 + $0x1e0] ss:$8 sps:$4 sm:$0xff]  }
  0x2d   : > { %932 = vmatprep.subr.bf16.mxu0 %v2573_v1  ;;  %2390 = vmatprep.subr.bf16.mxu1 %v2573_v1 }
  0x30   : > { %933 = vmatpush1.bf16.msra.mxu0 %v2447_v13  ;;  %2406 = vmatpush1.bf16.msra.mxu1 %v2447_v13  ;;  %v2543_v13 = vld [vmem:[%s2641_s30 + $0xf4] ss:$8 sps:$4 sm:$0xff]  }
  0x31   : > { %934 = vmatprep.subr.bf16.mxu0 %v2573_v1  ;;  %2391 = vmatprep.subr.bf16.mxu1 %v2573_v1 }
  0x34   : > { %935 = vmatpush1.bf16.msra.mxu0 %v2448_v14  ;;  %2407 = vmatpush1.bf16.msra.mxu1 %v2448_v14  ;;  %v2545_v14 = vld [vmem:[%s2641_s30 + $0x1f4] ss:$8 sps:$4 sm:$0xff]  }
  0x35   : > { %936 = vmatprep.subr.bf16.mxu0 %v2573_v1  ;;  %2392 = vmatprep.subr.bf16.mxu1 %v2573_v1 }
  0x38   : > { %937 = vmatpush1.bf16.msra.mxu0 %v2449_v15  ;;  %2408 = vmatpush1.bf16.msra.mxu1 %v2449_v15  ;;  %v2547_v15 = vld [vmem:[%s2641_s30 + $0xf0] ss:$8 sps:$4 sm:$0xff]  }
  0x39   : > { %938 = vmatprep.subr.bf16.mxu0 %v2573_v1  ;;  %2393 = vmatprep.subr.bf16.mxu1 %v2573_v1 }
  0x3c   : > { %939 = vmatpush1.bf16.msra.mxu0 %v2450_v16  ;;  %2409 = vmatpush1.bf16.msra.mxu1 %v2450_v16  ;;  %v2548_v16 = vld [vmem:[%s2641_s30 + $0x1f0] ss:$8 sps:$4 sm:$0xff]  }
  0x3d   : > { %940 = vmatprep.subr.bf16.mxu0 %v2573_v1  ;;  %2394 = vmatprep.subr.bf16.mxu1 %v2573_v1 }
  0x40   : > { %941 = vmatpush1.bf16.msra.mxu0 %v2451_v17  ;;  %2410 = vmatpush1.bf16.msra.mxu1 %v2451_v17  ;;  %v2767_v17 = vld [vmem:[%s2882_s2] ss:$0 sm:$0xff] }
  0x41   : > { %942 = vmatprep.subr.bf16.mxu0 %v2573_v1  ;;  %2395 = vmatprep.subr.bf16.mxu1 %v2573_v1  ;;  %v2525_v1 = vld [vmem:[%s2641_s30 + $0xc4] ss:$8 sps:$4 sm:$0xff]  }
  0x44   : > { %943 = vmatpush1.bf16.msra.mxu0 %v2452_v18  ;;  %2411 = vmatpush1.bf16.msra.mxu1 %v2452_v18 }
  0x47   : > { %945 = vmatmul.mubr.bf16.vlgmr.msra.gmra.mrb[0].mxu0 %v2453_v19  ;;  %1073 = vmatmul.mubr.bf16.vlgmr.msra.gmra.mrb[0].mxu1 %v2456_v20 }
  0x48   : > { %952 = vmatprep.mubr.bf16.mxu0 %v2459_v21  ;;  %1080 = vmatprep.mubr.bf16.mxu1 %v2461_v22 }
  0x4f   : > { %953 = vmatmul.mubr.bf16.gmra.mrb[4].mxu0 %v2463_v23  ;;  %1081 = vmatmul.mubr.bf16.gmra.mrb[4].mxu1 %v2464_v24 }
  0x50   : > { %960 = vmatprep.mubr.bf16.mxu0 %v2465_v25  ;;  %1088 = vmatprep.mubr.bf16.mxu1 %v2467_v26 }
  0x57   : > { %961 = vmatmul.mubr.bf16.gmra.mrb[8].mxu0 %v2469_v27  ;;  %1089 = vmatmul.mubr.bf16.gmra.mrb[8].mxu1 %v2470_v28 }
  0x58   : > { %968 = vmatprep.mubr.bf16.mxu0 %v2471_v29  ;;  %1096 = vmatprep.mubr.bf16.mxu1 %v2473_v30 }
  0x5f   : > { %969 = vmatmul.mubr.bf16.gmra.mrb[12].mxu0 %v2475_v31  ;;  %1097 = vmatmul.mubr.bf16.gmra.mrb[12].mxu1 %v2476_v32 }
  0x60   : > { %976 = vmatprep.mubr.bf16.mxu0 %v2477_v33  ;;  %1104 = vmatprep.mubr.bf16.mxu1 %v2479_v34 }
  0x67   : > { %977 = vmatmul.mubr.bf16.gmra.mrb[16].mxu0 %v2481_v35  ;;  %1105 = vmatmul.mubr.bf16.gmra.mrb[16].mxu1 %v2482_v36 }
  0x68   : > { %984 = vmatprep.mubr.bf16.mxu0 %v2483_v37  ;;  %1112 = vmatprep.mubr.bf16.mxu1 %v2485_v38 }
  0x6f   : > { %985 = vmatmul.mubr.bf16.gmra.mrb[20].mxu0 %v2487_v39  ;;  %1113 = vmatmul.mubr.bf16.gmra.mrb[20].mxu1 %v2488_v40 }
  0x70   : > { %992 = vmatprep.mubr.bf16.mxu0 %v2489_v41  ;;  %1120 = vmatprep.mubr.bf16.mxu1 %v2491_v42 }
  0x77   : > { %993 = vmatmul.mubr.bf16.gmra.mrb[24].mxu0 %v2493_v43  ;;  %1121 = vmatmul.mubr.bf16.gmra.mrb[24].mxu1 %v2494_v44 }
  0x78   : > { %1000 = vmatprep.mubr.bf16.mxu0 %v2495_v45  ;;  %1128 = vmatprep.mubr.bf16.mxu1 %v2497_v46 }
  0x7f   : > { %1001 = vmatmul.mubr.bf16.gmra.mrb[28].mxu0 %v2499_v47  ;;  %1129 = vmatmul.mubr.bf16.gmra.mrb[28].mxu1 %v2500_v48 }
  0x80   : > { %1008 = vmatprep.mubr.bf16.mxu0 %v2501_v49  ;;  %1136 = vmatprep.mubr.bf16.mxu1 %v2503_v50 }
  0x87   : > { %1009 = vmatmul.mubr.bf16.gmra.mrb[32].mxu0 %v2505_v51  ;;  %1137 = vmatmul.mubr.bf16.gmra.mrb[32].mxu1 %v2506_v52 }
  0x88   : > { %1016 = vmatprep.mubr.bf16.mxu0 %v2507_v53  ;;  %1144 = vmatprep.mubr.bf16.mxu1 %v2509_v54 }
  0x8f   : > { %1017 = vmatmul.mubr.bf16.gmra.mrb[36].mxu0 %v2511_v55  ;;  %1145 = vmatmul.mubr.bf16.gmra.mrb[36].mxu1 %v2512_v56 }
  0x90   : > { %1024 = vmatprep.mubr.bf16.mxu0 %v2513_v57  ;;  %1152 = vmatprep.mubr.bf16.mxu1 %v2515_v58 }
  0x97   : > { %1025 = vmatmul.mubr.bf16.gmra.mrb[40].mxu0 %v2517_v59  ;;  %1153 = vmatmul.mubr.bf16.gmra.mrb[40].mxu1 %v2518_v60 }
  0x98   : > { %1032 = vmatprep.mubr.bf16.mxu0 %v2519_v61  ;;  %1160 = vmatprep.mubr.bf16.mxu1 %v2521_v62 }
  0x9f   : > { %1033 = vmatmul.mubr.bf16.gmra.mrb[44].mxu0 %v2523_v63  ;;  %1161 = vmatmul.mubr.bf16.gmra.mrb[44].mxu1 %v2524_v0 }
  0xa0   : > { %1040 = vmatprep.mubr.bf16.mxu0 %v2525_v1  ;;  %1168 = vmatprep.mubr.bf16.mxu1 %v2527_v2 }
  0xa7   : > { %1041 = vmatmul.mubr.bf16.gmra.mrb[48].mxu0 %v2529_v3  ;;  %1169 = vmatmul.mubr.bf16.gmra.mrb[48].mxu1 %v2530_v4 }
  0xa8   : > { %1048 = vmatprep.mubr.bf16.mxu0 %v2531_v5  ;;  %1176 = vmatprep.mubr.bf16.mxu1 %v2533_v6 }
  0xaf   : > { %1049 = vmatmul.mubr.bf16.gmra.mrb[52].mxu0 %v2535_v7  ;;  %1177 = vmatmul.mubr.bf16.gmra.mrb[52].mxu1 %v2536_v8 }
  0xb0   : > { %1056 = vmatprep.mubr.bf16.mxu0 %v2537_v9  ;;  %1184 = vmatprep.mubr.bf16.mxu1 %v2539_v10 }
  0xb7   : > { %1057 = vmatmul.mubr.bf16.gmra.mrb[56].mxu0 %v2541_v11  ;;  %1185 = vmatmul.mubr.bf16.gmra.mrb[56].mxu1 %v2542_v12 }
  0xb8   : > { %1064 = vmatprep.mubr.bf16.mxu0 %v2543_v13  ;;  %1192 = vmatprep.mubr.bf16.mxu1 %v2545_v14 }
  0xbf   : > { %1065 = vmatmul.mubr.bf16.gmra.mrb[60].mxu0 %v2547_v15  ;;  %1193 = vmatmul.mubr.bf16.gmra.mrb[60].mxu1 %v2548_v16 }
 0x11a   : > { %v946_v18 = vpop.f32.mrb[0].mxu0  ;;  %v1074_v19 = vpop.f32.mrb[0].mxu1 }
 0x11b   : > { %v1403_v20 = vadd.f32 %v2767_v17, %v946_v18  ;;  %v1435_v21 = vadd.f32 %v2767_v17, %v1074_v19  ;;  %v948_v22 = vpop.f32.mrb[1].mxu0  ;;  %v1076_v23 = vpop.f32.mrb[1].mxu1 }
 0x11c   : > { %v949_v24 = vpop.f32.mrb[2].mxu0  ;;  %v1077_v25 = vpop.f32.mrb[2].mxu1 }
 0x11d   : > { %v1404_v26 = vadd.f32 %v2767_v17, %v949_v24  ;;  %v1436_v27 = vadd.f32 %v2767_v17, %v1077_v25  ;;  %v951_v28 = vpop.f32.mrb[3].mxu0  ;;  %v1079_v29 = vpop.f32.mrb[3].mxu1  ;;  %v1467_v30 = vmax.f32 %v1403_v20, 0.0  ;;  %v1499_v31 = vmax.f32 %v1435_v21, 0.0 }
 0x11f   : > { %v1468_v32 = vmax.f32 %v1404_v26, 0.0  ;;  %v1500_v33 = vmax.f32 %v1436_v27, 0.0 }
 0x121   : > { %v2192_v34 = vpack.c.bf16 %v1468_v32, %v1467_v30  ;;  %v2272_v35 = vpack.c.bf16 %v1500_v33, %v1499_v31 }
 0x122   : > { %v954_v36 = vpop.f32.mrb[4].mxu0  ;;  %v1082_v37 = vpop.f32.mrb[4].mxu1 }
 0x123   : > { %2193 = vst [vmem:[%s2777_s8] sm:$0xff] %v2192_v34   ;;  %2364 = vst [vmem:[%s2777_s8 + $0x80] sm:$0xff] %v2272_v35   ;;  %v1405_v38 = vadd.f32 %v2767_v17, %v954_v36  ;;  %v1437_v39 = vadd.f32 %v2767_v17, %v1082_v37  ;;  %v956_v40 = vpop.f32.mrb[5].mxu0  ;;  %v1084_v41 = vpop.f32.mrb[5].mxu1 }
 0x124   : > { %v957_v42 = vpop.f32.mrb[6].mxu0  ;;  %v1085_v43 = vpop.f32.mrb[6].mxu1 }
 0x125   : > { %v1406_v44 = vadd.f32 %v2767_v17, %v957_v42  ;;  %v1438_v45 = vadd.f32 %v2767_v17, %v1085_v43  ;;  %v959_v46 = vpop.f32.mrb[7].mxu0  ;;  %v1087_v47 = vpop.f32.mrb[7].mxu1  ;;  %v1469_v48 = vmax.f32 %v1405_v38, 0.0  ;;  %v1501_v49 = vmax.f32 %v1437_v39, 0.0 }
 0x127   : > { %v1470_v50 = vmax.f32 %v1406_v44, 0.0  ;;  %v1502_v51 = vmax.f32 %v1438_v45, 0.0 }
 0x129   : > { %v2197_v52 = vpack.c.bf16 %v1470_v50, %v1469_v48  ;;  %v2277_v53 = vpack.c.bf16 %v1502_v51, %v1501_v49 }
 0x12a   : > { %v962_v54 = vpop.f32.mrb[8].mxu0  ;;  %v1090_v55 = vpop.f32.mrb[8].mxu1 }
 0x12b   : > { %2349 = vst [vmem:[%s2777_s8 + $0x8] sm:$0xff] %v2197_v52   ;;  %2365 = vst [vmem:[%s2777_s8 + $0x88] sm:$0xff] %v2277_v53   ;;  %v1407_v56 = vadd.f32 %v2767_v17, %v962_v54  ;;  %v1439_v57 = vadd.f32 %v2767_v17, %v1090_v55  ;;  %v964_v58 = vpop.f32.mrb[9].mxu0  ;;  %v1092_v59 = vpop.f32.mrb[9].mxu1 }
 0x12c   : > { %v965_v60 = vpop.f32.mrb[10].mxu0  ;;  %v1093_v61 = vpop.f32.mrb[10].mxu1 }
 0x12d   : > { %v1408_v62 = vadd.f32 %v2767_v17, %v965_v60  ;;  %v1440_v63 = vadd.f32 %v2767_v17, %v1093_v61  ;;  %v967_v0 = vpop.f32.mrb[11].mxu0  ;;  %v1095_v1 = vpop.f32.mrb[11].mxu1  ;;  %v1471_v2 = vmax.f32 %v1407_v56, 0.0  ;;  %v1503_v3 = vmax.f32 %v1439_v57, 0.0 }
 0x12f   : > { %v1472_v4 = vmax.f32 %v1408_v62, 0.0  ;;  %v1504_v5 = vmax.f32 %v1440_v63, 0.0 }
 0x131   : > { %v2202_v6 = vpack.c.bf16 %v1472_v4, %v1471_v2  ;;  %v2282_v7 = vpack.c.bf16 %v1504_v5, %v1503_v3 }
 0x132   : > { %v970_v8 = vpop.f32.mrb[12].mxu0  ;;  %v1098_v9 = vpop.f32.mrb[12].mxu1 }
 0x133   : > { %2350 = vst [vmem:[%s2777_s8 + $0x10] sm:$0xff] %v2202_v6   ;;  %2366 = vst [vmem:[%s2777_s8 + $0x90] sm:$0xff] %v2282_v7   ;;  %v1409_v10 = vadd.f32 %v2767_v17, %v970_v8  ;;  %v1441_v11 = vadd.f32 %v2767_v17, %v1098_v9  ;;  %v972_v12 = vpop.f32.mrb[13].mxu0  ;;  %v1100_v13 = vpop.f32.mrb[13].mxu1 }
 0x134   : > { %v973_v14 = vpop.f32.mrb[14].mxu0  ;;  %v1101_v15 = vpop.f32.mrb[14].mxu1 }
 0x135   : > { %v1410_v16 = vadd.f32 %v2767_v17, %v973_v14  ;;  %v1442_v18 = vadd.f32 %v2767_v17, %v1101_v15  ;;  %v975_v19 = vpop.f32.mrb[15].mxu0  ;;  %v1103_v20 = vpop.f32.mrb[15].mxu1  ;;  %v1473_v21 = vmax.f32 %v1409_v10, 0.0  ;;  %v1505_v22 = vmax.f32 %v1441_v11, 0.0 }
 0x137   : > { %v1474_v23 = vmax.f32 %v1410_v16, 0.0  ;;  %v1506_v24 = vmax.f32 %v1442_v18, 0.0 }
 0x139   : > { %v2207_v25 = vpack.c.bf16 %v1474_v23, %v1473_v21  ;;  %v2287_v26 = vpack.c.bf16 %v1506_v24, %v1505_v22 }
 0x13a   : > { %v978_v27 = vpop.f32.mrb[16].mxu0  ;;  %v1106_v28 = vpop.f32.mrb[16].mxu1 }
 0x13b   : > { %2351 = vst [vmem:[%s2777_s8 + $0x18] sm:$0xff] %v2207_v25   ;;  %2367 = vst [vmem:[%s2777_s8 + $0x98] sm:$0xff] %v2287_v26   ;;  %v1411_v29 = vadd.f32 %v2767_v17, %v978_v27  ;;  %v1443_v30 = vadd.f32 %v2767_v17, %v1106_v28  ;;  %v980_v31 = vpop.f32.mrb[17].mxu0  ;;  %v1108_v32 = vpop.f32.mrb[17].mxu1 }
 0x13c   : > { %v981_v33 = vpop.f32.mrb[18].mxu0  ;;  %v1109_v34 = vpop.f32.mrb[18].mxu1 }
 0x13d   : > { %v1412_v35 = vadd.f32 %v2767_v17, %v981_v33  ;;  %v1444_v36 = vadd.f32 %v2767_v17, %v1109_v34  ;;  %v983_v37 = vpop.f32.mrb[19].mxu0  ;;  %v1111_v38 = vpop.f32.mrb[19].mxu1  ;;  %v1475_v39 = vmax.f32 %v1411_v29, 0.0  ;;  %v1507_v40 = vmax.f32 %v1443_v30, 0.0 }
 0x13f   : > { %v1476_v41 = vmax.f32 %v1412_v35, 0.0  ;;  %v1508_v42 = vmax.f32 %v1444_v36, 0.0 }
 0x141   : > { %v2212_v43 = vpack.c.bf16 %v1476_v41, %v1475_v39  ;;  %v2292_v44 = vpack.c.bf16 %v1508_v42, %v1507_v40 }
 0x142   : > { %v986_v45 = vpop.f32.mrb[20].mxu0  ;;  %v1114_v46 = vpop.f32.mrb[20].mxu1 }
 0x143   : > { %2352 = vst [vmem:[%s2777_s8 + $0x20] sm:$0xff] %v2212_v43   ;;  %2368 = vst [vmem:[%s2777_s8 + $0xa0] sm:$0xff] %v2292_v44   ;;  %v1413_v47 = vadd.f32 %v2767_v17, %v986_v45  ;;  %v1445_v48 = vadd.f32 %v2767_v17, %v1114_v46  ;;  %v988_v49 = vpop.f32.mrb[21].mxu0  ;;  %v1116_v50 = vpop.f32.mrb[21].mxu1 }
 0x144   : > { %v989_v51 = vpop.f32.mrb[22].mxu0  ;;  %v1117_v52 = vpop.f32.mrb[22].mxu1 }
 0x145   : > { %v1414_v53 = vadd.f32 %v2767_v17, %v989_v51  ;;  %v1446_v54 = vadd.f32 %v2767_v17, %v1117_v52  ;;  %v991_v55 = vpop.f32.mrb[23].mxu0  ;;  %v1119_v56 = vpop.f32.mrb[23].mxu1  ;;  %v1477_v57 = vmax.f32 %v1413_v47, 0.0  ;;  %v1509_v58 = vmax.f32 %v1445_v48, 0.0 }
 0x147   : > { %v1478_v59 = vmax.f32 %v1414_v53, 0.0  ;;  %v1510_v60 = vmax.f32 %v1446_v54, 0.0 }
 0x149   : > { %v2217_v61 = vpack.c.bf16 %v1478_v59, %v1477_v57  ;;  %v2297_v62 = vpack.c.bf16 %v1510_v60, %v1509_v58 }
 0x14a   : > { %v994_v63 = vpop.f32.mrb[24].mxu0  ;;  %v1122_v0 = vpop.f32.mrb[24].mxu1 }
 0x14b   : > { %2353 = vst [vmem:[%s2777_s8 + $0x28] sm:$0xff] %v2217_v61   ;;  %2369 = vst [vmem:[%s2777_s8 + $0xa8] sm:$0xff] %v2297_v62   ;;  %v1415_v1 = vadd.f32 %v2767_v17, %v994_v63  ;;  %v1447_v2 = vadd.f32 %v2767_v17, %v1122_v0  ;;  %v996_v3 = vpop.f32.mrb[25].mxu0  ;;  %v1124_v4 = vpop.f32.mrb[25].mxu1 }
 0x14c   : > { %v997_v5 = vpop.f32.mrb[26].mxu0  ;;  %v1125_v6 = vpop.f32.mrb[26].mxu1 }
 0x14d   : > { %v1416_v7 = vadd.f32 %v2767_v17, %v997_v5  ;;  %v1448_v8 = vadd.f32 %v2767_v17, %v1125_v6  ;;  %v999_v9 = vpop.f32.mrb[27].mxu0  ;;  %v1127_v10 = vpop.f32.mrb[27].mxu1  ;;  %v1479_v11 = vmax.f32 %v1415_v1, 0.0  ;;  %v1511_v12 = vmax.f32 %v1447_v2, 0.0 }
 0x14f   : > { %v1480_v13 = vmax.f32 %v1416_v7, 0.0  ;;  %v1512_v14 = vmax.f32 %v1448_v8, 0.0 }
 0x151   : > { %v2222_v15 = vpack.c.bf16 %v1480_v13, %v1479_v11  ;;  %v2302_v16 = vpack.c.bf16 %v1512_v14, %v1511_v12 }
 0x152   : > { %v1002_v18 = vpop.f32.mrb[28].mxu0  ;;  %v1130_v19 = vpop.f32.mrb[28].mxu1 }
 0x153   : > { %2354 = vst [vmem:[%s2777_s8 + $0x30] sm:$0xff] %v2222_v15   ;;  %2370 = vst [vmem:[%s2777_s8 + $0xb0] sm:$0xff] %v2302_v16   ;;  %v1417_v20 = vadd.f32 %v2767_v17, %v1002_v18  ;;  %v1449_v21 = vadd.f32 %v2767_v17, %v1130_v19  ;;  %v1004_v22 = vpop.f32.mrb[29].mxu0  ;;  %v1132_v23 = vpop.f32.mrb[29].mxu1 }
 0x154   : > { %v1005_v24 = vpop.f32.mrb[30].mxu0  ;;  %v1133_v25 = vpop.f32.mrb[30].mxu1 }
 0x155   : > { %v1418_v26 = vadd.f32 %v2767_v17, %v1005_v24  ;;  %v1450_v27 = vadd.f32 %v2767_v17, %v1133_v25  ;;  %v1007_v28 = vpop.f32.mrb[31].mxu0  ;;  %v1135_v29 = vpop.f32.mrb[31].mxu1  ;;  %v1481_v30 = vmax.f32 %v1417_v20, 0.0  ;;  %v1513_v31 = vmax.f32 %v1449_v21, 0.0 }
 0x157   : > { %v1482_v32 = vmax.f32 %v1418_v26, 0.0  ;;  %v1514_v33 = vmax.f32 %v1450_v27, 0.0 }
 0x159   : > { %v2227_v34 = vpack.c.bf16 %v1482_v32, %v1481_v30  ;;  %v2307_v35 = vpack.c.bf16 %v1514_v33, %v1513_v31 }
 0x15a   : > { %v1010_v36 = vpop.f32.mrb[32].mxu0  ;;  %v1138_v37 = vpop.f32.mrb[32].mxu1 }
 0x15b   : > { %2355 = vst [vmem:[%s2777_s8 + $0x38] sm:$0xff] %v2227_v34   ;;  %2371 = vst [vmem:[%s2777_s8 + $0xb8] sm:$0xff] %v2307_v35   ;;  %v1419_v38 = vadd.f32 %v2767_v17, %v1010_v36  ;;  %v1451_v39 = vadd.f32 %v2767_v17, %v1138_v37  ;;  %v1012_v40 = vpop.f32.mrb[33].mxu0  ;;  %v1140_v41 = vpop.f32.mrb[33].mxu1 }
 0x15c   : > { %v1013_v42 = vpop.f32.mrb[34].mxu0  ;;  %v1141_v43 = vpop.f32.mrb[34].mxu1 }
 0x15d   : > { %v1420_v44 = vadd.f32 %v2767_v17, %v1013_v42  ;;  %v1452_v45 = vadd.f32 %v2767_v17, %v1141_v43  ;;  %v1015_v46 = vpop.f32.mrb[35].mxu0  ;;  %v1143_v47 = vpop.f32.mrb[35].mxu1  ;;  %v1483_v48 = vmax.f32 %v1419_v38, 0.0  ;;  %v1515_v49 = vmax.f32 %v1451_v39, 0.0 }
 0x15f   : > { %v1484_v50 = vmax.f32 %v1420_v44, 0.0  ;;  %v1516_v51 = vmax.f32 %v1452_v45, 0.0 }
 0x161   : > { %v2232_v52 = vpack.c.bf16 %v1484_v50, %v1483_v48  ;;  %v2312_v53 = vpack.c.bf16 %v1516_v51, %v1515_v49 }
 0x162   : > { %v1018_v54 = vpop.f32.mrb[36].mxu0  ;;  %v1146_v55 = vpop.f32.mrb[36].mxu1 }
 0x163   : > { %2356 = vst [vmem:[%s2777_s8 + $0x40] sm:$0xff] %v2232_v52   ;;  %2372 = vst [vmem:[%s2777_s8 + $0xc0] sm:$0xff] %v2312_v53   ;;  %v1421_v56 = vadd.f32 %v2767_v17, %v1018_v54  ;;  %v1453_v57 = vadd.f32 %v2767_v17, %v1146_v55  ;;  %v1020_v58 = vpop.f32.mrb[37].mxu0  ;;  %v1148_v59 = vpop.f32.mrb[37].mxu1 }
 0x164   : > { %v1021_v60 = vpop.f32.mrb[38].mxu0  ;;  %v1149_v61 = vpop.f32.mrb[38].mxu1 }
 0x165   : > { %v1422_v62 = vadd.f32 %v2767_v17, %v1021_v60  ;;  %v1454_v63 = vadd.f32 %v2767_v17, %v1149_v61  ;;  %v1023_v0 = vpop.f32.mrb[39].mxu0  ;;  %v1151_v1 = vpop.f32.mrb[39].mxu1  ;;  %v1485_v2 = vmax.f32 %v1421_v56, 0.0  ;;  %v1517_v3 = vmax.f32 %v1453_v57, 0.0 }
 0x167   : > { %v1486_v4 = vmax.f32 %v1422_v62, 0.0  ;;  %v1518_v5 = vmax.f32 %v1454_v63, 0.0 }
 0x169   : > { %v2237_v6 = vpack.c.bf16 %v1486_v4, %v1485_v2  ;;  %v2317_v7 = vpack.c.bf16 %v1518_v5, %v1517_v3 }
 0x16a   : > { %v1026_v8 = vpop.f32.mrb[40].mxu0  ;;  %v1154_v9 = vpop.f32.mrb[40].mxu1 }
 0x16b   : > { %2357 = vst [vmem:[%s2777_s8 + $0x48] sm:$0xff] %v2237_v6   ;;  %2373 = vst [vmem:[%s2777_s8 + $0xc8] sm:$0xff] %v2317_v7   ;;  %v1423_v10 = vadd.f32 %v2767_v17, %v1026_v8  ;;  %v1455_v11 = vadd.f32 %v2767_v17, %v1154_v9  ;;  %v1028_v12 = vpop.f32.mrb[41].mxu0  ;;  %v1156_v13 = vpop.f32.mrb[41].mxu1 }
 0x16c   : > { %v1029_v14 = vpop.f32.mrb[42].mxu0  ;;  %v1157_v15 = vpop.f32.mrb[42].mxu1 }
 0x16d   : > { %v1424_v16 = vadd.f32 %v2767_v17, %v1029_v14  ;;  %v1456_v18 = vadd.f32 %v2767_v17, %v1157_v15  ;;  %v1031_v19 = vpop.f32.mrb[43].mxu0  ;;  %v1159_v20 = vpop.f32.mrb[43].mxu1  ;;  %v1487_v21 = vmax.f32 %v1423_v10, 0.0  ;;  %v1519_v22 = vmax.f32 %v1455_v11, 0.0 }
 0x16f   : > { %v1488_v23 = vmax.f32 %v1424_v16, 0.0  ;;  %v1520_v24 = vmax.f32 %v1456_v18, 0.0 }
 0x171   : > { %v2242_v25 = vpack.c.bf16 %v1488_v23, %v1487_v21  ;;  %v2322_v26 = vpack.c.bf16 %v1520_v24, %v1519_v22 }
 0x172   : > { %v1034_v27 = vpop.f32.mrb[44].mxu0  ;;  %v1162_v28 = vpop.f32.mrb[44].mxu1 }
 0x173   : > { %2358 = vst [vmem:[%s2777_s8 + $0x50] sm:$0xff] %v2242_v25   ;;  %2374 = vst [vmem:[%s2777_s8 + $0xd0] sm:$0xff] %v2322_v26   ;;  %v1425_v29 = vadd.f32 %v2767_v17, %v1034_v27  ;;  %v1457_v30 = vadd.f32 %v2767_v17, %v1162_v28  ;;  %v1036_v31 = vpop.f32.mrb[45].mxu0  ;;  %v1164_v32 = vpop.f32.mrb[45].mxu1 }
 0x174   : > { %v1037_v33 = vpop.f32.mrb[46].mxu0  ;;  %v1165_v34 = vpop.f32.mrb[46].mxu1 }
 0x175   : > { %v1426_v35 = vadd.f32 %v2767_v17, %v1037_v33  ;;  %v1458_v36 = vadd.f32 %v2767_v17, %v1165_v34  ;;  %v1039_v37 = vpop.f32.mrb[47].mxu0  ;;  %v1167_v38 = vpop.f32.mrb[47].mxu1  ;;  %v1489_v39 = vmax.f32 %v1425_v29, 0.0  ;;  %v1521_v40 = vmax.f32 %v1457_v30, 0.0 }
 0x177   : > { %v1490_v41 = vmax.f32 %v1426_v35, 0.0  ;;  %v1522_v42 = vmax.f32 %v1458_v36, 0.0 }
 0x179   : > { %v2247_v43 = vpack.c.bf16 %v1490_v41, %v1489_v39  ;;  %v2327_v44 = vpack.c.bf16 %v1522_v42, %v1521_v40 }
 0x17a   : > { %v1042_v45 = vpop.f32.mrb[48].mxu0  ;;  %v1170_v46 = vpop.f32.mrb[48].mxu1 }
 0x17b   : > { %2359 = vst [vmem:[%s2777_s8 + $0x58] sm:$0xff] %v2247_v43   ;;  %2375 = vst [vmem:[%s2777_s8 + $0xd8] sm:$0xff] %v2327_v44   ;;  %v1427_v47 = vadd.f32 %v2767_v17, %v1042_v45  ;;  %v1459_v48 = vadd.f32 %v2767_v17, %v1170_v46  ;;  %v1044_v49 = vpop.f32.mrb[49].mxu0  ;;  %v1172_v50 = vpop.f32.mrb[49].mxu1 }
 0x17c   : > { %v1045_v51 = vpop.f32.mrb[50].mxu0  ;;  %v1173_v52 = vpop.f32.mrb[50].mxu1 }
 0x17d   : > { %v1428_v53 = vadd.f32 %v2767_v17, %v1045_v51  ;;  %v1460_v54 = vadd.f32 %v2767_v17, %v1173_v52  ;;  %v1047_v55 = vpop.f32.mrb[51].mxu0  ;;  %v1175_v56 = vpop.f32.mrb[51].mxu1  ;;  %v1491_v57 = vmax.f32 %v1427_v47, 0.0  ;;  %v1523_v58 = vmax.f32 %v1459_v48, 0.0 }
 0x17f   : > { %v1492_v59 = vmax.f32 %v1428_v53, 0.0  ;;  %v1524_v60 = vmax.f32 %v1460_v54, 0.0 }
 0x181   : > { %v2252_v61 = vpack.c.bf16 %v1492_v59, %v1491_v57  ;;  %v2332_v62 = vpack.c.bf16 %v1524_v60, %v1523_v58 }
 0x182   : > { %v1050_v63 = vpop.f32.mrb[52].mxu0  ;;  %v1178_v0 = vpop.f32.mrb[52].mxu1 }
 0x183   : > { %2360 = vst [vmem:[%s2777_s8 + $0x60] sm:$0xff] %v2252_v61   ;;  %2376 = vst [vmem:[%s2777_s8 + $0xe0] sm:$0xff] %v2332_v62   ;;  %v1429_v1 = vadd.f32 %v2767_v17, %v1050_v63  ;;  %v1461_v2 = vadd.f32 %v2767_v17, %v1178_v0  ;;  %v1052_v3 = vpop.f32.mrb[53].mxu0  ;;  %v1180_v4 = vpop.f32.mrb[53].mxu1 }
 0x184   : > { %v1053_v5 = vpop.f32.mrb[54].mxu0  ;;  %v1181_v6 = vpop.f32.mrb[54].mxu1 }
 0x185   : > { %v1430_v7 = vadd.f32 %v2767_v17, %v1053_v5  ;;  %v1462_v8 = vadd.f32 %v2767_v17, %v1181_v6  ;;  %v1055_v9 = vpop.f32.mrb[55].mxu0  ;;  %v1183_v10 = vpop.f32.mrb[55].mxu1  ;;  %v1493_v11 = vmax.f32 %v1429_v1, 0.0  ;;  %v1525_v12 = vmax.f32 %v1461_v2, 0.0 }
 0x187   : > { %v1494_v13 = vmax.f32 %v1430_v7, 0.0  ;;  %v1526_v14 = vmax.f32 %v1462_v8, 0.0 }
 0x189   : > { %v2257_v15 = vpack.c.bf16 %v1494_v13, %v1493_v11  ;;  %v2337_v16 = vpack.c.bf16 %v1526_v14, %v1525_v12 }
 0x18a   : > { %v1058_v18 = vpop.f32.mrb[56].mxu0  ;;  %v1186_v19 = vpop.f32.mrb[56].mxu1 }
 0x18b   : > { %2361 = vst [vmem:[%s2777_s8 + $0x68] sm:$0xff] %v2257_v15   ;;  %2377 = vst [vmem:[%s2777_s8 + $0xe8] sm:$0xff] %v2337_v16   ;;  %v1431_v20 = vadd.f32 %v2767_v17, %v1058_v18  ;;  %v1463_v21 = vadd.f32 %v2767_v17, %v1186_v19  ;;  %v1060_v22 = vpop.f32.mrb[57].mxu0  ;;  %v1188_v23 = vpop.f32.mrb[57].mxu1 }
 0x18c   : > { %v1061_v24 = vpop.f32.mrb[58].mxu0  ;;  %v1189_v25 = vpop.f32.mrb[58].mxu1 }
 0x18d   : > { %v1432_v26 = vadd.f32 %v2767_v17, %v1061_v24  ;;  %v1464_v27 = vadd.f32 %v2767_v17, %v1189_v25  ;;  %v1063_v28 = vpop.f32.mrb[59].mxu0  ;;  %v1191_v29 = vpop.f32.mrb[59].mxu1  ;;  %v1495_v30 = vmax.f32 %v1431_v20, 0.0  ;;  %v1527_v31 = vmax.f32 %v1463_v21, 0.0 }
 0x18f   : > { %v1496_v32 = vmax.f32 %v1432_v26, 0.0  ;;  %v1528_v33 = vmax.f32 %v1464_v27, 0.0 }
 0x191   : > { %v2262_v34 = vpack.c.bf16 %v1496_v32, %v1495_v30  ;;  %v2342_v35 = vpack.c.bf16 %v1528_v33, %v1527_v31 }
 0x192   : > { %v1066_v36 = vpop.f32.mrb[60].mxu0  ;;  %v1194_v37 = vpop.f32.mrb[60].mxu1 }
 0x193   : > { %2362 = vst [vmem:[%s2777_s8 + $0x70] sm:$0xff] %v2262_v34   ;;  %2378 = vst [vmem:[%s2777_s8 + $0xf0] sm:$0xff] %v2342_v35   ;;  %v1433_v38 = vadd.f32 %v2767_v17, %v1066_v36  ;;  %v1465_v39 = vadd.f32 %v2767_v17, %v1194_v37  ;;  %v1068_v40 = vpop.f32.mrb[61].mxu0  ;;  %v1196_v41 = vpop.f32.mrb[61].mxu1 }
 0x194   : > { %v1069_v42 = vpop.f32.mrb[62].mxu0  ;;  %v1197_v43 = vpop.f32.mrb[62].mxu1 }
 0x195   : > { %v1434_v44 = vadd.f32 %v2767_v17, %v1069_v42  ;;  %v1466_v45 = vadd.f32 %v2767_v17, %v1197_v43  ;;  %v1071_v46 = vpop.f32.mrb[63].mxu0  ;;  %v1199_v47 = vpop.f32.mrb[63].mxu1  ;;  %v1497_v48 = vmax.f32 %v1433_v38, 0.0  ;;  %v1529_v49 = vmax.f32 %v1465_v39, 0.0 }
 0x197   : > { %v1498_v50 = vmax.f32 %v1434_v44, 0.0  ;;  %v1530_v51 = vmax.f32 %v1466_v45, 0.0 }
 0x199   : > { %v2267_v52 = vpack.c.bf16 %v1498_v50, %v1497_v48  ;;  %v2347_v53 = vpack.c.bf16 %v1530_v51, %v1529_v49 }
 0x19b   : > { %2363 = vst [vmem:[%s2777_s8 + $0x78] sm:$0xff] %v2267_v52   ;;  %2379 = vst [vmem:[%s2777_s8 + $0xf8] sm:$0xff] %v2347_v53  }
 0x19c PF: > { %s13_s14 = sadd.s32 1, %s2571_s14   ;;  %s2884_s12 = smov %s2567_s13 }
 0x19d   : > { %p10_p5 = scmp.ge.s32.totalorder %s13_s14, 6   ;;  %s2885_s13 = smov %s2887_s15 }
 0x19f   :  { %12 = sbr.rel (!%p10_p5) target bundleno = 2 (0x2), region = 76 }

// kernel: forward.56
= control target key start
LH: loop header
LB: loop body
LE: loop exit
PB: predicated region body
PF: predicated region fallthrough
CT: control target
= control target key end

     0   :  { %s2251_s1 = inlined_call_operand.vmem [shape: bf16[128,128], index: 1, kind: input, shape index: {}]   ;;  %s2252_s0 = inlined_call_operand.vmem [shape: bf16[512,128], index: 0, kind: input, shape index: {}]   ;;  %s2253_s2 = inlined_call_operand.vmem [shape: f32[1,128], index: 2, kind: input, shape index: {}]   ;;  %s2254_s3 = inlined_call_operand.vmem [shape: bf16[512,128], index: 3, kind: output, shape index: {}]  }
   0x1   :  { %v1906_v0 = vld [vmem:[%s2251_s1] sm:$0xff]   ;;  %v1907_v1 = vld [vmem:[%s2251_s1 + $0x8] sm:$0xff]   ;;  %v1908_v2 = vld [vmem:[%s2251_s1 + $0x10] sm:$0xff]  }
   0x2   :  { %1810 = vmatprep.subr.bf16.mxu0 %v1906_v0  ;;  %1890 = vmatprep.subr.bf16.mxu1 %v1906_v0  ;;  %v1909_v3 = vld [vmem:[%s2251_s1 + $0x18] sm:$0xff]   ;;  %v1914_v4 = vld [vmem:[%s2252_s0] sm:$0xff]   ;;  %v1911_v7 = vld [vmem:[%s2251_s1 + $0x28] sm:$0xff]  }
   0x3   :  { %1811 = vmatpush3.bf16.msra.mxu0 %v1906_v0  ;;  %1898 = vmatpush3.bf16.msra.mxu1 %v1906_v0  ;;  %v1915_v5 = vld [vmem:[%s2252_s0 + $0x80] sm:$0xff]   ;;  %v1912_v8 = vld [vmem:[%s2251_s1 + $0x30] sm:$0xff]   ;;  %v1913_v9 = vld [vmem:[%s2251_s1 + $0x38] sm:$0xff]  }
   0x4   :  { %1812 = vmatprep.subr.bf16.mxu0 %v1907_v1  ;;  %1891 = vmatprep.subr.bf16.mxu1 %v1907_v1  ;;  %v1910_v6 = vld [vmem:[%s2251_s1 + $0x20] sm:$0xff]   ;;  %v1916_v10 = vld [vmem:[%s2252_s0 + $0x8] sm:$0xff]   ;;  %v1918_v12 = vld [vmem:[%s2252_s0 + $0x10] sm:$0xff]  }
   0x5   :  { %1826 = vmatprep.mubr.bf16.mxu0 %v1914_v4  ;;  %1858 = vmatprep.mubr.bf16.mxu1 %v1915_v5  ;;  %v1917_v11 = vld [vmem:[%s2252_s0 + $0x88] sm:$0xff]   ;;  %v1919_v13 = vld [vmem:[%s2252_s0 + $0x90] sm:$0xff]   ;;  %v1920_v14 = vld [vmem:[%s2252_s0 + $0x18] sm:$0xff]  }
   0x6   :  { %v1921_v15 = vld [vmem:[%s2252_s0 + $0x98] sm:$0xff]   ;;  %v1922_v16 = vld [vmem:[%s2252_s0 + $0x20] sm:$0xff]   ;;  %v1924_v18 = vld [vmem:[%s2252_s0 + $0x28] sm:$0xff]  }
   0x7   :  { %1813 = vmatpush3.bf16.msra.mxu0 %v1907_v1  ;;  %1899 = vmatpush3.bf16.msra.mxu1 %v1907_v1  ;;  %v1923_v17 = vld [vmem:[%s2252_s0 + $0xa0] sm:$0xff]   ;;  %v1925_v19 = vld [vmem:[%s2252_s0 + $0xa8] sm:$0xff]   ;;  %v1926_v20 = vld [vmem:[%s2252_s0 + $0x30] sm:$0xff]  }
   0x8   :  { %1814 = vmatprep.subr.bf16.mxu0 %v1908_v2  ;;  %1892 = vmatprep.subr.bf16.mxu1 %v1908_v2  ;;  %v1927_v21 = vld [vmem:[%s2252_s0 + $0xb0] sm:$0xff]   ;;  %v1928_v22 = vld [vmem:[%s2252_s0 + $0x38] sm:$0xff]   ;;  %v1930_v24 = vld [vmem:[%s2252_s0 + $0x40] sm:$0xff]  }
   0x9   :  { %v1929_v23 = vld [vmem:[%s2252_s0 + $0xb8] sm:$0xff]   ;;  %v1931_v25 = vld [vmem:[%s2252_s0 + $0xc0] sm:$0xff]   ;;  %v1932_v26 = vld [vmem:[%s2252_s0 + $0x48] sm:$0xff]  }
   0xa   :  { %v1933_v27 = vld [vmem:[%s2252_s0 + $0xc8] sm:$0xff]   ;;  %v1934_v28 = vld [vmem:[%s2252_s0 + $0x50] sm:$0xff]   ;;  %v1936_v30 = vld [vmem:[%s2252_s0 + $0x58] sm:$0xff]  }
   0xb   :  { %1815 = vmatpush3.bf16.msra.mxu0 %v1908_v2  ;;  %1900 = vmatpush3.bf16.msra.mxu1 %v1908_v2  ;;  %v1935_v29 = vld [vmem:[%s2252_s0 + $0xd0] sm:$0xff]   ;;  %v1937_v31 = vld [vmem:[%s2252_s0 + $0xd8] sm:$0xff]   ;;  %v1938_v32 = vld [vmem:[%s2252_s0 + $0x60] sm:$0xff]  }
   0xc   :  { %1816 = vmatprep.subr.bf16.mxu0 %v1909_v3  ;;  %1893 = vmatprep.subr.bf16.mxu1 %v1909_v3  ;;  %v1939_v33 = vld [vmem:[%s2252_s0 + $0xe0] sm:$0xff]   ;;  %v1940_v34 = vld [vmem:[%s2252_s0 + $0x68] sm:$0xff]   ;;  %v1942_v36 = vld [vmem:[%s2252_s0 + $0x70] sm:$0xff]  }
   0xd   :  { %v1941_v35 = vld [vmem:[%s2252_s0 + $0xe8] sm:$0xff]   ;;  %v1943_v37 = vld [vmem:[%s2252_s0 + $0xf0] sm:$0xff]   ;;  %v1944_v38 = vld [vmem:[%s2252_s0 + $0x78] sm:$0xff]  }
   0xe   :  { %v1945_v39 = vld [vmem:[%s2252_s0 + $0xf8] sm:$0xff]   ;;  %v2089_v40 = vld [vmem:[%s2253_s2] ss:$0 sm:$0xff] }
   0xf   :  { %1817 = vmatpush3.bf16.msra.mxu0 %v1909_v3  ;;  %1901 = vmatpush3.bf16.msra.mxu1 %v1909_v3 }
  0x10   :  { %1818 = vmatprep.subr.bf16.mxu0 %v1910_v6  ;;  %1894 = vmatprep.subr.bf16.mxu1 %v1910_v6 }
  0x13   :  { %1819 = vmatpush3.bf16.msra.mxu0 %v1910_v6  ;;  %1902 = vmatpush3.bf16.msra.mxu1 %v1910_v6 }
  0x14   :  { %1820 = vmatprep.subr.bf16.mxu0 %v1911_v7  ;;  %1895 = vmatprep.subr.bf16.mxu1 %v1911_v7 }
  0x17   :  { %1821 = vmatpush3.bf16.msra.mxu0 %v1911_v7  ;;  %1903 = vmatpush3.bf16.msra.mxu1 %v1911_v7 }
  0x18   :  { %1822 = vmatprep.subr.bf16.mxu0 %v1912_v8  ;;  %1896 = vmatprep.subr.bf16.mxu1 %v1912_v8 }
  0x1b   :  { %1823 = vmatpush3.bf16.msra.mxu0 %v1912_v8  ;;  %1904 = vmatpush3.bf16.msra.mxu1 %v1912_v8 }
  0x1c   :  { %1824 = vmatprep.subr.bf16.mxu0 %v1913_v9  ;;  %1897 = vmatprep.subr.bf16.mxu1 %v1913_v9 }
  0x1f   :  { %1825 = vmatpush3.bf16.msra.mxu0 %v1913_v9  ;;  %1905 = vmatpush3.bf16.msra.mxu1 %v1913_v9 }
  0x22   :  { %1827 = vmatmul.mubr.bf16.vlgmr.msra.gmra.mrb[0].mxu0 %v1916_v10  ;;  %1859 = vmatmul.mubr.bf16.vlgmr.msra.gmra.mrb[0].mxu1 %v1917_v11 }
  0x23   :  { %1830 = vmatprep.mubr.bf16.mxu0 %v1918_v12  ;;  %1862 = vmatprep.mubr.bf16.mxu1 %v1919_v13 }
  0x2a   :  { %1831 = vmatmul.mubr.bf16.gmra.mrb[4].mxu0 %v1920_v14  ;;  %1863 = vmatmul.mubr.bf16.gmra.mrb[4].mxu1 %v1921_v15 }
  0x2b   :  { %1834 = vmatprep.mubr.bf16.mxu0 %v1922_v16  ;;  %1866 = vmatprep.mubr.bf16.mxu1 %v1923_v17 }
  0x32   :  { %1835 = vmatmul.mubr.bf16.gmra.mrb[8].mxu0 %v1924_v18  ;;  %1867 = vmatmul.mubr.bf16.gmra.mrb[8].mxu1 %v1925_v19 }
  0x33   :  { %1838 = vmatprep.mubr.bf16.mxu0 %v1926_v20  ;;  %1870 = vmatprep.mubr.bf16.mxu1 %v1927_v21 }
  0x3a   :  { %1839 = vmatmul.mubr.bf16.gmra.mrb[12].mxu0 %v1928_v22  ;;  %1871 = vmatmul.mubr.bf16.gmra.mrb[12].mxu1 %v1929_v23 }
  0x3b   :  { %1842 = vmatprep.mubr.bf16.mxu0 %v1930_v24  ;;  %1874 = vmatprep.mubr.bf16.mxu1 %v1931_v25 }
  0x42   :  { %1843 = vmatmul.mubr.bf16.gmra.mrb[16].mxu0 %v1932_v26  ;;  %1875 = vmatmul.mubr.bf16.gmra.mrb[16].mxu1 %v1933_v27 }
  0x43   :  { %1846 = vmatprep.mubr.bf16.mxu0 %v1934_v28  ;;  %1878 = vmatprep.mubr.bf16.mxu1 %v1935_v29 }
  0x4a   :  { %1847 = vmatmul.mubr.bf16.gmra.mrb[20].mxu0 %v1936_v30  ;;  %1879 = vmatmul.mubr.bf16.gmra.mrb[20].mxu1 %v1937_v31 }
  0x4b   :  { %1850 = vmatprep.mubr.bf16.mxu0 %v1938_v32  ;;  %1882 = vmatprep.mubr.bf16.mxu1 %v1939_v33 }
  0x52   :  { %1851 = vmatmul.mubr.bf16.gmra.mrb[24].mxu0 %v1940_v34  ;;  %1883 = vmatmul.mubr.bf16.gmra.mrb[24].mxu1 %v1941_v35 }
  0x53   :  { %1854 = vmatprep.mubr.bf16.mxu0 %v1942_v36  ;;  %1886 = vmatprep.mubr.bf16.mxu1 %v1943_v37 }
  0x5a   :  { %1855 = vmatmul.mubr.bf16.gmra.mrb[28].mxu0 %v1944_v38  ;;  %1887 = vmatmul.mubr.bf16.gmra.mrb[28].mxu1 %v1945_v39 }
  0xf5   :  { %v1828_v41 = vpop.f32.mrb[0].mxu0  ;;  %v1860_v42 = vpop.f32.mrb[0].mxu1 }
  0xf6   :  { %v960_v43 = vadd.f32 %v1828_v41, %v2089_v40  ;;  %v992_v44 = vadd.f32 %v1860_v42, %v2089_v40  ;;  %v501_v45 = vpop.f32.mrb[1].mxu0  ;;  %v629_v46 = vpop.f32.mrb[1].mxu1 }
  0xf7   :  { %v958_v47 = vadd.f32 %v2089_v40, %v501_v45  ;;  %v990_v48 = vadd.f32 %v2089_v40, %v629_v46  ;;  %v1829_v49 = vpop.f32.mrb[2].mxu0  ;;  %v1861_v50 = vpop.f32.mrb[2].mxu1 }
  0xf8   :  { %v961_v51 = vadd.f32 %v1829_v49, %v2089_v40  ;;  %v993_v52 = vadd.f32 %v1861_v50, %v2089_v40  ;;  %v504_v53 = vpop.f32.mrb[3].mxu0  ;;  %v632_v54 = vpop.f32.mrb[3].mxu1  ;;  %v1024_v57 = vmax.f32 %v960_v43, 0.0  ;;  %v1056_v58 = vmax.f32 %v992_v44, 0.0 }
  0xf9   :  { %v959_v55 = vadd.f32 %v2089_v40, %v504_v53  ;;  %v991_v56 = vadd.f32 %v2089_v40, %v632_v54  ;;  %v1022_v61 = vmax.f32 %v958_v47, 0.0  ;;  %v1054_v62 = vmax.f32 %v990_v48, 0.0 }
  0xfa   :  { %v1025_v59 = vmax.f32 %v961_v51, 0.0  ;;  %v1057_v60 = vmax.f32 %v993_v52, 0.0 }
  0xfb   :  { %v1023_v63 = vmax.f32 %v959_v55, 0.0  ;;  %v1055_v0 = vmax.f32 %v991_v56, 0.0 }
  0xfc   :  { %v1587_v1 = vpack.c.bf16 %v1025_v59, %v1024_v57  ;;  %v1667_v2 = vpack.c.bf16 %v1057_v60, %v1056_v58 }
  0xfd   :  { %v1582_v3 = vpack.c.bf16 %v1023_v63, %v1022_v61  ;;  %v1662_v4 = vpack.c.bf16 %v1055_v0, %v1054_v62  ;;  %v1832_v5 = vpop.f32.mrb[4].mxu0  ;;  %v1864_v6 = vpop.f32.mrb[4].mxu1 }
  0xfe   :  { %1739 = vst [vmem:[%s2254_s3 + $0x8] sm:$0xff] %v1587_v1   ;;  %1755 = vst [vmem:[%s2254_s3 + $0x88] sm:$0xff] %v1667_v2   ;;  %v964_v7 = vadd.f32 %v1832_v5, %v2089_v40  ;;  %v996_v8 = vadd.f32 %v1864_v6, %v2089_v40  ;;  %v517_v9 = vpop.f32.mrb[5].mxu0  ;;  %v645_v10 = vpop.f32.mrb[5].mxu1 }
  0xff   :  { %1583 = vst [vmem:[%s2254_s3] sm:$0xff] %v1582_v3   ;;  %1754 = vst [vmem:[%s2254_s3 + $0x80] sm:$0xff] %v1662_v4   ;;  %v962_v11 = vadd.f32 %v2089_v40, %v517_v9  ;;  %v994_v12 = vadd.f32 %v2089_v40, %v645_v10  ;;  %v1833_v13 = vpop.f32.mrb[6].mxu0  ;;  %v1865_v14 = vpop.f32.mrb[6].mxu1 }
 0x100   :  { %v965_v15 = vadd.f32 %v1833_v13, %v2089_v40  ;;  %v997_v16 = vadd.f32 %v1865_v14, %v2089_v40  ;;  %v520_v17 = vpop.f32.mrb[7].mxu0  ;;  %v648_v18 = vpop.f32.mrb[7].mxu1  ;;  %v1028_v21 = vmax.f32 %v964_v7, 0.0  ;;  %v1060_v22 = vmax.f32 %v996_v8, 0.0 }
 0x101   :  { %v963_v19 = vadd.f32 %v2089_v40, %v520_v17  ;;  %v995_v20 = vadd.f32 %v2089_v40, %v648_v18  ;;  %v1026_v25 = vmax.f32 %v962_v11, 0.0  ;;  %v1058_v26 = vmax.f32 %v994_v12, 0.0 }
 0x102   :  { %v1029_v23 = vmax.f32 %v965_v15, 0.0  ;;  %v1061_v24 = vmax.f32 %v997_v16, 0.0 }
 0x103   :  { %v1027_v27 = vmax.f32 %v963_v19, 0.0  ;;  %v1059_v28 = vmax.f32 %v995_v20, 0.0 }
 0x104   :  { %v1597_v29 = vpack.c.bf16 %v1029_v23, %v1028_v21  ;;  %v1677_v30 = vpack.c.bf16 %v1061_v24, %v1060_v22 }
 0x105   :  { %v1592_v31 = vpack.c.bf16 %v1027_v27, %v1026_v25  ;;  %v1672_v32 = vpack.c.bf16 %v1059_v28, %v1058_v26  ;;  %v1836_v33 = vpop.f32.mrb[8].mxu0  ;;  %v1868_v34 = vpop.f32.mrb[8].mxu1 }
 0x106   :  { %1741 = vst [vmem:[%s2254_s3 + $0x18] sm:$0xff] %v1597_v29   ;;  %1757 = vst [vmem:[%s2254_s3 + $0x98] sm:$0xff] %v1677_v30   ;;  %v968_v35 = vadd.f32 %v1836_v33, %v2089_v40  ;;  %v1000_v36 = vadd.f32 %v1868_v34, %v2089_v40  ;;  %v533_v37 = vpop.f32.mrb[9].mxu0  ;;  %v661_v38 = vpop.f32.mrb[9].mxu1 }
 0x107   :  { %1740 = vst [vmem:[%s2254_s3 + $0x10] sm:$0xff] %v1592_v31   ;;  %1756 = vst [vmem:[%s2254_s3 + $0x90] sm:$0xff] %v1672_v32   ;;  %v966_v39 = vadd.f32 %v2089_v40, %v533_v37  ;;  %v998_v41 = vadd.f32 %v2089_v40, %v661_v38  ;;  %v1837_v42 = vpop.f32.mrb[10].mxu0  ;;  %v1869_v43 = vpop.f32.mrb[10].mxu1 }
 0x108   :  { %v969_v44 = vadd.f32 %v1837_v42, %v2089_v40  ;;  %v1001_v45 = vadd.f32 %v1869_v43, %v2089_v40  ;;  %v536_v46 = vpop.f32.mrb[11].mxu0  ;;  %v664_v47 = vpop.f32.mrb[11].mxu1  ;;  %v1032_v50 = vmax.f32 %v968_v35, 0.0  ;;  %v1064_v51 = vmax.f32 %v1000_v36, 0.0 }
 0x109   :  { %v967_v48 = vadd.f32 %v2089_v40, %v536_v46  ;;  %v999_v49 = vadd.f32 %v2089_v40, %v664_v47  ;;  %v1030_v54 = vmax.f32 %v966_v39, 0.0  ;;  %v1062_v55 = vmax.f32 %v998_v41, 0.0 }
 0x10a   :  { %v1033_v52 = vmax.f32 %v969_v44, 0.0  ;;  %v1065_v53 = vmax.f32 %v1001_v45, 0.0 }
 0x10b   :  { %v1031_v56 = vmax.f32 %v967_v48, 0.0  ;;  %v1063_v57 = vmax.f32 %v999_v49, 0.0 }
 0x10c   :  { %v1607_v58 = vpack.c.bf16 %v1033_v52, %v1032_v50  ;;  %v1687_v59 = vpack.c.bf16 %v1065_v53, %v1064_v51 }
 0x10d   :  { %v1602_v60 = vpack.c.bf16 %v1031_v56, %v1030_v54  ;;  %v1682_v61 = vpack.c.bf16 %v1063_v57, %v1062_v55  ;;  %v1840_v62 = vpop.f32.mrb[12].mxu0  ;;  %v1872_v63 = vpop.f32.mrb[12].mxu1 }
 0x10e   :  { %1743 = vst [vmem:[%s2254_s3 + $0x28] sm:$0xff] %v1607_v58   ;;  %1759 = vst [vmem:[%s2254_s3 + $0xa8] sm:$0xff] %v1687_v59   ;;  %v972_v0 = vadd.f32 %v1840_v62, %v2089_v40  ;;  %v1004_v1 = vadd.f32 %v1872_v63, %v2089_v40  ;;  %v549_v2 = vpop.f32.mrb[13].mxu0  ;;  %v677_v3 = vpop.f32.mrb[13].mxu1 }
 0x10f   :  { %1742 = vst [vmem:[%s2254_s3 + $0x20] sm:$0xff] %v1602_v60   ;;  %1758 = vst [vmem:[%s2254_s3 + $0xa0] sm:$0xff] %v1682_v61   ;;  %v970_v4 = vadd.f32 %v2089_v40, %v549_v2  ;;  %v1002_v5 = vadd.f32 %v2089_v40, %v677_v3  ;;  %v1841_v6 = vpop.f32.mrb[14].mxu0  ;;  %v1873_v7 = vpop.f32.mrb[14].mxu1 }
 0x110   :  { %v973_v8 = vadd.f32 %v1841_v6, %v2089_v40  ;;  %v1005_v9 = vadd.f32 %v1873_v7, %v2089_v40  ;;  %v552_v10 = vpop.f32.mrb[15].mxu0  ;;  %v680_v11 = vpop.f32.mrb[15].mxu1  ;;  %v1036_v14 = vmax.f32 %v972_v0, 0.0  ;;  %v1068_v15 = vmax.f32 %v1004_v1, 0.0 }
 0x111   :  { %v971_v12 = vadd.f32 %v2089_v40, %v552_v10  ;;  %v1003_v13 = vadd.f32 %v2089_v40, %v680_v11  ;;  %v1034_v18 = vmax.f32 %v970_v4, 0.0  ;;  %v1066_v19 = vmax.f32 %v1002_v5, 0.0 }
 0x112   :  { %v1037_v16 = vmax.f32 %v973_v8, 0.0  ;;  %v1069_v17 = vmax.f32 %v1005_v9, 0.0 }
 0x113   :  { %v1035_v20 = vmax.f32 %v971_v12, 0.0  ;;  %v1067_v21 = vmax.f32 %v1003_v13, 0.0 }
 0x114   :  { %v1617_v22 = vpack.c.bf16 %v1037_v16, %v1036_v14  ;;  %v1697_v23 = vpack.c.bf16 %v1069_v17, %v1068_v15 }
 0x115   :  { %v1612_v24 = vpack.c.bf16 %v1035_v20, %v1034_v18  ;;  %v1692_v25 = vpack.c.bf16 %v1067_v21, %v1066_v19  ;;  %v1844_v26 = vpop.f32.mrb[16].mxu0  ;;  %v1876_v27 = vpop.f32.mrb[16].mxu1 }
 0x116   :  { %1745 = vst [vmem:[%s2254_s3 + $0x38] sm:$0xff] %v1617_v22   ;;  %1761 = vst [vmem:[%s2254_s3 + $0xb8] sm:$0xff] %v1697_v23   ;;  %v976_v28 = vadd.f32 %v1844_v26, %v2089_v40  ;;  %v1008_v29 = vadd.f32 %v1876_v27, %v2089_v40  ;;  %v565_v30 = vpop.f32.mrb[17].mxu0  ;;  %v693_v31 = vpop.f32.mrb[17].mxu1 }
 0x117   :  { %1744 = vst [vmem:[%s2254_s3 + $0x30] sm:$0xff] %v1612_v24   ;;  %1760 = vst [vmem:[%s2254_s3 + $0xb0] sm:$0xff] %v1692_v25   ;;  %v974_v32 = vadd.f32 %v2089_v40, %v565_v30  ;;  %v1006_v33 = vadd.f32 %v2089_v40, %v693_v31  ;;  %v1845_v34 = vpop.f32.mrb[18].mxu0  ;;  %v1877_v35 = vpop.f32.mrb[18].mxu1 }
 0x118   :  { %v977_v36 = vadd.f32 %v1845_v34, %v2089_v40  ;;  %v1009_v37 = vadd.f32 %v1877_v35, %v2089_v40  ;;  %v568_v38 = vpop.f32.mrb[19].mxu0  ;;  %v696_v39 = vpop.f32.mrb[19].mxu1  ;;  %v1040_v43 = vmax.f32 %v976_v28, 0.0  ;;  %v1072_v44 = vmax.f32 %v1008_v29, 0.0 }
 0x119   :  { %v975_v41 = vadd.f32 %v2089_v40, %v568_v38  ;;  %v1007_v42 = vadd.f32 %v2089_v40, %v696_v39  ;;  %v1038_v47 = vmax.f32 %v974_v32, 0.0  ;;  %v1070_v48 = vmax.f32 %v1006_v33, 0.0 }
 0x11a   :  { %v1041_v45 = vmax.f32 %v977_v36, 0.0  ;;  %v1073_v46 = vmax.f32 %v1009_v37, 0.0 }
 0x11b   :  { %v1039_v49 = vmax.f32 %v975_v41, 0.0  ;;  %v1071_v50 = vmax.f32 %v1007_v42, 0.0 }
 0x11c   :  { %v1627_v51 = vpack.c.bf16 %v1041_v45, %v1040_v43  ;;  %v1707_v52 = vpack.c.bf16 %v1073_v46, %v1072_v44 }
 0x11d   :  { %v1622_v53 = vpack.c.bf16 %v1039_v49, %v1038_v47  ;;  %v1702_v54 = vpack.c.bf16 %v1071_v50, %v1070_v48  ;;  %v1848_v55 = vpop.f32.mrb[20].mxu0  ;;  %v1880_v56 = vpop.f32.mrb[20].mxu1 }
 0x11e   :  { %1747 = vst [vmem:[%s2254_s3 + $0x48] sm:$0xff] %v1627_v51   ;;  %1763 = vst [vmem:[%s2254_s3 + $0xc8] sm:$0xff] %v1707_v52   ;;  %v980_v57 = vadd.f32 %v1848_v55, %v2089_v40  ;;  %v1012_v58 = vadd.f32 %v1880_v56, %v2089_v40  ;;  %v581_v59 = vpop.f32.mrb[21].mxu0  ;;  %v709_v60 = vpop.f32.mrb[21].mxu1 }
 0x11f   :  { %1746 = vst [vmem:[%s2254_s3 + $0x40] sm:$0xff] %v1622_v53   ;;  %1762 = vst [vmem:[%s2254_s3 + $0xc0] sm:$0xff] %v1702_v54   ;;  %v978_v61 = vadd.f32 %v2089_v40, %v581_v59  ;;  %v1010_v62 = vadd.f32 %v2089_v40, %v709_v60  ;;  %v1849_v63 = vpop.f32.mrb[22].mxu0  ;;  %v1881_v0 = vpop.f32.mrb[22].mxu1 }
 0x120   :  { %v981_v1 = vadd.f32 %v1849_v63, %v2089_v40  ;;  %v1013_v2 = vadd.f32 %v1881_v0, %v2089_v40  ;;  %v584_v3 = vpop.f32.mrb[23].mxu0  ;;  %v712_v4 = vpop.f32.mrb[23].mxu1  ;;  %v1044_v7 = vmax.f32 %v980_v57, 0.0  ;;  %v1076_v8 = vmax.f32 %v1012_v58, 0.0 }
 0x121   :  { %v979_v5 = vadd.f32 %v2089_v40, %v584_v3  ;;  %v1011_v6 = vadd.f32 %v2089_v40, %v712_v4  ;;  %v1042_v11 = vmax.f32 %v978_v61, 0.0  ;;  %v1074_v12 = vmax.f32 %v1010_v62, 0.0 }
 0x122   :  { %v1045_v9 = vmax.f32 %v981_v1, 0.0  ;;  %v1077_v10 = vmax.f32 %v1013_v2, 0.0 }
 0x123   :  { %v1043_v13 = vmax.f32 %v979_v5, 0.0  ;;  %v1075_v14 = vmax.f32 %v1011_v6, 0.0 }
 0x124   :  { %v1637_v15 = vpack.c.bf16 %v1045_v9, %v1044_v7  ;;  %v1717_v16 = vpack.c.bf16 %v1077_v10, %v1076_v8 }
 0x125   :  { %v1632_v17 = vpack.c.bf16 %v1043_v13, %v1042_v11  ;;  %v1712_v18 = vpack.c.bf16 %v1075_v14, %v1074_v12  ;;  %v1852_v19 = vpop.f32.mrb[24].mxu0  ;;  %v1884_v20 = vpop.f32.mrb[24].mxu1 }
 0x126   :  { %1749 = vst [vmem:[%s2254_s3 + $0x58] sm:$0xff] %v1637_v15   ;;  %1765 = vst [vmem:[%s2254_s3 + $0xd8] sm:$0xff] %v1717_v16   ;;  %v984_v21 = vadd.f32 %v1852_v19, %v2089_v40  ;;  %v1016_v22 = vadd.f32 %v1884_v20, %v2089_v40  ;;  %v597_v23 = vpop.f32.mrb[25].mxu0  ;;  %v725_v24 = vpop.f32.mrb[25].mxu1 }
 0x127   :  { %1748 = vst [vmem:[%s2254_s3 + $0x50] sm:$0xff] %v1632_v17   ;;  %1764 = vst [vmem:[%s2254_s3 + $0xd0] sm:$0xff] %v1712_v18   ;;  %v982_v25 = vadd.f32 %v2089_v40, %v597_v23  ;;  %v1014_v26 = vadd.f32 %v2089_v40, %v725_v24  ;;  %v1853_v27 = vpop.f32.mrb[26].mxu0  ;;  %v1885_v28 = vpop.f32.mrb[26].mxu1 }
 0x128   :  { %v985_v29 = vadd.f32 %v1853_v27, %v2089_v40  ;;  %v1017_v30 = vadd.f32 %v1885_v28, %v2089_v40  ;;  %v600_v31 = vpop.f32.mrb[27].mxu0  ;;  %v728_v32 = vpop.f32.mrb[27].mxu1  ;;  %v1048_v35 = vmax.f32 %v984_v21, 0.0  ;;  %v1080_v36 = vmax.f32 %v1016_v22, 0.0 }
 0x129   :  { %v983_v33 = vadd.f32 %v2089_v40, %v600_v31  ;;  %v1015_v34 = vadd.f32 %v2089_v40, %v728_v32  ;;  %v1046_v39 = vmax.f32 %v982_v25, 0.0  ;;  %v1078_v41 = vmax.f32 %v1014_v26, 0.0 }
 0x12a   :  { %v1049_v37 = vmax.f32 %v985_v29, 0.0  ;;  %v1081_v38 = vmax.f32 %v1017_v30, 0.0 }
 0x12b   :  { %v1047_v42 = vmax.f32 %v983_v33, 0.0  ;;  %v1079_v43 = vmax.f32 %v1015_v34, 0.0 }
 0x12c   :  { %v1647_v44 = vpack.c.bf16 %v1049_v37, %v1048_v35  ;;  %v1727_v45 = vpack.c.bf16 %v1081_v38, %v1080_v36 }
 0x12d   :  { %v1642_v46 = vpack.c.bf16 %v1047_v42, %v1046_v39  ;;  %v1722_v47 = vpack.c.bf16 %v1079_v43, %v1078_v41  ;;  %v1856_v48 = vpop.f32.mrb[28].mxu0  ;;  %v1888_v49 = vpop.f32.mrb[28].mxu1 }
 0x12e   :  { %1751 = vst [vmem:[%s2254_s3 + $0x68] sm:$0xff] %v1647_v44   ;;  %1767 = vst [vmem:[%s2254_s3 + $0xe8] sm:$0xff] %v1727_v45   ;;  %v988_v50 = vadd.f32 %v1856_v48, %v2089_v40  ;;  %v1020_v51 = vadd.f32 %v1888_v49, %v2089_v40  ;;  %v613_v52 = vpop.f32.mrb[29].mxu0  ;;  %v741_v53 = vpop.f32.mrb[29].mxu1 }
 0x12f   :  { %1750 = vst [vmem:[%s2254_s3 + $0x60] sm:$0xff] %v1642_v46   ;;  %1766 = vst [vmem:[%s2254_s3 + $0xe0] sm:$0xff] %v1722_v47   ;;  %v986_v54 = vadd.f32 %v2089_v40, %v613_v52  ;;  %v1018_v55 = vadd.f32 %v2089_v40, %v741_v53  ;;  %v1857_v56 = vpop.f32.mrb[30].mxu0  ;;  %v1889_v57 = vpop.f32.mrb[30].mxu1 }
 0x130   :  { %v989_v58 = vadd.f32 %v1857_v56, %v2089_v40  ;;  %v1021_v59 = vadd.f32 %v1889_v57, %v2089_v40  ;;  %v616_v60 = vpop.f32.mrb[31].mxu0  ;;  %v744_v61 = vpop.f32.mrb[31].mxu1  ;;  %v1052_v0 = vmax.f32 %v988_v50, 0.0  ;;  %v1084_v1 = vmax.f32 %v1020_v51, 0.0 }
 0x131   :  { %v987_v62 = vadd.f32 %v2089_v40, %v616_v60  ;;  %v1019_v63 = vadd.f32 %v2089_v40, %v744_v61  ;;  %v1050_v4 = vmax.f32 %v986_v54, 0.0  ;;  %v1082_v5 = vmax.f32 %v1018_v55, 0.0 }
 0x132   :  { %v1053_v2 = vmax.f32 %v989_v58, 0.0  ;;  %v1085_v3 = vmax.f32 %v1021_v59, 0.0 }
 0x133   :  { %v1051_v6 = vmax.f32 %v987_v62, 0.0  ;;  %v1083_v7 = vmax.f32 %v1019_v63, 0.0 }
 0x134   :  { %v1657_v8 = vpack.c.bf16 %v1053_v2, %v1052_v0  ;;  %v1737_v9 = vpack.c.bf16 %v1085_v3, %v1084_v1 }
 0x135   :  { %v1652_v10 = vpack.c.bf16 %v1051_v6, %v1050_v4  ;;  %v1732_v11 = vpack.c.bf16 %v1083_v7, %v1082_v5 }
 0x136   :  { %1753 = vst [vmem:[%s2254_s3 + $0x78] sm:$0xff] %v1657_v8   ;;  %1769 = vst [vmem:[%s2254_s3 + $0xf8] sm:$0xff] %v1737_v9  }
 0x137   :  { %1752 = vst [vmem:[%s2254_s3 + $0x70] sm:$0xff] %v1652_v10   ;;  %1768 = vst [vmem:[%s2254_s3 + $0xf0] sm:$0xff] %v1732_v11  }

// kernel: forward.58
= control target key start
LH: loop header
LB: loop body
LE: loop exit
PB: predicated region body
PF: predicated region fallthrough
CT: control target
= control target key end

     0   :  { %s2187_s1 = inlined_call_operand.vmem [shape: bf16[128,128], index: 1, kind: input, shape index: {}]   ;;  %s2188_s0 = inlined_call_operand.vmem [shape: bf16[512,128], index: 0, kind: input, shape index: {}]   ;;  %s2189_s2 = inlined_call_operand.vmem [shape: f32[1,128], index: 2, kind: input, shape index: {}]   ;;  %s2190_s3 = inlined_call_operand.vmem [shape: bf16[512,128], index: 3, kind: output, shape index: {}]  }
   0x1   :  { %v1842_v0 = vld [vmem:[%s2187_s1] sm:$0xff]   ;;  %v1843_v1 = vld [vmem:[%s2187_s1 + $0x8] sm:$0xff]   ;;  %v1844_v2 = vld [vmem:[%s2187_s1 + $0x10] sm:$0xff]  }
   0x2   :  { %1746 = vmatprep.subr.bf16.mxu0 %v1842_v0  ;;  %1826 = vmatprep.subr.bf16.mxu1 %v1842_v0  ;;  %v1845_v3 = vld [vmem:[%s2187_s1 + $0x18] sm:$0xff]   ;;  %v1850_v4 = vld [vmem:[%s2188_s0] sm:$0xff]   ;;  %v1847_v7 = vld [vmem:[%s2187_s1 + $0x28] sm:$0xff]  }
   0x3   :  { %1747 = vmatpush3.bf16.msra.mxu0 %v1842_v0  ;;  %1834 = vmatpush3.bf16.msra.mxu1 %v1842_v0  ;;  %v1851_v5 = vld [vmem:[%s2188_s0 + $0x80] sm:$0xff]   ;;  %v1848_v8 = vld [vmem:[%s2187_s1 + $0x30] sm:$0xff]   ;;  %v1849_v9 = vld [vmem:[%s2187_s1 + $0x38] sm:$0xff]  }
   0x4   :  { %1748 = vmatprep.subr.bf16.mxu0 %v1843_v1  ;;  %1827 = vmatprep.subr.bf16.mxu1 %v1843_v1  ;;  %v1846_v6 = vld [vmem:[%s2187_s1 + $0x20] sm:$0xff]   ;;  %v1852_v10 = vld [vmem:[%s2188_s0 + $0x8] sm:$0xff]   ;;  %v1854_v12 = vld [vmem:[%s2188_s0 + $0x10] sm:$0xff]  }
   0x5   :  { %1762 = vmatprep.mubr.bf16.mxu0 %v1850_v4  ;;  %1794 = vmatprep.mubr.bf16.mxu1 %v1851_v5  ;;  %v1853_v11 = vld [vmem:[%s2188_s0 + $0x88] sm:$0xff]   ;;  %v1855_v13 = vld [vmem:[%s2188_s0 + $0x90] sm:$0xff]   ;;  %v1856_v14 = vld [vmem:[%s2188_s0 + $0x18] sm:$0xff]  }
   0x6   :  { %v1857_v15 = vld [vmem:[%s2188_s0 + $0x98] sm:$0xff]   ;;  %v1858_v16 = vld [vmem:[%s2188_s0 + $0x20] sm:$0xff]   ;;  %v1860_v18 = vld [vmem:[%s2188_s0 + $0x28] sm:$0xff]  }
   0x7   :  { %1749 = vmatpush3.bf16.msra.mxu0 %v1843_v1  ;;  %1835 = vmatpush3.bf16.msra.mxu1 %v1843_v1  ;;  %v1859_v17 = vld [vmem:[%s2188_s0 + $0xa0] sm:$0xff]   ;;  %v1861_v19 = vld [vmem:[%s2188_s0 + $0xa8] sm:$0xff]   ;;  %v1862_v20 = vld [vmem:[%s2188_s0 + $0x30] sm:$0xff]  }
   0x8   :  { %1750 = vmatprep.subr.bf16.mxu0 %v1844_v2  ;;  %1828 = vmatprep.subr.bf16.mxu1 %v1844_v2  ;;  %v1863_v21 = vld [vmem:[%s2188_s0 + $0xb0] sm:$0xff]   ;;  %v1864_v22 = vld [vmem:[%s2188_s0 + $0x38] sm:$0xff]   ;;  %v1866_v24 = vld [vmem:[%s2188_s0 + $0x40] sm:$0xff]  }
   0x9   :  { %v1865_v23 = vld [vmem:[%s2188_s0 + $0xb8] sm:$0xff]   ;;  %v1867_v25 = vld [vmem:[%s2188_s0 + $0xc0] sm:$0xff]   ;;  %v1868_v26 = vld [vmem:[%s2188_s0 + $0x48] sm:$0xff]  }
   0xa   :  { %v1869_v27 = vld [vmem:[%s2188_s0 + $0xc8] sm:$0xff]   ;;  %v1870_v28 = vld [vmem:[%s2188_s0 + $0x50] sm:$0xff]   ;;  %v1872_v30 = vld [vmem:[%s2188_s0 + $0x58] sm:$0xff]  }
   0xb   :  { %1751 = vmatpush3.bf16.msra.mxu0 %v1844_v2  ;;  %1836 = vmatpush3.bf16.msra.mxu1 %v1844_v2  ;;  %v1871_v29 = vld [vmem:[%s2188_s0 + $0xd0] sm:$0xff]   ;;  %v1873_v31 = vld [vmem:[%s2188_s0 + $0xd8] sm:$0xff]   ;;  %v1874_v32 = vld [vmem:[%s2188_s0 + $0x60] sm:$0xff]  }
   0xc   :  { %1752 = vmatprep.subr.bf16.mxu0 %v1845_v3  ;;  %1829 = vmatprep.subr.bf16.mxu1 %v1845_v3  ;;  %v1875_v33 = vld [vmem:[%s2188_s0 + $0xe0] sm:$0xff]   ;;  %v1876_v34 = vld [vmem:[%s2188_s0 + $0x68] sm:$0xff]   ;;  %v1878_v36 = vld [vmem:[%s2188_s0 + $0x70] sm:$0xff]  }
   0xd   :  { %v1877_v35 = vld [vmem:[%s2188_s0 + $0xe8] sm:$0xff]   ;;  %v1879_v37 = vld [vmem:[%s2188_s0 + $0xf0] sm:$0xff]   ;;  %v1880_v38 = vld [vmem:[%s2188_s0 + $0x78] sm:$0xff]  }
   0xe   :  { %v1881_v39 = vld [vmem:[%s2188_s0 + $0xf8] sm:$0xff]   ;;  %v2025_v41 = vld [vmem:[%s2189_s2] ss:$0 sm:$0xff] }
   0xf   :  { %1753 = vmatpush3.bf16.msra.mxu0 %v1845_v3  ;;  %1837 = vmatpush3.bf16.msra.mxu1 %v1845_v3 }
  0x10   :  { %1754 = vmatprep.subr.bf16.mxu0 %v1846_v6  ;;  %1830 = vmatprep.subr.bf16.mxu1 %v1846_v6 }
  0x13   :  { %1755 = vmatpush3.bf16.msra.mxu0 %v1846_v6  ;;  %1838 = vmatpush3.bf16.msra.mxu1 %v1846_v6 }
  0x14   :  { %1756 = vmatprep.subr.bf16.mxu0 %v1847_v7  ;;  %1831 = vmatprep.subr.bf16.mxu1 %v1847_v7 }
  0x17   :  { %1757 = vmatpush3.bf16.msra.mxu0 %v1847_v7  ;;  %1839 = vmatpush3.bf16.msra.mxu1 %v1847_v7 }
  0x18   :  { %1758 = vmatprep.subr.bf16.mxu0 %v1848_v8  ;;  %1832 = vmatprep.subr.bf16.mxu1 %v1848_v8 }
  0x1b   :  { %1759 = vmatpush3.bf16.msra.mxu0 %v1848_v8  ;;  %1840 = vmatpush3.bf16.msra.mxu1 %v1848_v8 }
  0x1c   :  { %1760 = vmatprep.subr.bf16.mxu0 %v1849_v9  ;;  %1833 = vmatprep.subr.bf16.mxu1 %v1849_v9 }
  0x1f   :  { %1761 = vmatpush3.bf16.msra.mxu0 %v1849_v9  ;;  %1841 = vmatpush3.bf16.msra.mxu1 %v1849_v9 }
  0x22   :  { %1763 = vmatmul.mubr.bf16.vlgmr.msra.gmra.mrb[0].mxu0 %v1852_v10  ;;  %1795 = vmatmul.mubr.bf16.vlgmr.msra.gmra.mrb[0].mxu1 %v1853_v11 }
  0x23   :  { %1766 = vmatprep.mubr.bf16.mxu0 %v1854_v12  ;;  %1798 = vmatprep.mubr.bf16.mxu1 %v1855_v13 }
  0x2a   :  { %1767 = vmatmul.mubr.bf16.gmra.mrb[4].mxu0 %v1856_v14  ;;  %1799 = vmatmul.mubr.bf16.gmra.mrb[4].mxu1 %v1857_v15 }
  0x2b   :  { %1770 = vmatprep.mubr.bf16.mxu0 %v1858_v16  ;;  %1802 = vmatprep.mubr.bf16.mxu1 %v1859_v17 }
  0x32   :  { %1771 = vmatmul.mubr.bf16.gmra.mrb[8].mxu0 %v1860_v18  ;;  %1803 = vmatmul.mubr.bf16.gmra.mrb[8].mxu1 %v1861_v19 }
  0x33   :  { %1774 = vmatprep.mubr.bf16.mxu0 %v1862_v20  ;;  %1806 = vmatprep.mubr.bf16.mxu1 %v1863_v21 }
  0x3a   :  { %1775 = vmatmul.mubr.bf16.gmra.mrb[12].mxu0 %v1864_v22  ;;  %1807 = vmatmul.mubr.bf16.gmra.mrb[12].mxu1 %v1865_v23 }
  0x3b   :  { %1778 = vmatprep.mubr.bf16.mxu0 %v1866_v24  ;;  %1810 = vmatprep.mubr.bf16.mxu1 %v1867_v25 }
  0x42   :  { %1779 = vmatmul.mubr.bf16.gmra.mrb[16].mxu0 %v1868_v26  ;;  %1811 = vmatmul.mubr.bf16.gmra.mrb[16].mxu1 %v1869_v27 }
  0x43   :  { %1782 = vmatprep.mubr.bf16.mxu0 %v1870_v28  ;;  %1814 = vmatprep.mubr.bf16.mxu1 %v1871_v29 }
  0x4a   :  { %1783 = vmatmul.mubr.bf16.gmra.mrb[20].mxu0 %v1872_v30  ;;  %1815 = vmatmul.mubr.bf16.gmra.mrb[20].mxu1 %v1873_v31 }
  0x4b   :  { %1786 = vmatprep.mubr.bf16.mxu0 %v1874_v32  ;;  %1818 = vmatprep.mubr.bf16.mxu1 %v1875_v33 }
  0x52   :  { %1787 = vmatmul.mubr.bf16.gmra.mrb[24].mxu0 %v1876_v34  ;;  %1819 = vmatmul.mubr.bf16.gmra.mrb[24].mxu1 %v1877_v35 }
  0x53   :  { %1790 = vmatprep.mubr.bf16.mxu0 %v1878_v36  ;;  %1822 = vmatprep.mubr.bf16.mxu1 %v1879_v37 }
  0x5a   :  { %1791 = vmatmul.mubr.bf16.gmra.mrb[28].mxu0 %v1880_v38  ;;  %1823 = vmatmul.mubr.bf16.gmra.mrb[28].mxu1 %v1881_v39 }
  0xf5   :  { %v1764_v40 = vpop.f32.mrb[0].mxu0  ;;  %v1796_v42 = vpop.f32.mrb[0].mxu1 }
  0xf6   :  { %v501_v43 = vpop.f32.mrb[1].mxu0  ;;  %v629_v44 = vpop.f32.mrb[1].mxu1  ;;  %v960_v47 = vadd.f32 %v1764_v40, %v2025_v41  ;;  %v992_v48 = vadd.f32 %v1796_v42, %v2025_v41 }
  0xf7   :  { %v1765_v45 = vpop.f32.mrb[2].mxu0  ;;  %v1797_v46 = vpop.f32.mrb[2].mxu1  ;;  %v958_v53 = vadd.f32 %v2025_v41, %v501_v43  ;;  %v990_v54 = vadd.f32 %v2025_v41, %v629_v44 }
  0xf8   :  { %v961_v49 = vadd.f32 %v1765_v45, %v2025_v41  ;;  %v993_v50 = vadd.f32 %v1797_v46, %v2025_v41  ;;  %v504_v51 = vpop.f32.mrb[3].mxu0  ;;  %v632_v52 = vpop.f32.mrb[3].mxu1 }
  0xf9   :  { %v959_v55 = vadd.f32 %v2025_v41, %v504_v51  ;;  %v991_v56 = vadd.f32 %v2025_v41, %v632_v52 }
  0xfa   :  { %v1523_v57 = vpack.c.bf16 %v961_v49, %v960_v47  ;;  %v1603_v58 = vpack.c.bf16 %v993_v50, %v992_v48 }
  0xfb   :  { %v1518_v59 = vpack.c.bf16 %v959_v55, %v958_v53  ;;  %v1598_v60 = vpack.c.bf16 %v991_v56, %v990_v54 }
  0xfc   :  { %1675 = vst [vmem:[%s2190_s3 + $0x8] sm:$0xff] %v1523_v57   ;;  %1691 = vst [vmem:[%s2190_s3 + $0x88] sm:$0xff] %v1603_v58  }
  0xfd   :  { %1519 = vst [vmem:[%s2190_s3] sm:$0xff] %v1518_v59   ;;  %1690 = vst [vmem:[%s2190_s3 + $0x80] sm:$0xff] %v1598_v60   ;;  %v1768_v61 = vpop.f32.mrb[4].mxu0  ;;  %v1800_v62 = vpop.f32.mrb[4].mxu1 }
  0xfe   :  { %v517_v63 = vpop.f32.mrb[5].mxu0  ;;  %v645_v0 = vpop.f32.mrb[5].mxu1  ;;  %v964_v3 = vadd.f32 %v1768_v61, %v2025_v41  ;;  %v996_v4 = vadd.f32 %v1800_v62, %v2025_v41 }
  0xff   :  { %v1769_v1 = vpop.f32.mrb[6].mxu0  ;;  %v1801_v2 = vpop.f32.mrb[6].mxu1  ;;  %v962_v9 = vadd.f32 %v2025_v41, %v517_v63  ;;  %v994_v10 = vadd.f32 %v2025_v41, %v645_v0 }
 0x100   :  { %v965_v5 = vadd.f32 %v1769_v1, %v2025_v41  ;;  %v997_v6 = vadd.f32 %v1801_v2, %v2025_v41  ;;  %v520_v7 = vpop.f32.mrb[7].mxu0  ;;  %v648_v8 = vpop.f32.mrb[7].mxu1 }
 0x101   :  { %v963_v11 = vadd.f32 %v2025_v41, %v520_v7  ;;  %v995_v12 = vadd.f32 %v2025_v41, %v648_v8 }
 0x102   :  { %v1533_v13 = vpack.c.bf16 %v965_v5, %v964_v3  ;;  %v1613_v14 = vpack.c.bf16 %v997_v6, %v996_v4 }
 0x103   :  { %v1528_v15 = vpack.c.bf16 %v963_v11, %v962_v9  ;;  %v1608_v16 = vpack.c.bf16 %v995_v12, %v994_v10 }
 0x104   :  { %1677 = vst [vmem:[%s2190_s3 + $0x18] sm:$0xff] %v1533_v13   ;;  %1693 = vst [vmem:[%s2190_s3 + $0x98] sm:$0xff] %v1613_v14  }
 0x105   :  { %1676 = vst [vmem:[%s2190_s3 + $0x10] sm:$0xff] %v1528_v15   ;;  %1692 = vst [vmem:[%s2190_s3 + $0x90] sm:$0xff] %v1608_v16   ;;  %v1772_v17 = vpop.f32.mrb[8].mxu0  ;;  %v1804_v18 = vpop.f32.mrb[8].mxu1 }
 0x106   :  { %v533_v19 = vpop.f32.mrb[9].mxu0  ;;  %v661_v20 = vpop.f32.mrb[9].mxu1  ;;  %v968_v23 = vadd.f32 %v1772_v17, %v2025_v41  ;;  %v1000_v24 = vadd.f32 %v1804_v18, %v2025_v41 }
 0x107   :  { %v1773_v21 = vpop.f32.mrb[10].mxu0  ;;  %v1805_v22 = vpop.f32.mrb[10].mxu1  ;;  %v966_v29 = vadd.f32 %v2025_v41, %v533_v19  ;;  %v998_v30 = vadd.f32 %v2025_v41, %v661_v20 }
 0x108   :  { %v969_v25 = vadd.f32 %v1773_v21, %v2025_v41  ;;  %v1001_v26 = vadd.f32 %v1805_v22, %v2025_v41  ;;  %v536_v27 = vpop.f32.mrb[11].mxu0  ;;  %v664_v28 = vpop.f32.mrb[11].mxu1 }
 0x109   :  { %v967_v31 = vadd.f32 %v2025_v41, %v536_v27  ;;  %v999_v32 = vadd.f32 %v2025_v41, %v664_v28 }
 0x10a   :  { %v1543_v33 = vpack.c.bf16 %v969_v25, %v968_v23  ;;  %v1623_v34 = vpack.c.bf16 %v1001_v26, %v1000_v24 }
 0x10b   :  { %v1538_v35 = vpack.c.bf16 %v967_v31, %v966_v29  ;;  %v1618_v36 = vpack.c.bf16 %v999_v32, %v998_v30 }
 0x10c   :  { %1679 = vst [vmem:[%s2190_s3 + $0x28] sm:$0xff] %v1543_v33   ;;  %1695 = vst [vmem:[%s2190_s3 + $0xa8] sm:$0xff] %v1623_v34  }
 0x10d   :  { %1678 = vst [vmem:[%s2190_s3 + $0x20] sm:$0xff] %v1538_v35   ;;  %1694 = vst [vmem:[%s2190_s3 + $0xa0] sm:$0xff] %v1618_v36   ;;  %v1776_v37 = vpop.f32.mrb[12].mxu0  ;;  %v1808_v38 = vpop.f32.mrb[12].mxu1 }
 0x10e   :  { %v549_v39 = vpop.f32.mrb[13].mxu0  ;;  %v677_v40 = vpop.f32.mrb[13].mxu1  ;;  %v972_v44 = vadd.f32 %v1776_v37, %v2025_v41  ;;  %v1004_v45 = vadd.f32 %v1808_v38, %v2025_v41 }
 0x10f   :  { %v1777_v42 = vpop.f32.mrb[14].mxu0  ;;  %v1809_v43 = vpop.f32.mrb[14].mxu1  ;;  %v970_v50 = vadd.f32 %v2025_v41, %v549_v39  ;;  %v1002_v51 = vadd.f32 %v2025_v41, %v677_v40 }
 0x110   :  { %v973_v46 = vadd.f32 %v1777_v42, %v2025_v41  ;;  %v1005_v47 = vadd.f32 %v1809_v43, %v2025_v41  ;;  %v552_v48 = vpop.f32.mrb[15].mxu0  ;;  %v680_v49 = vpop.f32.mrb[15].mxu1 }
 0x111   :  { %v971_v52 = vadd.f32 %v2025_v41, %v552_v48  ;;  %v1003_v53 = vadd.f32 %v2025_v41, %v680_v49 }
 0x112   :  { %v1553_v54 = vpack.c.bf16 %v973_v46, %v972_v44  ;;  %v1633_v55 = vpack.c.bf16 %v1005_v47, %v1004_v45 }
 0x113   :  { %v1548_v56 = vpack.c.bf16 %v971_v52, %v970_v50  ;;  %v1628_v57 = vpack.c.bf16 %v1003_v53, %v1002_v51 }
 0x114   :  { %1681 = vst [vmem:[%s2190_s3 + $0x38] sm:$0xff] %v1553_v54   ;;  %1697 = vst [vmem:[%s2190_s3 + $0xb8] sm:$0xff] %v1633_v55  }
 0x115   :  { %1680 = vst [vmem:[%s2190_s3 + $0x30] sm:$0xff] %v1548_v56   ;;  %1696 = vst [vmem:[%s2190_s3 + $0xb0] sm:$0xff] %v1628_v57   ;;  %v1780_v58 = vpop.f32.mrb[16].mxu0  ;;  %v1812_v59 = vpop.f32.mrb[16].mxu1 }
 0x116   :  { %v565_v60 = vpop.f32.mrb[17].mxu0  ;;  %v693_v61 = vpop.f32.mrb[17].mxu1  ;;  %v976_v0 = vadd.f32 %v1780_v58, %v2025_v41  ;;  %v1008_v1 = vadd.f32 %v1812_v59, %v2025_v41 }
 0x117   :  { %v1781_v62 = vpop.f32.mrb[18].mxu0  ;;  %v1813_v63 = vpop.f32.mrb[18].mxu1  ;;  %v974_v6 = vadd.f32 %v2025_v41, %v565_v60  ;;  %v1006_v7 = vadd.f32 %v2025_v41, %v693_v61 }
 0x118   :  { %v977_v2 = vadd.f32 %v1781_v62, %v2025_v41  ;;  %v1009_v3 = vadd.f32 %v1813_v63, %v2025_v41  ;;  %v568_v4 = vpop.f32.mrb[19].mxu0  ;;  %v696_v5 = vpop.f32.mrb[19].mxu1 }
 0x119   :  { %v975_v8 = vadd.f32 %v2025_v41, %v568_v4  ;;  %v1007_v9 = vadd.f32 %v2025_v41, %v696_v5 }
 0x11a   :  { %v1563_v10 = vpack.c.bf16 %v977_v2, %v976_v0  ;;  %v1643_v11 = vpack.c.bf16 %v1009_v3, %v1008_v1 }
 0x11b   :  { %v1558_v12 = vpack.c.bf16 %v975_v8, %v974_v6  ;;  %v1638_v13 = vpack.c.bf16 %v1007_v9, %v1006_v7 }
 0x11c   :  { %1683 = vst [vmem:[%s2190_s3 + $0x48] sm:$0xff] %v1563_v10   ;;  %1699 = vst [vmem:[%s2190_s3 + $0xc8] sm:$0xff] %v1643_v11  }
 0x11d   :  { %1682 = vst [vmem:[%s2190_s3 + $0x40] sm:$0xff] %v1558_v12   ;;  %1698 = vst [vmem:[%s2190_s3 + $0xc0] sm:$0xff] %v1638_v13   ;;  %v1784_v14 = vpop.f32.mrb[20].mxu0  ;;  %v1816_v15 = vpop.f32.mrb[20].mxu1 }
 0x11e   :  { %v581_v16 = vpop.f32.mrb[21].mxu0  ;;  %v709_v17 = vpop.f32.mrb[21].mxu1  ;;  %v980_v20 = vadd.f32 %v1784_v14, %v2025_v41  ;;  %v1012_v21 = vadd.f32 %v1816_v15, %v2025_v41 }
 0x11f   :  { %v1785_v18 = vpop.f32.mrb[22].mxu0  ;;  %v1817_v19 = vpop.f32.mrb[22].mxu1  ;;  %v978_v26 = vadd.f32 %v2025_v41, %v581_v16  ;;  %v1010_v27 = vadd.f32 %v2025_v41, %v709_v17 }
 0x120   :  { %v981_v22 = vadd.f32 %v1785_v18, %v2025_v41  ;;  %v1013_v23 = vadd.f32 %v1817_v19, %v2025_v41  ;;  %v584_v24 = vpop.f32.mrb[23].mxu0  ;;  %v712_v25 = vpop.f32.mrb[23].mxu1 }
 0x121   :  { %v979_v28 = vadd.f32 %v2025_v41, %v584_v24  ;;  %v1011_v29 = vadd.f32 %v2025_v41, %v712_v25 }
 0x122   :  { %v1573_v30 = vpack.c.bf16 %v981_v22, %v980_v20  ;;  %v1653_v31 = vpack.c.bf16 %v1013_v23, %v1012_v21 }
 0x123   :  { %v1568_v32 = vpack.c.bf16 %v979_v28, %v978_v26  ;;  %v1648_v33 = vpack.c.bf16 %v1011_v29, %v1010_v27 }
 0x124   :  { %1685 = vst [vmem:[%s2190_s3 + $0x58] sm:$0xff] %v1573_v30   ;;  %1701 = vst [vmem:[%s2190_s3 + $0xd8] sm:$0xff] %v1653_v31  }
 0x125   :  { %1684 = vst [vmem:[%s2190_s3 + $0x50] sm:$0xff] %v1568_v32   ;;  %1700 = vst [vmem:[%s2190_s3 + $0xd0] sm:$0xff] %v1648_v33   ;;  %v1788_v34 = vpop.f32.mrb[24].mxu0  ;;  %v1820_v35 = vpop.f32.mrb[24].mxu1 }
 0x126   :  { %v597_v36 = vpop.f32.mrb[25].mxu0  ;;  %v725_v37 = vpop.f32.mrb[25].mxu1  ;;  %v984_v40 = vadd.f32 %v1788_v34, %v2025_v41  ;;  %v1016_v42 = vadd.f32 %v1820_v35, %v2025_v41 }
 0x127   :  { %v1789_v38 = vpop.f32.mrb[26].mxu0  ;;  %v1821_v39 = vpop.f32.mrb[26].mxu1  ;;  %v982_v47 = vadd.f32 %v2025_v41, %v597_v36  ;;  %v1014_v48 = vadd.f32 %v2025_v41, %v725_v37 }
 0x128   :  { %v985_v43 = vadd.f32 %v1789_v38, %v2025_v41  ;;  %v1017_v44 = vadd.f32 %v1821_v39, %v2025_v41  ;;  %v600_v45 = vpop.f32.mrb[27].mxu0  ;;  %v728_v46 = vpop.f32.mrb[27].mxu1 }
 0x129   :  { %v983_v49 = vadd.f32 %v2025_v41, %v600_v45  ;;  %v1015_v50 = vadd.f32 %v2025_v41, %v728_v46 }
 0x12a   :  { %v1583_v51 = vpack.c.bf16 %v985_v43, %v984_v40  ;;  %v1663_v52 = vpack.c.bf16 %v1017_v44, %v1016_v42 }
 0x12b   :  { %v1578_v53 = vpack.c.bf16 %v983_v49, %v982_v47  ;;  %v1658_v54 = vpack.c.bf16 %v1015_v50, %v1014_v48 }
 0x12c   :  { %1687 = vst [vmem:[%s2190_s3 + $0x68] sm:$0xff] %v1583_v51   ;;  %1703 = vst [vmem:[%s2190_s3 + $0xe8] sm:$0xff] %v1663_v52  }
 0x12d   :  { %1686 = vst [vmem:[%s2190_s3 + $0x60] sm:$0xff] %v1578_v53   ;;  %1702 = vst [vmem:[%s2190_s3 + $0xe0] sm:$0xff] %v1658_v54   ;;  %v1792_v55 = vpop.f32.mrb[28].mxu0  ;;  %v1824_v56 = vpop.f32.mrb[28].mxu1 }
 0x12e   :  { %v613_v57 = vpop.f32.mrb[29].mxu0  ;;  %v741_v58 = vpop.f32.mrb[29].mxu1  ;;  %v988_v61 = vadd.f32 %v1792_v55, %v2025_v41  ;;  %v1020_v62 = vadd.f32 %v1824_v56, %v2025_v41 }
 0x12f   :  { %v1793_v59 = vpop.f32.mrb[30].mxu0  ;;  %v1825_v60 = vpop.f32.mrb[30].mxu1  ;;  %v986_v3 = vadd.f32 %v2025_v41, %v613_v57  ;;  %v1018_v4 = vadd.f32 %v2025_v41, %v741_v58 }
 0x130   :  { %v989_v63 = vadd.f32 %v1793_v59, %v2025_v41  ;;  %v1021_v0 = vadd.f32 %v1825_v60, %v2025_v41  ;;  %v616_v1 = vpop.f32.mrb[31].mxu0  ;;  %v744_v2 = vpop.f32.mrb[31].mxu1 }
 0x131   :  { %v987_v5 = vadd.f32 %v2025_v41, %v616_v1  ;;  %v1019_v6 = vadd.f32 %v2025_v41, %v744_v2 }
 0x132   :  { %v1593_v7 = vpack.c.bf16 %v989_v63, %v988_v61  ;;  %v1673_v8 = vpack.c.bf16 %v1021_v0, %v1020_v62 }
 0x133   :  { %v1588_v9 = vpack.c.bf16 %v987_v5, %v986_v3  ;;  %v1668_v10 = vpack.c.bf16 %v1019_v6, %v1018_v4 }
 0x134   :  { %1689 = vst [vmem:[%s2190_s3 + $0x78] sm:$0xff] %v1593_v7   ;;  %1705 = vst [vmem:[%s2190_s3 + $0xf8] sm:$0xff] %v1673_v8  }
 0x135   :  { %1688 = vst [vmem:[%s2190_s3 + $0x70] sm:$0xff] %v1588_v9   ;;  %1704 = vst [vmem:[%s2190_s3 + $0xf0] sm:$0xff] %v1668_v10  }

// kernel: forward.59
= control target key start
LH: loop header
LB: loop body
LE: loop exit
PB: predicated region body
PF: predicated region fallthrough
CT: control target
= control target key end

     0   :  { %s2950_s1 = inlined_call_operand.vmem [shape: bf16[128,128], index: 1, kind: input, shape index: {}]   ;;  %s2951_s0 = inlined_call_operand.vmem [shape: bf16[512,128], index: 0, kind: input, shape index: {}]   ;;  %s2952_s3 = inlined_call_operand.vmem [shape: bf16[512,128], index: 3, kind: input, shape index: {}]   ;;  %s2953_s2 = inlined_call_operand.vmem [shape: f32[1,128], index: 2, kind: input, shape index: {}]   ;;  %s2954_s4 = inlined_call_operand.vmem [shape: bf16[512,128], index: 4, kind: output, shape index: {}]  }
   0x1   :  { %v2260_v0 = vld [vmem:[%s2950_s1] sm:$0xff]   ;;  %v2261_v1 = vld [vmem:[%s2950_s1 + $0x8] sm:$0xff]   ;;  %v2262_v2 = vld [vmem:[%s2950_s1 + $0x10] sm:$0xff]  }
   0x2   :  { %2164 = vmatprep.subr.bf16.mxu0 %v2260_v0  ;;  %2244 = vmatprep.subr.bf16.mxu1 %v2260_v0  ;;  %v2263_v3 = vld [vmem:[%s2950_s1 + $0x18] sm:$0xff]   ;;  %v2268_v4 = vld [vmem:[%s2951_s0] sm:$0xff]   ;;  %v2265_v7 = vld [vmem:[%s2950_s1 + $0x28] sm:$0xff]  }
   0x3   :  { %2165 = vmatpush3.bf16.msra.mxu0 %v2260_v0  ;;  %2252 = vmatpush3.bf16.msra.mxu1 %v2260_v0  ;;  %v2269_v5 = vld [vmem:[%s2951_s0 + $0x80] sm:$0xff]   ;;  %v2266_v8 = vld [vmem:[%s2950_s1 + $0x30] sm:$0xff]   ;;  %v2267_v9 = vld [vmem:[%s2950_s1 + $0x38] sm:$0xff]  }
   0x4   :  { %2166 = vmatprep.subr.bf16.mxu0 %v2261_v1  ;;  %2245 = vmatprep.subr.bf16.mxu1 %v2261_v1  ;;  %v2264_v6 = vld [vmem:[%s2950_s1 + $0x20] sm:$0xff]   ;;  %v2270_v10 = vld [vmem:[%s2951_s0 + $0x8] sm:$0xff]   ;;  %v2272_v12 = vld [vmem:[%s2951_s0 + $0x10] sm:$0xff]  }
   0x5   :  { %2180 = vmatprep.mubr.bf16.mxu0 %v2268_v4  ;;  %2212 = vmatprep.mubr.bf16.mxu1 %v2269_v5  ;;  %v2271_v11 = vld [vmem:[%s2951_s0 + $0x88] sm:$0xff]   ;;  %v2273_v13 = vld [vmem:[%s2951_s0 + $0x90] sm:$0xff]   ;;  %v2274_v14 = vld [vmem:[%s2951_s0 + $0x18] sm:$0xff]  }
   0x6   :  { %v2275_v15 = vld [vmem:[%s2951_s0 + $0x98] sm:$0xff]   ;;  %v2276_v16 = vld [vmem:[%s2951_s0 + $0x20] sm:$0xff]   ;;  %v2278_v18 = vld [vmem:[%s2951_s0 + $0x28] sm:$0xff]  }
   0x7   :  { %2167 = vmatpush3.bf16.msra.mxu0 %v2261_v1  ;;  %2253 = vmatpush3.bf16.msra.mxu1 %v2261_v1  ;;  %v2277_v17 = vld [vmem:[%s2951_s0 + $0xa0] sm:$0xff]   ;;  %v2279_v19 = vld [vmem:[%s2951_s0 + $0xa8] sm:$0xff]   ;;  %v2280_v20 = vld [vmem:[%s2951_s0 + $0x30] sm:$0xff]  }
   0x8   :  { %2168 = vmatprep.subr.bf16.mxu0 %v2262_v2  ;;  %2246 = vmatprep.subr.bf16.mxu1 %v2262_v2  ;;  %v2281_v21 = vld [vmem:[%s2951_s0 + $0xb0] sm:$0xff]   ;;  %v2282_v22 = vld [vmem:[%s2951_s0 + $0x38] sm:$0xff]   ;;  %v2284_v24 = vld [vmem:[%s2951_s0 + $0x40] sm:$0xff]  }
   0x9   :  { %v2283_v23 = vld [vmem:[%s2951_s0 + $0xb8] sm:$0xff]   ;;  %v2285_v25 = vld [vmem:[%s2951_s0 + $0xc0] sm:$0xff]   ;;  %v2286_v26 = vld [vmem:[%s2951_s0 + $0x48] sm:$0xff]  }
   0xa   :  { %v2287_v27 = vld [vmem:[%s2951_s0 + $0xc8] sm:$0xff]   ;;  %v2288_v28 = vld [vmem:[%s2951_s0 + $0x50] sm:$0xff]   ;;  %v2290_v30 = vld [vmem:[%s2951_s0 + $0x58] sm:$0xff]  }
   0xb   :  { %2169 = vmatpush3.bf16.msra.mxu0 %v2262_v2  ;;  %2254 = vmatpush3.bf16.msra.mxu1 %v2262_v2  ;;  %v2289_v29 = vld [vmem:[%s2951_s0 + $0xd0] sm:$0xff]   ;;  %v2291_v31 = vld [vmem:[%s2951_s0 + $0xd8] sm:$0xff]   ;;  %v2292_v32 = vld [vmem:[%s2951_s0 + $0x60] sm:$0xff]  }
   0xc   :  { %2170 = vmatprep.subr.bf16.mxu0 %v2263_v3  ;;  %2247 = vmatprep.subr.bf16.mxu1 %v2263_v3  ;;  %v2293_v33 = vld [vmem:[%s2951_s0 + $0xe0] sm:$0xff]   ;;  %v2294_v34 = vld [vmem:[%s2951_s0 + $0x68] sm:$0xff]   ;;  %v2296_v36 = vld [vmem:[%s2951_s0 + $0x70] sm:$0xff]  }
   0xd   :  { %v2295_v35 = vld [vmem:[%s2951_s0 + $0xe8] sm:$0xff]   ;;  %v2297_v37 = vld [vmem:[%s2951_s0 + $0xf0] sm:$0xff]   ;;  %v2298_v38 = vld [vmem:[%s2951_s0 + $0x78] sm:$0xff]  }
   0xe   :  { %v2299_v39 = vld [vmem:[%s2951_s0 + $0xf8] sm:$0xff]   ;;  %v2448_v40 = vld [vmem:[%s2952_s3 + $0x8] sm:$0xff]   ;;  %v2458_v42 = vld [vmem:[%s2952_s3] sm:$0xff]  }
   0xf   :  { %2171 = vmatpush3.bf16.msra.mxu0 %v2263_v3  ;;  %2255 = vmatpush3.bf16.msra.mxu1 %v2263_v3  ;;  %v2453_v41 = vld [vmem:[%s2952_s3 + $0x88] sm:$0xff]   ;;  %v2463_v43 = vld [vmem:[%s2952_s3 + $0x80] sm:$0xff]   ;;  %v2468_v44 = vld [vmem:[%s2952_s3 + $0x18] sm:$0xff]   ;;  %v1780_v48 = vunpack.c.l.bf16 %v2448_v40  ;;  %v1776_v50 = vunpack.c.l.bf16 %v2458_v42  ;;  %v1781_v53 = vunpack.c.h.bf16 %v2448_v40  ;;  %v1777_v55 = vunpack.c.h.bf16 %v2458_v42 }
  0x10   :  { %2172 = vmatprep.subr.bf16.mxu0 %v2264_v6  ;;  %2248 = vmatprep.subr.bf16.mxu1 %v2264_v6  ;;  %v2473_v45 = vld [vmem:[%s2952_s3 + $0x98] sm:$0xff]   ;;  %v2478_v46 = vld [vmem:[%s2952_s3 + $0x10] sm:$0xff]   ;;  %v1844_v49 = vunpack.c.l.bf16 %v2453_v41  ;;  %v1840_v51 = vunpack.c.l.bf16 %v2463_v43  ;;  %v2492_v52 = vld [vmem:[%s2952_s3 + $0x28] sm:$0xff]   ;;  %v1845_v54 = vunpack.c.h.bf16 %v2453_v41  ;;  %v1841_v56 = vunpack.c.h.bf16 %v2463_v43 }
  0x11   :  { %v2483_v47 = vld [vmem:[%s2952_s3 + $0x90] sm:$0xff]   ;;  %v2501_v57 = vld [vmem:[%s2952_s3 + $0xa8] sm:$0xff]   ;;  %v2506_v58 = vld [vmem:[%s2952_s3 + $0x20] sm:$0xff]   ;;  %v1788_v60 = vunpack.c.l.bf16 %v2468_v44  ;;  %v1852_v61 = vunpack.c.l.bf16 %v2473_v45  ;;  %v1784_v62 = vunpack.c.l.bf16 %v2478_v46  ;;  %v1789_v1 = vunpack.c.h.bf16 %v2468_v44 }
  0x12   :  { %v2511_v59 = vld [vmem:[%s2952_s3 + $0xa0] sm:$0xff]   ;;  %v1848_v63 = vunpack.c.l.bf16 %v2483_v47  ;;  %v2520_v0 = vld [vmem:[%s2952_s3 + $0x38] sm:$0xff]   ;;  %v1853_v2 = vunpack.c.h.bf16 %v2473_v45  ;;  %v1785_v3 = vunpack.c.h.bf16 %v2478_v46  ;;  %v1849_v4 = vunpack.c.h.bf16 %v2483_v47 }
  0x13   :  { %2173 = vmatpush3.bf16.msra.mxu0 %v2264_v6  ;;  %2256 = vmatpush3.bf16.msra.mxu1 %v2264_v6  ;;  %v2529_v5 = vld [vmem:[%s2952_s3 + $0xb8] sm:$0xff]   ;;  %v2534_v6 = vld [vmem:[%s2952_s3 + $0x30] sm:$0xff]  }
  0x14   :  { %2174 = vmatprep.subr.bf16.mxu0 %v2265_v7  ;;  %2249 = vmatprep.subr.bf16.mxu1 %v2265_v7 }
  0x17   :  { %2175 = vmatpush3.bf16.msra.mxu0 %v2265_v7  ;;  %2257 = vmatpush3.bf16.msra.mxu1 %v2265_v7  ;;  %v2539_v7 = vld [vmem:[%s2952_s3 + $0xb0] sm:$0xff]  }
  0x18   :  { %2176 = vmatprep.subr.bf16.mxu0 %v2266_v8  ;;  %2250 = vmatprep.subr.bf16.mxu1 %v2266_v8 }
  0x1b   :  { %2177 = vmatpush3.bf16.msra.mxu0 %v2266_v8  ;;  %2258 = vmatpush3.bf16.msra.mxu1 %v2266_v8  ;;  %v1796_v8 = vunpack.c.l.bf16 %v2492_v52 }
  0x1c   :  { %2178 = vmatprep.subr.bf16.mxu0 %v2267_v9  ;;  %2251 = vmatprep.subr.bf16.mxu1 %v2267_v9 }
  0x1f   :  { %2179 = vmatpush3.bf16.msra.mxu0 %v2267_v9  ;;  %2259 = vmatpush3.bf16.msra.mxu1 %v2267_v9  ;;  %v1860_v9 = vunpack.c.l.bf16 %v2501_v57 }
  0x22   :  { %2181 = vmatmul.mubr.bf16.vlgmr.msra.gmra.mrb[0].mxu0 %v2270_v10  ;;  %2213 = vmatmul.mubr.bf16.vlgmr.msra.gmra.mrb[0].mxu1 %v2271_v11  ;;  %v1792_v10 = vunpack.c.l.bf16 %v2506_v58  ;;  %v1856_v11 = vunpack.c.l.bf16 %v2511_v59 }
  0x23   :  { %2184 = vmatprep.mubr.bf16.mxu0 %v2272_v12  ;;  %2216 = vmatprep.mubr.bf16.mxu1 %v2273_v13  ;;  %v2548_v12 = vld [vmem:[%s2953_s2] ss:$0 sm:$0xff]  ;;  %v1797_v13 = vunpack.c.h.bf16 %v2492_v52 }
  0x2a   :  { %2185 = vmatmul.mubr.bf16.gmra.mrb[4].mxu0 %v2274_v14  ;;  %2217 = vmatmul.mubr.bf16.gmra.mrb[4].mxu1 %v2275_v15  ;;  %v1861_v14 = vunpack.c.h.bf16 %v2501_v57  ;;  %v1793_v15 = vunpack.c.h.bf16 %v2506_v58 }
  0x2b   :  { %2188 = vmatprep.mubr.bf16.mxu0 %v2276_v16  ;;  %2220 = vmatprep.mubr.bf16.mxu1 %v2277_v17  ;;  %v1857_v16 = vunpack.c.h.bf16 %v2511_v59  ;;  %v2557_v17 = vld [vmem:[%s2952_s3 + $0x48] sm:$0xff]  }
  0x32   :  { %2189 = vmatmul.mubr.bf16.gmra.mrb[8].mxu0 %v2278_v18  ;;  %2221 = vmatmul.mubr.bf16.gmra.mrb[8].mxu1 %v2279_v19  ;;  %v2562_v18 = vld [vmem:[%s2952_s3 + $0xc8] sm:$0xff]   ;;  %v1804_v19 = vunpack.c.l.bf16 %v2520_v0 }
  0x33   :  { %2192 = vmatprep.mubr.bf16.mxu0 %v2280_v20  ;;  %2224 = vmatprep.mubr.bf16.mxu1 %v2281_v21  ;;  %v1868_v20 = vunpack.c.l.bf16 %v2529_v5 }
  0x3a   :  { %2193 = vmatmul.mubr.bf16.gmra.mrb[12].mxu0 %v2282_v22  ;;  %2225 = vmatmul.mubr.bf16.gmra.mrb[12].mxu1 %v2283_v23  ;;  %v2571_v23 = vld [vmem:[%s2952_s3 + $0x40] sm:$0xff]  }
  0x3b   :  { %2196 = vmatprep.mubr.bf16.mxu0 %v2284_v24  ;;  %2228 = vmatprep.mubr.bf16.mxu1 %v2285_v25  ;;  %v2576_v24 = vld [vmem:[%s2952_s3 + $0xc0] sm:$0xff]  }
  0x42   :  { %2197 = vmatmul.mubr.bf16.gmra.mrb[16].mxu0 %v2286_v26  ;;  %2229 = vmatmul.mubr.bf16.gmra.mrb[16].mxu1 %v2287_v27 }
  0x43   :  { %2200 = vmatprep.mubr.bf16.mxu0 %v2288_v28  ;;  %2232 = vmatprep.mubr.bf16.mxu1 %v2289_v29 }
  0x4a   :  { %2201 = vmatmul.mubr.bf16.gmra.mrb[20].mxu0 %v2290_v30  ;;  %2233 = vmatmul.mubr.bf16.gmra.mrb[20].mxu1 %v2291_v31  ;;  %v1872_v30 = vunpack.c.l.bf16 %v2576_v24 }
  0x4b   :  { %2204 = vmatprep.mubr.bf16.mxu0 %v2292_v32  ;;  %2236 = vmatprep.mubr.bf16.mxu1 %v2293_v33 }
  0x52   :  { %2205 = vmatmul.mubr.bf16.gmra.mrb[24].mxu0 %v2294_v34  ;;  %2237 = vmatmul.mubr.bf16.gmra.mrb[24].mxu1 %v2295_v35 }
  0x53   :  { %2208 = vmatprep.mubr.bf16.mxu0 %v2296_v36  ;;  %2240 = vmatprep.mubr.bf16.mxu1 %v2297_v37 }
  0x5a   :  { %2209 = vmatmul.mubr.bf16.gmra.mrb[28].mxu0 %v2298_v38  ;;  %2241 = vmatmul.mubr.bf16.gmra.mrb[28].mxu1 %v2299_v39 }
  0xf5   :  { %v2182_v25 = vpop.f32.mrb[0].mxu0  ;;  %v2214_v26 = vpop.f32.mrb[0].mxu1 }
  0xf6   :  { %v963_v31 = vadd.f32 %v2182_v25, %v2548_v12  ;;  %v995_v32 = vadd.f32 %v2214_v26, %v2548_v12  ;;  %v504_v33 = vpop.f32.mrb[1].mxu0  ;;  %v632_v34 = vpop.f32.mrb[1].mxu1 }
  0xf7   :  { %v961_v37 = vadd.f32 %v2548_v12, %v504_v33  ;;  %v993_v38 = vadd.f32 %v2548_v12, %v632_v34  ;;  %v2183_v39 = vpop.f32.mrb[2].mxu0  ;;  %v2215_v28 = vpop.f32.mrb[2].mxu1 }
  0xf8   :  { %v1155_v27 = vadd.f32 %v1780_v48, %v963_v31  ;;  %v1187_v25 = vadd.f32 %v1844_v49, %v995_v32  ;;  %v964_v26 = vadd.f32 %v2183_v39, %v2548_v12  ;;  %v996_v22 = vadd.f32 %v2215_v28, %v2548_v12  ;;  %v507_v21 = vpop.f32.mrb[3].mxu0  ;;  %v635_v35 = vpop.f32.mrb[3].mxu1 }
  0xf9   :  { %v1153_v36 = vadd.f32 %v1776_v50, %v961_v37  ;;  %v1185_v33 = vadd.f32 %v1840_v51, %v993_v38  ;;  %v962_v34 = vadd.f32 %v2548_v12, %v507_v21  ;;  %v994_v29 = vadd.f32 %v2548_v12, %v635_v35 }
  0xfa   :  { %v1156_v48 = vadd.f32 %v1781_v53, %v964_v26  ;;  %v1188_v49 = vadd.f32 %v1845_v54, %v996_v22  ;;  %v1813_v28 = vunpack.c.h.bf16 %v2557_v17  ;;  %v1809_v21 = vunpack.c.h.bf16 %v2571_v23 }
  0xfb   :  { %v1154_v50 = vadd.f32 %v1777_v55, %v962_v34  ;;  %v1186_v51 = vadd.f32 %v1841_v56, %v994_v29  ;;  %v1219_v35 = vmax.f32 %v1155_v27, 0.0  ;;  %v1251_v40 = vmax.f32 %v1187_v25, 0.0 }
  0xfc   :  { %v1220_v53 = vmax.f32 %v1156_v48, 0.0  ;;  %v1252_v37 = vmax.f32 %v1188_v49, 0.0  ;;  %v1217_v41 = vmax.f32 %v1153_v36, 0.0  ;;  %v1249_v54 = vmax.f32 %v1185_v33, 0.0  ;;  %v2617_v48 = vld [vmem:[%s2952_s3 + $0x58] sm:$0xff]  }
  0xfd   :  { %v1218_v22 = vmax.f32 %v1154_v50, 0.0  ;;  %v1250_v38 = vmax.f32 %v1186_v51, 0.0  ;;  %v2186_v39 = vpop.f32.mrb[4].mxu0  ;;  %v2218_v26 = vpop.f32.mrb[4].mxu1  ;;  %v2622_v49 = vld [vmem:[%s2952_s3 + $0xd8] sm:$0xff]  }
  0xfe   :  { %v1910_v31 = vpack.c.bf16 %v1220_v53, %v1219_v35  ;;  %v1990_v42 = vpack.c.bf16 %v1252_v37, %v1251_v40  ;;  %v967_v55 = vadd.f32 %v2186_v39, %v2548_v12  ;;  %v999_v43 = vadd.f32 %v2218_v26, %v2548_v12  ;;  %v520_v56 = vpop.f32.mrb[5].mxu0  ;;  %v648_v29 = vpop.f32.mrb[5].mxu1 }
  0xff   :  { %v1905_v34 = vpack.c.bf16 %v1218_v22, %v1217_v41  ;;  %v1985_v32 = vpack.c.bf16 %v1250_v38, %v1249_v54  ;;  %v965_v27 = vadd.f32 %v2548_v12, %v520_v56  ;;  %v997_v25 = vadd.f32 %v2548_v12, %v648_v29  ;;  %v2187_v36 = vpop.f32.mrb[6].mxu0  ;;  %v2219_v33 = vpop.f32.mrb[6].mxu1  ;;  %v2644_v41 = vld [vmem:[%s2952_s3 + $0xd0] sm:$0xff]  }
 0x100   :  { %2093 = vst [vmem:[%s2954_s4 + $0x8] sm:$0xff] %v1910_v31   ;;  %2109 = vst [vmem:[%s2954_s4 + $0x88] sm:$0xff] %v1990_v42   ;;  %v1159_v50 = vadd.f32 %v1788_v60, %v967_v55  ;;  %v1191_v51 = vadd.f32 %v1852_v61, %v999_v43  ;;  %v968_v35 = vadd.f32 %v2187_v36, %v2548_v12  ;;  %v523_v53 = vpop.f32.mrb[7].mxu0  ;;  %v651_v37 = vpop.f32.mrb[7].mxu1  ;;  %v2639_v31 = vld [vmem:[%s2952_s3 + $0x50] sm:$0xff]   ;;  %v1820_v26 = vunpack.c.l.bf16 %v2617_v48 }
 0x101   :  { %v1000_v40 = vadd.f32 %v2219_v33, %v2548_v12  ;;  %1906 = vst [vmem:[%s2954_s4] sm:$0xff] %v1905_v34   ;;  %2108 = vst [vmem:[%s2954_s4 + $0x80] sm:$0xff] %v1985_v32   ;;  %v1157_v60 = vadd.f32 %v1784_v62, %v965_v27  ;;  %v1189_v61 = vadd.f32 %v1848_v63, %v997_v25  ;;  %v1884_v32 = vunpack.c.l.bf16 %v2622_v49 }
 0x102   :  { %v966_v54 = vadd.f32 %v2548_v12, %v523_v53  ;;  %v998_v22 = vadd.f32 %v2548_v12, %v651_v37  ;;  %v1160_v38 = vadd.f32 %v1789_v1, %v968_v35  ;;  %v1816_v42 = vunpack.c.l.bf16 %v2639_v31 }
 0x103   :  { %v1192_v39 = vadd.f32 %v1853_v2, %v1000_v40  ;;  %v1880_v55 = vunpack.c.l.bf16 %v2644_v41  ;;  %v1223_v43 = vmax.f32 %v1159_v50, 0.0  ;;  %v1255_v44 = vmax.f32 %v1191_v51, 0.0 }
 0x104   :  { %v1158_v62 = vadd.f32 %v1785_v3, %v966_v54  ;;  %v1190_v63 = vadd.f32 %v1849_v4, %v998_v22  ;;  %v1224_v1 = vmax.f32 %v1160_v38, 0.0  ;;  %v1221_v45 = vmax.f32 %v1157_v60, 0.0 }
 0x105   :  { %v1256_v56 = vmax.f32 %v1192_v39, 0.0  ;;  %v1253_v2 = vmax.f32 %v1189_v61, 0.0  ;;  %v2190_v27 = vpop.f32.mrb[8].mxu0  ;;  %v2222_v25 = vpop.f32.mrb[8].mxu1 }
 0x106   :  { %v1222_v29 = vmax.f32 %v1158_v62, 0.0  ;;  %v1254_v34 = vmax.f32 %v1190_v63, 0.0  ;;  %v1920_v36 = vpack.c.bf16 %v1224_v1, %v1223_v43  ;;  %v971_v3 = vadd.f32 %v2190_v27, %v2548_v12  ;;  %v536_v4 = vpop.f32.mrb[9].mxu0  ;;  %v664_v33 = vpop.f32.mrb[9].mxu1 }
 0x107   :  { %v2000_v46 = vpack.c.bf16 %v1256_v56, %v1255_v44  ;;  %v1003_v47 = vadd.f32 %v2222_v25, %v2548_v12  ;;  %v969_v50 = vadd.f32 %v2548_v12, %v536_v4  ;;  %v1001_v51 = vadd.f32 %v2548_v12, %v664_v33  ;;  %v2191_v53 = vpop.f32.mrb[10].mxu0  ;;  %v2223_v37 = vpop.f32.mrb[10].mxu1 }
 0x108   :  { %v1915_v35 = vpack.c.bf16 %v1222_v29, %v1221_v45  ;;  %v1995_v40 = vpack.c.bf16 %v1254_v34, %v1253_v2  ;;  %2095 = vst [vmem:[%s2954_s4 + $0x18] sm:$0xff] %v1920_v36   ;;  %v1163_v60 = vadd.f32 %v1796_v8, %v971_v3  ;;  %v972_v54 = vadd.f32 %v2191_v53, %v2548_v12  ;;  %v539_v38 = vpop.f32.mrb[11].mxu0  ;;  %v667_v39 = vpop.f32.mrb[11].mxu1  ;;  %v2717_v53 = vld [vmem:[%s2952_s3 + $0x68] sm:$0xff]  }
 0x109   :  { %2111 = vst [vmem:[%s2954_s4 + $0x98] sm:$0xff] %v2000_v46   ;;  %v1195_v61 = vadd.f32 %v1860_v9, %v1003_v47  ;;  %v1004_v22 = vadd.f32 %v2223_v37, %v2548_v12  ;;  %v1161_v8 = vadd.f32 %v1792_v10, %v969_v50  ;;  %v1193_v9 = vadd.f32 %v1856_v11, %v1001_v51  ;;  %v2722_v37 = vld [vmem:[%s2952_s3 + $0xe8] sm:$0xff]  }
 0x10a   :  { %2094 = vst [vmem:[%s2954_s4 + $0x10] sm:$0xff] %v1915_v35   ;;  %2110 = vst [vmem:[%s2954_s4 + $0x90] sm:$0xff] %v1995_v40   ;;  %v970_v62 = vadd.f32 %v2548_v12, %v539_v38  ;;  %v1002_v63 = vadd.f32 %v2548_v12, %v667_v39  ;;  %v1164_v43 = vadd.f32 %v1797_v13, %v972_v54  ;;  %v1821_v1 = vunpack.c.h.bf16 %v2617_v48 }
 0x10b   :  { %v1196_v44 = vadd.f32 %v1861_v14, %v1004_v22  ;;  %v1885_v56 = vunpack.c.h.bf16 %v2622_v49  ;;  %v1817_v45 = vunpack.c.h.bf16 %v2639_v31  ;;  %v1881_v2 = vunpack.c.h.bf16 %v2644_v41 }
 0x10c   :  { %v1162_v10 = vadd.f32 %v1793_v15, %v970_v62  ;;  %v1194_v11 = vadd.f32 %v1857_v16, %v1002_v63  ;;  %v1227_v29 = vmax.f32 %v1163_v60, 0.0  ;;  %v1259_v52 = vmax.f32 %v1195_v61, 0.0 }
 0x10d   :  { %v1228_v13 = vmax.f32 %v1164_v43, 0.0  ;;  %v1260_v34 = vmax.f32 %v1196_v44, 0.0  ;;  %v1225_v57 = vmax.f32 %v1161_v8, 0.0  ;;  %v1257_v14 = vmax.f32 %v1193_v9, 0.0  ;;  %v2194_v36 = vpop.f32.mrb[12].mxu0  ;;  %v2226_v46 = vpop.f32.mrb[12].mxu1 }
 0x10e   :  { %v1226_v27 = vmax.f32 %v1162_v10, 0.0  ;;  %v1258_v25 = vmax.f32 %v1194_v11, 0.0  ;;  %v975_v15 = vadd.f32 %v2194_v36, %v2548_v12  ;;  %v1007_v59 = vadd.f32 %v2226_v46, %v2548_v12  ;;  %v552_v16 = vpop.f32.mrb[13].mxu0  ;;  %v680_v47 = vpop.f32.mrb[13].mxu1  ;;  %v2739_v8 = vld [vmem:[%s2952_s3 + $0x60] sm:$0xff]  }
 0x10f   :  { %v1930_v3 = vpack.c.bf16 %v1228_v13, %v1227_v29  ;;  %v2010_v58 = vpack.c.bf16 %v1260_v34, %v1259_v52  ;;  %v973_v35 = vadd.f32 %v2548_v12, %v552_v16  ;;  %v1005_v40 = vadd.f32 %v2548_v12, %v680_v47  ;;  %v2195_v50 = vpop.f32.mrb[14].mxu0  ;;  %v2227_v51 = vpop.f32.mrb[14].mxu1  ;;  %v2744_v9 = vld [vmem:[%s2952_s3 + $0xe0] sm:$0xff]  }
 0x110   :  { %v1925_v4 = vpack.c.bf16 %v1226_v27, %v1225_v57  ;;  %v2005_v33 = vpack.c.bf16 %v1258_v25, %v1257_v14  ;;  %v1167_v60 = vadd.f32 %v1804_v19, %v975_v15  ;;  %v1199_v61 = vadd.f32 %v1868_v20, %v1007_v59  ;;  %v555_v38 = vpop.f32.mrb[15].mxu0  ;;  %v683_v39 = vpop.f32.mrb[15].mxu1 }
 0x111   :  { %2097 = vst [vmem:[%s2954_s4 + $0x28] sm:$0xff] %v1930_v3   ;;  %2113 = vst [vmem:[%s2954_s4 + $0xa8] sm:$0xff] %v2010_v58   ;;  %v976_v54 = vadd.f32 %v2195_v50, %v2548_v12  ;;  %v1008_v22 = vadd.f32 %v2227_v51, %v2548_v12  ;;  %v2955_v19 = vunpack.c.l.bf16 %v2534_v6  ;;  %v2956_v62 = vunpack.c.l.bf16 %v2539_v7 }
 0x112   :  { %2096 = vst [vmem:[%s2954_s4 + $0x20] sm:$0xff] %v1925_v4   ;;  %2112 = vst [vmem:[%s2954_s4 + $0xa0] sm:$0xff] %v2005_v33   ;;  %v974_v43 = vadd.f32 %v2548_v12, %v555_v38  ;;  %v1006_v44 = vadd.f32 %v2548_v12, %v683_v39  ;;  %v2957_v10 = vunpack.c.h.bf16 %v2520_v0  ;;  %v2958_v29 = vunpack.c.h.bf16 %v2529_v5 }
 0x113   :  { %v1165_v20 = vadd.f32 %v2955_v19, %v973_v35  ;;  %v1197_v63 = vadd.f32 %v2956_v62, %v1005_v40  ;;  %v1828_v13 = vunpack.c.l.bf16 %v2717_v53  ;;  %v1892_v34 = vunpack.c.l.bf16 %v2722_v37 }
 0x114   :  { %v1168_v11 = vadd.f32 %v2957_v10, %v976_v54  ;;  %v1200_v52 = vadd.f32 %v2958_v29, %v1008_v22  ;;  %v2959_v57 = vunpack.c.h.bf16 %v2534_v6  ;;  %v2960_v27 = vunpack.c.h.bf16 %v2539_v7 }
 0x115   :  { %v1824_v36 = vunpack.c.l.bf16 %v2739_v8  ;;  %v1888_v46 = vunpack.c.l.bf16 %v2744_v9  ;;  %v1231_v3 = vmax.f32 %v1167_v60, 0.0  ;;  %v1263_v0 = vmax.f32 %v1199_v61, 0.0  ;;  %v2198_v4 = vpop.f32.mrb[16].mxu0  ;;  %v2230_v33 = vpop.f32.mrb[16].mxu1 }
 0x116   :  { %v1166_v14 = vadd.f32 %v2959_v57, %v974_v43  ;;  %v1198_v25 = vadd.f32 %v2960_v27, %v1006_v44  ;;  %v1232_v58 = vmax.f32 %v1168_v11, 0.0  ;;  %v1264_v15 = vmax.f32 %v1200_v52, 0.0  ;;  %v568_v50 = vpop.f32.mrb[17].mxu0  ;;  %v696_v51 = vpop.f32.mrb[17].mxu1 }
 0x117   :  { %v1229_v5 = vmax.f32 %v1165_v20, 0.0  ;;  %v1261_v59 = vmax.f32 %v1197_v63, 0.0  ;;  %v979_v40 = vadd.f32 %v2198_v4, %v2548_v12  ;;  %v1011_v7 = vadd.f32 %v2230_v33, %v2548_v12  ;;  %v2199_v38 = vpop.f32.mrb[18].mxu0  ;;  %v2231_v39 = vpop.f32.mrb[18].mxu1 }
 0x118   :  { %v1230_v16 = vmax.f32 %v1166_v14, 0.0  ;;  %v1262_v47 = vmax.f32 %v1198_v25, 0.0  ;;  %v1940_v35 = vpack.c.bf16 %v1232_v58, %v1231_v3  ;;  %v2020_v6 = vpack.c.bf16 %v1264_v15, %v1263_v0  ;;  %v571_v10 = vpop.f32.mrb[19].mxu0  ;;  %v699_v11 = vpop.f32.mrb[19].mxu1 }
 0x119   :  { %v977_v60 = vadd.f32 %v2548_v12, %v568_v50  ;;  %v1009_v61 = vadd.f32 %v2548_v12, %v696_v51  ;;  %v2961_v19 = vunpack.c.l.bf16 %v2557_v17  ;;  %v2962_v62 = vunpack.c.l.bf16 %v2562_v18 }
 0x11a   :  { %v1935_v54 = vpack.c.bf16 %v1230_v16, %v1229_v5  ;;  %v2015_v22 = vpack.c.bf16 %v1262_v47, %v1261_v59  ;;  %2099 = vst [vmem:[%s2954_s4 + $0x38] sm:$0xff] %v1940_v35   ;;  %2115 = vst [vmem:[%s2954_s4 + $0xb8] sm:$0xff] %v2020_v6   ;;  %v980_v43 = vadd.f32 %v2199_v38, %v2548_v12  ;;  %v2963_v29 = vunpack.c.l.bf16 %v2571_v23 }
 0x11b   :  { %v1171_v20 = vadd.f32 %v2961_v19, %v979_v40  ;;  %v1203_v63 = vadd.f32 %v2962_v62, %v1011_v7  ;;  %v1012_v44 = vadd.f32 %v2231_v39, %v2548_v12  ;;  %v1201_v57 = vadd.f32 %v1872_v30, %v1009_v61  ;;  %v2817_v62 = vld [vmem:[%s2952_s3 + $0x78] sm:$0xff]  }
 0x11c   :  { %2098 = vst [vmem:[%s2954_s4 + $0x30] sm:$0xff] %v1935_v54   ;;  %2114 = vst [vmem:[%s2954_s4 + $0xb0] sm:$0xff] %v2015_v22   ;;  %v1169_v52 = vadd.f32 %v2963_v29, %v977_v60  ;;  %v978_v14 = vadd.f32 %v2548_v12, %v571_v10  ;;  %v1010_v27 = vadd.f32 %v2548_v12, %v699_v11  ;;  %v2964_v3 = vunpack.c.h.bf16 %v2562_v18 }
 0x11d   :  { %v1172_v25 = vadd.f32 %v1813_v28, %v980_v43  ;;  %v1829_v58 = vunpack.c.h.bf16 %v2717_v53  ;;  %v1893_v15 = vunpack.c.h.bf16 %v2722_v37  ;;  %v2965_v59 = vunpack.c.h.bf16 %v2576_v24  ;;  %v2202_v7 = vpop.f32.mrb[20].mxu0  ;;  %v2234_v50 = vpop.f32.mrb[20].mxu1 }
 0x11e   :  { %v1204_v0 = vadd.f32 %v2964_v3, %v1012_v44  ;;  %v1170_v5 = vadd.f32 %v1809_v21, %v978_v14  ;;  %v1825_v16 = vunpack.c.h.bf16 %v2739_v8  ;;  %v1889_v47 = vunpack.c.h.bf16 %v2744_v9  ;;  %v584_v54 = vpop.f32.mrb[21].mxu0  ;;  %v712_v22 = vpop.f32.mrb[21].mxu1  ;;  %v2844_v14 = vld [vmem:[%s2952_s3 + $0xf0] sm:$0xff]  }
 0x11f   :  { %v1202_v30 = vadd.f32 %v2965_v59, %v1010_v27  ;;  %v1235_v4 = vmax.f32 %v1171_v20, 0.0  ;;  %v1267_v17 = vmax.f32 %v1203_v63, 0.0  ;;  %v1236_v28 = vmax.f32 %v1172_v25, 0.0  ;;  %v2203_v19 = vpop.f32.mrb[22].mxu0  ;;  %v2235_v20 = vpop.f32.mrb[22].mxu1  ;;  %v2822_v63 = vld [vmem:[%s2952_s3 + $0xf8] sm:$0xff]  }
 0x120   :  { %v1268_v33 = vmax.f32 %v1204_v0, 0.0  ;;  %v1233_v18 = vmax.f32 %v1169_v52, 0.0  ;;  %v1265_v35 = vmax.f32 %v1201_v57, 0.0  ;;  %v1234_v6 = vmax.f32 %v1170_v5, 0.0  ;;  %v587_v29 = vpop.f32.mrb[23].mxu0  ;;  %v715_v52 = vpop.f32.mrb[23].mxu1 }
 0x121   :  { %v1266_v40 = vmax.f32 %v1202_v30, 0.0  ;;  %v1950_v51 = vpack.c.bf16 %v1236_v28, %v1235_v4  ;;  %v983_v21 = vadd.f32 %v2202_v7, %v2548_v12  ;;  %v1015_v24 = vadd.f32 %v2234_v50, %v2548_v12  ;;  %v2839_v57 = vld [vmem:[%s2952_s3 + $0x70] sm:$0xff]  }
 0x122   :  { %v2030_v23 = vpack.c.bf16 %v1268_v33, %v1267_v17  ;;  %v1945_v60 = vpack.c.bf16 %v1234_v6, %v1233_v18  ;;  %v981_v38 = vadd.f32 %v2548_v12, %v584_v54  ;;  %v1013_v39 = vadd.f32 %v2548_v12, %v712_v22 }
 0x123   :  { %v2025_v61 = vpack.c.bf16 %v1266_v40, %v1265_v35  ;;  %2101 = vst [vmem:[%s2954_s4 + $0x48] sm:$0xff] %v1950_v51   ;;  %v1175_v43 = vadd.f32 %v1820_v26, %v983_v21  ;;  %v1207_v44 = vadd.f32 %v1884_v32, %v1015_v24  ;;  %v984_v10 = vadd.f32 %v2203_v19, %v2548_v12 }
 0x124   :  { %2117 = vst [vmem:[%s2954_s4 + $0xc8] sm:$0xff] %v2030_v23   ;;  %v1016_v11 = vadd.f32 %v2235_v20, %v2548_v12  ;;  %2100 = vst [vmem:[%s2954_s4 + $0x40] sm:$0xff] %v1945_v60   ;;  %v1173_v26 = vadd.f32 %v1816_v42, %v981_v38  ;;  %v1205_v32 = vadd.f32 %v1880_v55, %v1013_v39  ;;  %v1836_v5 = vunpack.c.l.bf16 %v2817_v62 }
 0x125   :  { %2116 = vst [vmem:[%s2954_s4 + $0xc0] sm:$0xff] %v2025_v61   ;;  %v982_v27 = vadd.f32 %v2548_v12, %v587_v29  ;;  %v1014_v25 = vadd.f32 %v2548_v12, %v715_v52  ;;  %v1176_v3 = vadd.f32 %v1821_v1, %v984_v10  ;;  %v1900_v59 = vunpack.c.l.bf16 %v2822_v63  ;;  %v2206_v35 = vpop.f32.mrb[24].mxu0  ;;  %v2238_v6 = vpop.f32.mrb[24].mxu1 }
 0x126   :  { %v1208_v0 = vadd.f32 %v1885_v56, %v1016_v11  ;;  %v1832_v30 = vunpack.c.l.bf16 %v2839_v57  ;;  %v1896_v4 = vunpack.c.l.bf16 %v2844_v14  ;;  %v1239_v17 = vmax.f32 %v1175_v43, 0.0  ;;  %v728_v7 = vpop.f32.mrb[25].mxu1 }
 0x127   :  { %v1174_v42 = vadd.f32 %v1817_v45, %v982_v27  ;;  %v1206_v55 = vadd.f32 %v1881_v2, %v1014_v25  ;;  %v1271_v48 = vmax.f32 %v1207_v44, 0.0  ;;  %v1240_v1 = vmax.f32 %v1176_v3, 0.0  ;;  %v600_v2 = vpop.f32.mrb[25].mxu0  ;;  %v2239_v54 = vpop.f32.mrb[26].mxu1 }
 0x128   :  { %v1272_v28 = vmax.f32 %v1208_v0, 0.0  ;;  %v1237_v49 = vmax.f32 %v1173_v26, 0.0  ;;  %v1269_v56 = vmax.f32 %v1205_v32, 0.0  ;;  %v987_v45 = vadd.f32 %v2206_v35, %v2548_v12  ;;  %v2207_v24 = vpop.f32.mrb[26].mxu0  ;;  %v731_v19 = vpop.f32.mrb[27].mxu1 }
 0x129   :  { %v1238_v33 = vmax.f32 %v1174_v42, 0.0  ;;  %v1270_v18 = vmax.f32 %v1206_v55, 0.0  ;;  %v1960_v40 = vpack.c.bf16 %v1240_v1, %v1239_v17  ;;  %v1019_v41 = vadd.f32 %v2238_v6, %v2548_v12  ;;  %v603_v39 = vpop.f32.mrb[27].mxu0 }
 0x12a   :  { %v2040_v31 = vpack.c.bf16 %v1272_v28, %v1271_v48  ;;  %v985_v23 = vadd.f32 %v2548_v12, %v600_v2  ;;  %v1017_v21 = vadd.f32 %v2548_v12, %v728_v7  ;;  %v1179_v22 = vadd.f32 %v1828_v13, %v987_v45 }
 0x12b   :  { %v1955_v50 = vpack.c.bf16 %v1238_v33, %v1237_v49  ;;  %v2035_v51 = vpack.c.bf16 %v1270_v18, %v1269_v56  ;;  %2103 = vst [vmem:[%s2954_s4 + $0x58] sm:$0xff] %v1960_v40   ;;  %v1211_v60 = vadd.f32 %v1892_v34, %v1019_v41  ;;  %v988_v61 = vadd.f32 %v2207_v24, %v2548_v12 }
 0x12c   :  { %2119 = vst [vmem:[%s2954_s4 + $0xd8] sm:$0xff] %v2040_v31   ;;  %v1020_v38 = vadd.f32 %v2239_v54, %v2548_v12  ;;  %v1177_v13 = vadd.f32 %v1824_v36, %v985_v23  ;;  %v1209_v34 = vadd.f32 %v1888_v46, %v1017_v21  ;;  %v986_v20 = vadd.f32 %v2548_v12, %v603_v39 }
 0x12d   :  { %2102 = vst [vmem:[%s2954_s4 + $0x50] sm:$0xff] %v1955_v50   ;;  %2118 = vst [vmem:[%s2954_s4 + $0xd0] sm:$0xff] %v2035_v51   ;;  %v1018_v43 = vadd.f32 %v2548_v12, %v731_v19  ;;  %v1180_v44 = vadd.f32 %v1829_v58, %v988_v61  ;;  %v1837_v11 = vunpack.c.h.bf16 %v2817_v62  ;;  %v1901_v29 = vunpack.c.h.bf16 %v2822_v63  ;;  %v2210_v0 = vpop.f32.mrb[28].mxu0  ;;  %v2242_v42 = vpop.f32.mrb[28].mxu1 }
 0x12e   :  { %v1212_v10 = vadd.f32 %v1893_v15, %v1020_v38  ;;  %v1178_v36 = vadd.f32 %v1825_v16, %v986_v20  ;;  %v1833_v52 = vunpack.c.h.bf16 %v2839_v57  ;;  %v1897_v26 = vunpack.c.h.bf16 %v2844_v14  ;;  %v744_v17 = vpop.f32.mrb[29].mxu1 }
 0x12f   :  { %v1210_v46 = vadd.f32 %v1889_v47, %v1018_v43  ;;  %v1243_v32 = vmax.f32 %v1179_v22, 0.0  ;;  %v1275_v53 = vmax.f32 %v1211_v60, 0.0  ;;  %v1244_v58 = vmax.f32 %v1180_v44, 0.0  ;;  %v616_v47 = vpop.f32.mrb[29].mxu0  ;;  %v2243_v33 = vpop.f32.mrb[30].mxu1 }
 0x130   :  { %v1276_v27 = vmax.f32 %v1212_v10, 0.0  ;;  %v1241_v37 = vmax.f32 %v1177_v13, 0.0  ;;  %v1273_v15 = vmax.f32 %v1209_v34, 0.0  ;;  %v1242_v25 = vmax.f32 %v1178_v36, 0.0  ;;  %v2211_v56 = vpop.f32.mrb[30].mxu0  ;;  %v747_v45 = vpop.f32.mrb[31].mxu1 }
 0x131   :  { %v1274_v3 = vmax.f32 %v1210_v46, 0.0  ;;  %v1970_v55 = vpack.c.bf16 %v1244_v58, %v1243_v32  ;;  %v991_v16 = vadd.f32 %v2210_v0, %v2548_v12  ;;  %v1023_v9 = vadd.f32 %v2242_v42, %v2548_v12  ;;  %v619_v31 = vpop.f32.mrb[31].mxu0 }
 0x132   :  { %v2050_v8 = vpack.c.bf16 %v1276_v27, %v1275_v53  ;;  %v1965_v48 = vpack.c.bf16 %v1242_v25, %v1241_v37  ;;  %v989_v28 = vadd.f32 %v2548_v12, %v616_v47  ;;  %v1021_v49 = vadd.f32 %v2548_v12, %v744_v17 }
 0x133   :  { %v2045_v1 = vpack.c.bf16 %v1274_v3, %v1273_v15  ;;  %2105 = vst [vmem:[%s2954_s4 + $0x68] sm:$0xff] %v1970_v55   ;;  %v1183_v18 = vadd.f32 %v1836_v5, %v991_v16  ;;  %v1215_v35 = vadd.f32 %v1900_v59, %v1023_v9  ;;  %v992_v6 = vadd.f32 %v2211_v56, %v2548_v12 }
 0x134   :  { %2121 = vst [vmem:[%s2954_s4 + $0xe8] sm:$0xff] %v2050_v8   ;;  %v1024_v40 = vadd.f32 %v2243_v33, %v2548_v12  ;;  %2104 = vst [vmem:[%s2954_s4 + $0x60] sm:$0xff] %v1965_v48   ;;  %v1181_v62 = vadd.f32 %v1832_v30, %v989_v28  ;;  %v1213_v63 = vadd.f32 %v1896_v4, %v1021_v49 }
 0x135   :  { %2120 = vst [vmem:[%s2954_s4 + $0xe0] sm:$0xff] %v2045_v1   ;;  %v990_v5 = vadd.f32 %v2548_v12, %v619_v31  ;;  %v1022_v59 = vadd.f32 %v2548_v12, %v747_v45  ;;  %v1184_v41 = vadd.f32 %v1837_v11, %v992_v6  ;;  %v1247_v51 = vmax.f32 %v1183_v18, 0.0 }
 0x136   :  { %v1216_v2 = vadd.f32 %v1901_v29, %v1024_v40  ;;  %v1279_v23 = vmax.f32 %v1215_v35, 0.0  ;;  %v1245_v54 = vmax.f32 %v1181_v62, 0.0  ;;  %v1277_v22 = vmax.f32 %v1213_v63, 0.0 }
 0x137   :  { %v1182_v7 = vadd.f32 %v1833_v52, %v990_v5  ;;  %v1214_v50 = vadd.f32 %v1897_v26, %v1022_v59  ;;  %v1248_v21 = vmax.f32 %v1184_v41, 0.0 }
 0x138   :  { %v1280_v24 = vmax.f32 %v1216_v2, 0.0 }
 0x139   :  { %v1246_v60 = vmax.f32 %v1182_v7, 0.0  ;;  %v1278_v57 = vmax.f32 %v1214_v50, 0.0  ;;  %v1980_v30 = vpack.c.bf16 %v1248_v21, %v1247_v51 }
 0x13a   :  { %v2060_v61 = vpack.c.bf16 %v1280_v24, %v1279_v23 }
 0x13b   :  { %v1975_v14 = vpack.c.bf16 %v1246_v60, %v1245_v54  ;;  %v2055_v4 = vpack.c.bf16 %v1278_v57, %v1277_v22  ;;  %2107 = vst [vmem:[%s2954_s4 + $0x78] sm:$0xff] %v1980_v30  }
 0x13c   :  { %2123 = vst [vmem:[%s2954_s4 + $0xf8] sm:$0xff] %v2060_v61  }
 0x13d   :  { %2106 = vst [vmem:[%s2954_s4 + $0x70] sm:$0xff] %v1975_v14   ;;  %2122 = vst [vmem:[%s2954_s4 + $0xf0] sm:$0xff] %v2055_v4  }

// kernel: forward.68
= control target key start
LH: loop header
LB: loop body
LE: loop exit
PB: predicated region body
PF: predicated region fallthrough
CT: control target
= control target key end

     0   :  { %s705_s1 = inlined_call_operand.vmem [shape: bf16[128,128], index: 1, kind: input, shape index: {}]   ;;  %s706_s0 = inlined_call_operand.vmem [shape: bf16[128,128], index: 0, kind: input, shape index: {}]   ;;  %s707_s2 = inlined_call_operand.vmem [shape: f32[1,128], index: 2, kind: input, shape index: {}]   ;;  %s708_s3 = inlined_call_operand.vmem [shape: bf16[128,128], index: 3, kind: output, shape index: {}]  }
   0x1   :  { %v594_v0 = vld [vmem:[%s705_s1] sm:$0xff]   ;;  %v595_v1 = vld [vmem:[%s705_s1 + $0x8] sm:$0xff]   ;;  %v596_v2 = vld [vmem:[%s705_s1 + $0x10] sm:$0xff]  }
   0x2   :  { %546 = vmatprep.subr.bf16.mxu0 %v594_v0  ;;  %578 = vmatprep.subr.bf16.mxu1 %v594_v0  ;;  %v597_v3 = vld [vmem:[%s705_s1 + $0x18] sm:$0xff]   ;;  %v602_v4 = vld [vmem:[%s706_s0] sm:$0xff]   ;;  %v599_v7 = vld [vmem:[%s705_s1 + $0x28] sm:$0xff]  }
   0x3   :  { %547 = vmatpush3.bf16.msra.mxu0 %v594_v0  ;;  %586 = vmatpush3.bf16.msra.mxu1 %v594_v0  ;;  %v603_v5 = vld [vmem:[%s706_s0 + $0x20] sm:$0xff]   ;;  %v600_v8 = vld [vmem:[%s705_s1 + $0x30] sm:$0xff]   ;;  %v601_v9 = vld [vmem:[%s705_s1 + $0x38] sm:$0xff]  }
   0x4   :  { %548 = vmatprep.subr.bf16.mxu0 %v595_v1  ;;  %579 = vmatprep.subr.bf16.mxu1 %v595_v1  ;;  %v598_v6 = vld [vmem:[%s705_s1 + $0x20] sm:$0xff]   ;;  %v604_v10 = vld [vmem:[%s706_s0 + $0x8] sm:$0xff]   ;;  %v606_v12 = vld [vmem:[%s706_s0 + $0x10] sm:$0xff]  }
   0x5   :  { %562 = vmatprep.mubr.bf16.mxu0 %v602_v4  ;;  %570 = vmatprep.mubr.bf16.mxu1 %v603_v5  ;;  %v605_v11 = vld [vmem:[%s706_s0 + $0x28] sm:$0xff]   ;;  %v607_v13 = vld [vmem:[%s706_s0 + $0x30] sm:$0xff]   ;;  %v608_v14 = vld [vmem:[%s706_s0 + $0x18] sm:$0xff]  }
   0x6   :  { %v609_v15 = vld [vmem:[%s706_s0 + $0x38] sm:$0xff]   ;;  %v450_v17 = vld [vmem:[%s707_s2] ss:$0 sm:$0xff] }
   0x7   :  { %549 = vmatpush3.bf16.msra.mxu0 %v595_v1  ;;  %587 = vmatpush3.bf16.msra.mxu1 %v595_v1 }
   0x8   :  { %550 = vmatprep.subr.bf16.mxu0 %v596_v2  ;;  %580 = vmatprep.subr.bf16.mxu1 %v596_v2 }
   0xb   :  { %551 = vmatpush3.bf16.msra.mxu0 %v596_v2  ;;  %588 = vmatpush3.bf16.msra.mxu1 %v596_v2 }
   0xc   :  { %552 = vmatprep.subr.bf16.mxu0 %v597_v3  ;;  %581 = vmatprep.subr.bf16.mxu1 %v597_v3 }
   0xf   :  { %553 = vmatpush3.bf16.msra.mxu0 %v597_v3  ;;  %589 = vmatpush3.bf16.msra.mxu1 %v597_v3 }
  0x10   :  { %554 = vmatprep.subr.bf16.mxu0 %v598_v6  ;;  %582 = vmatprep.subr.bf16.mxu1 %v598_v6 }
  0x13   :  { %555 = vmatpush3.bf16.msra.mxu0 %v598_v6  ;;  %590 = vmatpush3.bf16.msra.mxu1 %v598_v6 }
  0x14   :  { %556 = vmatprep.subr.bf16.mxu0 %v599_v7  ;;  %583 = vmatprep.subr.bf16.mxu1 %v599_v7 }
  0x17   :  { %557 = vmatpush3.bf16.msra.mxu0 %v599_v7  ;;  %591 = vmatpush3.bf16.msra.mxu1 %v599_v7 }
  0x18   :  { %558 = vmatprep.subr.bf16.mxu0 %v600_v8  ;;  %584 = vmatprep.subr.bf16.mxu1 %v600_v8 }
  0x1b   :  { %559 = vmatpush3.bf16.msra.mxu0 %v600_v8  ;;  %592 = vmatpush3.bf16.msra.mxu1 %v600_v8 }
  0x1c   :  { %560 = vmatprep.subr.bf16.mxu0 %v601_v9  ;;  %585 = vmatprep.subr.bf16.mxu1 %v601_v9 }
  0x1f   :  { %561 = vmatpush3.bf16.msra.mxu0 %v601_v9  ;;  %593 = vmatpush3.bf16.msra.mxu1 %v601_v9 }
  0x22   :  { %563 = vmatmul.mubr.bf16.vlgmr.msra.gmra.mrb[0].mxu0 %v604_v10  ;;  %571 = vmatmul.mubr.bf16.vlgmr.msra.gmra.mrb[0].mxu1 %v605_v11 }
  0x23   :  { %566 = vmatprep.mubr.bf16.mxu0 %v606_v12  ;;  %574 = vmatprep.mubr.bf16.mxu1 %v607_v13 }
  0x2a   :  { %567 = vmatmul.mubr.bf16.gmra.mrb[4].mxu0 %v608_v14  ;;  %575 = vmatmul.mubr.bf16.gmra.mrb[4].mxu1 %v609_v15 }
  0xf5   :  { %v564_v16 = vpop.f32.mrb[0].mxu0  ;;  %v572_v18 = vpop.f32.mrb[0].mxu1 }
  0xf6   :  { %v213_v19 = vpop.f32.mrb[1].mxu0  ;;  %v245_v20 = vpop.f32.mrb[1].mxu1  ;;  %v336_v23 = vadd.f32 %v564_v16, %v450_v17  ;;  %v344_v24 = vadd.f32 %v572_v18, %v450_v17 }
  0xf7   :  { %v565_v21 = vpop.f32.mrb[2].mxu0  ;;  %v573_v22 = vpop.f32.mrb[2].mxu1  ;;  %v334_v29 = vadd.f32 %v450_v17, %v213_v19  ;;  %v342_v30 = vadd.f32 %v450_v17, %v245_v20 }
  0xf8   :  { %v337_v25 = vadd.f32 %v565_v21, %v450_v17  ;;  %v345_v26 = vadd.f32 %v573_v22, %v450_v17  ;;  %v216_v27 = vpop.f32.mrb[3].mxu0  ;;  %v248_v28 = vpop.f32.mrb[3].mxu1 }
  0xf9   :  { %v335_v31 = vadd.f32 %v450_v17, %v216_v27  ;;  %v343_v32 = vadd.f32 %v450_v17, %v248_v28 }
  0xfa   :  { %v491_v33 = vpack.c.bf16 %v337_v25, %v336_v23  ;;  %v511_v34 = vpack.c.bf16 %v345_v26, %v344_v24 }
  0xfb   :  { %v486_v35 = vpack.c.bf16 %v335_v31, %v334_v29  ;;  %v506_v36 = vpack.c.bf16 %v343_v32, %v342_v30 }
  0xfc   :  { %523 = vst [vmem:[%s708_s3 + $0x8] sm:$0xff] %v491_v33   ;;  %527 = vst [vmem:[%s708_s3 + $0x28] sm:$0xff] %v511_v34  }
  0xfd   :  { %487 = vst [vmem:[%s708_s3] sm:$0xff] %v486_v35   ;;  %526 = vst [vmem:[%s708_s3 + $0x20] sm:$0xff] %v506_v36   ;;  %v568_v37 = vpop.f32.mrb[4].mxu0  ;;  %v576_v38 = vpop.f32.mrb[4].mxu1 }
  0xfe   :  { %v229_v39 = vpop.f32.mrb[5].mxu0  ;;  %v261_v40 = vpop.f32.mrb[5].mxu1  ;;  %v340_v43 = vadd.f32 %v568_v37, %v450_v17  ;;  %v348_v44 = vadd.f32 %v576_v38, %v450_v17 }
  0xff   :  { %v569_v41 = vpop.f32.mrb[6].mxu0  ;;  %v577_v42 = vpop.f32.mrb[6].mxu1  ;;  %v338_v49 = vadd.f32 %v450_v17, %v229_v39  ;;  %v346_v50 = vadd.f32 %v450_v17, %v261_v40 }
 0x100   :  { %v341_v45 = vadd.f32 %v569_v41, %v450_v17  ;;  %v349_v46 = vadd.f32 %v577_v42, %v450_v17  ;;  %v232_v47 = vpop.f32.mrb[7].mxu0  ;;  %v264_v48 = vpop.f32.mrb[7].mxu1 }
 0x101   :  { %v339_v51 = vadd.f32 %v450_v17, %v232_v47  ;;  %v347_v52 = vadd.f32 %v450_v17, %v264_v48 }
 0x102   :  { %v501_v53 = vpack.c.bf16 %v341_v45, %v340_v43  ;;  %v521_v54 = vpack.c.bf16 %v349_v46, %v348_v44 }
 0x103   :  { %v496_v55 = vpack.c.bf16 %v339_v51, %v338_v49  ;;  %v516_v56 = vpack.c.bf16 %v347_v52, %v346_v50 }
 0x104   :  { %525 = vst [vmem:[%s708_s3 + $0x18] sm:$0xff] %v501_v53   ;;  %529 = vst [vmem:[%s708_s3 + $0x38] sm:$0xff] %v521_v54  }
 0x105   :  { %524 = vst [vmem:[%s708_s3 + $0x10] sm:$0xff] %v496_v55   ;;  %528 = vst [vmem:[%s708_s3 + $0x30] sm:$0xff] %v516_v56  }

// kernel: forward.67
= control target key start
LH: loop header
LB: loop body
LE: loop exit
PB: predicated region body
PF: predicated region fallthrough
CT: control target
= control target key end

     0   :  { %s939_s1 = inlined_call_operand.vmem [shape: bf16[256,128], index: 1, kind: input, shape index: {}]   ;;  %s940_s0 = inlined_call_operand.vmem [shape: bf16[128,256], index: 0, kind: input, shape index: {}]   ;;  %s941_s2 = inlined_call_operand.vmem [shape: f32[1,128], index: 2, kind: input, shape index: {}]   ;;  %s942_s3 = inlined_call_operand.vmem [shape: bf16[128,128], index: 3, kind: output, shape index: {}]  }
   0x1   :  { %v738_v0 = vld [vmem:[%s939_s1 + $0x40] sm:$0xff]   ;;  %v740_v2 = vld [vmem:[%s939_s1 + $0x48] sm:$0xff]   ;;  %v742_v4 = vld [vmem:[%s939_s1 + $0x50] sm:$0xff]  }
   0x2   :  { %v739_v1 = vld [vmem:[%s939_s1] sm:$0xff]   ;;  %658 = vmatprep.subr.bf16.mxu0 %v738_v0  ;;  %722 = vmatprep.subr.bf16.mxu1 %v738_v0  ;;  %v741_v3 = vld [vmem:[%s939_s1 + $0x8] sm:$0xff]   ;;  %v743_v5 = vld [vmem:[%s939_s1 + $0x10] sm:$0xff]  }
   0x3   :  { %659 = vmatpush3.bf16.msra.mxu0 %v739_v1  ;;  %730 = vmatpush3.bf16.msra.mxu1 %v739_v1  ;;  %v744_v6 = vld [vmem:[%s939_s1 + $0x58] sm:$0xff]   ;;  %v746_v8 = vld [vmem:[%s939_s1 + $0x60] sm:$0xff]   ;;  %v748_v10 = vld [vmem:[%s939_s1 + $0x68] sm:$0xff]  }
   0x4   :  { %660 = vmatprep.subr.bf16.mxu0 %v740_v2  ;;  %723 = vmatprep.subr.bf16.mxu1 %v740_v2  ;;  %v745_v7 = vld [vmem:[%s939_s1 + $0x18] sm:$0xff]   ;;  %v747_v9 = vld [vmem:[%s939_s1 + $0x20] sm:$0xff]   ;;  %v749_v13 = vld [vmem:[%s939_s1 + $0x28] sm:$0xff]  }
   0x5   :  { %v756_v11 = vld [vmem:[%s940_s0 + $0x4] ss:$8 sps:$4 sm:$0xff]   ;;  %v750_v14 = vld [vmem:[%s939_s1 + $0x70] sm:$0xff]   ;;  %v752_v16 = vld [vmem:[%s939_s1 + $0x78] sm:$0xff]  }
   0x6   :  { %v759_v12 = vld [vmem:[%s940_s0 + $0x44] ss:$8 sps:$4 sm:$0xff]   ;;  %307 = vmatprep.mubr.bf16.mxu0 %v756_v11  ;;  %v751_v15 = vld [vmem:[%s939_s1 + $0x30] sm:$0xff]   ;;  %v753_v17 = vld [vmem:[%s939_s1 + $0x38] sm:$0xff]  }
   0x7   :  { %661 = vmatpush3.bf16.msra.mxu0 %v741_v3  ;;  %731 = vmatpush3.bf16.msra.mxu1 %v741_v3  ;;  %v754_v18 = vld [vmem:[%s940_s0] ss:$8 sps:$4 sm:$0xff]   ;;  %v760_v20 = vld [vmem:[%s940_s0 + $0x14] ss:$8 sps:$4 sm:$0xff]   ;;  %v764_v22 = vld [vmem:[%s940_s0 + $0x10] ss:$8 sps:$4 sm:$0xff]  }
   0x8   :  { %662 = vmatprep.subr.bf16.mxu0 %v742_v4  ;;  %724 = vmatprep.subr.bf16.mxu1 %v742_v4  ;;  %v757_v19 = vld [vmem:[%s940_s0 + $0x40] ss:$8 sps:$4 sm:$0xff]   ;;  %v762_v21 = vld [vmem:[%s940_s0 + $0x54] ss:$8 sps:$4 sm:$0xff]   ;;  %v765_v23 = vld [vmem:[%s940_s0 + $0x50] ss:$8 sps:$4 sm:$0xff]  }
   0x9   :  { %339 = vmatprep.mubr.bf16.mxu1 %v759_v12  ;;  %v766_v24 = vld [vmem:[%s940_s0 + $0x24] ss:$8 sps:$4 sm:$0xff]   ;;  %v770_v26 = vld [vmem:[%s940_s0 + $0x20] ss:$8 sps:$4 sm:$0xff]   ;;  %v772_v28 = vld [vmem:[%s940_s0 + $0x34] ss:$8 sps:$4 sm:$0xff]  }
   0xa   :  { %v768_v25 = vld [vmem:[%s940_s0 + $0x64] ss:$8 sps:$4 sm:$0xff]   ;;  %v771_v27 = vld [vmem:[%s940_s0 + $0x60] ss:$8 sps:$4 sm:$0xff]   ;;  %v774_v29 = vld [vmem:[%s940_s0 + $0x74] ss:$8 sps:$4 sm:$0xff]  }
   0xb   :  { %663 = vmatpush3.bf16.msra.mxu0 %v743_v5  ;;  %732 = vmatpush3.bf16.msra.mxu1 %v743_v5  ;;  %v776_v30 = vld [vmem:[%s940_s0 + $0x30] ss:$8 sps:$4 sm:$0xff]   ;;  %v897_v35 = vld [vmem:[%s941_s2] ss:$0 sm:$0xff] }
   0xc   :  { %664 = vmatprep.subr.bf16.mxu0 %v744_v6  ;;  %725 = vmatprep.subr.bf16.mxu1 %v744_v6  ;;  %v777_v31 = vld [vmem:[%s940_s0 + $0x70] ss:$8 sps:$4 sm:$0xff]  }
   0xf   :  { %665 = vmatpush3.bf16.msra.mxu0 %v745_v7  ;;  %733 = vmatpush3.bf16.msra.mxu1 %v745_v7 }
  0x10   :  { %666 = vmatprep.subr.bf16.mxu0 %v746_v8  ;;  %726 = vmatprep.subr.bf16.mxu1 %v746_v8 }
  0x13   :  { %667 = vmatpush3.bf16.msra.mxu0 %v747_v9  ;;  %734 = vmatpush3.bf16.msra.mxu1 %v747_v9 }
  0x14   :  { %668 = vmatprep.subr.bf16.mxu0 %v748_v10  ;;  %727 = vmatprep.subr.bf16.mxu1 %v748_v10 }
  0x17   :  { %669 = vmatpush3.bf16.msra.mxu0 %v749_v13  ;;  %735 = vmatpush3.bf16.msra.mxu1 %v749_v13 }
  0x18   :  { %670 = vmatprep.subr.bf16.mxu0 %v750_v14  ;;  %728 = vmatprep.subr.bf16.mxu1 %v750_v14 }
  0x1b   :  { %671 = vmatpush3.bf16.msra.mxu0 %v751_v15  ;;  %736 = vmatpush3.bf16.msra.mxu1 %v751_v15 }
  0x1c   :  { %672 = vmatprep.subr.bf16.mxu0 %v752_v16  ;;  %729 = vmatprep.subr.bf16.mxu1 %v752_v16 }
  0x1f   :  { %673 = vmatpush3.bf16.msra.mxu0 %v753_v17  ;;  %737 = vmatpush3.bf16.msra.mxu1 %v753_v17 }
  0x22   :  { %308 = vmatmul.mubr.bf16.vlgmr.msra.gmra.mrb[0].mxu0 %v754_v18  ;;  %340 = vmatmul.mubr.bf16.vlgmr.msra.gmra.mrb[0].mxu1 %v757_v19 }
  0x23   :  { %315 = vmatprep.mubr.bf16.mxu0 %v760_v20  ;;  %347 = vmatprep.mubr.bf16.mxu1 %v762_v21 }
  0x2a   :  { %316 = vmatmul.mubr.bf16.gmra.mrb[4].mxu0 %v764_v22  ;;  %348 = vmatmul.mubr.bf16.gmra.mrb[4].mxu1 %v765_v23 }
  0x2b   :  { %323 = vmatprep.mubr.bf16.mxu0 %v766_v24  ;;  %355 = vmatprep.mubr.bf16.mxu1 %v768_v25 }
  0x32   :  { %324 = vmatmul.mubr.bf16.gmra.mrb[8].mxu0 %v770_v26  ;;  %356 = vmatmul.mubr.bf16.gmra.mrb[8].mxu1 %v771_v27 }
  0x33   :  { %331 = vmatprep.mubr.bf16.mxu0 %v772_v28  ;;  %363 = vmatprep.mubr.bf16.mxu1 %v774_v29 }
  0x3a   :  { %332 = vmatmul.mubr.bf16.gmra.mrb[12].mxu0 %v776_v30  ;;  %364 = vmatmul.mubr.bf16.gmra.mrb[12].mxu1 %v777_v31 }
  0xf5   :  { %v674_v32 = vpop.f32.mrb[0].mxu0  ;;  %v698_v33 = vpop.f32.mrb[0].mxu1 }
  0xf6   :  { %v675_v34 = vpop.f32.mrb[1].mxu0  ;;  %v699_v36 = vpop.f32.mrb[1].mxu1 }
  0xf7   :  { %v676_v37 = vadd.f32 %v675_v34, %v674_v32  ;;  %v700_v38 = vadd.f32 %v699_v36, %v698_v33  ;;  %v677_v39 = vpop.f32.mrb[2].mxu0  ;;  %v701_v40 = vpop.f32.mrb[2].mxu1 }
  0xf8   :  { %v678_v41 = vpop.f32.mrb[3].mxu0  ;;  %v702_v42 = vpop.f32.mrb[3].mxu1 }
  0xf9   :  { %v430_v43 = vadd.f32 %v676_v37, %v897_v35  ;;  %v438_v44 = vadd.f32 %v700_v38, %v897_v35  ;;  %v679_v45 = vadd.f32 %v678_v41, %v677_v39  ;;  %v703_v46 = vadd.f32 %v702_v42, %v701_v40 }
  0xfb   :  { %v431_v47 = vadd.f32 %v679_v45, %v897_v35  ;;  %v439_v48 = vadd.f32 %v703_v46, %v897_v35  ;;  %v446_v49 = vmax.f32 %v430_v43, 0.0  ;;  %v454_v50 = vmax.f32 %v438_v44, 0.0 }
  0xfd   :  { %v447_v51 = vmax.f32 %v431_v47, 0.0  ;;  %v455_v52 = vmax.f32 %v439_v48, 0.0  ;;  %v680_v53 = vpop.f32.mrb[4].mxu0  ;;  %v704_v54 = vpop.f32.mrb[4].mxu1 }
  0xfe   :  { %v681_v55 = vpop.f32.mrb[5].mxu0  ;;  %v705_v56 = vpop.f32.mrb[5].mxu1 }
  0xff   :  { %v614_v57 = vpack.c.bf16 %v447_v51, %v446_v49  ;;  %v634_v58 = vpack.c.bf16 %v455_v52, %v454_v50  ;;  %v682_v59 = vadd.f32 %v681_v55, %v680_v53  ;;  %v706_v60 = vadd.f32 %v705_v56, %v704_v54  ;;  %v683_v61 = vpop.f32.mrb[6].mxu0  ;;  %v707_v62 = vpop.f32.mrb[6].mxu1 }
 0x100   :  { %v684_v63 = vpop.f32.mrb[7].mxu0  ;;  %v708_v0 = vpop.f32.mrb[7].mxu1 }
 0x101   :  { %615 = vst [vmem:[%s942_s3] sm:$0xff] %v614_v57   ;;  %654 = vst [vmem:[%s942_s3 + $0x20] sm:$0xff] %v634_v58   ;;  %v432_v1 = vadd.f32 %v682_v59, %v897_v35  ;;  %v440_v2 = vadd.f32 %v706_v60, %v897_v35  ;;  %v685_v3 = vadd.f32 %v684_v63, %v683_v61 }
 0x102   :  { %v709_v4 = vadd.f32 %v708_v0, %v707_v62 }
 0x103   :  { %v433_v5 = vadd.f32 %v685_v3, %v897_v35  ;;  %v448_v7 = vmax.f32 %v432_v1, 0.0  ;;  %v456_v8 = vmax.f32 %v440_v2, 0.0 }
 0x104   :  { %v441_v6 = vadd.f32 %v709_v4, %v897_v35 }
 0x105   :  { %v449_v9 = vmax.f32 %v433_v5, 0.0  ;;  %v686_v11 = vpop.f32.mrb[8].mxu0  ;;  %v710_v12 = vpop.f32.mrb[8].mxu1 }
 0x106   :  { %v457_v10 = vmax.f32 %v441_v6, 0.0  ;;  %v687_v13 = vpop.f32.mrb[9].mxu0  ;;  %v711_v14 = vpop.f32.mrb[9].mxu1 }
 0x107   :  { %v619_v15 = vpack.c.bf16 %v449_v9, %v448_v7  ;;  %v688_v17 = vadd.f32 %v687_v13, %v686_v11  ;;  %v712_v18 = vadd.f32 %v711_v14, %v710_v12  ;;  %v689_v19 = vpop.f32.mrb[10].mxu0  ;;  %v713_v20 = vpop.f32.mrb[10].mxu1 }
 0x108   :  { %v639_v16 = vpack.c.bf16 %v457_v10, %v456_v8  ;;  %v690_v21 = vpop.f32.mrb[11].mxu0  ;;  %v714_v22 = vpop.f32.mrb[11].mxu1 }
 0x109   :  { %651 = vst [vmem:[%s942_s3 + $0x8] sm:$0xff] %v619_v15   ;;  %v434_v23 = vadd.f32 %v688_v17, %v897_v35  ;;  %v442_v24 = vadd.f32 %v712_v18, %v897_v35  ;;  %v691_v25 = vadd.f32 %v690_v21, %v689_v19  ;;  %v715_v26 = vadd.f32 %v714_v22, %v713_v20 }
 0x10a   :  { %655 = vst [vmem:[%s942_s3 + $0x28] sm:$0xff] %v639_v16  }
 0x10b   :  { %v435_v27 = vadd.f32 %v691_v25, %v897_v35  ;;  %v443_v28 = vadd.f32 %v715_v26, %v897_v35  ;;  %v450_v29 = vmax.f32 %v434_v23, 0.0  ;;  %v458_v30 = vmax.f32 %v442_v24, 0.0 }
 0x10d   :  { %v451_v31 = vmax.f32 %v435_v27, 0.0  ;;  %v459_v32 = vmax.f32 %v443_v28, 0.0  ;;  %v692_v33 = vpop.f32.mrb[12].mxu0  ;;  %v716_v34 = vpop.f32.mrb[12].mxu1 }
 0x10e   :  { %v693_v36 = vpop.f32.mrb[13].mxu0  ;;  %v717_v37 = vpop.f32.mrb[13].mxu1 }
 0x10f   :  { %v624_v38 = vpack.c.bf16 %v451_v31, %v450_v29  ;;  %v644_v39 = vpack.c.bf16 %v459_v32, %v458_v30  ;;  %v694_v40 = vadd.f32 %v693_v36, %v692_v33  ;;  %v718_v41 = vadd.f32 %v717_v37, %v716_v34  ;;  %v695_v42 = vpop.f32.mrb[14].mxu0  ;;  %v719_v43 = vpop.f32.mrb[14].mxu1 }
 0x110   :  { %v696_v44 = vpop.f32.mrb[15].mxu0  ;;  %v720_v45 = vpop.f32.mrb[15].mxu1 }
 0x111   :  { %652 = vst [vmem:[%s942_s3 + $0x10] sm:$0xff] %v624_v38   ;;  %656 = vst [vmem:[%s942_s3 + $0x30] sm:$0xff] %v644_v39   ;;  %v436_v46 = vadd.f32 %v694_v40, %v897_v35  ;;  %v444_v47 = vadd.f32 %v718_v41, %v897_v35  ;;  %v697_v48 = vadd.f32 %v696_v44, %v695_v42 }
 0x112   :  { %v721_v49 = vadd.f32 %v720_v45, %v719_v43 }
 0x113   :  { %v437_v50 = vadd.f32 %v697_v48, %v897_v35  ;;  %v452_v52 = vmax.f32 %v436_v46, 0.0  ;;  %v460_v53 = vmax.f32 %v444_v47, 0.0 }
 0x114   :  { %v445_v51 = vadd.f32 %v721_v49, %v897_v35 }
 0x115   :  { %v453_v54 = vmax.f32 %v437_v50, 0.0 }
 0x116   :  { %v461_v55 = vmax.f32 %v445_v51, 0.0 }
 0x117   :  { %v629_v56 = vpack.c.bf16 %v453_v54, %v452_v52 }
 0x118   :  { %v649_v57 = vpack.c.bf16 %v461_v55, %v460_v53 }
 0x119   :  { %653 = vst [vmem:[%s942_s3 + $0x18] sm:$0xff] %v629_v56  }
 0x11a   :  { %657 = vst [vmem:[%s942_s3 + $0x38] sm:$0xff] %v649_v57  }

// kernel: forward.69
= control target key start
LH: loop header
LB: loop body
LE: loop exit
PB: predicated region body
PF: predicated region fallthrough
CT: control target
= control target key end

     0   :  { %s874_s1 = inlined_call_operand.vmem [shape: bf16[128,128], index: 1, kind: input, shape index: {}]   ;;  %s875_s0 = inlined_call_operand.vmem [shape: bf16[128,128], index: 0, kind: input, shape index: {}]   ;;  %s876_s3 = inlined_call_operand.vmem [shape: bf16[128,128], index: 3, kind: input, shape index: {}]   ;;  %s877_s2 = inlined_call_operand.vmem [shape: f32[1,128], index: 2, kind: input, shape index: {}]   ;;  %s878_s4 = inlined_call_operand.vmem [shape: bf16[128,128], index: 4, kind: output, shape index: {}]  }
   0x1   :  { %v700_v0 = vld [vmem:[%s874_s1] sm:$0xff]   ;;  %v701_v1 = vld [vmem:[%s874_s1 + $0x8] sm:$0xff]   ;;  %v702_v2 = vld [vmem:[%s874_s1 + $0x10] sm:$0xff]  }
   0x2   :  { %652 = vmatprep.subr.bf16.mxu0 %v700_v0  ;;  %684 = vmatprep.subr.bf16.mxu1 %v700_v0  ;;  %v703_v3 = vld [vmem:[%s874_s1 + $0x18] sm:$0xff]   ;;  %v708_v4 = vld [vmem:[%s875_s0] sm:$0xff]   ;;  %v705_v7 = vld [vmem:[%s874_s1 + $0x28] sm:$0xff]  }
   0x3   :  { %653 = vmatpush3.bf16.msra.mxu0 %v700_v0  ;;  %692 = vmatpush3.bf16.msra.mxu1 %v700_v0  ;;  %v709_v5 = vld [vmem:[%s875_s0 + $0x20] sm:$0xff]   ;;  %v706_v8 = vld [vmem:[%s874_s1 + $0x30] sm:$0xff]   ;;  %v707_v9 = vld [vmem:[%s874_s1 + $0x38] sm:$0xff]  }
   0x4   :  { %654 = vmatprep.subr.bf16.mxu0 %v701_v1  ;;  %685 = vmatprep.subr.bf16.mxu1 %v701_v1  ;;  %v704_v6 = vld [vmem:[%s874_s1 + $0x20] sm:$0xff]   ;;  %v710_v10 = vld [vmem:[%s875_s0 + $0x8] sm:$0xff]   ;;  %v712_v12 = vld [vmem:[%s875_s0 + $0x10] sm:$0xff]  }
   0x5   :  { %668 = vmatprep.mubr.bf16.mxu0 %v708_v4  ;;  %676 = vmatprep.mubr.bf16.mxu1 %v709_v5  ;;  %v711_v11 = vld [vmem:[%s875_s0 + $0x28] sm:$0xff]   ;;  %v713_v13 = vld [vmem:[%s875_s0 + $0x30] sm:$0xff]   ;;  %v714_v14 = vld [vmem:[%s875_s0 + $0x18] sm:$0xff]  }
   0x6   :  { %v715_v15 = vld [vmem:[%s875_s0 + $0x38] sm:$0xff]   ;;  %v622_v16 = vld [vmem:[%s876_s3 + $0x8] sm:$0xff]   ;;  %v551_v18 = vld [vmem:[%s876_s3] sm:$0xff]  }
   0x7   :  { %655 = vmatpush3.bf16.msra.mxu0 %v701_v1  ;;  %693 = vmatpush3.bf16.msra.mxu1 %v701_v1  ;;  %v626_v17 = vld [vmem:[%s876_s3 + $0x28] sm:$0xff]   ;;  %v625_v19 = vld [vmem:[%s876_s3 + $0x20] sm:$0xff]   ;;  %v809_v21 = vld [vmem:[%s876_s3 + $0x18] sm:$0xff]   ;;  %v556_v23 = vunpack.c.l.bf16 %v622_v16  ;;  %v552_v25 = vunpack.c.l.bf16 %v551_v18  ;;  %v557_v31 = vunpack.c.h.bf16 %v622_v16  ;;  %v553_v33 = vunpack.c.h.bf16 %v551_v18 }
   0x8   :  { %656 = vmatprep.subr.bf16.mxu0 %v702_v2  ;;  %686 = vmatprep.subr.bf16.mxu1 %v702_v2  ;;  %v804_v20 = vld [vmem:[%s877_s2] ss:$0 sm:$0xff]  ;;  %v814_v22 = vld [vmem:[%s876_s3 + $0x38] sm:$0xff]   ;;  %v572_v24 = vunpack.c.l.bf16 %v626_v17  ;;  %v568_v26 = vunpack.c.l.bf16 %v625_v19  ;;  %v819_v27 = vld [vmem:[%s876_s3 + $0x10] sm:$0xff]   ;;  %v573_v32 = vunpack.c.h.bf16 %v626_v17  ;;  %v569_v34 = vunpack.c.h.bf16 %v625_v19 }
   0x9   :  { %v824_v28 = vld [vmem:[%s876_s3 + $0x30] sm:$0xff]   ;;  %v564_v39 = vunpack.c.l.bf16 %v809_v21  ;;  %v580_v40 = vunpack.c.l.bf16 %v814_v22  ;;  %v560_v45 = vunpack.c.l.bf16 %v819_v27  ;;  %v565_v59 = vunpack.c.h.bf16 %v809_v21 }
   0xa   :  { %v576_v46 = vunpack.c.l.bf16 %v824_v28  ;;  %v581_v60 = vunpack.c.h.bf16 %v814_v22  ;;  %v561_v63 = vunpack.c.h.bf16 %v819_v27  ;;  %v577_v0 = vunpack.c.h.bf16 %v824_v28 }
   0xb   :  { %657 = vmatpush3.bf16.msra.mxu0 %v702_v2  ;;  %694 = vmatpush3.bf16.msra.mxu1 %v702_v2 }
   0xc   :  { %658 = vmatprep.subr.bf16.mxu0 %v703_v3  ;;  %687 = vmatprep.subr.bf16.mxu1 %v703_v3 }
   0xf   :  { %659 = vmatpush3.bf16.msra.mxu0 %v703_v3  ;;  %695 = vmatpush3.bf16.msra.mxu1 %v703_v3 }
  0x10   :  { %660 = vmatprep.subr.bf16.mxu0 %v704_v6  ;;  %688 = vmatprep.subr.bf16.mxu1 %v704_v6 }
  0x13   :  { %661 = vmatpush3.bf16.msra.mxu0 %v704_v6  ;;  %696 = vmatpush3.bf16.msra.mxu1 %v704_v6 }
  0x14   :  { %662 = vmatprep.subr.bf16.mxu0 %v705_v7  ;;  %689 = vmatprep.subr.bf16.mxu1 %v705_v7 }
  0x17   :  { %663 = vmatpush3.bf16.msra.mxu0 %v705_v7  ;;  %697 = vmatpush3.bf16.msra.mxu1 %v705_v7 }
  0x18   :  { %664 = vmatprep.subr.bf16.mxu0 %v706_v8  ;;  %690 = vmatprep.subr.bf16.mxu1 %v706_v8 }
  0x1b   :  { %665 = vmatpush3.bf16.msra.mxu0 %v706_v8  ;;  %698 = vmatpush3.bf16.msra.mxu1 %v706_v8 }
  0x1c   :  { %666 = vmatprep.subr.bf16.mxu0 %v707_v9  ;;  %691 = vmatprep.subr.bf16.mxu1 %v707_v9 }
  0x1f   :  { %667 = vmatpush3.bf16.msra.mxu0 %v707_v9  ;;  %699 = vmatpush3.bf16.msra.mxu1 %v707_v9 }
  0x22   :  { %669 = vmatmul.mubr.bf16.vlgmr.msra.gmra.mrb[0].mxu0 %v710_v10  ;;  %677 = vmatmul.mubr.bf16.vlgmr.msra.gmra.mrb[0].mxu1 %v711_v11 }
  0x23   :  { %672 = vmatprep.mubr.bf16.mxu0 %v712_v12  ;;  %680 = vmatprep.mubr.bf16.mxu1 %v713_v13 }
  0x2a   :  { %673 = vmatmul.mubr.bf16.gmra.mrb[4].mxu0 %v714_v14  ;;  %681 = vmatmul.mubr.bf16.gmra.mrb[4].mxu1 %v715_v15 }
  0xf5   :  { %v670_v29 = vpop.f32.mrb[0].mxu0  ;;  %v678_v30 = vpop.f32.mrb[0].mxu1 }
  0xf6   :  { %v339_v35 = vadd.f32 %v670_v29, %v804_v20  ;;  %v347_v36 = vadd.f32 %v678_v30, %v804_v20  ;;  %v216_v37 = vpop.f32.mrb[1].mxu0  ;;  %v248_v38 = vpop.f32.mrb[1].mxu1 }
  0xf7   :  { %v337_v41 = vadd.f32 %v804_v20, %v216_v37  ;;  %v345_v42 = vadd.f32 %v804_v20, %v248_v38  ;;  %v671_v43 = vpop.f32.mrb[2].mxu0  ;;  %v679_v44 = vpop.f32.mrb[2].mxu1 }
  0xf8   :  { %v387_v47 = vadd.f32 %v556_v23, %v339_v35  ;;  %v395_v48 = vadd.f32 %v572_v24, %v347_v36  ;;  %v340_v49 = vadd.f32 %v671_v43, %v804_v20  ;;  %v348_v50 = vadd.f32 %v679_v44, %v804_v20  ;;  %v219_v51 = vpop.f32.mrb[3].mxu0  ;;  %v251_v52 = vpop.f32.mrb[3].mxu1 }
  0xf9   :  { %v385_v53 = vadd.f32 %v552_v25, %v337_v41  ;;  %v393_v54 = vadd.f32 %v568_v26, %v345_v42  ;;  %v338_v55 = vadd.f32 %v804_v20, %v219_v51  ;;  %v346_v56 = vadd.f32 %v804_v20, %v251_v52 }
  0xfa   :  { %v388_v57 = vadd.f32 %v557_v31, %v340_v49  ;;  %v396_v58 = vadd.f32 %v573_v32, %v348_v50  ;;  %v403_v1 = vmax.f32 %v387_v47, 0.0  ;;  %v411_v2 = vmax.f32 %v395_v48, 0.0 }
  0xfb   :  { %v386_v61 = vadd.f32 %v553_v33, %v338_v55  ;;  %v394_v62 = vadd.f32 %v569_v34, %v346_v56  ;;  %v401_v5 = vmax.f32 %v385_v53, 0.0  ;;  %v409_v6 = vmax.f32 %v393_v54, 0.0 }
  0xfc   :  { %v404_v3 = vmax.f32 %v388_v57, 0.0  ;;  %v412_v4 = vmax.f32 %v396_v58, 0.0 }
  0xfd   :  { %v402_v7 = vmax.f32 %v386_v61, 0.0  ;;  %v410_v8 = vmax.f32 %v394_v62, 0.0  ;;  %v674_v9 = vpop.f32.mrb[4].mxu0  ;;  %v682_v10 = vpop.f32.mrb[4].mxu1 }
  0xfe   :  { %v590_v11 = vpack.c.bf16 %v404_v3, %v403_v1  ;;  %v610_v12 = vpack.c.bf16 %v412_v4, %v411_v2  ;;  %v343_v13 = vadd.f32 %v674_v9, %v804_v20  ;;  %v351_v14 = vadd.f32 %v682_v10, %v804_v20  ;;  %v232_v15 = vpop.f32.mrb[5].mxu0  ;;  %v264_v16 = vpop.f32.mrb[5].mxu1 }
  0xff   :  { %v585_v17 = vpack.c.bf16 %v402_v7, %v401_v5  ;;  %v605_v18 = vpack.c.bf16 %v410_v8, %v409_v6  ;;  %v341_v19 = vadd.f32 %v804_v20, %v232_v15  ;;  %v349_v21 = vadd.f32 %v804_v20, %v264_v16  ;;  %v675_v22 = vpop.f32.mrb[6].mxu0  ;;  %v683_v23 = vpop.f32.mrb[6].mxu1 }
 0x100   :  { %629 = vst [vmem:[%s878_s4 + $0x8] sm:$0xff] %v590_v11   ;;  %633 = vst [vmem:[%s878_s4 + $0x28] sm:$0xff] %v610_v12   ;;  %v391_v24 = vadd.f32 %v564_v39, %v343_v13  ;;  %v399_v25 = vadd.f32 %v580_v40, %v351_v14  ;;  %v344_v26 = vadd.f32 %v675_v22, %v804_v20  ;;  %v235_v28 = vpop.f32.mrb[7].mxu0  ;;  %v267_v29 = vpop.f32.mrb[7].mxu1 }
 0x101   :  { %v352_v27 = vadd.f32 %v683_v23, %v804_v20  ;;  %586 = vst [vmem:[%s878_s4] sm:$0xff] %v585_v17   ;;  %632 = vst [vmem:[%s878_s4 + $0x20] sm:$0xff] %v605_v18   ;;  %v389_v30 = vadd.f32 %v560_v45, %v341_v19  ;;  %v397_v31 = vadd.f32 %v576_v46, %v349_v21 }
 0x102   :  { %v342_v32 = vadd.f32 %v804_v20, %v235_v28  ;;  %v350_v33 = vadd.f32 %v804_v20, %v267_v29  ;;  %v392_v34 = vadd.f32 %v565_v59, %v344_v26  ;;  %v407_v38 = vmax.f32 %v391_v24, 0.0 }
 0x103   :  { %v400_v35 = vadd.f32 %v581_v60, %v352_v27  ;;  %v415_v39 = vmax.f32 %v399_v25, 0.0  ;;  %v405_v42 = vmax.f32 %v389_v30, 0.0  ;;  %v413_v43 = vmax.f32 %v397_v31, 0.0 }
 0x104   :  { %v390_v36 = vadd.f32 %v561_v63, %v342_v32  ;;  %v398_v37 = vadd.f32 %v577_v0, %v350_v33  ;;  %v408_v40 = vmax.f32 %v392_v34, 0.0 }
 0x105   :  { %v416_v41 = vmax.f32 %v400_v35, 0.0 }
 0x106   :  { %v406_v44 = vmax.f32 %v390_v36, 0.0  ;;  %v414_v47 = vmax.f32 %v398_v37, 0.0  ;;  %v600_v48 = vpack.c.bf16 %v408_v40, %v407_v38 }
 0x107   :  { %v620_v49 = vpack.c.bf16 %v416_v41, %v415_v39 }
 0x108   :  { %v595_v45 = vpack.c.bf16 %v406_v44, %v405_v42  ;;  %v615_v46 = vpack.c.bf16 %v414_v47, %v413_v43  ;;  %631 = vst [vmem:[%s878_s4 + $0x18] sm:$0xff] %v600_v48  }
 0x109   :  { %635 = vst [vmem:[%s878_s4 + $0x38] sm:$0xff] %v620_v49  }
 0x10a   :  { %630 = vst [vmem:[%s878_s4 + $0x10] sm:$0xff] %v595_v45   ;;  %634 = vst [vmem:[%s878_s4 + $0x30] sm:$0xff] %v615_v46  }

// kernel: forward.70
= control target key start
LH: loop header
LB: loop body
LE: loop exit
PB: predicated region body
PF: predicated region fallthrough
CT: control target
= control target key end

     0   :  { %s721_s1 = inlined_call_operand.vmem [shape: bf16[128,128], index: 1, kind: input, shape index: {}]   ;;  %s722_s0 = inlined_call_operand.vmem [shape: bf16[128,128], index: 0, kind: input, shape index: {}]   ;;  %s723_s2 = inlined_call_operand.vmem [shape: f32[1,128], index: 2, kind: input, shape index: {}]   ;;  %s724_s3 = inlined_call_operand.vmem [shape: bf16[128,128], index: 3, kind: output, shape index: {}]  }
   0x1   :  { %v610_v0 = vld [vmem:[%s721_s1] sm:$0xff]   ;;  %v611_v1 = vld [vmem:[%s721_s1 + $0x8] sm:$0xff]   ;;  %v612_v2 = vld [vmem:[%s721_s1 + $0x10] sm:$0xff]  }
   0x2   :  { %562 = vmatprep.subr.bf16.mxu0 %v610_v0  ;;  %594 = vmatprep.subr.bf16.mxu1 %v610_v0  ;;  %v613_v3 = vld [vmem:[%s721_s1 + $0x18] sm:$0xff]   ;;  %v618_v4 = vld [vmem:[%s722_s0] sm:$0xff]   ;;  %v615_v7 = vld [vmem:[%s721_s1 + $0x28] sm:$0xff]  }
   0x3   :  { %563 = vmatpush3.bf16.msra.mxu0 %v610_v0  ;;  %602 = vmatpush3.bf16.msra.mxu1 %v610_v0  ;;  %v619_v5 = vld [vmem:[%s722_s0 + $0x20] sm:$0xff]   ;;  %v616_v8 = vld [vmem:[%s721_s1 + $0x30] sm:$0xff]   ;;  %v617_v9 = vld [vmem:[%s721_s1 + $0x38] sm:$0xff]  }
   0x4   :  { %564 = vmatprep.subr.bf16.mxu0 %v611_v1  ;;  %595 = vmatprep.subr.bf16.mxu1 %v611_v1  ;;  %v614_v6 = vld [vmem:[%s721_s1 + $0x20] sm:$0xff]   ;;  %v620_v10 = vld [vmem:[%s722_s0 + $0x8] sm:$0xff]   ;;  %v622_v12 = vld [vmem:[%s722_s0 + $0x10] sm:$0xff]  }
   0x5   :  { %578 = vmatprep.mubr.bf16.mxu0 %v618_v4  ;;  %586 = vmatprep.mubr.bf16.mxu1 %v619_v5  ;;  %v621_v11 = vld [vmem:[%s722_s0 + $0x28] sm:$0xff]   ;;  %v623_v13 = vld [vmem:[%s722_s0 + $0x30] sm:$0xff]   ;;  %v624_v14 = vld [vmem:[%s722_s0 + $0x18] sm:$0xff]  }
   0x6   :  { %v625_v15 = vld [vmem:[%s722_s0 + $0x38] sm:$0xff]   ;;  %v466_v16 = vld [vmem:[%s723_s2] ss:$0 sm:$0xff] }
   0x7   :  { %565 = vmatpush3.bf16.msra.mxu0 %v611_v1  ;;  %603 = vmatpush3.bf16.msra.mxu1 %v611_v1 }
   0x8   :  { %566 = vmatprep.subr.bf16.mxu0 %v612_v2  ;;  %596 = vmatprep.subr.bf16.mxu1 %v612_v2 }
   0xb   :  { %567 = vmatpush3.bf16.msra.mxu0 %v612_v2  ;;  %604 = vmatpush3.bf16.msra.mxu1 %v612_v2 }
   0xc   :  { %568 = vmatprep.subr.bf16.mxu0 %v613_v3  ;;  %597 = vmatprep.subr.bf16.mxu1 %v613_v3 }
   0xf   :  { %569 = vmatpush3.bf16.msra.mxu0 %v613_v3  ;;  %605 = vmatpush3.bf16.msra.mxu1 %v613_v3 }
  0x10   :  { %570 = vmatprep.subr.bf16.mxu0 %v614_v6  ;;  %598 = vmatprep.subr.bf16.mxu1 %v614_v6 }
  0x13   :  { %571 = vmatpush3.bf16.msra.mxu0 %v614_v6  ;;  %606 = vmatpush3.bf16.msra.mxu1 %v614_v6 }
  0x14   :  { %572 = vmatprep.subr.bf16.mxu0 %v615_v7  ;;  %599 = vmatprep.subr.bf16.mxu1 %v615_v7 }
  0x17   :  { %573 = vmatpush3.bf16.msra.mxu0 %v615_v7  ;;  %607 = vmatpush3.bf16.msra.mxu1 %v615_v7 }
  0x18   :  { %574 = vmatprep.subr.bf16.mxu0 %v616_v8  ;;  %600 = vmatprep.subr.bf16.mxu1 %v616_v8 }
  0x1b   :  { %575 = vmatpush3.bf16.msra.mxu0 %v616_v8  ;;  %608 = vmatpush3.bf16.msra.mxu1 %v616_v8 }
  0x1c   :  { %576 = vmatprep.subr.bf16.mxu0 %v617_v9  ;;  %601 = vmatprep.subr.bf16.mxu1 %v617_v9 }
  0x1f   :  { %577 = vmatpush3.bf16.msra.mxu0 %v617_v9  ;;  %609 = vmatpush3.bf16.msra.mxu1 %v617_v9 }
  0x22   :  { %579 = vmatmul.mubr.bf16.vlgmr.msra.gmra.mrb[0].mxu0 %v620_v10  ;;  %587 = vmatmul.mubr.bf16.vlgmr.msra.gmra.mrb[0].mxu1 %v621_v11 }
  0x23   :  { %582 = vmatprep.mubr.bf16.mxu0 %v622_v12  ;;  %590 = vmatprep.mubr.bf16.mxu1 %v623_v13 }
  0x2a   :  { %583 = vmatmul.mubr.bf16.gmra.mrb[4].mxu0 %v624_v14  ;;  %591 = vmatmul.mubr.bf16.gmra.mrb[4].mxu1 %v625_v15 }
  0xf5   :  { %v580_v17 = vpop.f32.mrb[0].mxu0  ;;  %v588_v18 = vpop.f32.mrb[0].mxu1 }
  0xf6   :  { %v336_v19 = vadd.f32 %v580_v17, %v466_v16  ;;  %v344_v20 = vadd.f32 %v588_v18, %v466_v16  ;;  %v213_v21 = vpop.f32.mrb[1].mxu0  ;;  %v245_v22 = vpop.f32.mrb[1].mxu1 }
  0xf7   :  { %v334_v23 = vadd.f32 %v466_v16, %v213_v21  ;;  %v342_v24 = vadd.f32 %v466_v16, %v245_v22  ;;  %v581_v25 = vpop.f32.mrb[2].mxu0  ;;  %v589_v26 = vpop.f32.mrb[2].mxu1 }
  0xf8   :  { %v337_v27 = vadd.f32 %v581_v25, %v466_v16  ;;  %v345_v28 = vadd.f32 %v589_v26, %v466_v16  ;;  %v216_v29 = vpop.f32.mrb[3].mxu0  ;;  %v248_v30 = vpop.f32.mrb[3].mxu1  ;;  %v352_v33 = vmax.f32 %v336_v19, 0.0  ;;  %v360_v34 = vmax.f32 %v344_v20, 0.0 }
  0xf9   :  { %v335_v31 = vadd.f32 %v466_v16, %v216_v29  ;;  %v343_v32 = vadd.f32 %v466_v16, %v248_v30  ;;  %v350_v37 = vmax.f32 %v334_v23, 0.0  ;;  %v358_v38 = vmax.f32 %v342_v24, 0.0 }
  0xfa   :  { %v353_v35 = vmax.f32 %v337_v27, 0.0  ;;  %v361_v36 = vmax.f32 %v345_v28, 0.0 }
  0xfb   :  { %v351_v39 = vmax.f32 %v335_v31, 0.0  ;;  %v359_v40 = vmax.f32 %v343_v32, 0.0 }
  0xfc   :  { %v507_v41 = vpack.c.bf16 %v353_v35, %v352_v33  ;;  %v527_v42 = vpack.c.bf16 %v361_v36, %v360_v34 }
  0xfd   :  { %v502_v43 = vpack.c.bf16 %v351_v39, %v350_v37  ;;  %v522_v44 = vpack.c.bf16 %v359_v40, %v358_v38  ;;  %v584_v45 = vpop.f32.mrb[4].mxu0  ;;  %v592_v46 = vpop.f32.mrb[4].mxu1 }
  0xfe   :  { %539 = vst [vmem:[%s724_s3 + $0x8] sm:$0xff] %v507_v41   ;;  %543 = vst [vmem:[%s724_s3 + $0x28] sm:$0xff] %v527_v42   ;;  %v340_v47 = vadd.f32 %v584_v45, %v466_v16  ;;  %v348_v48 = vadd.f32 %v592_v46, %v466_v16  ;;  %v229_v49 = vpop.f32.mrb[5].mxu0  ;;  %v261_v50 = vpop.f32.mrb[5].mxu1 }
  0xff   :  { %503 = vst [vmem:[%s724_s3] sm:$0xff] %v502_v43   ;;  %542 = vst [vmem:[%s724_s3 + $0x20] sm:$0xff] %v522_v44   ;;  %v338_v51 = vadd.f32 %v466_v16, %v229_v49  ;;  %v346_v52 = vadd.f32 %v466_v16, %v261_v50  ;;  %v585_v53 = vpop.f32.mrb[6].mxu0  ;;  %v593_v54 = vpop.f32.mrb[6].mxu1 }
 0x100   :  { %v341_v55 = vadd.f32 %v585_v53, %v466_v16  ;;  %v349_v56 = vadd.f32 %v593_v54, %v466_v16  ;;  %v232_v57 = vpop.f32.mrb[7].mxu0  ;;  %v264_v58 = vpop.f32.mrb[7].mxu1  ;;  %v356_v61 = vmax.f32 %v340_v47, 0.0  ;;  %v364_v62 = vmax.f32 %v348_v48, 0.0 }
 0x101   :  { %v339_v59 = vadd.f32 %v466_v16, %v232_v57  ;;  %v347_v60 = vadd.f32 %v466_v16, %v264_v58  ;;  %v354_v1 = vmax.f32 %v338_v51, 0.0  ;;  %v362_v2 = vmax.f32 %v346_v52, 0.0 }
 0x102   :  { %v357_v63 = vmax.f32 %v341_v55, 0.0  ;;  %v365_v0 = vmax.f32 %v349_v56, 0.0 }
 0x103   :  { %v355_v3 = vmax.f32 %v339_v59, 0.0  ;;  %v363_v4 = vmax.f32 %v347_v60, 0.0 }
 0x104   :  { %v517_v5 = vpack.c.bf16 %v357_v63, %v356_v61  ;;  %v537_v6 = vpack.c.bf16 %v365_v0, %v364_v62 }
 0x105   :  { %v512_v7 = vpack.c.bf16 %v355_v3, %v354_v1  ;;  %v532_v8 = vpack.c.bf16 %v363_v4, %v362_v2 }
 0x106   :  { %541 = vst [vmem:[%s724_s3 + $0x18] sm:$0xff] %v517_v5   ;;  %545 = vst [vmem:[%s724_s3 + $0x38] sm:$0xff] %v537_v6  }
 0x107   :  { %540 = vst [vmem:[%s724_s3 + $0x10] sm:$0xff] %v512_v7   ;;  %544 = vst [vmem:[%s724_s3 + $0x30] sm:$0xff] %v532_v8  }

// kernel: forward.75
= control target key start
LH: loop header
LB: loop body
LE: loop exit
PB: predicated region body
PF: predicated region fallthrough
CT: control target
= control target key end

     0   :  { %9 = vsyncpa [#allocation4], 0  ;;  %s754_s15 = smov [#allocation3]   ;;  %s922_s0 = inlined_call_operand.vmem [shape: bf16[128,128], index: 0, kind: input, shape index: {}]   ;;  %s923_s1 = inlined_call_operand.vmem [shape: bf16[128,128], index: 1, kind: input, shape index: {}]   ;;  %s924_s2 = inlined_call_operand.hbm [shape: f32[1,128], index: 2, kind: input, shape index: {}]   ;;  %s925_s3 = inlined_call_operand.vmem [shape: bf16[128,128], index: 3, kind: input, shape index: {}]   ;;  %s926_s4 = inlined_call_operand.vmem [shape: bf16[128,128], index: 4, kind: output, shape index: {}]  }
   0x1   :  { %s20_s16 = sshll.u32 %s754_s15, 4  ;;  %s730_s19 = scalar_lea.hbm %s924_s2, 16  ;;  %s21_s16 = int_to_ptr.vmem [resolvable:$true] %s20_s16 }
   0x2   :  { %p731_p0 = scmp.ne.s32.totalorder %s924_s2, %s730_s19  ;;  %p734_p1 = scmp.lt.u32.totalorder %s730_s19, %s924_s2 }
   0x4   :  { %p736_p2 = pnand %p734_p1, %p731_p0 }
   0x6   :  { %739 = shalt.err (!%p736_p2)
}
   0x7   :  { %s740_s24 = scalar_lea.vmem %s21_s16, 16  ;;  %s744_s25 = scalar_lea.vmem %s21_s16, 32 }
   0x8   :  { %p741_p3 = scmp.ne.s32.totalorder %s21_s16, %s740_s24  ;;  %p745_p4 = scmp.lt.s32.totalorder %s21_s16, %s21_s16 }
   0x9   :  { %p746_p5 = scmp.lt.s32.totalorder %s744_s25, %s740_s24 }
   0xb   :  { %p747_p6 = por %p746_p5, %p745_p4 }
   0xd   :  { %p748_p7 = pnand %p747_p6, %p741_p3 }
   0xf   :  { %751 = shalt.err (!%p748_p7)
}
  0x10   :  { %23 = dma.hbm_to_vmem [thread:$0]  %s924_s2, 16, %s21_s16, [#allocation4]  }
  0x11   :  { %752 = dma.done.wait [#allocation4], 16  }
  0x12   :  { %753 = vsyncadd [#allocation4], 4294967280  ;;  %v714_v0 = vld [vmem:[%s923_s1] sm:$0xff]   ;;  %v715_v1 = vld [vmem:[%s923_s1 + $0x8] sm:$0xff]  }
  0x13   :  { %665 = vmatprep.subr.bf16.mxu0 %v714_v0  ;;  %697 = vmatprep.subr.bf16.mxu1 %v714_v0  ;;  %v716_v2 = vld [vmem:[%s923_s1 + $0x10] sm:$0xff]   ;;  %v717_v3 = vld [vmem:[%s923_s1 + $0x18] sm:$0xff]   ;;  %v722_v4 = vld [vmem:[%s922_s0] sm:$0xff]  }
  0x14   :  { %666 = vmatpush3.bf16.msra.mxu0 %v714_v0  ;;  %705 = vmatpush3.bf16.msra.mxu1 %v714_v0  ;;  %v723_v5 = vld [vmem:[%s922_s0 + $0x20] sm:$0xff]   ;;  %v719_v7 = vld [vmem:[%s923_s1 + $0x28] sm:$0xff]   ;;  %v720_v8 = vld [vmem:[%s923_s1 + $0x30] sm:$0xff]  }
  0x15   :  { %667 = vmatprep.subr.bf16.mxu0 %v715_v1  ;;  %698 = vmatprep.subr.bf16.mxu1 %v715_v1  ;;  %v718_v6 = vld [vmem:[%s923_s1 + $0x20] sm:$0xff]   ;;  %v721_v9 = vld [vmem:[%s923_s1 + $0x38] sm:$0xff]   ;;  %v724_v10 = vld [vmem:[%s922_s0 + $0x8] sm:$0xff]  }
  0x16   :  { %681 = vmatprep.mubr.bf16.mxu0 %v722_v4  ;;  %689 = vmatprep.mubr.bf16.mxu1 %v723_v5  ;;  %v725_v11 = vld [vmem:[%s922_s0 + $0x28] sm:$0xff]   ;;  %v726_v12 = vld [vmem:[%s922_s0 + $0x10] sm:$0xff]   ;;  %v728_v14 = vld [vmem:[%s922_s0 + $0x18] sm:$0xff]  }
  0x17   :  { %v727_v13 = vld [vmem:[%s922_s0 + $0x30] sm:$0xff]   ;;  %v729_v15 = vld [vmem:[%s922_s0 + $0x38] sm:$0xff]   ;;  %v635_v16 = vld [vmem:[%s925_s3 + $0x8] sm:$0xff]  }
  0x18   :  { %668 = vmatpush3.bf16.msra.mxu0 %v715_v1  ;;  %706 = vmatpush3.bf16.msra.mxu1 %v715_v1  ;;  %v639_v17 = vld [vmem:[%s925_s3 + $0x28] sm:$0xff]   ;;  %v564_v18 = vld [vmem:[%s925_s3] sm:$0xff]   ;;  %v857_v21 = vld [vmem:[%s925_s3 + $0x18] sm:$0xff]   ;;  %v569_v23 = vunpack.c.l.bf16 %v635_v16  ;;  %v570_v31 = vunpack.c.h.bf16 %v635_v16 }
  0x19   :  { %669 = vmatprep.subr.bf16.mxu0 %v716_v2  ;;  %699 = vmatprep.subr.bf16.mxu1 %v716_v2  ;;  %v638_v19 = vld [vmem:[%s925_s3 + $0x20] sm:$0xff]   ;;  %v862_v22 = vld [vmem:[%s925_s3 + $0x38] sm:$0xff]   ;;  %v585_v24 = vunpack.c.l.bf16 %v639_v17  ;;  %v565_v25 = vunpack.c.l.bf16 %v564_v18  ;;  %v867_v27 = vld [vmem:[%s925_s3 + $0x10] sm:$0xff]   ;;  %v586_v32 = vunpack.c.h.bf16 %v639_v17  ;;  %v566_v33 = vunpack.c.h.bf16 %v564_v18 }
  0x1a   :  { %v852_v20 = vld [vmem:[#allocation3] ss:$0 sm:$0xff]  ;;  %v581_v26 = vunpack.c.l.bf16 %v638_v19  ;;  %v872_v28 = vld [vmem:[%s925_s3 + $0x30] sm:$0xff]   ;;  %v582_v34 = vunpack.c.h.bf16 %v638_v19  ;;  %v577_v39 = vunpack.c.l.bf16 %v857_v21  ;;  %v593_v40 = vunpack.c.l.bf16 %v862_v22 }
  0x1b   :  { %v573_v45 = vunpack.c.l.bf16 %v867_v27  ;;  %v589_v46 = vunpack.c.l.bf16 %v872_v28  ;;  %v578_v59 = vunpack.c.h.bf16 %v857_v21  ;;  %v594_v60 = vunpack.c.h.bf16 %v862_v22 }
  0x1c   :  { %670 = vmatpush3.bf16.msra.mxu0 %v716_v2  ;;  %707 = vmatpush3.bf16.msra.mxu1 %v716_v2  ;;  %v574_v63 = vunpack.c.h.bf16 %v867_v27  ;;  %v590_v0 = vunpack.c.h.bf16 %v872_v28 }
  0x1d   :  { %671 = vmatprep.subr.bf16.mxu0 %v717_v3  ;;  %700 = vmatprep.subr.bf16.mxu1 %v717_v3 }
  0x20   :  { %672 = vmatpush3.bf16.msra.mxu0 %v717_v3  ;;  %708 = vmatpush3.bf16.msra.mxu1 %v717_v3 }
  0x21   :  { %673 = vmatprep.subr.bf16.mxu0 %v718_v6  ;;  %701 = vmatprep.subr.bf16.mxu1 %v718_v6 }
  0x24   :  { %674 = vmatpush3.bf16.msra.mxu0 %v718_v6  ;;  %709 = vmatpush3.bf16.msra.mxu1 %v718_v6 }
  0x25   :  { %675 = vmatprep.subr.bf16.mxu0 %v719_v7  ;;  %702 = vmatprep.subr.bf16.mxu1 %v719_v7 }
  0x28   :  { %676 = vmatpush3.bf16.msra.mxu0 %v719_v7  ;;  %710 = vmatpush3.bf16.msra.mxu1 %v719_v7 }
  0x29   :  { %677 = vmatprep.subr.bf16.mxu0 %v720_v8  ;;  %703 = vmatprep.subr.bf16.mxu1 %v720_v8 }
  0x2c   :  { %678 = vmatpush3.bf16.msra.mxu0 %v720_v8  ;;  %711 = vmatpush3.bf16.msra.mxu1 %v720_v8 }
  0x2d   :  { %679 = vmatprep.subr.bf16.mxu0 %v721_v9  ;;  %704 = vmatprep.subr.bf16.mxu1 %v721_v9 }
  0x30   :  { %680 = vmatpush3.bf16.msra.mxu0 %v721_v9  ;;  %712 = vmatpush3.bf16.msra.mxu1 %v721_v9 }
  0x33   :  { %682 = vmatmul.mubr.bf16.vlgmr.msra.gmra.mrb[0].mxu0 %v724_v10  ;;  %690 = vmatmul.mubr.bf16.vlgmr.msra.gmra.mrb[0].mxu1 %v725_v11 }
  0x34   :  { %685 = vmatprep.mubr.bf16.mxu0 %v726_v12  ;;  %693 = vmatprep.mubr.bf16.mxu1 %v727_v13 }
  0x3b   :  { %686 = vmatmul.mubr.bf16.gmra.mrb[4].mxu0 %v728_v14  ;;  %694 = vmatmul.mubr.bf16.gmra.mrb[4].mxu1 %v729_v15 }
 0x106   :  { %v683_v29 = vpop.f32.mrb[0].mxu0  ;;  %v691_v30 = vpop.f32.mrb[0].mxu1 }
 0x107   :  { %v351_v35 = vadd.f32 %v683_v29, %v852_v20  ;;  %v359_v36 = vadd.f32 %v691_v30, %v852_v20  ;;  %v228_v37 = vpop.f32.mrb[1].mxu0  ;;  %v260_v38 = vpop.f32.mrb[1].mxu1 }
 0x108   :  { %v349_v41 = vadd.f32 %v852_v20, %v228_v37  ;;  %v357_v42 = vadd.f32 %v852_v20, %v260_v38  ;;  %v684_v43 = vpop.f32.mrb[2].mxu0  ;;  %v692_v44 = vpop.f32.mrb[2].mxu1 }
 0x109   :  { %v399_v47 = vadd.f32 %v569_v23, %v351_v35  ;;  %v407_v48 = vadd.f32 %v585_v24, %v359_v36  ;;  %v352_v49 = vadd.f32 %v684_v43, %v852_v20  ;;  %v360_v50 = vadd.f32 %v692_v44, %v852_v20  ;;  %v231_v51 = vpop.f32.mrb[3].mxu0  ;;  %v263_v52 = vpop.f32.mrb[3].mxu1 }
 0x10a   :  { %v397_v53 = vadd.f32 %v565_v25, %v349_v41  ;;  %v405_v54 = vadd.f32 %v581_v26, %v357_v42  ;;  %v350_v55 = vadd.f32 %v852_v20, %v231_v51  ;;  %v358_v56 = vadd.f32 %v852_v20, %v263_v52 }
 0x10b   :  { %v400_v57 = vadd.f32 %v570_v31, %v352_v49  ;;  %v408_v58 = vadd.f32 %v586_v32, %v360_v50  ;;  %v415_v1 = vmax.f32 %v399_v47, 0.0  ;;  %v423_v2 = vmax.f32 %v407_v48, 0.0 }
 0x10c   :  { %v398_v61 = vadd.f32 %v566_v33, %v350_v55  ;;  %v406_v62 = vadd.f32 %v582_v34, %v358_v56  ;;  %v413_v5 = vmax.f32 %v397_v53, 0.0  ;;  %v421_v6 = vmax.f32 %v405_v54, 0.0 }
 0x10d   :  { %v416_v3 = vmax.f32 %v400_v57, 0.0  ;;  %v424_v4 = vmax.f32 %v408_v58, 0.0 }
 0x10e   :  { %v414_v7 = vmax.f32 %v398_v61, 0.0  ;;  %v422_v8 = vmax.f32 %v406_v62, 0.0  ;;  %v687_v9 = vpop.f32.mrb[4].mxu0  ;;  %v695_v10 = vpop.f32.mrb[4].mxu1 }
 0x10f   :  { %v603_v11 = vpack.c.bf16 %v416_v3, %v415_v1  ;;  %v623_v12 = vpack.c.bf16 %v424_v4, %v423_v2  ;;  %v355_v13 = vadd.f32 %v687_v9, %v852_v20  ;;  %v363_v14 = vadd.f32 %v695_v10, %v852_v20  ;;  %v244_v15 = vpop.f32.mrb[5].mxu0  ;;  %v276_v16 = vpop.f32.mrb[5].mxu1 }
 0x110   :  { %v598_v17 = vpack.c.bf16 %v414_v7, %v413_v5  ;;  %v618_v18 = vpack.c.bf16 %v422_v8, %v421_v6  ;;  %v353_v19 = vadd.f32 %v852_v20, %v244_v15  ;;  %v361_v21 = vadd.f32 %v852_v20, %v276_v16  ;;  %v688_v22 = vpop.f32.mrb[6].mxu0  ;;  %v696_v23 = vpop.f32.mrb[6].mxu1 }
 0x111   :  { %642 = vst [vmem:[%s926_s4 + $0x8] sm:$0xff] %v603_v11   ;;  %646 = vst [vmem:[%s926_s4 + $0x28] sm:$0xff] %v623_v12   ;;  %v403_v24 = vadd.f32 %v577_v39, %v355_v13  ;;  %v411_v25 = vadd.f32 %v593_v40, %v363_v14  ;;  %v356_v26 = vadd.f32 %v688_v22, %v852_v20  ;;  %v247_v28 = vpop.f32.mrb[7].mxu0  ;;  %v279_v29 = vpop.f32.mrb[7].mxu1 }
 0x112   :  { %v364_v27 = vadd.f32 %v696_v23, %v852_v20  ;;  %599 = vst [vmem:[%s926_s4] sm:$0xff] %v598_v17   ;;  %645 = vst [vmem:[%s926_s4 + $0x20] sm:$0xff] %v618_v18   ;;  %v401_v30 = vadd.f32 %v573_v45, %v353_v19  ;;  %v409_v31 = vadd.f32 %v589_v46, %v361_v21 }
 0x113   :  { %v354_v32 = vadd.f32 %v852_v20, %v247_v28  ;;  %v362_v33 = vadd.f32 %v852_v20, %v279_v29  ;;  %v404_v34 = vadd.f32 %v578_v59, %v356_v26  ;;  %v419_v38 = vmax.f32 %v403_v24, 0.0 }
 0x114   :  { %v412_v35 = vadd.f32 %v594_v60, %v364_v27  ;;  %v427_v39 = vmax.f32 %v411_v25, 0.0  ;;  %v417_v42 = vmax.f32 %v401_v30, 0.0  ;;  %v425_v43 = vmax.f32 %v409_v31, 0.0 }
 0x115   :  { %v402_v36 = vadd.f32 %v574_v63, %v354_v32  ;;  %v410_v37 = vadd.f32 %v590_v0, %v362_v33  ;;  %v420_v40 = vmax.f32 %v404_v34, 0.0 }
 0x116   :  { %v428_v41 = vmax.f32 %v412_v35, 0.0 }
 0x117   :  { %v418_v44 = vmax.f32 %v402_v36, 0.0  ;;  %v426_v47 = vmax.f32 %v410_v37, 0.0  ;;  %v613_v48 = vpack.c.bf16 %v420_v40, %v419_v38 }
 0x118   :  { %v633_v49 = vpack.c.bf16 %v428_v41, %v427_v39 }
 0x119   :  { %v608_v45 = vpack.c.bf16 %v418_v44, %v417_v42  ;;  %v628_v46 = vpack.c.bf16 %v426_v47, %v425_v43  ;;  %644 = vst [vmem:[%s926_s4 + $0x18] sm:$0xff] %v613_v48  }
 0x11a   :  { %648 = vst [vmem:[%s926_s4 + $0x38] sm:$0xff] %v633_v49  }
 0x11b   :  { %643 = vst [vmem:[%s926_s4 + $0x10] sm:$0xff] %v608_v45   ;;  %647 = vst [vmem:[%s926_s4 + $0x30] sm:$0xff] %v628_v46  }
 0x11c   :  { %513 = vsyncpa [#allocation4], 1 }

// kernel: forward.76
= control target key start
LH: loop header
LB: loop body
LE: loop exit
PB: predicated region body
PF: predicated region fallthrough
CT: control target
= control target key end

     0   :  { %8 = vsyncpa [#allocation4], 0  ;;  %s664_s12 = smov [#allocation3]   ;;  %s769_s0 = inlined_call_operand.vmem [shape: bf16[128,128], index: 0, kind: input, shape index: {}]   ;;  %s770_s1 = inlined_call_operand.vmem [shape: bf16[128,128], index: 1, kind: input, shape index: {}]   ;;  %s771_s2 = inlined_call_operand.hbm [shape: f32[1,128], index: 2, kind: input, shape index: {}]   ;;  %s772_s3 = inlined_call_operand.vmem [shape: bf16[128,128], index: 3, kind: output, shape index: {}]  }
   0x1   :  { %s19_s13 = sshll.u32 %s664_s12, 4  ;;  %s640_s16 = scalar_lea.hbm %s771_s2, 16  ;;  %s20_s13 = int_to_ptr.vmem [resolvable:$true] %s19_s13 }
   0x2   :  { %p641_p0 = scmp.ne.s32.totalorder %s771_s2, %s640_s16  ;;  %p644_p1 = scmp.lt.u32.totalorder %s640_s16, %s771_s2 }
   0x4   :  { %p646_p2 = pnand %p644_p1, %p641_p0 }
   0x6   :  { %649 = shalt.err (!%p646_p2)
}
   0x7   :  { %s650_s21 = scalar_lea.vmem %s20_s13, 16  ;;  %s654_s22 = scalar_lea.vmem %s20_s13, 32 }
   0x8   :  { %p651_p3 = scmp.ne.s32.totalorder %s20_s13, %s650_s21  ;;  %p655_p4 = scmp.lt.s32.totalorder %s20_s13, %s20_s13 }
   0x9   :  { %p656_p5 = scmp.lt.s32.totalorder %s654_s22, %s650_s21 }
   0xb   :  { %p657_p6 = por %p656_p5, %p655_p4 }
   0xd   :  { %p658_p7 = pnand %p657_p6, %p651_p3 }
   0xf   :  { %661 = shalt.err (!%p658_p7)
}
  0x10   :  { %22 = dma.hbm_to_vmem [thread:$0]  %s771_s2, 16, %s20_s13, [#allocation4]  }
  0x11   :  { %662 = dma.done.wait [#allocation4], 16  }
  0x12   :  { %663 = vsyncadd [#allocation4], 4294967280  ;;  %v624_v0 = vld [vmem:[%s770_s1] sm:$0xff]   ;;  %v625_v1 = vld [vmem:[%s770_s1 + $0x8] sm:$0xff]  }
  0x13   :  { %575 = vmatprep.subr.bf16.mxu0 %v624_v0  ;;  %607 = vmatprep.subr.bf16.mxu1 %v624_v0  ;;  %v626_v2 = vld [vmem:[%s770_s1 + $0x10] sm:$0xff]   ;;  %v627_v3 = vld [vmem:[%s770_s1 + $0x18] sm:$0xff]   ;;  %v632_v4 = vld [vmem:[%s769_s0] sm:$0xff]  }
  0x14   :  { %576 = vmatpush3.bf16.msra.mxu0 %v624_v0  ;;  %615 = vmatpush3.bf16.msra.mxu1 %v624_v0  ;;  %v633_v5 = vld [vmem:[%s769_s0 + $0x20] sm:$0xff]   ;;  %v629_v7 = vld [vmem:[%s770_s1 + $0x28] sm:$0xff]   ;;  %v630_v8 = vld [vmem:[%s770_s1 + $0x30] sm:$0xff]  }
  0x15   :  { %577 = vmatprep.subr.bf16.mxu0 %v625_v1  ;;  %608 = vmatprep.subr.bf16.mxu1 %v625_v1  ;;  %v628_v6 = vld [vmem:[%s770_s1 + $0x20] sm:$0xff]   ;;  %v631_v9 = vld [vmem:[%s770_s1 + $0x38] sm:$0xff]   ;;  %v634_v10 = vld [vmem:[%s769_s0 + $0x8] sm:$0xff]  }
  0x16   :  { %591 = vmatprep.mubr.bf16.mxu0 %v632_v4  ;;  %599 = vmatprep.mubr.bf16.mxu1 %v633_v5  ;;  %v635_v11 = vld [vmem:[%s769_s0 + $0x28] sm:$0xff]   ;;  %v636_v12 = vld [vmem:[%s769_s0 + $0x10] sm:$0xff]   ;;  %v638_v14 = vld [vmem:[%s769_s0 + $0x18] sm:$0xff]  }
  0x17   :  { %v637_v13 = vld [vmem:[%s769_s0 + $0x30] sm:$0xff]   ;;  %v639_v15 = vld [vmem:[%s769_s0 + $0x38] sm:$0xff]   ;;  %v479_v16 = vld [vmem:[#allocation3] ss:$0 sm:$0xff] }
  0x18   :  { %578 = vmatpush3.bf16.msra.mxu0 %v625_v1  ;;  %616 = vmatpush3.bf16.msra.mxu1 %v625_v1 }
  0x19   :  { %579 = vmatprep.subr.bf16.mxu0 %v626_v2  ;;  %609 = vmatprep.subr.bf16.mxu1 %v626_v2 }
  0x1c   :  { %580 = vmatpush3.bf16.msra.mxu0 %v626_v2  ;;  %617 = vmatpush3.bf16.msra.mxu1 %v626_v2 }
  0x1d   :  { %581 = vmatprep.subr.bf16.mxu0 %v627_v3  ;;  %610 = vmatprep.subr.bf16.mxu1 %v627_v3 }
  0x20   :  { %582 = vmatpush3.bf16.msra.mxu0 %v627_v3  ;;  %618 = vmatpush3.bf16.msra.mxu1 %v627_v3 }
  0x21   :  { %583 = vmatprep.subr.bf16.mxu0 %v628_v6  ;;  %611 = vmatprep.subr.bf16.mxu1 %v628_v6 }
  0x24   :  { %584 = vmatpush3.bf16.msra.mxu0 %v628_v6  ;;  %619 = vmatpush3.bf16.msra.mxu1 %v628_v6 }
  0x25   :  { %585 = vmatprep.subr.bf16.mxu0 %v629_v7  ;;  %612 = vmatprep.subr.bf16.mxu1 %v629_v7 }
  0x28   :  { %586 = vmatpush3.bf16.msra.mxu0 %v629_v7  ;;  %620 = vmatpush3.bf16.msra.mxu1 %v629_v7 }
  0x29   :  { %587 = vmatprep.subr.bf16.mxu0 %v630_v8  ;;  %613 = vmatprep.subr.bf16.mxu1 %v630_v8 }
  0x2c   :  { %588 = vmatpush3.bf16.msra.mxu0 %v630_v8  ;;  %621 = vmatpush3.bf16.msra.mxu1 %v630_v8 }
  0x2d   :  { %589 = vmatprep.subr.bf16.mxu0 %v631_v9  ;;  %614 = vmatprep.subr.bf16.mxu1 %v631_v9 }
  0x30   :  { %590 = vmatpush3.bf16.msra.mxu0 %v631_v9  ;;  %622 = vmatpush3.bf16.msra.mxu1 %v631_v9 }
  0x33   :  { %592 = vmatmul.mubr.bf16.vlgmr.msra.gmra.mrb[0].mxu0 %v634_v10  ;;  %600 = vmatmul.mubr.bf16.vlgmr.msra.gmra.mrb[0].mxu1 %v635_v11 }
  0x34   :  { %595 = vmatprep.mubr.bf16.mxu0 %v636_v12  ;;  %603 = vmatprep.mubr.bf16.mxu1 %v637_v13 }
  0x3b   :  { %596 = vmatmul.mubr.bf16.gmra.mrb[4].mxu0 %v638_v14  ;;  %604 = vmatmul.mubr.bf16.gmra.mrb[4].mxu1 %v639_v15 }
 0x106   :  { %v593_v17 = vpop.f32.mrb[0].mxu0  ;;  %v601_v18 = vpop.f32.mrb[0].mxu1 }
 0x107   :  { %v348_v19 = vadd.f32 %v593_v17, %v479_v16  ;;  %v356_v20 = vadd.f32 %v601_v18, %v479_v16  ;;  %v225_v21 = vpop.f32.mrb[1].mxu0  ;;  %v257_v22 = vpop.f32.mrb[1].mxu1 }
 0x108   :  { %v346_v23 = vadd.f32 %v479_v16, %v225_v21  ;;  %v354_v24 = vadd.f32 %v479_v16, %v257_v22  ;;  %v594_v25 = vpop.f32.mrb[2].mxu0  ;;  %v602_v26 = vpop.f32.mrb[2].mxu1 }
 0x109   :  { %v349_v27 = vadd.f32 %v594_v25, %v479_v16  ;;  %v357_v28 = vadd.f32 %v602_v26, %v479_v16  ;;  %v228_v29 = vpop.f32.mrb[3].mxu0  ;;  %v260_v30 = vpop.f32.mrb[3].mxu1  ;;  %v364_v33 = vmax.f32 %v348_v19, 0.0  ;;  %v372_v34 = vmax.f32 %v356_v20, 0.0 }
 0x10a   :  { %v347_v31 = vadd.f32 %v479_v16, %v228_v29  ;;  %v355_v32 = vadd.f32 %v479_v16, %v260_v30  ;;  %v362_v37 = vmax.f32 %v346_v23, 0.0  ;;  %v370_v38 = vmax.f32 %v354_v24, 0.0 }
 0x10b   :  { %v365_v35 = vmax.f32 %v349_v27, 0.0  ;;  %v373_v36 = vmax.f32 %v357_v28, 0.0 }
 0x10c   :  { %v363_v39 = vmax.f32 %v347_v31, 0.0  ;;  %v371_v40 = vmax.f32 %v355_v32, 0.0 }
 0x10d   :  { %v520_v41 = vpack.c.bf16 %v365_v35, %v364_v33  ;;  %v540_v42 = vpack.c.bf16 %v373_v36, %v372_v34 }
 0x10e   :  { %v515_v43 = vpack.c.bf16 %v363_v39, %v362_v37  ;;  %v535_v44 = vpack.c.bf16 %v371_v40, %v370_v38  ;;  %v597_v45 = vpop.f32.mrb[4].mxu0  ;;  %v605_v46 = vpop.f32.mrb[4].mxu1 }
 0x10f   :  { %552 = vst [vmem:[%s772_s3 + $0x8] sm:$0xff] %v520_v41   ;;  %556 = vst [vmem:[%s772_s3 + $0x28] sm:$0xff] %v540_v42   ;;  %v352_v47 = vadd.f32 %v597_v45, %v479_v16  ;;  %v360_v48 = vadd.f32 %v605_v46, %v479_v16  ;;  %v241_v49 = vpop.f32.mrb[5].mxu0  ;;  %v273_v50 = vpop.f32.mrb[5].mxu1 }
 0x110   :  { %516 = vst [vmem:[%s772_s3] sm:$0xff] %v515_v43   ;;  %555 = vst [vmem:[%s772_s3 + $0x20] sm:$0xff] %v535_v44   ;;  %v350_v51 = vadd.f32 %v479_v16, %v241_v49  ;;  %v358_v52 = vadd.f32 %v479_v16, %v273_v50  ;;  %v598_v53 = vpop.f32.mrb[6].mxu0  ;;  %v606_v54 = vpop.f32.mrb[6].mxu1 }
 0x111   :  { %v353_v55 = vadd.f32 %v598_v53, %v479_v16  ;;  %v361_v56 = vadd.f32 %v606_v54, %v479_v16  ;;  %v244_v57 = vpop.f32.mrb[7].mxu0  ;;  %v276_v58 = vpop.f32.mrb[7].mxu1  ;;  %v368_v61 = vmax.f32 %v352_v47, 0.0  ;;  %v376_v62 = vmax.f32 %v360_v48, 0.0 }
 0x112   :  { %v351_v59 = vadd.f32 %v479_v16, %v244_v57  ;;  %v359_v60 = vadd.f32 %v479_v16, %v276_v58  ;;  %v366_v1 = vmax.f32 %v350_v51, 0.0  ;;  %v374_v2 = vmax.f32 %v358_v52, 0.0 }
 0x113   :  { %v369_v63 = vmax.f32 %v353_v55, 0.0  ;;  %v377_v0 = vmax.f32 %v361_v56, 0.0 }
 0x114   :  { %v367_v3 = vmax.f32 %v351_v59, 0.0  ;;  %v375_v4 = vmax.f32 %v359_v60, 0.0 }
 0x115   :  { %v530_v5 = vpack.c.bf16 %v369_v63, %v368_v61  ;;  %v550_v6 = vpack.c.bf16 %v377_v0, %v376_v62 }
 0x116   :  { %v525_v7 = vpack.c.bf16 %v367_v3, %v366_v1  ;;  %v545_v8 = vpack.c.bf16 %v375_v4, %v374_v2 }
 0x117   :  { %554 = vst [vmem:[%s772_s3 + $0x18] sm:$0xff] %v530_v5   ;;  %558 = vst [vmem:[%s772_s3 + $0x38] sm:$0xff] %v550_v6  }
 0x118   :  { %553 = vst [vmem:[%s772_s3 + $0x10] sm:$0xff] %v525_v7   ;;  %557 = vst [vmem:[%s772_s3 + $0x30] sm:$0xff] %v545_v8  }
 0x119   :  { %462 = vsyncpa [#allocation4], 1 }

// kernel: forward.74
= control target key start
LH: loop header
LB: loop body
LE: loop exit
PB: predicated region body
PF: predicated region fallthrough
CT: control target
= control target key end

     0   :  { %8 = vsyncpa [#allocation4], 0  ;;  %s816_s12 = smov [#allocation3]   ;;  %s987_s0 = inlined_call_operand.vmem [shape: bf16[128,256], index: 0, kind: input, shape index: {}]   ;;  %s988_s1 = inlined_call_operand.vmem [shape: bf16[256,128], index: 1, kind: input, shape index: {}]   ;;  %s989_s2 = inlined_call_operand.hbm [shape: f32[1,128], index: 2, kind: input, shape index: {}]   ;;  %s990_s3 = inlined_call_operand.vmem [shape: bf16[128,128], index: 3, kind: output, shape index: {}]  }
   0x1   :  { %s19_s13 = sshll.u32 %s816_s12, 4  ;;  %s792_s16 = scalar_lea.hbm %s989_s2, 16  ;;  %s20_s13 = int_to_ptr.vmem [resolvable:$true] %s19_s13 }
   0x2   :  { %p793_p0 = scmp.ne.s32.totalorder %s989_s2, %s792_s16  ;;  %p796_p1 = scmp.lt.u32.totalorder %s792_s16, %s989_s2 }
   0x4   :  { %p798_p2 = pnand %p796_p1, %p793_p0 }
   0x6   :  { %801 = shalt.err (!%p798_p2)
}
   0x7   :  { %s802_s21 = scalar_lea.vmem %s20_s13, 16  ;;  %s806_s22 = scalar_lea.vmem %s20_s13, 32 }
   0x8   :  { %p803_p3 = scmp.ne.s32.totalorder %s20_s13, %s802_s21  ;;  %p807_p4 = scmp.lt.s32.totalorder %s20_s13, %s20_s13 }
   0x9   :  { %p808_p5 = scmp.lt.s32.totalorder %s806_s22, %s802_s21 }
   0xb   :  { %p809_p6 = por %p808_p5, %p807_p4 }
   0xd   :  { %p810_p7 = pnand %p809_p6, %p803_p3 }
   0xf   :  { %813 = shalt.err (!%p810_p7)
}
  0x10   :  { %22 = dma.hbm_to_vmem [thread:$0]  %s989_s2, 16, %s20_s13, [#allocation4]  }
  0x11   :  { %814 = dma.done.wait [#allocation4], 16  }
  0x12   :  { %815 = vsyncadd [#allocation4], 4294967280  ;;  %v752_v0 = vld [vmem:[%s988_s1 + $0x40] sm:$0xff]   ;;  %v754_v2 = vld [vmem:[%s988_s1 + $0x48] sm:$0xff]  }
  0x13   :  { %v753_v1 = vld [vmem:[%s988_s1] sm:$0xff]   ;;  %671 = vmatprep.subr.bf16.mxu0 %v752_v0  ;;  %735 = vmatprep.subr.bf16.mxu1 %v752_v0  ;;  %v755_v3 = vld [vmem:[%s988_s1 + $0x8] sm:$0xff]   ;;  %v756_v4 = vld [vmem:[%s988_s1 + $0x50] sm:$0xff]  }
  0x14   :  { %672 = vmatpush3.bf16.msra.mxu0 %v753_v1  ;;  %743 = vmatpush3.bf16.msra.mxu1 %v753_v1  ;;  %v757_v5 = vld [vmem:[%s988_s1 + $0x10] sm:$0xff]   ;;  %v758_v6 = vld [vmem:[%s988_s1 + $0x58] sm:$0xff]   ;;  %v760_v8 = vld [vmem:[%s988_s1 + $0x60] sm:$0xff]  }
  0x15   :  { %673 = vmatprep.subr.bf16.mxu0 %v754_v2  ;;  %736 = vmatprep.subr.bf16.mxu1 %v754_v2  ;;  %v759_v7 = vld [vmem:[%s988_s1 + $0x18] sm:$0xff]   ;;  %v761_v9 = vld [vmem:[%s988_s1 + $0x20] sm:$0xff]   ;;  %v762_v10 = vld [vmem:[%s988_s1 + $0x68] sm:$0xff]  }
  0x16   :  { %v770_v11 = vld [vmem:[%s987_s0 + $0x4] ss:$8 sps:$4 sm:$0xff]   ;;  %v764_v14 = vld [vmem:[%s988_s1 + $0x70] sm:$0xff]   ;;  %v766_v16 = vld [vmem:[%s988_s1 + $0x78] sm:$0xff]  }
  0x17   :  { %v773_v12 = vld [vmem:[%s987_s0 + $0x44] ss:$8 sps:$4 sm:$0xff]   ;;  %319 = vmatprep.mubr.bf16.mxu0 %v770_v11  ;;  %v765_v15 = vld [vmem:[%s988_s1 + $0x30] sm:$0xff]   ;;  %v767_v17 = vld [vmem:[%s988_s1 + $0x38] sm:$0xff]  }
  0x18   :  { %674 = vmatpush3.bf16.msra.mxu0 %v755_v3  ;;  %744 = vmatpush3.bf16.msra.mxu1 %v755_v3  ;;  %v763_v13 = vld [vmem:[%s988_s1 + $0x28] sm:$0xff]   ;;  %v774_v20 = vld [vmem:[%s987_s0 + $0x14] ss:$8 sps:$4 sm:$0xff]   ;;  %v778_v22 = vld [vmem:[%s987_s0 + $0x10] ss:$8 sps:$4 sm:$0xff]  }
  0x19   :  { %675 = vmatprep.subr.bf16.mxu0 %v756_v4  ;;  %737 = vmatprep.subr.bf16.mxu1 %v756_v4  ;;  %v768_v18 = vld [vmem:[%s987_s0] ss:$8 sps:$4 sm:$0xff]   ;;  %v776_v21 = vld [vmem:[%s987_s0 + $0x54] ss:$8 sps:$4 sm:$0xff]   ;;  %v779_v23 = vld [vmem:[%s987_s0 + $0x50] ss:$8 sps:$4 sm:$0xff]  }
  0x1a   :  { %351 = vmatprep.mubr.bf16.mxu1 %v773_v12  ;;  %v771_v19 = vld [vmem:[%s987_s0 + $0x40] ss:$8 sps:$4 sm:$0xff]   ;;  %v780_v24 = vld [vmem:[%s987_s0 + $0x24] ss:$8 sps:$4 sm:$0xff]   ;;  %v786_v28 = vld [vmem:[%s987_s0 + $0x34] ss:$8 sps:$4 sm:$0xff]  }
  0x1b   :  { %v782_v25 = vld [vmem:[%s987_s0 + $0x64] ss:$8 sps:$4 sm:$0xff]   ;;  %v784_v26 = vld [vmem:[%s987_s0 + $0x20] ss:$8 sps:$4 sm:$0xff]   ;;  %v788_v29 = vld [vmem:[%s987_s0 + $0x74] ss:$8 sps:$4 sm:$0xff]  }
  0x1c   :  { %676 = vmatpush3.bf16.msra.mxu0 %v757_v5  ;;  %745 = vmatpush3.bf16.msra.mxu1 %v757_v5  ;;  %v785_v27 = vld [vmem:[%s987_s0 + $0x60] ss:$8 sps:$4 sm:$0xff]   ;;  %v790_v30 = vld [vmem:[%s987_s0 + $0x30] ss:$8 sps:$4 sm:$0xff]  }
  0x1d   :  { %677 = vmatprep.subr.bf16.mxu0 %v758_v6  ;;  %738 = vmatprep.subr.bf16.mxu1 %v758_v6  ;;  %v791_v31 = vld [vmem:[%s987_s0 + $0x70] ss:$8 sps:$4 sm:$0xff]   ;;  %v945_v35 = vld [vmem:[#allocation3] ss:$0 sm:$0xff] }
  0x20   :  { %678 = vmatpush3.bf16.msra.mxu0 %v759_v7  ;;  %746 = vmatpush3.bf16.msra.mxu1 %v759_v7 }
  0x21   :  { %679 = vmatprep.subr.bf16.mxu0 %v760_v8  ;;  %739 = vmatprep.subr.bf16.mxu1 %v760_v8 }
  0x24   :  { %680 = vmatpush3.bf16.msra.mxu0 %v761_v9  ;;  %747 = vmatpush3.bf16.msra.mxu1 %v761_v9 }
  0x25   :  { %681 = vmatprep.subr.bf16.mxu0 %v762_v10  ;;  %740 = vmatprep.subr.bf16.mxu1 %v762_v10 }
  0x28   :  { %682 = vmatpush3.bf16.msra.mxu0 %v763_v13  ;;  %748 = vmatpush3.bf16.msra.mxu1 %v763_v13 }
  0x29   :  { %683 = vmatprep.subr.bf16.mxu0 %v764_v14  ;;  %741 = vmatprep.subr.bf16.mxu1 %v764_v14 }
  0x2c   :  { %684 = vmatpush3.bf16.msra.mxu0 %v765_v15  ;;  %749 = vmatpush3.bf16.msra.mxu1 %v765_v15 }
  0x2d   :  { %685 = vmatprep.subr.bf16.mxu0 %v766_v16  ;;  %742 = vmatprep.subr.bf16.mxu1 %v766_v16 }
  0x30   :  { %686 = vmatpush3.bf16.msra.mxu0 %v767_v17  ;;  %750 = vmatpush3.bf16.msra.mxu1 %v767_v17 }
  0x33   :  { %320 = vmatmul.mubr.bf16.vlgmr.msra.gmra.mrb[0].mxu0 %v768_v18  ;;  %352 = vmatmul.mubr.bf16.vlgmr.msra.gmra.mrb[0].mxu1 %v771_v19 }
  0x34   :  { %327 = vmatprep.mubr.bf16.mxu0 %v774_v20  ;;  %359 = vmatprep.mubr.bf16.mxu1 %v776_v21 }
  0x3b   :  { %328 = vmatmul.mubr.bf16.gmra.mrb[4].mxu0 %v778_v22  ;;  %360 = vmatmul.mubr.bf16.gmra.mrb[4].mxu1 %v779_v23 }
  0x3c   :  { %335 = vmatprep.mubr.bf16.mxu0 %v780_v24  ;;  %367 = vmatprep.mubr.bf16.mxu1 %v782_v25 }
  0x43   :  { %336 = vmatmul.mubr.bf16.gmra.mrb[8].mxu0 %v784_v26  ;;  %368 = vmatmul.mubr.bf16.gmra.mrb[8].mxu1 %v785_v27 }
  0x44   :  { %343 = vmatprep.mubr.bf16.mxu0 %v786_v28  ;;  %375 = vmatprep.mubr.bf16.mxu1 %v788_v29 }
  0x4b   :  { %344 = vmatmul.mubr.bf16.gmra.mrb[12].mxu0 %v790_v30  ;;  %376 = vmatmul.mubr.bf16.gmra.mrb[12].mxu1 %v791_v31 }
 0x106   :  { %v687_v32 = vpop.f32.mrb[0].mxu0  ;;  %v711_v33 = vpop.f32.mrb[0].mxu1 }
 0x107   :  { %v688_v34 = vpop.f32.mrb[1].mxu0  ;;  %v712_v36 = vpop.f32.mrb[1].mxu1 }
 0x108   :  { %v689_v37 = vadd.f32 %v688_v34, %v687_v32  ;;  %v713_v38 = vadd.f32 %v712_v36, %v711_v33  ;;  %v690_v39 = vpop.f32.mrb[2].mxu0  ;;  %v714_v40 = vpop.f32.mrb[2].mxu1 }
 0x109   :  { %v691_v41 = vpop.f32.mrb[3].mxu0  ;;  %v715_v42 = vpop.f32.mrb[3].mxu1 }
 0x10a   :  { %v442_v43 = vadd.f32 %v689_v37, %v945_v35  ;;  %v450_v44 = vadd.f32 %v713_v38, %v945_v35  ;;  %v692_v45 = vadd.f32 %v691_v41, %v690_v39  ;;  %v716_v46 = vadd.f32 %v715_v42, %v714_v40 }
 0x10c   :  { %v443_v47 = vadd.f32 %v692_v45, %v945_v35  ;;  %v451_v48 = vadd.f32 %v716_v46, %v945_v35  ;;  %v458_v49 = vmax.f32 %v442_v43, 0.0  ;;  %v466_v50 = vmax.f32 %v450_v44, 0.0 }
 0x10e   :  { %v459_v51 = vmax.f32 %v443_v47, 0.0  ;;  %v467_v52 = vmax.f32 %v451_v48, 0.0  ;;  %v693_v53 = vpop.f32.mrb[4].mxu0  ;;  %v717_v54 = vpop.f32.mrb[4].mxu1 }
 0x10f   :  { %v694_v55 = vpop.f32.mrb[5].mxu0  ;;  %v718_v56 = vpop.f32.mrb[5].mxu1 }
 0x110   :  { %v627_v57 = vpack.c.bf16 %v459_v51, %v458_v49  ;;  %v647_v58 = vpack.c.bf16 %v467_v52, %v466_v50  ;;  %v695_v59 = vadd.f32 %v694_v55, %v693_v53  ;;  %v719_v60 = vadd.f32 %v718_v56, %v717_v54  ;;  %v696_v61 = vpop.f32.mrb[6].mxu0  ;;  %v720_v62 = vpop.f32.mrb[6].mxu1 }
 0x111   :  { %v697_v63 = vpop.f32.mrb[7].mxu0  ;;  %v721_v0 = vpop.f32.mrb[7].mxu1 }
 0x112   :  { %628 = vst [vmem:[%s990_s3] sm:$0xff] %v627_v57   ;;  %667 = vst [vmem:[%s990_s3 + $0x20] sm:$0xff] %v647_v58   ;;  %v444_v1 = vadd.f32 %v695_v59, %v945_v35  ;;  %v452_v2 = vadd.f32 %v719_v60, %v945_v35  ;;  %v698_v3 = vadd.f32 %v697_v63, %v696_v61 }
 0x113   :  { %v722_v4 = vadd.f32 %v721_v0, %v720_v62 }
 0x114   :  { %v445_v5 = vadd.f32 %v698_v3, %v945_v35  ;;  %v460_v7 = vmax.f32 %v444_v1, 0.0  ;;  %v468_v8 = vmax.f32 %v452_v2, 0.0 }
 0x115   :  { %v453_v6 = vadd.f32 %v722_v4, %v945_v35 }
 0x116   :  { %v461_v9 = vmax.f32 %v445_v5, 0.0  ;;  %v699_v11 = vpop.f32.mrb[8].mxu0  ;;  %v723_v12 = vpop.f32.mrb[8].mxu1 }
 0x117   :  { %v469_v10 = vmax.f32 %v453_v6, 0.0  ;;  %v700_v13 = vpop.f32.mrb[9].mxu0  ;;  %v724_v14 = vpop.f32.mrb[9].mxu1 }
 0x118   :  { %v632_v15 = vpack.c.bf16 %v461_v9, %v460_v7  ;;  %v701_v17 = vadd.f32 %v700_v13, %v699_v11  ;;  %v725_v18 = vadd.f32 %v724_v14, %v723_v12  ;;  %v702_v19 = vpop.f32.mrb[10].mxu0  ;;  %v726_v20 = vpop.f32.mrb[10].mxu1 }
 0x119   :  { %v652_v16 = vpack.c.bf16 %v469_v10, %v468_v8  ;;  %v703_v21 = vpop.f32.mrb[11].mxu0  ;;  %v727_v22 = vpop.f32.mrb[11].mxu1 }
 0x11a   :  { %664 = vst [vmem:[%s990_s3 + $0x8] sm:$0xff] %v632_v15   ;;  %v446_v23 = vadd.f32 %v701_v17, %v945_v35  ;;  %v454_v24 = vadd.f32 %v725_v18, %v945_v35  ;;  %v704_v25 = vadd.f32 %v703_v21, %v702_v19  ;;  %v728_v26 = vadd.f32 %v727_v22, %v726_v20 }
 0x11b   :  { %668 = vst [vmem:[%s990_s3 + $0x28] sm:$0xff] %v652_v16  }
 0x11c   :  { %v447_v27 = vadd.f32 %v704_v25, %v945_v35  ;;  %v455_v28 = vadd.f32 %v728_v26, %v945_v35  ;;  %v462_v29 = vmax.f32 %v446_v23, 0.0  ;;  %v470_v30 = vmax.f32 %v454_v24, 0.0 }
 0x11e   :  { %v463_v31 = vmax.f32 %v447_v27, 0.0  ;;  %v471_v32 = vmax.f32 %v455_v28, 0.0  ;;  %v705_v33 = vpop.f32.mrb[12].mxu0  ;;  %v729_v34 = vpop.f32.mrb[12].mxu1 }
 0x11f   :  { %v706_v36 = vpop.f32.mrb[13].mxu0  ;;  %v730_v37 = vpop.f32.mrb[13].mxu1 }
 0x120   :  { %v637_v38 = vpack.c.bf16 %v463_v31, %v462_v29  ;;  %v657_v39 = vpack.c.bf16 %v471_v32, %v470_v30  ;;  %v707_v40 = vadd.f32 %v706_v36, %v705_v33  ;;  %v731_v41 = vadd.f32 %v730_v37, %v729_v34  ;;  %v708_v42 = vpop.f32.mrb[14].mxu0  ;;  %v732_v43 = vpop.f32.mrb[14].mxu1 }
 0x121   :  { %v709_v44 = vpop.f32.mrb[15].mxu0  ;;  %v733_v45 = vpop.f32.mrb[15].mxu1 }
 0x122   :  { %665 = vst [vmem:[%s990_s3 + $0x10] sm:$0xff] %v637_v38   ;;  %669 = vst [vmem:[%s990_s3 + $0x30] sm:$0xff] %v657_v39   ;;  %v448_v46 = vadd.f32 %v707_v40, %v945_v35  ;;  %v456_v47 = vadd.f32 %v731_v41, %v945_v35  ;;  %v710_v48 = vadd.f32 %v709_v44, %v708_v42 }
 0x123   :  { %v734_v49 = vadd.f32 %v733_v45, %v732_v43 }
 0x124   :  { %v449_v50 = vadd.f32 %v710_v48, %v945_v35  ;;  %v464_v52 = vmax.f32 %v448_v46, 0.0  ;;  %v472_v53 = vmax.f32 %v456_v47, 0.0 }
 0x125   :  { %v457_v51 = vadd.f32 %v734_v49, %v945_v35 }
 0x126   :  { %v465_v54 = vmax.f32 %v449_v50, 0.0 }
 0x127   :  { %v473_v55 = vmax.f32 %v457_v51, 0.0 }
 0x128   :  { %v642_v56 = vpack.c.bf16 %v465_v54, %v464_v52 }
 0x129   :  { %v662_v57 = vpack.c.bf16 %v473_v55, %v472_v53 }
 0x12a   :  { %666 = vst [vmem:[%s990_s3 + $0x18] sm:$0xff] %v642_v56  }
 0x12b   :  { %670 = vst [vmem:[%s990_s3 + $0x38] sm:$0xff] %v662_v57  }
 0x12c   :  { %558 = vsyncpa [#allocation4], 1 }

// kernel: forward.81
= control target key start
LH: loop header
LB: loop body
LE: loop exit
PB: predicated region body
PF: predicated region fallthrough
CT: control target
= control target key end

     0   :  { %8 = vsyncpa [#allocation4], 0  ;;  %s314_s12 = smov [#allocation3]   ;;  %s383_s0 = inlined_call_operand.vmem [shape: bf16[32,128], index: 0, kind: input, shape index: {}]   ;;  %s384_s1 = inlined_call_operand.vmem [shape: bf16[128,128], index: 1, kind: input, shape index: {}]   ;;  %s385_s2 = inlined_call_operand.hbm [shape: f32[1,128], index: 2, kind: input, shape index: {}]   ;;  %s386_s3 = inlined_call_operand.vmem [shape: bf16[32,128], index: 3, kind: output, shape index: {}]  }
   0x1   :  { %s19_s13 = sshll.u32 %s314_s12, 4  ;;  %s290_s16 = scalar_lea.hbm %s385_s2, 16  ;;  %s20_s13 = int_to_ptr.vmem [resolvable:$true] %s19_s13 }
   0x2   :  { %p291_p0 = scmp.ne.s32.totalorder %s385_s2, %s290_s16  ;;  %p294_p1 = scmp.lt.u32.totalorder %s290_s16, %s385_s2 }
   0x4   :  { %p296_p2 = pnand %p294_p1, %p291_p0 }
   0x6   :  { %299 = shalt.err (!%p296_p2)
}
   0x7   :  { %s300_s21 = scalar_lea.vmem %s20_s13, 16  ;;  %s304_s22 = scalar_lea.vmem %s20_s13, 32 }
   0x8   :  { %p301_p3 = scmp.ne.s32.totalorder %s20_s13, %s300_s21  ;;  %p305_p4 = scmp.lt.s32.totalorder %s20_s13, %s20_s13 }
   0x9   :  { %p306_p5 = scmp.lt.s32.totalorder %s304_s22, %s300_s21 }
   0xb   :  { %p307_p6 = por %p306_p5, %p305_p4 }
   0xd   :  { %p308_p7 = pnand %p307_p6, %p301_p3 }
   0xf   :  { %311 = shalt.err (!%p308_p7)
}
  0x10   :  { %22 = dma.hbm_to_vmem [thread:$0]  %s385_s2, 16, %s20_s13, [#allocation4]  }
  0x11   :  { %312 = dma.done.wait [#allocation4], 16  }
  0x12   :  { %313 = vsyncadd [#allocation4], 4294967280  ;;  %v280_v0 = vld [vmem:[%s384_s1] sm:$0xff]   ;;  %v281_v1 = vld [vmem:[%s384_s1 + $0x8] sm:$0xff]  }
  0x13   :  { %259 = vmatprep.subr.bf16.mxu0 %v280_v0  ;;  %v282_v2 = vld [vmem:[%s384_s1 + $0x10] sm:$0xff]   ;;  %v283_v3 = vld [vmem:[%s384_s1 + $0x18] sm:$0xff]   ;;  %v288_v4 = vld [vmem:[%s383_s0] sm:$0xff]  }
  0x14   :  { %260 = vmatpush3.bf16.msra.mxu0 %v280_v0  ;;  %275 = vmatprep.mubr.bf16.mxu0 %v288_v4  ;;  %v284_v5 = vld [vmem:[%s384_s1 + $0x20] sm:$0xff]   ;;  %v285_v6 = vld [vmem:[%s384_s1 + $0x28] sm:$0xff]   ;;  %v286_v7 = vld [vmem:[%s384_s1 + $0x30] sm:$0xff]  }
  0x15   :  { %261 = vmatprep.subr.bf16.mxu0 %v281_v1  ;;  %v287_v8 = vld [vmem:[%s384_s1 + $0x38] sm:$0xff]   ;;  %v289_v9 = vld [vmem:[%s383_s0 + $0x8] sm:$0xff]   ;;  %v229_v11 = vld [vmem:[#allocation3] ss:$0 sm:$0xff] }
  0x18   :  { %262 = vmatpush3.bf16.msra.mxu0 %v281_v1 }
  0x19   :  { %263 = vmatprep.subr.bf16.mxu0 %v282_v2 }
  0x1c   :  { %264 = vmatpush3.bf16.msra.mxu0 %v282_v2 }
  0x1d   :  { %265 = vmatprep.subr.bf16.mxu0 %v283_v3 }
  0x20   :  { %266 = vmatpush3.bf16.msra.mxu0 %v283_v3 }
  0x21   :  { %267 = vmatprep.subr.bf16.mxu0 %v284_v5 }
  0x24   :  { %268 = vmatpush3.bf16.msra.mxu0 %v284_v5 }
  0x25   :  { %269 = vmatprep.subr.bf16.mxu0 %v285_v6 }
  0x28   :  { %270 = vmatpush3.bf16.msra.mxu0 %v285_v6 }
  0x29   :  { %271 = vmatprep.subr.bf16.mxu0 %v286_v7 }
  0x2c   :  { %272 = vmatpush3.bf16.msra.mxu0 %v286_v7 }
  0x2d   :  { %273 = vmatprep.subr.bf16.mxu0 %v287_v8 }
  0x30   :  { %274 = vmatpush3.bf16.msra.mxu0 %v287_v8 }
  0x33   :  { %276 = vmatmul.mubr.bf16.vlgmr.msra.gmra.mrb[0].mxu0 %v289_v9 }
 0x106   :  { %v277_v10 = vpop.f32.mrb[0].mxu0 }
 0x107   :  { %v153_v12 = vpop.f32.mrb[1].mxu0  ;;  %v192_v14 = vadd.f32 %v277_v10, %v229_v11 }
 0x108   :  { %v278_v13 = vpop.f32.mrb[2].mxu0  ;;  %v190_v17 = vadd.f32 %v229_v11, %v153_v12 }
 0x109   :  { %v193_v15 = vadd.f32 %v278_v13, %v229_v11  ;;  %v156_v16 = vpop.f32.mrb[3].mxu0 }
 0x10a   :  { %v191_v18 = vadd.f32 %v229_v11, %v156_v16 }
 0x10b   :  { %v246_v19 = vpack.c.bf16 %v193_v15, %v192_v14 }
 0x10c   :  { %v241_v20 = vpack.c.bf16 %v191_v18, %v190_v17 }
 0x10d   :  { %248 = vst [vmem:[%s386_s3 + $0x8] sm:$0xff] %v246_v19  }
 0x10e   :  { %242 = vst [vmem:[%s386_s3] sm:$0xff] %v241_v20  }
 0x10f   :  { %218 = vsyncpa [#allocation4], 1 }

// kernel: forward.80
= control target key start
LH: loop header
LB: loop body
LE: loop exit
PB: predicated region body
PF: predicated region fallthrough
CT: control target
= control target key end

     0   :  { %8 = vsyncpa [#allocation4], 0  ;;  %s589_s12 = smov [#allocation3]   ;;  %s718_s0 = inlined_call_operand.vmem [shape: bf16[32,384], index: 0, kind: input, shape index: {}]   ;;  %s719_s1 = inlined_call_operand.vmem [shape: bf16[384,128], index: 1, kind: input, shape index: {}]   ;;  %s720_s2 = inlined_call_operand.hbm [shape: f32[1,128], index: 2, kind: input, shape index: {}]   ;;  %s721_s3 = inlined_call_operand.vmem [shape: bf16[32,128], index: 3, kind: output, shape index: {}]  }
   0x1   :  { %s19_s13 = sshll.u32 %s589_s12, 4  ;;  %s565_s16 = scalar_lea.hbm %s720_s2, 16  ;;  %s20_s13 = int_to_ptr.vmem [resolvable:$true] %s19_s13 }
   0x2   :  { %p566_p0 = scmp.ne.s32.totalorder %s720_s2, %s565_s16  ;;  %p569_p1 = scmp.lt.u32.totalorder %s565_s16, %s720_s2 }
   0x4   :  { %p571_p2 = pnand %p569_p1, %p566_p0 }
   0x6   :  { %574 = shalt.err (!%p571_p2)
}
   0x7   :  { %s575_s21 = scalar_lea.vmem %s20_s13, 16  ;;  %s579_s22 = scalar_lea.vmem %s20_s13, 32 }
   0x8   :  { %p576_p3 = scmp.ne.s32.totalorder %s20_s13, %s575_s21  ;;  %p580_p4 = scmp.lt.s32.totalorder %s20_s13, %s20_s13 }
   0x9   :  { %p581_p5 = scmp.lt.s32.totalorder %s579_s22, %s575_s21 }
   0xb   :  { %p582_p6 = por %p581_p5, %p580_p4 }
   0xd   :  { %p583_p7 = pnand %p582_p6, %p576_p3 }
   0xf   :  { %586 = shalt.err (!%p583_p7)
}
  0x10   :  { %22 = dma.hbm_to_vmem [thread:$0]  %s720_s2, 16, %s20_s13, [#allocation4]  }
  0x11   :  { %587 = dma.done.wait [#allocation4], 16  }
  0x12   :  { %588 = vsyncadd [#allocation4], 4294967280  ;;  %v533_v0 = vld [vmem:[%s719_s1 + $0x40] sm:$0xff]   ;;  %v536_v3 = vld [vmem:[%s719_s1 + $0x48] sm:$0xff]  }
  0x13   :  { %v534_v1 = vld [vmem:[%s719_s1] sm:$0xff]   ;;  %474 = vmatprep.subr.bf16.mxu0 %v533_v0  ;;  %v537_v4 = vld [vmem:[%s719_s1 + $0x8] sm:$0xff]   ;;  %v539_v6 = vld [vmem:[%s719_s1 + $0x50] sm:$0xff]  }
  0x14   :  { %v535_v2 = vld [vmem:[%s719_s1 + $0x80] sm:$0xff]   ;;  %475 = vmatpush3.bf16.msra.mxu0 %v534_v1  ;;  %v538_v5 = vld [vmem:[%s719_s1 + $0x88] sm:$0xff]   ;;  %v540_v7 = vld [vmem:[%s719_s1 + $0x10] sm:$0xff]  }
  0x15   :  { %512 = vmatprep.subr.bf16.mxu1 %v535_v2  ;;  %476 = vmatprep.subr.bf16.mxu0 %v536_v3  ;;  %v541_v8 = vld [vmem:[%s719_s1 + $0x90] sm:$0xff]   ;;  %v542_v9 = vld [vmem:[%s719_s1 + $0x58] sm:$0xff]   ;;  %v545_v12 = vld [vmem:[%s719_s1 + $0x60] sm:$0xff]  }
  0x16   :  { %513 = vmatpush3.bf16.msra.mxu1 %v535_v2  ;;  %v543_v10 = vld [vmem:[%s719_s1 + $0x18] sm:$0xff]   ;;  %v547_v13 = vld [vmem:[%s719_s1 + $0xa0] sm:$0xff]   ;;  %v548_v15 = vld [vmem:[%s719_s1 + $0x68] sm:$0xff]  }
  0x17   :  { %514 = vmatprep.subr.bf16.mxu1 %v538_v5  ;;  %v544_v11 = vld [vmem:[%s719_s1 + $0x98] sm:$0xff]   ;;  %v546_v14 = vld [vmem:[%s719_s1 + $0x20] sm:$0xff]   ;;  %v550_v16 = vld [vmem:[%s719_s1 + $0xa8] sm:$0xff]  }
  0x18   :  { %477 = vmatpush3.bf16.msra.mxu0 %v537_v4  ;;  %v549_v17 = vld [vmem:[%s719_s1 + $0x28] sm:$0xff]   ;;  %v551_v18 = vld [vmem:[%s719_s1 + $0x70] sm:$0xff]   ;;  %v554_v21 = vld [vmem:[%s719_s1 + $0x78] sm:$0xff]  }
  0x19   :  { %478 = vmatprep.subr.bf16.mxu0 %v539_v6  ;;  %v552_v19 = vld [vmem:[%s719_s1 + $0x30] sm:$0xff]   ;;  %v556_v22 = vld [vmem:[%s719_s1 + $0xb8] sm:$0xff]   ;;  %v557_v26 = vld [vmem:[%s718_s0] ss:$12 sps:$4 sm:$0xff]  }
  0x1a   :  { %515 = vmatpush3.bf16.msra.mxu1 %v538_v5  ;;  %v553_v20 = vld [vmem:[%s719_s1 + $0xb0] sm:$0xff]   ;;  %v555_v25 = vld [vmem:[%s719_s1 + $0x38] sm:$0xff]   ;;  %v561_v28 = vld [vmem:[%s718_s0 + $0x20] ss:$12 sps:$4 sm:$0xff]  }
  0x1b   :  { %516 = vmatprep.subr.bf16.mxu1 %v541_v8  ;;  %v559_v23 = vld [vmem:[%s718_s0 + $0x4] ss:$12 sps:$4 sm:$0xff]   ;;  %v560_v24 = vld [vmem:[%s718_s0 + $0x8] ss:$12 sps:$4 sm:$0xff]   ;;  %v454_v37 = vld [vmem:[#allocation3] ss:$0 sm:$0xff] }
  0x1c   :  { %479 = vmatpush3.bf16.msra.mxu0 %v540_v7  ;;  %303 = vmatprep.mubr.bf16.mxu0 %v559_v23  ;;  %v562_v27 = vld [vmem:[%s718_s0 + $0x1c] ss:$12 sps:$4 sm:$0xff]   ;;  %v564_v29 = vld [vmem:[%s718_s0 + $0x18] ss:$12 sps:$4 sm:$0xff]  }
  0x1d   :  { %480 = vmatprep.subr.bf16.mxu0 %v542_v9  ;;  %528 = vmatprep.mubr.bf16.mxu1 %v560_v24 }
  0x1e   :  { %517 = vmatpush3.bf16.msra.mxu1 %v541_v8 }
  0x1f   :  { %518 = vmatprep.subr.bf16.mxu1 %v544_v11 }
  0x20   :  { %481 = vmatpush3.bf16.msra.mxu0 %v543_v10 }
  0x21   :  { %482 = vmatprep.subr.bf16.mxu0 %v545_v12 }
  0x22   :  { %519 = vmatpush3.bf16.msra.mxu1 %v544_v11 }
  0x23   :  { %520 = vmatprep.subr.bf16.mxu1 %v547_v13 }
  0x24   :  { %483 = vmatpush3.bf16.msra.mxu0 %v546_v14 }
  0x25   :  { %484 = vmatprep.subr.bf16.mxu0 %v548_v15 }
  0x26   :  { %521 = vmatpush3.bf16.msra.mxu1 %v547_v13 }
  0x27   :  { %522 = vmatprep.subr.bf16.mxu1 %v550_v16 }
  0x28   :  { %485 = vmatpush3.bf16.msra.mxu0 %v549_v17 }
  0x29   :  { %486 = vmatprep.subr.bf16.mxu0 %v551_v18 }
  0x2a   :  { %523 = vmatpush3.bf16.msra.mxu1 %v550_v16 }
  0x2b   :  { %524 = vmatprep.subr.bf16.mxu1 %v553_v20 }
  0x2c   :  { %487 = vmatpush3.bf16.msra.mxu0 %v552_v19 }
  0x2d   :  { %488 = vmatprep.subr.bf16.mxu0 %v554_v21 }
  0x2e   :  { %525 = vmatpush3.bf16.msra.mxu1 %v553_v20 }
  0x2f   :  { %526 = vmatprep.subr.bf16.mxu1 %v556_v22 }
  0x30   :  { %489 = vmatpush3.bf16.msra.mxu0 %v555_v25 }
  0x32   :  { %527 = vmatpush3.bf16.msra.mxu1 %v556_v22 }
  0x33   :  { %304 = vmatmul.mubr.bf16.vlgmr.msra.gmra.mrb[0].mxu0 %v557_v26 }
  0x34   :  { %311 = vmatprep.mubr.bf16.mxu0 %v562_v27 }
  0x35   :  { %529 = vmatmul.mubr.bf16.vlgmr.msra.gmra.mrb[0].mxu1 %v561_v28 }
  0x3b   :  { %312 = vmatmul.mubr.bf16.gmra.mrb[4].mxu0 %v564_v29 }
 0x106   :  { %v490_v30 = vpop.f32.mrb[0].mxu0 }
 0x107   :  { %v491_v31 = vpop.f32.mrb[1].mxu0 }
 0x108   :  { %v492_v32 = vadd.f32 %v491_v31, %v490_v30  ;;  %v493_v33 = vpop.f32.mrb[2].mxu0  ;;  %v530_v34 = vpop.f32.mrb[0].mxu1 }
 0x109   :  { %v494_v35 = vpop.f32.mrb[3].mxu0  ;;  %v354_v36 = vpop.f32.mrb[1].mxu1 }
 0x10a   :  { %v495_v38 = vadd.f32 %v494_v35, %v493_v33  ;;  %v355_v39 = vadd.f32 %v492_v32, %v354_v36  ;;  %v531_v40 = vpop.f32.mrb[2].mxu1 }
 0x10b   :  { %v357_v41 = vpop.f32.mrb[3].mxu1 }
 0x10c   :  { %v391_v42 = vadd.f32 %v454_v37, %v355_v39  ;;  %v358_v43 = vadd.f32 %v495_v38, %v357_v41 }
 0x10e   :  { %v392_v44 = vadd.f32 %v454_v37, %v358_v43  ;;  %v496_v45 = vpop.f32.mrb[4].mxu0  ;;  %v395_v47 = vmax.f32 %v391_v42, 0.0 }
 0x10f   :  { %v497_v46 = vpop.f32.mrb[5].mxu0 }
 0x110   :  { %v396_v48 = vmax.f32 %v392_v44, 0.0  ;;  %v498_v49 = vadd.f32 %v497_v46, %v496_v45  ;;  %v499_v50 = vpop.f32.mrb[6].mxu0 }
 0x111   :  { %v500_v51 = vpop.f32.mrb[7].mxu0 }
 0x112   :  { %v466_v52 = vpack.c.bf16 %v396_v48, %v395_v47  ;;  %v363_v53 = vadd.f32 %v530_v34, %v498_v49  ;;  %v501_v54 = vadd.f32 %v500_v51, %v499_v50 }
 0x114   :  { %467 = vst [vmem:[%s721_s3] sm:$0xff] %v466_v52   ;;  %v393_v55 = vadd.f32 %v454_v37, %v363_v53  ;;  %v366_v56 = vadd.f32 %v531_v40, %v501_v54 }
 0x116   :  { %v394_v57 = vadd.f32 %v454_v37, %v366_v56  ;;  %v397_v58 = vmax.f32 %v393_v55, 0.0 }
 0x118   :  { %v398_v59 = vmax.f32 %v394_v57, 0.0 }
 0x11a   :  { %v471_v60 = vpack.c.bf16 %v398_v59, %v397_v58 }
 0x11c   :  { %473 = vst [vmem:[%s721_s3 + $0x8] sm:$0xff] %v471_v60  }
 0x11d   :  { %423 = vsyncpa [#allocation4], 1 }

// kernel: forward.82
= control target key start
LH: loop header
LB: loop body
LE: loop exit
PB: predicated region body
PF: predicated region fallthrough
CT: control target
= control target key end

     0   :  { %9 = vsyncpa [#allocation4], 0  ;;  %s342_s15 = smov [#allocation3]   ;;  %s422_s0 = inlined_call_operand.vmem [shape: bf16[32,128], index: 0, kind: input, shape index: {}]   ;;  %s423_s1 = inlined_call_operand.vmem [shape: bf16[128,128], index: 1, kind: input, shape index: {}]   ;;  %s424_s2 = inlined_call_operand.hbm [shape: f32[1,128], index: 2, kind: input, shape index: {}]   ;;  %s425_s3 = inlined_call_operand.vmem [shape: bf16[32,128], index: 3, kind: input, shape index: {}]   ;;  %s426_s4 = inlined_call_operand.vmem [shape: bf16[32,128], index: 4, kind: output, shape index: {}]  }
   0x1   :  { %s20_s16 = sshll.u32 %s342_s15, 4  ;;  %s318_s19 = scalar_lea.hbm %s424_s2, 16  ;;  %s21_s16 = int_to_ptr.vmem [resolvable:$true] %s20_s16 }
   0x2   :  { %p319_p0 = scmp.ne.s32.totalorder %s424_s2, %s318_s19  ;;  %p322_p1 = scmp.lt.u32.totalorder %s318_s19, %s424_s2 }
   0x4   :  { %p324_p2 = pnand %p322_p1, %p319_p0 }
   0x6   :  { %327 = shalt.err (!%p324_p2)
}
   0x7   :  { %s328_s24 = scalar_lea.vmem %s21_s16, 16  ;;  %s332_s25 = scalar_lea.vmem %s21_s16, 32 }
   0x8   :  { %p329_p3 = scmp.ne.s32.totalorder %s21_s16, %s328_s24  ;;  %p333_p4 = scmp.lt.s32.totalorder %s21_s16, %s21_s16 }
   0x9   :  { %p334_p5 = scmp.lt.s32.totalorder %s332_s25, %s328_s24 }
   0xb   :  { %p335_p6 = por %p334_p5, %p333_p4 }
   0xd   :  { %p336_p7 = pnand %p335_p6, %p329_p3 }
   0xf   :  { %339 = shalt.err (!%p336_p7)
}
  0x10   :  { %23 = dma.hbm_to_vmem [thread:$0]  %s424_s2, 16, %s21_s16, [#allocation4]  }
  0x11   :  { %340 = dma.done.wait [#allocation4], 16  }
  0x12   :  { %341 = vsyncadd [#allocation4], 4294967280  ;;  %v308_v0 = vld [vmem:[%s423_s1] sm:$0xff]   ;;  %v309_v1 = vld [vmem:[%s423_s1 + $0x8] sm:$0xff]  }
  0x13   :  { %287 = vmatprep.subr.bf16.mxu0 %v308_v0  ;;  %v310_v2 = vld [vmem:[%s423_s1 + $0x10] sm:$0xff]   ;;  %v311_v3 = vld [vmem:[%s423_s1 + $0x18] sm:$0xff]   ;;  %v316_v4 = vld [vmem:[%s422_s0] sm:$0xff]  }
  0x14   :  { %288 = vmatpush3.bf16.msra.mxu0 %v308_v0  ;;  %303 = vmatprep.mubr.bf16.mxu0 %v316_v4  ;;  %v312_v5 = vld [vmem:[%s423_s1 + $0x20] sm:$0xff]   ;;  %v313_v6 = vld [vmem:[%s423_s1 + $0x28] sm:$0xff]   ;;  %v314_v7 = vld [vmem:[%s423_s1 + $0x30] sm:$0xff]  }
  0x15   :  { %289 = vmatprep.subr.bf16.mxu0 %v309_v1  ;;  %v315_v8 = vld [vmem:[%s423_s1 + $0x38] sm:$0xff]   ;;  %v317_v9 = vld [vmem:[%s422_s0 + $0x8] sm:$0xff]   ;;  %v258_v11 = vld [vmem:[%s425_s3] sm:$0xff]  }
  0x16   :  { %v275_v10 = vld [vmem:[%s425_s3 + $0x8] sm:$0xff]   ;;  %v248_v12 = vld [vmem:[#allocation3] ss:$0 sm:$0xff]  ;;  %v259_v15 = vunpack.c.l.bf16 %v258_v11  ;;  %v260_v21 = vunpack.c.h.bf16 %v258_v11 }
  0x17   :  { %v263_v13 = vunpack.c.l.bf16 %v275_v10  ;;  %v264_v18 = vunpack.c.h.bf16 %v275_v10 }
  0x18   :  { %290 = vmatpush3.bf16.msra.mxu0 %v309_v1 }
  0x19   :  { %291 = vmatprep.subr.bf16.mxu0 %v310_v2 }
  0x1c   :  { %292 = vmatpush3.bf16.msra.mxu0 %v310_v2 }
  0x1d   :  { %293 = vmatprep.subr.bf16.mxu0 %v311_v3 }
  0x20   :  { %294 = vmatpush3.bf16.msra.mxu0 %v311_v3 }
  0x21   :  { %295 = vmatprep.subr.bf16.mxu0 %v312_v5 }
  0x24   :  { %296 = vmatpush3.bf16.msra.mxu0 %v312_v5 }
  0x25   :  { %297 = vmatprep.subr.bf16.mxu0 %v313_v6 }
  0x28   :  { %298 = vmatpush3.bf16.msra.mxu0 %v313_v6 }
  0x29   :  { %299 = vmatprep.subr.bf16.mxu0 %v314_v7 }
  0x2c   :  { %300 = vmatpush3.bf16.msra.mxu0 %v314_v7 }
  0x2d   :  { %301 = vmatprep.subr.bf16.mxu0 %v315_v8 }
  0x30   :  { %302 = vmatpush3.bf16.msra.mxu0 %v315_v8 }
  0x33   :  { %304 = vmatmul.mubr.bf16.vlgmr.msra.gmra.mrb[0].mxu0 %v317_v9 }
 0x106   :  { %v305_v14 = vpop.f32.mrb[0].mxu0 }
 0x107   :  { %v195_v16 = vadd.f32 %v305_v14, %v248_v12  ;;  %v156_v17 = vpop.f32.mrb[1].mxu0 }
 0x108   :  { %v193_v19 = vadd.f32 %v248_v12, %v156_v17  ;;  %v306_v20 = vpop.f32.mrb[2].mxu0 }
 0x109   :  { %v207_v22 = vadd.f32 %v263_v13, %v195_v16  ;;  %v196_v23 = vadd.f32 %v306_v20, %v248_v12  ;;  %v159_v24 = vpop.f32.mrb[3].mxu0 }
 0x10a   :  { %v205_v25 = vadd.f32 %v259_v15, %v193_v19  ;;  %v194_v26 = vadd.f32 %v248_v12, %v159_v24 }
 0x10b   :  { %v208_v27 = vadd.f32 %v264_v18, %v196_v23  ;;  %v211_v29 = vmax.f32 %v207_v22, 0.0 }
 0x10c   :  { %v206_v28 = vadd.f32 %v260_v21, %v194_v26  ;;  %v209_v31 = vmax.f32 %v205_v25, 0.0 }
 0x10d   :  { %v212_v30 = vmax.f32 %v208_v27, 0.0 }
 0x10e   :  { %v210_v32 = vmax.f32 %v206_v28, 0.0 }
 0x10f   :  { %v273_v33 = vpack.c.bf16 %v212_v30, %v211_v29 }
 0x110   :  { %v268_v34 = vpack.c.bf16 %v210_v32, %v209_v31 }
 0x111   :  { %276 = vst [vmem:[%s426_s4 + $0x8] sm:$0xff] %v273_v33  }
 0x112   :  { %269 = vst [vmem:[%s426_s4] sm:$0xff] %v268_v34  }
 0x113   :  { %237 = vsyncpa [#allocation4], 1 }

// kernel: forward.83
= control target key start
LH: loop header
LB: loop body
LE: loop exit
PB: predicated region body
PF: predicated region fallthrough
CT: control target
= control target key end

     0   :  { %8 = vsyncpa [#allocation4], 0  ;;  %s318_s12 = smov [#allocation3]   ;;  %s387_s0 = inlined_call_operand.vmem [shape: bf16[32,128], index: 0, kind: input, shape index: {}]   ;;  %s388_s1 = inlined_call_operand.vmem [shape: bf16[128,128], index: 1, kind: input, shape index: {}]   ;;  %s389_s2 = inlined_call_operand.hbm [shape: f32[1,128], index: 2, kind: input, shape index: {}]   ;;  %s390_s3 = inlined_call_operand.vmem [shape: bf16[32,128], index: 3, kind: output, shape index: {}]  }
   0x1   :  { %s19_s13 = sshll.u32 %s318_s12, 4  ;;  %s294_s16 = scalar_lea.hbm %s389_s2, 16  ;;  %s20_s13 = int_to_ptr.vmem [resolvable:$true] %s19_s13 }
   0x2   :  { %p295_p0 = scmp.ne.s32.totalorder %s389_s2, %s294_s16  ;;  %p298_p1 = scmp.lt.u32.totalorder %s294_s16, %s389_s2 }
   0x4   :  { %p300_p2 = pnand %p298_p1, %p295_p0 }
   0x6   :  { %303 = shalt.err (!%p300_p2)
}
   0x7   :  { %s304_s21 = scalar_lea.vmem %s20_s13, 16  ;;  %s308_s22 = scalar_lea.vmem %s20_s13, 32 }
   0x8   :  { %p305_p3 = scmp.ne.s32.totalorder %s20_s13, %s304_s21  ;;  %p309_p4 = scmp.lt.s32.totalorder %s20_s13, %s20_s13 }
   0x9   :  { %p310_p5 = scmp.lt.s32.totalorder %s308_s22, %s304_s21 }
   0xb   :  { %p311_p6 = por %p310_p5, %p309_p4 }
   0xd   :  { %p312_p7 = pnand %p311_p6, %p305_p3 }
   0xf   :  { %315 = shalt.err (!%p312_p7)
}
  0x10   :  { %22 = dma.hbm_to_vmem [thread:$0]  %s389_s2, 16, %s20_s13, [#allocation4]  }
  0x11   :  { %316 = dma.done.wait [#allocation4], 16  }
  0x12   :  { %317 = vsyncadd [#allocation4], 4294967280  ;;  %v284_v0 = vld [vmem:[%s388_s1] sm:$0xff]   ;;  %v285_v1 = vld [vmem:[%s388_s1 + $0x8] sm:$0xff]  }
  0x13   :  { %263 = vmatprep.subr.bf16.mxu0 %v284_v0  ;;  %v286_v2 = vld [vmem:[%s388_s1 + $0x10] sm:$0xff]   ;;  %v287_v3 = vld [vmem:[%s388_s1 + $0x18] sm:$0xff]   ;;  %v292_v4 = vld [vmem:[%s387_s0] sm:$0xff]  }
  0x14   :  { %264 = vmatpush3.bf16.msra.mxu0 %v284_v0  ;;  %279 = vmatprep.mubr.bf16.mxu0 %v292_v4  ;;  %v288_v5 = vld [vmem:[%s388_s1 + $0x20] sm:$0xff]   ;;  %v289_v6 = vld [vmem:[%s388_s1 + $0x28] sm:$0xff]   ;;  %v290_v7 = vld [vmem:[%s388_s1 + $0x30] sm:$0xff]  }
  0x15   :  { %265 = vmatprep.subr.bf16.mxu0 %v285_v1  ;;  %v291_v8 = vld [vmem:[%s388_s1 + $0x38] sm:$0xff]   ;;  %v293_v9 = vld [vmem:[%s387_s0 + $0x8] sm:$0xff]   ;;  %v233_v10 = vld [vmem:[#allocation3] ss:$0 sm:$0xff] }
  0x18   :  { %266 = vmatpush3.bf16.msra.mxu0 %v285_v1 }
  0x19   :  { %267 = vmatprep.subr.bf16.mxu0 %v286_v2 }
  0x1c   :  { %268 = vmatpush3.bf16.msra.mxu0 %v286_v2 }
  0x1d   :  { %269 = vmatprep.subr.bf16.mxu0 %v287_v3 }
  0x20   :  { %270 = vmatpush3.bf16.msra.mxu0 %v287_v3 }
  0x21   :  { %271 = vmatprep.subr.bf16.mxu0 %v288_v5 }
  0x24   :  { %272 = vmatpush3.bf16.msra.mxu0 %v288_v5 }
  0x25   :  { %273 = vmatprep.subr.bf16.mxu0 %v289_v6 }
  0x28   :  { %274 = vmatpush3.bf16.msra.mxu0 %v289_v6 }
  0x29   :  { %275 = vmatprep.subr.bf16.mxu0 %v290_v7 }
  0x2c   :  { %276 = vmatpush3.bf16.msra.mxu0 %v290_v7 }
  0x2d   :  { %277 = vmatprep.subr.bf16.mxu0 %v291_v8 }
  0x30   :  { %278 = vmatpush3.bf16.msra.mxu0 %v291_v8 }
  0x33   :  { %280 = vmatmul.mubr.bf16.vlgmr.msra.gmra.mrb[0].mxu0 %v293_v9 }
 0x106   :  { %v281_v11 = vpop.f32.mrb[0].mxu0 }
 0x107   :  { %v192_v12 = vadd.f32 %v281_v11, %v233_v10  ;;  %v153_v13 = vpop.f32.mrb[1].mxu0 }
 0x108   :  { %v190_v14 = vadd.f32 %v233_v10, %v153_v13  ;;  %v282_v15 = vpop.f32.mrb[2].mxu0 }
 0x109   :  { %v193_v16 = vadd.f32 %v282_v15, %v233_v10  ;;  %v156_v17 = vpop.f32.mrb[3].mxu0  ;;  %v196_v19 = vmax.f32 %v192_v12, 0.0 }
 0x10a   :  { %v191_v18 = vadd.f32 %v233_v10, %v156_v17  ;;  %v194_v21 = vmax.f32 %v190_v14, 0.0 }
 0x10b   :  { %v197_v20 = vmax.f32 %v193_v16, 0.0 }
 0x10c   :  { %v195_v22 = vmax.f32 %v191_v18, 0.0 }
 0x10d   :  { %v250_v23 = vpack.c.bf16 %v197_v20, %v196_v19 }
 0x10e   :  { %v245_v24 = vpack.c.bf16 %v195_v22, %v194_v21 }
 0x10f   :  { %252 = vst [vmem:[%s390_s3 + $0x8] sm:$0xff] %v250_v23  }
 0x110   :  { %246 = vst [vmem:[%s390_s3] sm:$0xff] %v245_v24  }
 0x111   :  { %222 = vsyncpa [#allocation4], 1 }

// kernel: forward.87
= control target key start
LH: loop header
LB: loop body
LE: loop exit
PB: predicated region body
PF: predicated region fallthrough
CT: control target
= control target key end

     0   :  { %s670_s1 = inlined_call_operand.vmem [shape: bf16[384,128], index: 1, kind: input, shape index: {}]   ;;  %s671_s0 = inlined_call_operand.vmem [shape: bf16[32,384], index: 0, kind: input, shape index: {}]   ;;  %s672_s2 = inlined_call_operand.vmem [shape: f32[1,128], index: 2, kind: input, shape index: {}]   ;;  %s673_s3 = inlined_call_operand.vmem [shape: bf16[32,128], index: 3, kind: output, shape index: {}]  }
   0x1   :  { %v519_v0 = vld [vmem:[%s670_s1 + $0x40] sm:$0xff]   ;;  %v522_v3 = vld [vmem:[%s670_s1 + $0x48] sm:$0xff]   ;;  %v525_v6 = vld [vmem:[%s670_s1 + $0x50] sm:$0xff]  }
   0x2   :  { %v520_v1 = vld [vmem:[%s670_s1] sm:$0xff]   ;;  %461 = vmatprep.subr.bf16.mxu0 %v519_v0  ;;  %v523_v4 = vld [vmem:[%s670_s1 + $0x8] sm:$0xff]   ;;  %v526_v7 = vld [vmem:[%s670_s1 + $0x10] sm:$0xff]  }
   0x3   :  { %v521_v2 = vld [vmem:[%s670_s1 + $0x80] sm:$0xff]   ;;  %462 = vmatpush3.bf16.msra.mxu0 %v520_v1  ;;  %v524_v5 = vld [vmem:[%s670_s1 + $0x88] sm:$0xff]   ;;  %v527_v8 = vld [vmem:[%s670_s1 + $0x90] sm:$0xff]  }
   0x4   :  { %499 = vmatprep.subr.bf16.mxu1 %v521_v2  ;;  %463 = vmatprep.subr.bf16.mxu0 %v522_v3  ;;  %v528_v9 = vld [vmem:[%s670_s1 + $0x58] sm:$0xff]   ;;  %v531_v12 = vld [vmem:[%s670_s1 + $0x60] sm:$0xff]   ;;  %v534_v15 = vld [vmem:[%s670_s1 + $0x68] sm:$0xff]  }
   0x5   :  { %500 = vmatpush3.bf16.msra.mxu1 %v521_v2  ;;  %v529_v10 = vld [vmem:[%s670_s1 + $0x18] sm:$0xff]   ;;  %v533_v13 = vld [vmem:[%s670_s1 + $0xa0] sm:$0xff]   ;;  %v536_v16 = vld [vmem:[%s670_s1 + $0xa8] sm:$0xff]  }
   0x6   :  { %501 = vmatprep.subr.bf16.mxu1 %v524_v5  ;;  %v530_v11 = vld [vmem:[%s670_s1 + $0x98] sm:$0xff]   ;;  %v532_v14 = vld [vmem:[%s670_s1 + $0x20] sm:$0xff]   ;;  %v535_v17 = vld [vmem:[%s670_s1 + $0x28] sm:$0xff]  }
   0x7   :  { %464 = vmatpush3.bf16.msra.mxu0 %v523_v4  ;;  %v537_v18 = vld [vmem:[%s670_s1 + $0x70] sm:$0xff]   ;;  %v540_v21 = vld [vmem:[%s670_s1 + $0x78] sm:$0xff]   ;;  %v543_v26 = vld [vmem:[%s671_s0] ss:$12 sps:$4 sm:$0xff]  }
   0x8   :  { %465 = vmatprep.subr.bf16.mxu0 %v525_v6  ;;  %v538_v19 = vld [vmem:[%s670_s1 + $0x30] sm:$0xff]   ;;  %v542_v22 = vld [vmem:[%s670_s1 + $0xb8] sm:$0xff]   ;;  %v547_v28 = vld [vmem:[%s671_s0 + $0x20] ss:$12 sps:$4 sm:$0xff]  }
   0x9   :  { %502 = vmatpush3.bf16.msra.mxu1 %v524_v5  ;;  %v539_v20 = vld [vmem:[%s670_s1 + $0xb0] sm:$0xff]   ;;  %v541_v25 = vld [vmem:[%s670_s1 + $0x38] sm:$0xff]   ;;  %v441_v37 = vld [vmem:[%s672_s2] ss:$0 sm:$0xff] }
   0xa   :  { %503 = vmatprep.subr.bf16.mxu1 %v527_v8  ;;  %v545_v23 = vld [vmem:[%s671_s0 + $0x4] ss:$12 sps:$4 sm:$0xff]   ;;  %v546_v24 = vld [vmem:[%s671_s0 + $0x8] ss:$12 sps:$4 sm:$0xff]  }
   0xb   :  { %466 = vmatpush3.bf16.msra.mxu0 %v526_v7  ;;  %291 = vmatprep.mubr.bf16.mxu0 %v545_v23  ;;  %v548_v27 = vld [vmem:[%s671_s0 + $0x1c] ss:$12 sps:$4 sm:$0xff]   ;;  %v550_v29 = vld [vmem:[%s671_s0 + $0x18] ss:$12 sps:$4 sm:$0xff]  }
   0xc   :  { %467 = vmatprep.subr.bf16.mxu0 %v528_v9  ;;  %515 = vmatprep.mubr.bf16.mxu1 %v546_v24 }
   0xd   :  { %504 = vmatpush3.bf16.msra.mxu1 %v527_v8 }
   0xe   :  { %505 = vmatprep.subr.bf16.mxu1 %v530_v11 }
   0xf   :  { %468 = vmatpush3.bf16.msra.mxu0 %v529_v10 }
  0x10   :  { %469 = vmatprep.subr.bf16.mxu0 %v531_v12 }
  0x11   :  { %506 = vmatpush3.bf16.msra.mxu1 %v530_v11 }
  0x12   :  { %507 = vmatprep.subr.bf16.mxu1 %v533_v13 }
  0x13   :  { %470 = vmatpush3.bf16.msra.mxu0 %v532_v14 }
  0x14   :  { %471 = vmatprep.subr.bf16.mxu0 %v534_v15 }
  0x15   :  { %508 = vmatpush3.bf16.msra.mxu1 %v533_v13 }
  0x16   :  { %509 = vmatprep.subr.bf16.mxu1 %v536_v16 }
  0x17   :  { %472 = vmatpush3.bf16.msra.mxu0 %v535_v17 }
  0x18   :  { %473 = vmatprep.subr.bf16.mxu0 %v537_v18 }
  0x19   :  { %510 = vmatpush3.bf16.msra.mxu1 %v536_v16 }
  0x1a   :  { %511 = vmatprep.subr.bf16.mxu1 %v539_v20 }
  0x1b   :  { %474 = vmatpush3.bf16.msra.mxu0 %v538_v19 }
  0x1c   :  { %475 = vmatprep.subr.bf16.mxu0 %v540_v21 }
  0x1d   :  { %512 = vmatpush3.bf16.msra.mxu1 %v539_v20 }
  0x1e   :  { %513 = vmatprep.subr.bf16.mxu1 %v542_v22 }
  0x1f   :  { %476 = vmatpush3.bf16.msra.mxu0 %v541_v25 }
  0x21   :  { %514 = vmatpush3.bf16.msra.mxu1 %v542_v22 }
  0x22   :  { %292 = vmatmul.mubr.bf16.vlgmr.msra.gmra.mrb[0].mxu0 %v543_v26 }
  0x23   :  { %299 = vmatprep.mubr.bf16.mxu0 %v548_v27 }
  0x24   :  { %516 = vmatmul.mubr.bf16.vlgmr.msra.gmra.mrb[0].mxu1 %v547_v28 }
  0x2a   :  { %300 = vmatmul.mubr.bf16.gmra.mrb[4].mxu0 %v550_v29 }
  0xf5   :  { %v477_v30 = vpop.f32.mrb[0].mxu0 }
  0xf6   :  { %v478_v31 = vpop.f32.mrb[1].mxu0 }
  0xf7   :  { %v479_v32 = vadd.f32 %v478_v31, %v477_v30  ;;  %v480_v33 = vpop.f32.mrb[2].mxu0  ;;  %v517_v34 = vpop.f32.mrb[0].mxu1 }
  0xf8   :  { %v481_v35 = vpop.f32.mrb[3].mxu0  ;;  %v342_v36 = vpop.f32.mrb[1].mxu1 }
  0xf9   :  { %v482_v38 = vadd.f32 %v481_v35, %v480_v33  ;;  %v343_v39 = vadd.f32 %v479_v32, %v342_v36  ;;  %v518_v40 = vpop.f32.mrb[2].mxu1 }
  0xfa   :  { %v345_v41 = vpop.f32.mrb[3].mxu1 }
  0xfb   :  { %v379_v42 = vadd.f32 %v441_v37, %v343_v39  ;;  %v346_v43 = vadd.f32 %v482_v38, %v345_v41 }
  0xfd   :  { %v380_v44 = vadd.f32 %v441_v37, %v346_v43  ;;  %v483_v45 = vpop.f32.mrb[4].mxu0  ;;  %v383_v47 = vmax.f32 %v379_v42, 0.0 }
  0xfe   :  { %v484_v46 = vpop.f32.mrb[5].mxu0 }
  0xff   :  { %v384_v48 = vmax.f32 %v380_v44, 0.0  ;;  %v485_v49 = vadd.f32 %v484_v46, %v483_v45  ;;  %v486_v50 = vpop.f32.mrb[6].mxu0 }
 0x100   :  { %v487_v51 = vpop.f32.mrb[7].mxu0 }
 0x101   :  { %v453_v52 = vpack.c.bf16 %v384_v48, %v383_v47  ;;  %v351_v53 = vadd.f32 %v517_v34, %v485_v49  ;;  %v488_v54 = vadd.f32 %v487_v51, %v486_v50 }
 0x103   :  { %454 = vst [vmem:[%s673_s3] sm:$0xff] %v453_v52   ;;  %v381_v55 = vadd.f32 %v441_v37, %v351_v53  ;;  %v354_v56 = vadd.f32 %v518_v40, %v488_v54 }
 0x105   :  { %v382_v57 = vadd.f32 %v441_v37, %v354_v56  ;;  %v385_v58 = vmax.f32 %v381_v55, 0.0 }
 0x107   :  { %v386_v59 = vmax.f32 %v382_v57, 0.0 }
 0x109   :  { %v458_v60 = vpack.c.bf16 %v386_v59, %v385_v58 }
 0x10b   :  { %460 = vst [vmem:[%s673_s3 + $0x8] sm:$0xff] %v458_v60  }

// kernel: forward.94
= control target key start
LH: loop header
LB: loop body
LE: loop exit
PB: predicated region body
PF: predicated region fallthrough
CT: control target
= control target key end

     0   :  { %s374_s1 = inlined_call_operand.vmem [shape: bf16[128,128], index: 1, kind: input, shape index: {}]   ;;  %s375_s0 = inlined_call_operand.vmem [shape: bf16[32,128], index: 0, kind: input, shape index: {}]   ;;  %s376_s3 = inlined_call_operand.vmem [shape: bf16[32,128], index: 3, kind: input, shape index: {}]   ;;  %s377_s2 = inlined_call_operand.vmem [shape: f32[1,128], index: 2, kind: input, shape index: {}]   ;;  %s378_s4 = inlined_call_operand.vmem [shape: bf16[32,128], index: 4, kind: output, shape index: {}]  }
   0x1   :  { %v294_v0 = vld [vmem:[%s374_s1] sm:$0xff]   ;;  %v295_v1 = vld [vmem:[%s374_s1 + $0x8] sm:$0xff]   ;;  %v296_v2 = vld [vmem:[%s374_s1 + $0x10] sm:$0xff]  }
   0x2   :  { %274 = vmatprep.subr.bf16.mxu0 %v294_v0  ;;  %v297_v3 = vld [vmem:[%s374_s1 + $0x18] sm:$0xff]   ;;  %v302_v4 = vld [vmem:[%s375_s0] sm:$0xff]   ;;  %v299_v6 = vld [vmem:[%s374_s1 + $0x28] sm:$0xff]  }
   0x3   :  { %275 = vmatpush3.bf16.msra.mxu0 %v294_v0  ;;  %290 = vmatprep.mubr.bf16.mxu0 %v302_v4  ;;  %v298_v5 = vld [vmem:[%s374_s1 + $0x20] sm:$0xff]   ;;  %v300_v7 = vld [vmem:[%s374_s1 + $0x30] sm:$0xff]   ;;  %v301_v8 = vld [vmem:[%s374_s1 + $0x38] sm:$0xff]  }
   0x4   :  { %276 = vmatprep.subr.bf16.mxu0 %v295_v1  ;;  %v303_v9 = vld [vmem:[%s375_s0 + $0x8] sm:$0xff]   ;;  %v245_v11 = vld [vmem:[%s376_s3] sm:$0xff]  }
   0x5   :  { %v262_v10 = vld [vmem:[%s376_s3 + $0x8] sm:$0xff]   ;;  %v235_v12 = vld [vmem:[%s377_s2] ss:$0 sm:$0xff]  ;;  %v246_v15 = vunpack.c.l.bf16 %v245_v11  ;;  %v247_v21 = vunpack.c.h.bf16 %v245_v11 }
   0x6   :  { %v250_v13 = vunpack.c.l.bf16 %v262_v10  ;;  %v251_v18 = vunpack.c.h.bf16 %v262_v10 }
   0x7   :  { %277 = vmatpush3.bf16.msra.mxu0 %v295_v1 }
   0x8   :  { %278 = vmatprep.subr.bf16.mxu0 %v296_v2 }
   0xb   :  { %279 = vmatpush3.bf16.msra.mxu0 %v296_v2 }
   0xc   :  { %280 = vmatprep.subr.bf16.mxu0 %v297_v3 }
   0xf   :  { %281 = vmatpush3.bf16.msra.mxu0 %v297_v3 }
  0x10   :  { %282 = vmatprep.subr.bf16.mxu0 %v298_v5 }
  0x13   :  { %283 = vmatpush3.bf16.msra.mxu0 %v298_v5 }
  0x14   :  { %284 = vmatprep.subr.bf16.mxu0 %v299_v6 }
  0x17   :  { %285 = vmatpush3.bf16.msra.mxu0 %v299_v6 }
  0x18   :  { %286 = vmatprep.subr.bf16.mxu0 %v300_v7 }
  0x1b   :  { %287 = vmatpush3.bf16.msra.mxu0 %v300_v7 }
  0x1c   :  { %288 = vmatprep.subr.bf16.mxu0 %v301_v8 }
  0x1f   :  { %289 = vmatpush3.bf16.msra.mxu0 %v301_v8 }
  0x22   :  { %291 = vmatmul.mubr.bf16.vlgmr.msra.gmra.mrb[0].mxu0 %v303_v9 }
  0xf5   :  { %v292_v14 = vpop.f32.mrb[0].mxu0 }
  0xf6   :  { %v183_v16 = vadd.f32 %v292_v14, %v235_v12  ;;  %v144_v17 = vpop.f32.mrb[1].mxu0 }
  0xf7   :  { %v181_v19 = vadd.f32 %v235_v12, %v144_v17  ;;  %v293_v20 = vpop.f32.mrb[2].mxu0 }
  0xf8   :  { %v195_v22 = vadd.f32 %v250_v13, %v183_v16  ;;  %v184_v23 = vadd.f32 %v293_v20, %v235_v12  ;;  %v147_v24 = vpop.f32.mrb[3].mxu0 }
  0xf9   :  { %v193_v25 = vadd.f32 %v246_v15, %v181_v19  ;;  %v182_v26 = vadd.f32 %v235_v12, %v147_v24 }
  0xfa   :  { %v196_v27 = vadd.f32 %v251_v18, %v184_v23  ;;  %v199_v29 = vmax.f32 %v195_v22, 0.0 }
  0xfb   :  { %v194_v28 = vadd.f32 %v247_v21, %v182_v26  ;;  %v197_v31 = vmax.f32 %v193_v25, 0.0 }
  0xfc   :  { %v200_v30 = vmax.f32 %v196_v27, 0.0 }
  0xfd   :  { %v198_v32 = vmax.f32 %v194_v28, 0.0 }
  0xfe   :  { %v260_v33 = vpack.c.bf16 %v200_v30, %v199_v29 }
  0xff   :  { %v255_v34 = vpack.c.bf16 %v198_v32, %v197_v31 }
 0x100   :  { %263 = vst [vmem:[%s378_s4 + $0x8] sm:$0xff] %v260_v33  }
 0x101   :  { %256 = vst [vmem:[%s378_s4] sm:$0xff] %v255_v34  }

// kernel: forward.95
= control target key start
LH: loop header
LB: loop body
LE: loop exit
PB: predicated region body
PF: predicated region fallthrough
CT: control target
= control target key end

     0   :  { %s339_s1 = inlined_call_operand.vmem [shape: bf16[128,128], index: 1, kind: input, shape index: {}]   ;;  %s340_s0 = inlined_call_operand.vmem [shape: bf16[32,128], index: 0, kind: input, shape index: {}]   ;;  %s341_s2 = inlined_call_operand.vmem [shape: f32[1,128], index: 2, kind: input, shape index: {}]   ;;  %s342_s3 = inlined_call_operand.vmem [shape: bf16[32,128], index: 3, kind: output, shape index: {}]  }
   0x1   :  { %v270_v0 = vld [vmem:[%s339_s1] sm:$0xff]   ;;  %v271_v1 = vld [vmem:[%s339_s1 + $0x8] sm:$0xff]   ;;  %v272_v2 = vld [vmem:[%s339_s1 + $0x10] sm:$0xff]  }
   0x2   :  { %250 = vmatprep.subr.bf16.mxu0 %v270_v0  ;;  %v273_v3 = vld [vmem:[%s339_s1 + $0x18] sm:$0xff]   ;;  %v278_v4 = vld [vmem:[%s340_s0] sm:$0xff]   ;;  %v275_v6 = vld [vmem:[%s339_s1 + $0x28] sm:$0xff]  }
   0x3   :  { %251 = vmatpush3.bf16.msra.mxu0 %v270_v0  ;;  %266 = vmatprep.mubr.bf16.mxu0 %v278_v4  ;;  %v274_v5 = vld [vmem:[%s339_s1 + $0x20] sm:$0xff]   ;;  %v276_v7 = vld [vmem:[%s339_s1 + $0x30] sm:$0xff]   ;;  %v277_v8 = vld [vmem:[%s339_s1 + $0x38] sm:$0xff]  }
   0x4   :  { %252 = vmatprep.subr.bf16.mxu0 %v271_v1  ;;  %v279_v9 = vld [vmem:[%s340_s0 + $0x8] sm:$0xff]   ;;  %v220_v10 = vld [vmem:[%s341_s2] ss:$0 sm:$0xff] }
   0x7   :  { %253 = vmatpush3.bf16.msra.mxu0 %v271_v1 }
   0x8   :  { %254 = vmatprep.subr.bf16.mxu0 %v272_v2 }
   0xb   :  { %255 = vmatpush3.bf16.msra.mxu0 %v272_v2 }
   0xc   :  { %256 = vmatprep.subr.bf16.mxu0 %v273_v3 }
   0xf   :  { %257 = vmatpush3.bf16.msra.mxu0 %v273_v3 }
  0x10   :  { %258 = vmatprep.subr.bf16.mxu0 %v274_v5 }
  0x13   :  { %259 = vmatpush3.bf16.msra.mxu0 %v274_v5 }
  0x14   :  { %260 = vmatprep.subr.bf16.mxu0 %v275_v6 }
  0x17   :  { %261 = vmatpush3.bf16.msra.mxu0 %v275_v6 }
  0x18   :  { %262 = vmatprep.subr.bf16.mxu0 %v276_v7 }
  0x1b   :  { %263 = vmatpush3.bf16.msra.mxu0 %v276_v7 }
  0x1c   :  { %264 = vmatprep.subr.bf16.mxu0 %v277_v8 }
  0x1f   :  { %265 = vmatpush3.bf16.msra.mxu0 %v277_v8 }
  0x22   :  { %267 = vmatmul.mubr.bf16.vlgmr.msra.gmra.mrb[0].mxu0 %v279_v9 }
  0xf5   :  { %v268_v11 = vpop.f32.mrb[0].mxu0 }
  0xf6   :  { %v180_v12 = vadd.f32 %v268_v11, %v220_v10  ;;  %v141_v13 = vpop.f32.mrb[1].mxu0 }
  0xf7   :  { %v178_v14 = vadd.f32 %v220_v10, %v141_v13  ;;  %v269_v15 = vpop.f32.mrb[2].mxu0 }
  0xf8   :  { %v181_v16 = vadd.f32 %v269_v15, %v220_v10  ;;  %v144_v17 = vpop.f32.mrb[3].mxu0  ;;  %v184_v19 = vmax.f32 %v180_v12, 0.0 }
  0xf9   :  { %v179_v18 = vadd.f32 %v220_v10, %v144_v17  ;;  %v182_v21 = vmax.f32 %v178_v14, 0.0 }
  0xfa   :  { %v185_v20 = vmax.f32 %v181_v16, 0.0 }
  0xfb   :  { %v183_v22 = vmax.f32 %v179_v18, 0.0 }
  0xfc   :  { %v237_v23 = vpack.c.bf16 %v185_v20, %v184_v19 }
  0xfd   :  { %v232_v24 = vpack.c.bf16 %v183_v22, %v182_v21 }
  0xfe   :  { %239 = vst [vmem:[%s342_s3 + $0x8] sm:$0xff] %v237_v23  }
  0xff   :  { %233 = vst [vmem:[%s342_s3] sm:$0xff] %v232_v24  }

// kernel: forward.101
= control target key start
LH: loop header
LB: loop body
LE: loop exit
PB: predicated region body
PF: predicated region fallthrough
CT: control target
= control target key end

     0   :  { %s958_s15 = smov 0   ;;  %s960_s16 = smov 0   ;;  %s1073_s0 = inlined_call_operand.vmem [shape: bf16[16,128], index: 0, kind: input, shape index: {}]   ;;  %s1074_s1 = inlined_call_operand.vmem [shape: bf16[128,256], index: 1, kind: input, shape index: {}]   ;;  %s1075_s2 = inlined_call_operand.vmem [shape: f32[1,256], index: 2, kind: input, shape index: {}]   ;;  %s1076_s3 = inlined_call_operand.vmem [shape: bf16[16,256], index: 3, kind: input, shape index: {}]   ;;  %s1077_s4 = inlined_call_operand.vmem [shape: bf16[16,256], index: 4, kind: output, shape index: {}]  }
   0x1   :  { %s962_s17 = smov 0   ;;  %s964_s18 = smov 0  }
   0x2   :  { %s966_s19 = smov 0  }
   0x3 LB: > { %s29_s20 = sadd.s32 1, %s925_s18  ;;  %s771_s21 = sadd.s32 4294967295, %s929_s19   ;;  %s929_s19 = sphi %s966_s19, %s14_s19   ;;  %s925_s18 = sphi %s964_s18, %s1083_s18   ;;  %s921_s17 = sphi %s962_s17, %s1082_s17   ;;  %s917_s16 = sphi %s960_s16, %s1081_s16   ;;  %s913_s15 = sphi %s958_s15, %s1080_s15  }
   0x4   : > { %p31_p0 = scmp.ge.s32.totalorder %s29_s20, 2  ;;  %p77_p1 = scmp.ne.s32.totalorder %s917_s16, %s913_s15 }
   0x5   : > { %p78_p2 = scmp.eq.s32.totalorder %s929_s19, 0  ;;  %p163_p4 = scmp.eq.s32.totalorder %s771_s21, 1 }
   0x6   : > { %s1085_s20 = smov (%p31_p0, %s29_s20), 0  ;;  %s70_s24 = sadd.s32 1, %s917_s16 }
   0x7   : > { %p990_p3 = por %p78_p2, %p77_p1  ;;  %s66_s23 = ssub.s32 %s925_s18, %s1085_s20 }
   0x8   : > { %p68_p5 = scmp.eq.s32.totalorder %s66_s23, 0  ;;  %p997_p6 = por %p163_p4, %p77_p1 }
   0x9   : > { %p775_p7 = scmp.ge.s32.totalorder %s929_s19, 2 }
   0xa   : > { %s1002_s26 = scalar_select %p68_p5, %s917_s16, %s70_s24  }
   0xb   : > { %197 = sbr.rel (%p775_p7) target bundleno = 39 (0x27), region = 20 }
  0x12   : > { %200 = sbr.rel (!%p990_p3) target bundleno = 32 (0x20), region = 24  ;;  %s202_s27 = sand.u32 (%p990_p3), 1, %s917_s16  }
  0x13   : > { %s777_s28 = sshll.u32 (%p990_p3), %s925_s18, 2  ;;  %s776_s29 = sshll.u32 (%p990_p3), %s202_s27, 6 }
  0x14   : > { %s1012_s6 = scalar_lea.vmem (%p990_p3), %s1074_s1, %s777_s28  ;;  %s204_s7 = scalar_lea.vmem (%p990_p3), [#allocation3], %s776_s29 }
  0x15   : > { %v225_v0 = vld [vmem:[%s1012_s6] sm:$0xf] (%p990_p3)  ;;  %v227_v1 = vld [vmem:[%s1012_s6 + $0x8] sm:$0xf] (%p990_p3)  ;;  %v229_v2 = vld [vmem:[%s1012_s6 + $0x10] sm:$0xf] (%p990_p3) }
  0x16   : > { %226 = vst [vmem:[%s204_s7] sm:$0xf] (%p990_p3), %v225_v0  ;;  %228 = vst [vmem:[%s204_s7 + $0x4] sm:$0xf] (%p990_p3), %v227_v1  ;;  %v231_v3 = vld [vmem:[%s1012_s6 + $0x18] sm:$0xf] (%p990_p3) }
  0x17   : > { %v233_v4 = vld [vmem:[%s1012_s6 + $0x20] sm:$0xf] (%p990_p3)  ;;  %230 = vst [vmem:[%s204_s7 + $0x8] sm:$0xf] (%p990_p3), %v229_v2  ;;  %232 = vst [vmem:[%s204_s7 + $0xc] sm:$0xf] (%p990_p3), %v231_v3 }
  0x18   : > { %234 = vst [vmem:[%s204_s7 + $0x10] sm:$0xf] (%p990_p3), %v233_v4  ;;  %v235_v5 = vld [vmem:[%s1012_s6 + $0x28] sm:$0xf] (%p990_p3)  ;;  %v237_v6 = vld [vmem:[%s1012_s6 + $0x30] sm:$0xf] (%p990_p3) }
  0x19   : > { %v239_v7 = vld [vmem:[%s1012_s6 + $0x38] sm:$0xf]  ;;  %236 = vst [vmem:[%s204_s7 + $0x14] sm:$0xf] %v235_v5  ;;  %238 = vst [vmem:[%s204_s7 + $0x18] sm:$0xf] %v237_v6 }
  0x1a   : > { %240 = vst [vmem:[%s204_s7 + $0x1c] sm:$0xf] %v239_v7  ;;  %v241_v8 = vld [vmem:[%s1012_s6 + $0x40] sm:$0xf]  ;;  %v243_v9 = vld [vmem:[%s1012_s6 + $0x48] sm:$0xf] }
  0x1b   : > { %v245_v10 = vld [vmem:[%s1012_s6 + $0x50] sm:$0xf]  ;;  %242 = vst [vmem:[%s204_s7 + $0x20] sm:$0xf] %v241_v8  ;;  %244 = vst [vmem:[%s204_s7 + $0x24] sm:$0xf] %v243_v9 }
  0x1c   : > { %246 = vst [vmem:[%s204_s7 + $0x28] sm:$0xf] %v245_v10  ;;  %v247_v11 = vld [vmem:[%s1012_s6 + $0x58] sm:$0xf]  ;;  %v249_v12 = vld [vmem:[%s1012_s6 + $0x60] sm:$0xf] }
  0x1d   : > { %v251_v13 = vld [vmem:[%s1012_s6 + $0x68] sm:$0xf]  ;;  %248 = vst [vmem:[%s204_s7 + $0x2c] sm:$0xf] %v247_v11  ;;  %250 = vst [vmem:[%s204_s7 + $0x30] sm:$0xf] %v249_v12 }
  0x1e   : > { %252 = vst [vmem:[%s204_s7 + $0x34] sm:$0xf] %v251_v13  ;;  %v253_v14 = vld [vmem:[%s1012_s6 + $0x70] sm:$0xf]  ;;  %v255_v15 = vld [vmem:[%s1012_s6 + $0x78] sm:$0xf] }
  0x1f   : > { %254 = vst [vmem:[%s204_s7 + $0x38] sm:$0xf] %v253_v14  ;;  %256 = vst [vmem:[%s204_s7 + $0x3c] sm:$0xf] %v255_v15 }
  0x20 PF: > { %317 = sbr.rel (!%p990_p3) target bundleno = 39 (0x27), region = 69  ;;  %s319_s8 = sand.u32 (%p990_p3), 1, %s917_s16  }
  0x21   : > { %s779_s9 = sshll.u32 (%p990_p3), %s925_s18, 2  ;;  %s778_s10 = sshll.u32 (%p990_p3), %s319_s8, 3 }
  0x22   : > { %s326_s13 = scalar_lea.vmem (%p990_p3), %s1076_s3, %s779_s9  ;;  %s321_s14 = scalar_lea.vmem (%p990_p3), [#allocation4], %s778_s10 }
  0x23   : > { %v342_v16 = vld [vmem:[%s326_s13] sm:$0xf] (%p990_p3)  ;;  %v344_v17 = vld [vmem:[%s326_s13 + $0x8] sm:$0xf] (%p990_p3) }
  0x24   : > { %343 = vst [vmem:[%s321_s14] sm:$0xf] (%p990_p3), %v342_v16  ;;  %345 = vst [vmem:[%s321_s14 + $0x4] sm:$0xf] (%p990_p3), %v344_v17 }
  0x27 PF: > { %p780_p8 = scmp.ge.s32.totalorder %s929_s19, 1  ;;  %p371_p9 = scmp.lt.s32.totalorder %s929_s19, 3 }
  0x29   : > { %p372_p10 = pnand %p780_p8, %p371_p9 }
  0x2a   : > { %s378_s21 = sand.u32 (!%p372_p10), 1, %s913_s15   ;;  %v931_v18 = vmov (!%p372_p10), 0.0   ;;  %vm932_vm0 = vmmov (!%p372_p10), 0   ;;  %v890_v27 = vld [vmem:[%s1073_s0] sm:$0xff] (!%p372_p10)   ;;  %p434_p11 = scmp.lt.s32.totalorder (!%p372_p10), %s921_s17, 1 }
  0x2b   : > { %375 = sbr.rel (%p372_p10) target bundleno = 308 (0x134), region = 110  ;;  %820 = vmatprep.subr.bf16.mxu0 (!%p372_p10), %v931_v18  ;;  %s781_s22 = sshll.u32 (!%p372_p10), %s378_s21, 6  ;;  %836 = vmatprep.mubr.msk.bf16.mxu0 (!%p372_p10), %vm932_vm0, %v931_v18 }
  0x2c   : > { %s380_s23 = scalar_lea.vmem (!%p372_p10), [#allocation3], %s781_s22  ;;  %s782_s28 = sshll.u32 (!%p372_p10), %s378_s21, 3 }
  0x2d   : > { %v882_v19 = vld [vmem:[%s380_s23] sm:$0xff] (!%p372_p10)   ;;  %v883_v20 = vld [vmem:[%s380_s23 + $0x8] sm:$0xff] (!%p372_p10)   ;;  %v884_v21 = vld [vmem:[%s380_s23 + $0x10] sm:$0xff] (!%p372_p10)   ;;  %s387_s7 = scalar_lea.vmem (!%p372_p10), [#allocation4], %s782_s28  ;;  %s423_s15 = scalar_lea.vmem (!%p372_p10), [#allocation5], %s782_s28 }
  0x2e   : > { %821 = vmatpush3.bf16.msra.mxu0 (!%p372_p10), %v882_v19  ;;  %v885_v22 = vld [vmem:[%s380_s23 + $0x18] sm:$0xff] (!%p372_p10)   ;;  %v886_v23 = vld [vmem:[%s380_s23 + $0x20] sm:$0xff] (!%p372_p10)   ;;  %v887_v24 = vld [vmem:[%s380_s23 + $0x28] sm:$0xff] (!%p372_p10)  }
  0x2f   : > { %822 = vmatprep.subr.bf16.mxu0 (!%p372_p10), %v931_v18  ;;  %v888_v25 = vld [vmem:[%s380_s23 + $0x30] sm:$0xff] (!%p372_p10)   ;;  %v889_v26 = vld [vmem:[%s380_s23 + $0x38] sm:$0xff] (!%p372_p10)   ;;  %v803_v28 = vld [vmem:[%s387_s7] sm:$0xff] (!%p372_p10)  }
  0x30   : > { %v804_v30 = vunpack.c.l.bf16 (!%p372_p10), %v803_v28  ;;  %v805_v34 = vunpack.c.h.bf16 (!%p372_p10), %v803_v28 }
  0x32   : > { %823 = vmatpush3.bf16.msra.mxu0 %v883_v20  ;;  %s435_s29 = scalar_select %p434_p11, %s921_s17, 1 }
  0x33   : > { %824 = vmatprep.subr.bf16.mxu0 %v931_v18  ;;  %s797_s8 = sshll.u32 (%p997_p6), %s921_s17, 2 }
  0x34   : > { %s436_s6 = scalar_lea.vmem %s1075_s2, %s435_s29  ;;  %s608_s11 = scalar_lea.vmem (%p997_p6), %s1077_s4, %s797_s8 }
  0x35   : > { %v793_v29 = vld [vmem:[%s436_s6] ss:$0 sm:$0xff] }
  0x36   : > { %825 = vmatpush3.bf16.msra.mxu0 %v884_v21 }
  0x37   : > { %826 = vmatprep.subr.bf16.mxu0 %v931_v18 }
  0x3a   : > { %827 = vmatpush3.bf16.msra.mxu0 %v885_v22 }
  0x3b   : > { %828 = vmatprep.subr.bf16.mxu0 %v931_v18 }
  0x3e   : > { %829 = vmatpush3.bf16.msra.mxu0 %v886_v23 }
  0x3f   : > { %830 = vmatprep.subr.bf16.mxu0 %v931_v18 }
  0x42   : > { %831 = vmatpush3.bf16.msra.mxu0 %v887_v24 }
  0x43   : > { %832 = vmatprep.subr.bf16.mxu0 %v931_v18 }
  0x46   : > { %833 = vmatpush3.bf16.msra.mxu0 %v888_v25 }
  0x47   : > { %834 = vmatprep.subr.bf16.mxu0 %v931_v18 }
  0x4a   : > { %835 = vmatpush3.bf16.msra.mxu0 %v889_v26 }
  0x4d   : > { %837 = vmatmul.mubr.bf16.vlgmr.msra.gmra.mrb[0].mxu0 %v890_v27 }
 0x120   : > { %v554_v31 = vpop.f32.mrb[0].mxu0 }
 0x121   : > { %v577_v32 = vadd.f32 %v793_v29, %v554_v31  ;;  %v838_v33 = vpop.f32.mrb[1].mxu0 }
 0x122   : > { %v557_v35 = vpop.f32.mrb[2].mxu0 }
 0x123   : > { %v583_v36 = vadd.f32 %v804_v30, %v577_v32  ;;  %v578_v37 = vadd.f32 %v793_v29, %v557_v35  ;;  %v839_v38 = vpop.f32.mrb[3].mxu0 }
 0x125   : > { %v584_v39 = vadd.f32 %v805_v34, %v578_v37  ;;  %v585_v40 = vmax.f32 %v583_v36, 0.0  ;;  %603 = sbr.rel (!%p997_p6) target bundleno = 308 (0x134), region = 130 }
 0x127   : > { %v586_v41 = vmax.f32 %v584_v39, 0.0 }
 0x129   : > { %v809_v42 = vpack.c.bf16 %v586_v41, %v585_v40 }
 0x12b   : > { %810 = vst [vmem:[%s423_s15] sm:$0xff] %v809_v42  }
 0x132   : > { %v624_v43 = vld [vmem:[%s423_s15] sm:$0xf]  ;;  %v626_v44 = vld [vmem:[%s423_s15 + $0x4] sm:$0xf] }
 0x133   : > { %625 = vst [vmem:[%s608_s11] sm:$0xf] %v624_v43  ;;  %627 = vst [vmem:[%s608_s11 + $0x8] sm:$0xf] %v626_v44 }
 0x134 PF: > { %s14_s19 = sadd.s32 1, %s929_s19   ;;  %s1080_s15 = smov %s917_s16 }
 0x135   : > { %p11_p12 = scmp.ge.s32.totalorder %s14_s19, 4   ;;  %s1081_s16 = smov %s1002_s26 }
 0x136   : > { %s1082_s17 = smov %s925_s18  ;;  %s1083_s18 = smov %s1085_s20 }
 0x137   :  { %13 = sbr.rel (!%p11_p12) target bundleno = 3 (0x3), region = 216 }

// kernel: forward.100
= control target key start
LH: loop header
LB: loop body
LE: loop exit
PB: predicated region body
PF: predicated region fallthrough
CT: control target
= control target key end

     0   :  { %s820_s12 = smov 0   ;;  %s822_s13 = smov 0   ;;  %s922_s0 = inlined_call_operand.vmem [shape: bf16[16,128], index: 0, kind: input, shape index: {}]   ;;  %s923_s1 = inlined_call_operand.vmem [shape: bf16[128,256], index: 1, kind: input, shape index: {}]   ;;  %s924_s2 = inlined_call_operand.vmem [shape: f32[1,256], index: 2, kind: input, shape index: {}]   ;;  %s925_s3 = inlined_call_operand.vmem [shape: bf16[16,256], index: 3, kind: output, shape index: {}]  }
   0x1   :  { %s824_s14 = smov 0   ;;  %s826_s15 = smov 0  }
   0x2   :  { %s828_s16 = smov 0  }
   0x3 LB: > { %s28_s17 = sadd.s32 1, %s792_s15  ;;  %s645_s18 = sadd.s32 4294967295, %s796_s16   ;;  %s796_s16 = sphi %s828_s16, %s13_s16   ;;  %s792_s15 = sphi %s826_s15, %s930_s15   ;;  %s788_s14 = sphi %s824_s14, %s929_s14   ;;  %s784_s13 = sphi %s822_s13, %s928_s13   ;;  %s780_s12 = sphi %s820_s12, %s927_s12  }
   0x4   : > { %p30_p0 = scmp.ge.s32.totalorder %s28_s17, 2  ;;  %p76_p1 = scmp.ne.s32.totalorder %s784_s13, %s780_s12 }
   0x5   : > { %p77_p2 = scmp.eq.s32.totalorder %s796_s16, 0  ;;  %p134_p4 = scmp.eq.s32.totalorder %s645_s18, 1 }
   0x6   : > { %s932_s17 = smov (%p30_p0, %s28_s17), 0  ;;  %s69_s20 = sadd.s32 1, %s784_s13 }
   0x7   : > { %p78_p3 = por %p77_p2, %p76_p1  ;;  %s65_s19 = ssub.s32 %s792_s15, %s932_s17 }
   0x8   : > { %p67_p5 = scmp.eq.s32.totalorder %s65_s19, 0  ;;  %p855_p6 = por %p134_p4, %p76_p1 }
   0x9   : > { %p649_p7 = scmp.ge.s32.totalorder %s796_s16, 2 }
   0xa   : > { %s860_s22 = scalar_select %p67_p5, %s784_s13, %s69_s20  }
   0xb   : > { %168 = sbr.rel (%p649_p7) target bundleno = 32 (0x20), region = 20 }
  0x12   : > { %171 = sbr.rel (!%p78_p3) target bundleno = 32 (0x20), region = 24  ;;  %s173_s23 = sand.u32 (%p78_p3), 1, %s784_s13  }
  0x13   : > { %s651_s24 = sshll.u32 (%p78_p3), %s792_s15, 2  ;;  %s650_s25 = sshll.u32 (%p78_p3), %s173_s23, 6 }
  0x14   : > { %s868_s28 = scalar_lea.vmem (%p78_p3), %s923_s1, %s651_s24  ;;  %s175_s29 = scalar_lea.vmem (%p78_p3), [#allocation3], %s650_s25 }
  0x15   : > { %v196_v0 = vld [vmem:[%s868_s28] sm:$0xf] (%p78_p3)  ;;  %v198_v1 = vld [vmem:[%s868_s28 + $0x8] sm:$0xf] (%p78_p3)  ;;  %v200_v2 = vld [vmem:[%s868_s28 + $0x10] sm:$0xf] (%p78_p3) }
  0x16   : > { %197 = vst [vmem:[%s175_s29] sm:$0xf] (%p78_p3), %v196_v0  ;;  %199 = vst [vmem:[%s175_s29 + $0x4] sm:$0xf] (%p78_p3), %v198_v1  ;;  %v202_v3 = vld [vmem:[%s868_s28 + $0x18] sm:$0xf] (%p78_p3) }
  0x17   : > { %v204_v4 = vld [vmem:[%s868_s28 + $0x20] sm:$0xf] (%p78_p3)  ;;  %201 = vst [vmem:[%s175_s29 + $0x8] sm:$0xf] (%p78_p3), %v200_v2  ;;  %203 = vst [vmem:[%s175_s29 + $0xc] sm:$0xf] (%p78_p3), %v202_v3 }
  0x18   : > { %205 = vst [vmem:[%s175_s29 + $0x10] sm:$0xf] (%p78_p3), %v204_v4  ;;  %v206_v5 = vld [vmem:[%s868_s28 + $0x28] sm:$0xf] (%p78_p3)  ;;  %v208_v6 = vld [vmem:[%s868_s28 + $0x30] sm:$0xf] (%p78_p3) }
  0x19   : > { %v210_v7 = vld [vmem:[%s868_s28 + $0x38] sm:$0xf]  ;;  %207 = vst [vmem:[%s175_s29 + $0x14] sm:$0xf] %v206_v5  ;;  %209 = vst [vmem:[%s175_s29 + $0x18] sm:$0xf] %v208_v6 }
  0x1a   : > { %211 = vst [vmem:[%s175_s29 + $0x1c] sm:$0xf] %v210_v7  ;;  %v212_v8 = vld [vmem:[%s868_s28 + $0x40] sm:$0xf]  ;;  %v214_v9 = vld [vmem:[%s868_s28 + $0x48] sm:$0xf] }
  0x1b   : > { %v216_v10 = vld [vmem:[%s868_s28 + $0x50] sm:$0xf]  ;;  %213 = vst [vmem:[%s175_s29 + $0x20] sm:$0xf] %v212_v8  ;;  %215 = vst [vmem:[%s175_s29 + $0x24] sm:$0xf] %v214_v9 }
  0x1c   : > { %217 = vst [vmem:[%s175_s29 + $0x28] sm:$0xf] %v216_v10  ;;  %v218_v11 = vld [vmem:[%s868_s28 + $0x58] sm:$0xf]  ;;  %v220_v12 = vld [vmem:[%s868_s28 + $0x60] sm:$0xf] }
  0x1d   : > { %v222_v13 = vld [vmem:[%s868_s28 + $0x68] sm:$0xf]  ;;  %219 = vst [vmem:[%s175_s29 + $0x2c] sm:$0xf] %v218_v11  ;;  %221 = vst [vmem:[%s175_s29 + $0x30] sm:$0xf] %v220_v12 }
  0x1e   : > { %223 = vst [vmem:[%s175_s29 + $0x34] sm:$0xf] %v222_v13  ;;  %v224_v14 = vld [vmem:[%s868_s28 + $0x70] sm:$0xf]  ;;  %v226_v15 = vld [vmem:[%s868_s28 + $0x78] sm:$0xf] }
  0x1f   : > { %225 = vst [vmem:[%s175_s29 + $0x38] sm:$0xf] %v224_v14  ;;  %227 = vst [vmem:[%s175_s29 + $0x3c] sm:$0xf] %v226_v15 }
  0x20 PF: > { %p652_p8 = scmp.ge.s32.totalorder %s796_s16, 1  ;;  %p287_p9 = scmp.lt.s32.totalorder %s796_s16, 3 }
  0x22   : > { %p288_p10 = pnand %p652_p8, %p287_p9 }
  0x23   : > { %s294_s30 = sand.u32 (!%p288_p10), 1, %s780_s12   ;;  %v798_v16 = vmov (!%p288_p10), 0.0   ;;  %vm799_vm0 = vmmov (!%p288_p10), 0   ;;  %v757_v25 = vld [vmem:[%s922_s0] sm:$0xff] (!%p288_p10)   ;;  %p337_p11 = scmp.lt.s32.totalorder (!%p288_p10), %s788_s14, 1 }
  0x24   : > { %291 = sbr.rel (%p288_p10) target bundleno = 297 (0x129), region = 69  ;;  %687 = vmatprep.subr.bf16.mxu0 (!%p288_p10), %v798_v16  ;;  %s653_s4 = sshll.u32 (!%p288_p10), %s294_s30, 6  ;;  %703 = vmatprep.mubr.msk.bf16.mxu0 (!%p288_p10), %vm799_vm0, %v798_v16 }
  0x25   : > { %s296_s5 = scalar_lea.vmem (!%p288_p10), [#allocation3], %s653_s4  ;;  %s654_s18 = sshll.u32 (!%p288_p10), %s294_s30, 3 }
  0x26   : > { %v749_v17 = vld [vmem:[%s296_s5] sm:$0xff] (!%p288_p10)   ;;  %v750_v18 = vld [vmem:[%s296_s5 + $0x8] sm:$0xff] (!%p288_p10)   ;;  %v751_v19 = vld [vmem:[%s296_s5 + $0x10] sm:$0xff] (!%p288_p10)   ;;  %s326_s19 = scalar_lea.vmem (!%p288_p10), [#allocation4], %s654_s18 }
  0x27   : > { %688 = vmatpush3.bf16.msra.mxu0 (!%p288_p10), %v749_v17  ;;  %v752_v20 = vld [vmem:[%s296_s5 + $0x18] sm:$0xff] (!%p288_p10)   ;;  %v753_v21 = vld [vmem:[%s296_s5 + $0x20] sm:$0xff] (!%p288_p10)   ;;  %v754_v22 = vld [vmem:[%s296_s5 + $0x28] sm:$0xff] (!%p288_p10)  }
  0x28   : > { %689 = vmatprep.subr.bf16.mxu0 (!%p288_p10), %v798_v16  ;;  %v755_v23 = vld [vmem:[%s296_s5 + $0x30] sm:$0xff] (!%p288_p10)   ;;  %v756_v24 = vld [vmem:[%s296_s5 + $0x38] sm:$0xff] (!%p288_p10)  }
  0x2b   : > { %690 = vmatpush3.bf16.msra.mxu0 %v750_v18  ;;  %s338_s8 = scalar_select %p337_p11, %s788_s14, 1 }
  0x2c   : > { %691 = vmatprep.subr.bf16.mxu0 %v798_v16  ;;  %s668_s20 = sshll.u32 (%p855_p6), %s788_s14, 2 }
  0x2d   : > { %s339_s11 = scalar_lea.vmem %s924_s2, %s338_s8  ;;  %s502_s25 = scalar_lea.vmem (%p855_p6), %s925_s3, %s668_s20 }
  0x2e   : > { %v664_v27 = vld [vmem:[%s339_s11] ss:$0 sm:$0xff] }
  0x2f   : > { %692 = vmatpush3.bf16.msra.mxu0 %v751_v19 }
  0x30   : > { %693 = vmatprep.subr.bf16.mxu0 %v798_v16 }
  0x33   : > { %694 = vmatpush3.bf16.msra.mxu0 %v752_v20 }
  0x34   : > { %695 = vmatprep.subr.bf16.mxu0 %v798_v16 }
  0x37   : > { %696 = vmatpush3.bf16.msra.mxu0 %v753_v21 }
  0x38   : > { %697 = vmatprep.subr.bf16.mxu0 %v798_v16 }
  0x3b   : > { %698 = vmatpush3.bf16.msra.mxu0 %v754_v22 }
  0x3c   : > { %699 = vmatprep.subr.bf16.mxu0 %v798_v16 }
  0x3f   : > { %700 = vmatpush3.bf16.msra.mxu0 %v755_v23 }
  0x40   : > { %701 = vmatprep.subr.bf16.mxu0 %v798_v16 }
  0x43   : > { %702 = vmatpush3.bf16.msra.mxu0 %v756_v24 }
  0x46   : > { %704 = vmatmul.mubr.bf16.vlgmr.msra.gmra.mrb[0].mxu0 %v757_v25 }
 0x119   : > { %v456_v26 = vpop.f32.mrb[0].mxu0 }
 0x11a   : > { %v705_v28 = vpop.f32.mrb[1].mxu0  ;;  %v479_v30 = vadd.f32 %v664_v27, %v456_v26  ;;  %497 = sbr.rel (!%p855_p6) target bundleno = 297 (0x129), region = 85 }
 0x11b   : > { %v459_v29 = vpop.f32.mrb[2].mxu0 }
 0x11c   : > { %v480_v31 = vadd.f32 %v664_v27, %v459_v29  ;;  %v706_v32 = vpop.f32.mrb[3].mxu0 }
 0x11e   : > { %v676_v33 = vpack.c.bf16 %v480_v31, %v479_v30 }
 0x120   : > { %677 = vst [vmem:[%s326_s19] sm:$0xff] %v676_v33  }
 0x127   : > { %v518_v34 = vld [vmem:[%s326_s19] sm:$0xf]  ;;  %v520_v35 = vld [vmem:[%s326_s19 + $0x4] sm:$0xf] }
 0x128   : > { %519 = vst [vmem:[%s502_s25] sm:$0xf] %v518_v34  ;;  %521 = vst [vmem:[%s502_s25 + $0x8] sm:$0xf] %v520_v35 }
 0x129 PF: > { %s13_s16 = sadd.s32 1, %s796_s16   ;;  %s927_s12 = smov %s784_s13 }
 0x12a   : > { %p10_p12 = scmp.ge.s32.totalorder %s13_s16, 4   ;;  %s928_s13 = smov %s860_s22 }
 0x12b   : > { %s929_s14 = smov %s792_s15  ;;  %s930_s15 = smov %s932_s17 }
 0x12c   :  { %12 = sbr.rel (!%p10_p12) target bundleno = 3 (0x3), region = 163 }

// kernel: forward.102
= control target key start
LH: loop header
LB: loop body
LE: loop exit
PB: predicated region body
PF: predicated region fallthrough
CT: control target
= control target key end

     0   :  { %s387_s1 = inlined_call_operand.vmem [shape: bf16[256,128], index: 1, kind: input, shape index: {}]   ;;  %s388_s0 = inlined_call_operand.vmem [shape: bf16[16,256], index: 0, kind: input, shape index: {}]   ;;  %s389_s2 = inlined_call_operand.vmem [shape: f32[1,128], index: 2, kind: input, shape index: {}]   ;;  %s390_s3 = inlined_call_operand.vmem [shape: bf16[16,128], index: 3, kind: output, shape index: {}]  }
   0x1   :  { %v288_v0 = vld [vmem:[%s387_s1 + $0x40] sm:$0xff]   ;;  %v290_v2 = vld [vmem:[%s387_s1 + $0x48] sm:$0xff]   ;;  %v292_v4 = vld [vmem:[%s387_s1 + $0x50] sm:$0xff]  }
   0x2   :  { %v289_v1 = vld [vmem:[%s387_s1] sm:$0xff]   ;;  %266 = vmatprep.subr.bf16.mxu0 %v288_v0  ;;  %v291_v3 = vld [vmem:[%s387_s1 + $0x8] sm:$0xff]   ;;  %v293_v5 = vld [vmem:[%s387_s1 + $0x10] sm:$0xff]  }
   0x3   :  { %267 = vmatpush3.bf16.msra.mxu0 %v289_v1  ;;  %v294_v6 = vld [vmem:[%s387_s1 + $0x58] sm:$0xff]   ;;  %v296_v8 = vld [vmem:[%s387_s1 + $0x60] sm:$0xff]   ;;  %v298_v10 = vld [vmem:[%s387_s1 + $0x68] sm:$0xff]  }
   0x4   :  { %268 = vmatprep.subr.bf16.mxu0 %v290_v2  ;;  %v295_v7 = vld [vmem:[%s387_s1 + $0x18] sm:$0xff]   ;;  %v297_v9 = vld [vmem:[%s387_s1 + $0x20] sm:$0xff]   ;;  %v299_v12 = vld [vmem:[%s387_s1 + $0x28] sm:$0xff]  }
   0x5   :  { %v306_v11 = vld [vmem:[%s388_s0 + $0x4] ss:$8 sps:$4 sm:$0xff]   ;;  %v300_v13 = vld [vmem:[%s387_s1 + $0x70] sm:$0xff]   ;;  %v302_v15 = vld [vmem:[%s387_s1 + $0x78] sm:$0xff]  }
   0x6   :  { %195 = vmatprep.mubr.bf16.mxu0 %v306_v11  ;;  %v301_v14 = vld [vmem:[%s387_s1 + $0x30] sm:$0xff]   ;;  %v303_v16 = vld [vmem:[%s387_s1 + $0x38] sm:$0xff]   ;;  %v304_v17 = vld [vmem:[%s388_s0] ss:$8 sps:$4 sm:$0xff]  }
   0x7   :  { %269 = vmatpush3.bf16.msra.mxu0 %v291_v3  ;;  %v256_v20 = vld [vmem:[%s389_s2] ss:$0 sm:$0xff] }
   0x8   :  { %270 = vmatprep.subr.bf16.mxu0 %v292_v4 }
   0xb   :  { %271 = vmatpush3.bf16.msra.mxu0 %v293_v5 }
   0xc   :  { %272 = vmatprep.subr.bf16.mxu0 %v294_v6 }
   0xf   :  { %273 = vmatpush3.bf16.msra.mxu0 %v295_v7 }
  0x10   :  { %274 = vmatprep.subr.bf16.mxu0 %v296_v8 }
  0x13   :  { %275 = vmatpush3.bf16.msra.mxu0 %v297_v9 }
  0x14   :  { %276 = vmatprep.subr.bf16.mxu0 %v298_v10 }
  0x17   :  { %277 = vmatpush3.bf16.msra.mxu0 %v299_v12 }
  0x18   :  { %278 = vmatprep.subr.bf16.mxu0 %v300_v13 }
  0x1b   :  { %279 = vmatpush3.bf16.msra.mxu0 %v301_v14 }
  0x1c   :  { %280 = vmatprep.subr.bf16.mxu0 %v302_v15 }
  0x1f   :  { %281 = vmatpush3.bf16.msra.mxu0 %v303_v16 }
  0x22   :  { %196 = vmatmul.mubr.bf16.vlgmr.msra.gmra.mrb[0].mxu0 %v304_v17 }
  0xf5   :  { %v282_v18 = vpop.f32.mrb[0].mxu0 }
  0xf6   :  { %v283_v19 = vpop.f32.mrb[1].mxu0 }
  0xf7   :  { %v284_v21 = vadd.f32 %v283_v19, %v282_v18  ;;  %v285_v22 = vpop.f32.mrb[2].mxu0 }
  0xf8   :  { %v286_v23 = vpop.f32.mrb[3].mxu0 }
  0xf9   :  { %v220_v24 = vadd.f32 %v284_v21, %v256_v20  ;;  %v287_v25 = vadd.f32 %v286_v23, %v285_v22 }
  0xfb   :  { %v221_v26 = vadd.f32 %v287_v25, %v256_v20  ;;  %v222_v27 = vmax.f32 %v220_v24, 0.0 }
  0xfd   :  { %v223_v28 = vmax.f32 %v221_v26, 0.0 }
  0xff   :  { %v264_v29 = vpack.c.bf16 %v223_v28, %v222_v27 }
 0x101   :  { %265 = vst [vmem:[%s390_s3] sm:$0xff] %v264_v29  }

// kernel: forward.99
= control target key start
LH: loop header
LB: loop body
LE: loop exit
PB: predicated region body
PF: predicated region fallthrough
CT: control target
= control target key end

     0   :  { %v709_v34 = vmov 0.0   ;;  %vm710_vm0 = vmmov 0   ;;  %s872_s1 = inlined_call_operand.vmem [shape: bf16[640,128], index: 1, kind: input, shape index: {}]   ;;  %s873_s0 = inlined_call_operand.vmem [shape: bf16[16,640], index: 0, kind: input, shape index: {}]   ;;  %s874_s2 = inlined_call_operand.vmem [shape: f32[1,128], index: 2, kind: input, shape index: {}]   ;;  %s875_s3 = inlined_call_operand.vmem [shape: bf16[16,128], index: 3, kind: output, shape index: {}]  }
   0x1   :  { %v662_v0 = vld [vmem:[%s872_s1 + $0x40] sm:$0xff]   ;;  %v666_v4 = vld [vmem:[%s872_s1 + $0x48] sm:$0xff]   ;;  %v670_v8 = vld [vmem:[%s872_s1 + $0x50] sm:$0xff]  }
   0x2   :  { %v663_v1 = vld [vmem:[%s872_s1 + $0xc0] sm:$0xff]   ;;  %587 = vmatprep.subr.bf16.mxu0 %v662_v0  ;;  %v667_v5 = vld [vmem:[%s872_s1 + $0xc8] sm:$0xff]   ;;  %v671_v9 = vld [vmem:[%s872_s1 + $0xd0] sm:$0xff]  }
   0x3   :  { %v664_v2 = vld [vmem:[%s872_s1] sm:$0xff]   ;;  %609 = vmatprep.subr.bf16.mxu1 %v663_v1  ;;  %v668_v6 = vld [vmem:[%s872_s1 + $0x8] sm:$0xff]   ;;  %v672_v10 = vld [vmem:[%s872_s1 + $0x10] sm:$0xff]  }
   0x4   :  { %v665_v3 = vld [vmem:[%s872_s1 + $0x80] sm:$0xff]   ;;  %588 = vmatpush3.bf16.msra.mxu0 %v664_v2  ;;  %v669_v7 = vld [vmem:[%s872_s1 + $0x88] sm:$0xff]   ;;  %v673_v11 = vld [vmem:[%s872_s1 + $0x90] sm:$0xff]  }
   0x5   :  { %610 = vmatpush3.bf16.msra.mxu1 %v665_v3  ;;  %589 = vmatprep.subr.bf16.mxu0 %v666_v4  ;;  %v674_v12 = vld [vmem:[%s872_s1 + $0x58] sm:$0xff]   ;;  %v678_v16 = vld [vmem:[%s872_s1 + $0x60] sm:$0xff]   ;;  %v682_v20 = vld [vmem:[%s872_s1 + $0x68] sm:$0xff]  }
   0x6   :  { %611 = vmatprep.subr.bf16.mxu1 %v667_v5  ;;  %v675_v13 = vld [vmem:[%s872_s1 + $0xd8] sm:$0xff]   ;;  %v679_v17 = vld [vmem:[%s872_s1 + $0xe0] sm:$0xff]   ;;  %v683_v21 = vld [vmem:[%s872_s1 + $0xe8] sm:$0xff]  }
   0x7   :  { %v676_v14 = vld [vmem:[%s872_s1 + $0x18] sm:$0xff]   ;;  %v680_v18 = vld [vmem:[%s872_s1 + $0x20] sm:$0xff]   ;;  %v684_v22 = vld [vmem:[%s872_s1 + $0x28] sm:$0xff]  }
   0x8   :  { %590 = vmatpush3.bf16.msra.mxu0 %v668_v6  ;;  %v677_v15 = vld [vmem:[%s872_s1 + $0x98] sm:$0xff]   ;;  %v681_v19 = vld [vmem:[%s872_s1 + $0xa0] sm:$0xff]   ;;  %v685_v23 = vld [vmem:[%s872_s1 + $0xa8] sm:$0xff]  }
   0x9   :  { %612 = vmatpush3.bf16.msra.mxu1 %v669_v7  ;;  %591 = vmatprep.subr.bf16.mxu0 %v670_v8  ;;  %v686_v24 = vld [vmem:[%s872_s1 + $0x70] sm:$0xff]   ;;  %v690_v28 = vld [vmem:[%s872_s1 + $0x78] sm:$0xff]   ;;  %v699_v36 = vld [vmem:[%s873_s0 + $0xc] ss:$20 sps:$4 sm:$0xff]  }
   0xa   :  { %613 = vmatprep.subr.bf16.mxu1 %v671_v9  ;;  %v687_v25 = vld [vmem:[%s872_s1 + $0xf0] sm:$0xff]   ;;  %v691_v29 = vld [vmem:[%s872_s1 + $0xf8] sm:$0xff]   ;;  %v700_v37 = vld [vmem:[%s872_s1 + $0x100] sm:$0xff]   ;;  %448 = vmatprep.mubr.bf16.mxu1 %v699_v36 }
   0xb   :  { %v688_v26 = vld [vmem:[%s872_s1 + $0x30] sm:$0xff]   ;;  %v692_v30 = vld [vmem:[%s872_s1 + $0x38] sm:$0xff]   ;;  %v701_v38 = vld [vmem:[%s872_s1 + $0x108] sm:$0xff]  }
   0xc   :  { %592 = vmatpush3.bf16.msra.mxu0 %v672_v10  ;;  %v689_v27 = vld [vmem:[%s872_s1 + $0xb0] sm:$0xff]   ;;  %v693_v31 = vld [vmem:[%s872_s1 + $0xb8] sm:$0xff]   ;;  %v704_v41 = vld [vmem:[%s872_s1 + $0x120] sm:$0xff]  }
   0xd   :  { %614 = vmatpush3.bf16.msra.mxu1 %v673_v11  ;;  %593 = vmatprep.subr.bf16.mxu0 %v674_v12  ;;  %v694_v32 = vld [vmem:[%s873_s0] ss:$20 sps:$4 sm:$0xff]   ;;  %v696_v33 = vld [vmem:[%s873_s0 + $0x4] ss:$20 sps:$4 sm:$0xff]   ;;  %v697_v35 = vld [vmem:[%s873_s0 + $0x8] ss:$20 sps:$4 sm:$0xff]  }
   0xe   :  { %615 = vmatprep.subr.bf16.mxu1 %v675_v13  ;;  %407 = vmatprep.mubr.bf16.mxu0 %v696_v33  ;;  %v702_v39 = vld [vmem:[%s872_s1 + $0x110] sm:$0xff]   ;;  %v703_v40 = vld [vmem:[%s872_s1 + $0x118] sm:$0xff]   ;;  %v705_v42 = vld [vmem:[%s872_s1 + $0x128] sm:$0xff]  }
   0xf   :  { %v706_v43 = vld [vmem:[%s872_s1 + $0x130] sm:$0xff]   ;;  %v707_v44 = vld [vmem:[%s872_s1 + $0x138] sm:$0xff]   ;;  %v577_v61 = vld [vmem:[%s874_s2] ss:$0 sm:$0xff] }
  0x10   :  { %594 = vmatpush3.bf16.msra.mxu0 %v676_v14  ;;  %v708_v45 = vld [vmem:[%s873_s0 + $0x10] ss:$20 sps:$4 sm:$0xff]  }
  0x11   :  { %616 = vmatpush3.bf16.msra.mxu1 %v677_v15  ;;  %595 = vmatprep.subr.bf16.mxu0 %v678_v16 }
  0x12   :  { %617 = vmatprep.subr.bf16.mxu1 %v679_v17 }
  0x14   :  { %596 = vmatpush3.bf16.msra.mxu0 %v680_v18 }
  0x15   :  { %618 = vmatpush3.bf16.msra.mxu1 %v681_v19  ;;  %597 = vmatprep.subr.bf16.mxu0 %v682_v20 }
  0x16   :  { %619 = vmatprep.subr.bf16.mxu1 %v683_v21 }
  0x18   :  { %598 = vmatpush3.bf16.msra.mxu0 %v684_v22 }
  0x19   :  { %620 = vmatpush3.bf16.msra.mxu1 %v685_v23  ;;  %599 = vmatprep.subr.bf16.mxu0 %v686_v24 }
  0x1a   :  { %621 = vmatprep.subr.bf16.mxu1 %v687_v25 }
  0x1c   :  { %600 = vmatpush3.bf16.msra.mxu0 %v688_v26 }
  0x1d   :  { %622 = vmatpush3.bf16.msra.mxu1 %v689_v27  ;;  %601 = vmatprep.subr.bf16.mxu0 %v690_v28 }
  0x1e   :  { %623 = vmatprep.subr.bf16.mxu1 %v691_v29 }
  0x20   :  { %602 = vmatpush3.bf16.msra.mxu0 %v692_v30 }
  0x21   :  { %624 = vmatpush3.bf16.msra.mxu1 %v693_v31  ;;  %640 = vmatprep.subr.bf16.mxu0 %v709_v34 }
  0x23   :  { %408 = vmatmul.mubr.bf16.vlgmr.msra.gmra.mrb[0].mxu0 %v694_v32 }
  0x24   :  { %449 = vmatmul.mubr.bf16.vlgmr.msra.gmra.mrb[0].mxu1 %v697_v35  ;;  %641 = vmatpush3.bf16.msra.mxu0 %v700_v37 }
  0x25   :  { %642 = vmatprep.subr.bf16.mxu0 %v709_v34  ;;  %656 = vmatprep.mubr.msk.bf16.mxu0 %vm710_vm0, %v709_v34 }
  0x28   :  { %643 = vmatpush3.bf16.msra.mxu0 %v701_v38 }
  0x29   :  { %644 = vmatprep.subr.bf16.mxu0 %v709_v34 }
  0x2c   :  { %645 = vmatpush3.bf16.msra.mxu0 %v702_v39 }
  0x2d   :  { %646 = vmatprep.subr.bf16.mxu0 %v709_v34 }
  0x30   :  { %647 = vmatpush3.bf16.msra.mxu0 %v703_v40 }
  0x31   :  { %648 = vmatprep.subr.bf16.mxu0 %v709_v34 }
  0x34   :  { %649 = vmatpush3.bf16.msra.mxu0 %v704_v41 }
  0x35   :  { %650 = vmatprep.subr.bf16.mxu0 %v709_v34 }
  0x38   :  { %651 = vmatpush3.bf16.msra.mxu0 %v705_v42 }
  0x39   :  { %652 = vmatprep.subr.bf16.mxu0 %v709_v34 }
  0x3c   :  { %653 = vmatpush3.bf16.msra.mxu0 %v706_v43 }
  0x3d   :  { %654 = vmatprep.subr.bf16.mxu0 %v709_v34 }
  0x40   :  { %655 = vmatpush3.bf16.msra.mxu0 %v707_v44 }
  0x43   :  { %657 = vmatmul.mubr.bf16.vlgmr.msra.gmra.mrb[4].mxu0 %v708_v45 }
  0xf6   :  { %v603_v46 = vpop.f32.mrb[0].mxu0 }
  0xf7   :  { %v625_v47 = vpop.f32.mrb[0].mxu1  ;;  %v604_v48 = vpop.f32.mrb[1].mxu0 }
  0xf8   :  { %v605_v49 = vadd.f32 %v604_v48, %v603_v46  ;;  %v626_v50 = vpop.f32.mrb[1].mxu1  ;;  %v606_v51 = vpop.f32.mrb[2].mxu0 }
  0xf9   :  { %v627_v52 = vadd.f32 %v626_v50, %v625_v47  ;;  %v628_v53 = vpop.f32.mrb[2].mxu1  ;;  %v607_v54 = vpop.f32.mrb[3].mxu0 }
  0xfa   :  { %v608_v55 = vadd.f32 %v607_v54, %v606_v51  ;;  %v629_v56 = vpop.f32.mrb[3].mxu1 }
  0xfb   :  { %v630_v57 = vadd.f32 %v629_v56, %v628_v53  ;;  %v451_v58 = vadd.f32 %v627_v52, %v605_v49 }
  0xfd   :  { %v454_v59 = vadd.f32 %v630_v57, %v608_v55 }
 0x116   :  { %v491_v60 = vpop.f32.mrb[4].mxu0 }
 0x117   :  { %v492_v62 = vadd.f32 %v491_v60, %v451_v58  ;;  %v658_v63 = vpop.f32.mrb[5].mxu0 }
 0x118   :  { %v494_v0 = vpop.f32.mrb[6].mxu0 }
 0x119   :  { %v514_v1 = vadd.f32 %v577_v61, %v492_v62  ;;  %v495_v2 = vadd.f32 %v494_v0, %v454_v59  ;;  %v659_v3 = vpop.f32.mrb[7].mxu0 }
 0x11b   :  { %v515_v4 = vadd.f32 %v577_v61, %v495_v2  ;;  %v516_v5 = vmax.f32 %v514_v1, 0.0 }
 0x11d   :  { %v517_v6 = vmax.f32 %v515_v4, 0.0 }
 0x11f   :  { %v585_v7 = vpack.c.bf16 %v517_v6, %v516_v5 }
 0x121   :  { %586 = vst [vmem:[%s875_s3] sm:$0xff] %v585_v7  }

// kernel: forward.108
= control target key start
LH: loop header
LB: loop body
LE: loop exit
PB: predicated region body
PF: predicated region fallthrough
CT: control target
= control target key end

     0   :  { %s385_s1 = inlined_call_operand.vmem [shape: bf16[256,128], index: 1, kind: input, shape index: {}]   ;;  %s386_s0 = inlined_call_operand.vmem [shape: bf16[16,256], index: 0, kind: input, shape index: {}]   ;;  %s387_s2 = inlined_call_operand.vmem [shape: f32[1,128], index: 2, kind: input, shape index: {}]   ;;  %s388_s3 = inlined_call_operand.vmem [shape: bf16[16,128], index: 3, kind: output, shape index: {}]  }
   0x1   :  { %v286_v0 = vld [vmem:[%s385_s1 + $0x40] sm:$0xff]   ;;  %v288_v2 = vld [vmem:[%s385_s1 + $0x48] sm:$0xff]   ;;  %v290_v4 = vld [vmem:[%s385_s1 + $0x50] sm:$0xff]  }
   0x2   :  { %v287_v1 = vld [vmem:[%s385_s1] sm:$0xff]   ;;  %264 = vmatprep.subr.bf16.mxu0 %v286_v0  ;;  %v289_v3 = vld [vmem:[%s385_s1 + $0x8] sm:$0xff]   ;;  %v291_v5 = vld [vmem:[%s385_s1 + $0x10] sm:$0xff]  }
   0x3   :  { %265 = vmatpush3.bf16.msra.mxu0 %v287_v1  ;;  %v292_v6 = vld [vmem:[%s385_s1 + $0x58] sm:$0xff]   ;;  %v294_v8 = vld [vmem:[%s385_s1 + $0x60] sm:$0xff]   ;;  %v296_v10 = vld [vmem:[%s385_s1 + $0x68] sm:$0xff]  }
   0x4   :  { %266 = vmatprep.subr.bf16.mxu0 %v288_v2  ;;  %v293_v7 = vld [vmem:[%s385_s1 + $0x18] sm:$0xff]   ;;  %v295_v9 = vld [vmem:[%s385_s1 + $0x20] sm:$0xff]   ;;  %v297_v12 = vld [vmem:[%s385_s1 + $0x28] sm:$0xff]  }
   0x5   :  { %v304_v11 = vld [vmem:[%s386_s0 + $0x4] ss:$8 sps:$4 sm:$0xff]   ;;  %v298_v13 = vld [vmem:[%s385_s1 + $0x70] sm:$0xff]   ;;  %v300_v15 = vld [vmem:[%s385_s1 + $0x78] sm:$0xff]  }
   0x6   :  { %195 = vmatprep.mubr.bf16.mxu0 %v304_v11  ;;  %v299_v14 = vld [vmem:[%s385_s1 + $0x30] sm:$0xff]   ;;  %v301_v16 = vld [vmem:[%s385_s1 + $0x38] sm:$0xff]   ;;  %v302_v17 = vld [vmem:[%s386_s0] ss:$8 sps:$4 sm:$0xff]  }
   0x7   :  { %267 = vmatpush3.bf16.msra.mxu0 %v289_v3  ;;  %v254_v22 = vld [vmem:[%s387_s2] ss:$0 sm:$0xff] }
   0x8   :  { %268 = vmatprep.subr.bf16.mxu0 %v290_v4 }
   0xb   :  { %269 = vmatpush3.bf16.msra.mxu0 %v291_v5 }
   0xc   :  { %270 = vmatprep.subr.bf16.mxu0 %v292_v6 }
   0xf   :  { %271 = vmatpush3.bf16.msra.mxu0 %v293_v7 }
  0x10   :  { %272 = vmatprep.subr.bf16.mxu0 %v294_v8 }
  0x13   :  { %273 = vmatpush3.bf16.msra.mxu0 %v295_v9 }
  0x14   :  { %274 = vmatprep.subr.bf16.mxu0 %v296_v10 }
  0x17   :  { %275 = vmatpush3.bf16.msra.mxu0 %v297_v12 }
  0x18   :  { %276 = vmatprep.subr.bf16.mxu0 %v298_v13 }
  0x1b   :  { %277 = vmatpush3.bf16.msra.mxu0 %v299_v14 }
  0x1c   :  { %278 = vmatprep.subr.bf16.mxu0 %v300_v15 }
  0x1f   :  { %279 = vmatpush3.bf16.msra.mxu0 %v301_v16 }
  0x22   :  { %196 = vmatmul.mubr.bf16.vlgmr.msra.gmra.mrb[0].mxu0 %v302_v17 }
  0xf5   :  { %v280_v18 = vpop.f32.mrb[0].mxu0 }
  0xf6   :  { %v281_v19 = vpop.f32.mrb[1].mxu0 }
  0xf7   :  { %v282_v20 = vadd.f32 %v281_v19, %v280_v18  ;;  %v283_v21 = vpop.f32.mrb[2].mxu0 }
  0xf8   :  { %v284_v23 = vpop.f32.mrb[3].mxu0 }
  0xf9   :  { %v285_v24 = vadd.f32 %v284_v23, %v283_v21  ;;  %v220_v25 = vadd.f32 %v282_v20, %v254_v22 }
  0xfb   :  { %v221_v26 = vadd.f32 %v285_v24, %v254_v22 }
  0xfd   :  { %v262_v27 = vpack.c.bf16 %v221_v26, %v220_v25 }
  0xff   :  { %263 = vst [vmem:[%s388_s3] sm:$0xff] %v262_v27  }

// kernel: forward.109
= control target key start
LH: loop header
LB: loop body
LE: loop exit
PB: predicated region body
PF: predicated region fallthrough
CT: control target
= control target key end

     0   :  { %v617_v39 = vmov 0.0   ;;  %vm618_vm0 = vmmov 0   ;;  %vm421_vm1 = vcmask 523264   ;;  %vm465_vm2 = vcmask 654336   ;;  %s772_s1 = inlined_call_operand.vmem [shape: bf16[512,64], index: 1, kind: input, shape index: {}]   ;;  %s773_s0 = inlined_call_operand.vmem [shape: bf16[8,512], index: 0, kind: input, shape index: {}]   ;;  %s774_s3 = inlined_call_operand.vmem [shape: bf16[64,80], index: 3, kind: input, shape index: {}]   ;;  %s775_s2 = inlined_call_operand.vmem [shape: f32[1,64], index: 2, kind: input, shape index: {}]   ;;  %s776_s4 = inlined_call_operand.vmem [shape: f32[1,80], index: 4, kind: input, shape index: {}]   ;;  %s777_s5 = inlined_call_operand.vmem [shape: f32[8,80], index: 5, kind: output, shape index: {}]  }
   0x1   :  { %v577_v0 = vld [vmem:[%s772_s1 + $0x40] sm:$0xff]   ;;  %v581_v4 = vld [vmem:[%s772_s1 + $0x48] sm:$0xff]   ;;  %v585_v8 = vld [vmem:[%s772_s1 + $0x50] sm:$0xff]  }
   0x2   :  { %v578_v1 = vld [vmem:[%s772_s1 + $0xc0] sm:$0xff]   ;;  %514 = vmatprep.subr.bf16.mxu0 %v577_v0  ;;  %v582_v5 = vld [vmem:[%s772_s1 + $0xc8] sm:$0xff]   ;;  %v586_v9 = vld [vmem:[%s772_s1 + $0xd0] sm:$0xff]  }
   0x3   :  { %v579_v2 = vld [vmem:[%s772_s1] sm:$0xff]   ;;  %536 = vmatprep.subr.bf16.mxu1 %v578_v1  ;;  %v583_v6 = vld [vmem:[%s772_s1 + $0x8] sm:$0xff]   ;;  %v587_v10 = vld [vmem:[%s772_s1 + $0x10] sm:$0xff]  }
   0x4   :  { %v580_v3 = vld [vmem:[%s772_s1 + $0x80] sm:$0xff]   ;;  %515 = vmatpush3.bf16.msra.mxu0 %v579_v2  ;;  %v584_v7 = vld [vmem:[%s772_s1 + $0x88] sm:$0xff]   ;;  %v588_v11 = vld [vmem:[%s772_s1 + $0x90] sm:$0xff]  }
   0x5   :  { %537 = vmatpush3.bf16.msra.mxu1 %v580_v3  ;;  %516 = vmatprep.subr.bf16.mxu0 %v581_v4  ;;  %v589_v12 = vld [vmem:[%s772_s1 + $0x58] sm:$0xff]   ;;  %v593_v16 = vld [vmem:[%s772_s1 + $0x60] sm:$0xff]   ;;  %v597_v20 = vld [vmem:[%s772_s1 + $0x68] sm:$0xff]  }
   0x6   :  { %538 = vmatprep.subr.bf16.mxu1 %v582_v5  ;;  %v590_v13 = vld [vmem:[%s772_s1 + $0xd8] sm:$0xff]   ;;  %v594_v17 = vld [vmem:[%s772_s1 + $0xe0] sm:$0xff]   ;;  %v598_v21 = vld [vmem:[%s772_s1 + $0xe8] sm:$0xff]  }
   0x7   :  { %v591_v14 = vld [vmem:[%s772_s1 + $0x18] sm:$0xff]   ;;  %v595_v18 = vld [vmem:[%s772_s1 + $0x20] sm:$0xff]   ;;  %v599_v22 = vld [vmem:[%s772_s1 + $0x28] sm:$0xff]  }
   0x8   :  { %517 = vmatpush3.bf16.msra.mxu0 %v583_v6  ;;  %v592_v15 = vld [vmem:[%s772_s1 + $0x98] sm:$0xff]   ;;  %v596_v19 = vld [vmem:[%s772_s1 + $0xa0] sm:$0xff]   ;;  %v600_v23 = vld [vmem:[%s772_s1 + $0xa8] sm:$0xff]  }
   0x9   :  { %539 = vmatpush3.bf16.msra.mxu1 %v584_v7  ;;  %518 = vmatprep.subr.bf16.mxu0 %v585_v8  ;;  %v601_v24 = vld [vmem:[%s772_s1 + $0x70] sm:$0xff]   ;;  %v605_v28 = vld [vmem:[%s772_s1 + $0x78] sm:$0xff]   ;;  %v21_v32 = vld [vmem:[%s773_s0] sm:$0xff] }
   0xa   :  { %540 = vmatprep.subr.bf16.mxu1 %v586_v9  ;;  %v602_v25 = vld [vmem:[%s772_s1 + $0xf0] sm:$0xff]   ;;  %v606_v29 = vld [vmem:[%s772_s1 + $0xf8] sm:$0xff]   ;;  %v22_v33 = vld [vmem:[%s773_s0 + $0x8] sm:$0xff]  ;;  %v472_v34 = vcombine.low %v21_v32, %v21_v32  ;;  %v473_v35 = vcombine.high %v21_v32, %v21_v32 }
   0xb   :  { %v603_v26 = vld [vmem:[%s772_s1 + $0x30] sm:$0xff]   ;;  %v607_v30 = vld [vmem:[%s772_s1 + $0x38] sm:$0xff]   ;;  %v474_v36 = vcombine.low %v22_v33, %v22_v33  ;;  %v475_v37 = vcombine.high %v22_v33, %v22_v33  ;;  %v613_v38 = vld [vmem:[%s774_s3] sm:$0xff]  }
   0xc   :  { %519 = vmatpush3.bf16.msra.mxu0 %v587_v10  ;;  %v604_v27 = vld [vmem:[%s772_s1 + $0xb0] sm:$0xff]   ;;  %v608_v31 = vld [vmem:[%s772_s1 + $0xb8] sm:$0xff]   ;;  %332 = vmatprep.mubr.bf16.mxu0 %v473_v35  ;;  %v614_v40 = vld [vmem:[%s774_s3 + $0x8] sm:$0xff]  }
   0xd   :  { %541 = vmatpush3.bf16.msra.mxu1 %v588_v11  ;;  %520 = vmatprep.subr.bf16.mxu0 %v589_v12  ;;  %v615_v41 = vld [vmem:[%s774_s3 + $0x10] sm:$0xff]   ;;  %v616_v42 = vld [vmem:[%s774_s3 + $0x18] sm:$0xff]   ;;  %v471_v45 = vld [vmem:[%s775_s2] ss:$0 sm:$0xff] }
   0xe   :  { %542 = vmatprep.subr.bf16.mxu1 %v590_v13  ;;  %372 = vmatprep.mubr.bf16.mxu1 %v475_v37  ;;  %v508_v58 = vld [vmem:[%s776_s4] ss:$0 sm:$0xff] }
  0x10   :  { %521 = vmatpush3.bf16.msra.mxu0 %v591_v14 }
  0x11   :  { %543 = vmatpush3.bf16.msra.mxu1 %v592_v15  ;;  %522 = vmatprep.subr.bf16.mxu0 %v593_v16 }
  0x12   :  { %544 = vmatprep.subr.bf16.mxu1 %v594_v17 }
  0x14   :  { %523 = vmatpush3.bf16.msra.mxu0 %v595_v18 }
  0x15   :  { %545 = vmatpush3.bf16.msra.mxu1 %v596_v19  ;;  %524 = vmatprep.subr.bf16.mxu0 %v597_v20 }
  0x16   :  { %546 = vmatprep.subr.bf16.mxu1 %v598_v21 }
  0x18   :  { %525 = vmatpush3.bf16.msra.mxu0 %v599_v22 }
  0x19   :  { %547 = vmatpush3.bf16.msra.mxu1 %v600_v23  ;;  %526 = vmatprep.subr.bf16.mxu0 %v601_v24 }
  0x1a   :  { %548 = vmatprep.subr.bf16.mxu1 %v602_v25 }
  0x1c   :  { %527 = vmatpush3.bf16.msra.mxu0 %v603_v26 }
  0x1d   :  { %549 = vmatpush3.bf16.msra.mxu1 %v604_v27  ;;  %528 = vmatprep.subr.bf16.mxu0 %v605_v28 }
  0x1e   :  { %550 = vmatprep.subr.bf16.mxu1 %v606_v29 }
  0x20   :  { %529 = vmatpush3.bf16.msra.mxu0 %v607_v30 }
  0x21   :  { %551 = vmatpush3.bf16.msra.mxu1 %v608_v31  ;;  %563 = vmatprep.subr.bf16.mxu0 %v617_v39 }
  0x23   :  { %333 = vmatmul.mubr.bf16.vlgmr.msra.gmra.mrb[0].mxu0 %v472_v34 }
  0x24   :  { %373 = vmatmul.mubr.bf16.vlgmr.msra.gmra.mrb[0].mxu1 %v474_v36  ;;  %564 = vmatpush3.bf16.msra.mxu0 %v613_v38 }
  0x25   :  { %565 = vmatprep.subr.bf16.mxu0 %v617_v39  ;;  %571 = vmatprep.mubr.msk.bf16.mxu0 %vm618_vm0, %v617_v39 }
  0x28   :  { %566 = vmatpush3.bf16.msra.mxu0 %v614_v40 }
  0x29   :  { %567 = vmatprep.subr.bf16.mxu0 %v617_v39 }
  0x2c   :  { %568 = vmatpush3.bf16.msra.mxu0 %v615_v41 }
  0x2d   :  { %569 = vmatprep.subr.bf16.mxu0 %v617_v39 }
  0x30   :  { %570 = vmatpush3.bf16.msra.mxu0 %v616_v42 }
  0xf6   :  { %v530_v43 = vpop.f32.mrb[0].mxu0 }
  0xf7   :  { %v552_v44 = vpop.f32.mrb[0].mxu1  ;;  %v531_v46 = vpop.f32.mrb[1].mxu0 }
  0xf8   :  { %v553_v47 = vpop.f32.mrb[1].mxu1  ;;  %v532_v48 = vadd.f32 %v531_v46, %v530_v43  ;;  %v533_v50 = vpop.f32.mrb[2].mxu0 }
  0xf9   :  { %v554_v49 = vadd.f32 %v553_v47, %v552_v44  ;;  %v555_v51 = vpop.f32.mrb[2].mxu1  ;;  %v534_v52 = vpop.f32.mrb[3].mxu0 }
  0xfa   :  { %v556_v53 = vpop.f32.mrb[3].mxu1  ;;  %v335_v54 = vadd.f32 %v532_v48, %v471_v45 }
  0xfc   :  { %v375_v55 = vadd.f32 %v554_v49, %v335_v54 }
  0xfe   :  { %v380_v56 = vmax.f32 %v375_v55, 0.0 }
 0x100   :  { %v381_v57 = vpack.c.bf16 %v380_v56, %v380_v56 }
 0x102   :  { %572 = vmatmul.mubr.msk.bf16.vlgmr.msra.gmra.mrb[4].mxu0 %vm421_vm1, %v381_v57 }
 0x1d5   :  { %v459_v59 = vpop.f32.mrb[4].mxu0 }
 0x1d6   :  { %v460_v60 = vadd.f32 %v508_v58, %v459_v59  ;;  %v573_v61 = vpop.f32.mrb[5].mxu0 }
 0x1d7   :  { %v462_v62 = vpop.f32.mrb[6].mxu0 }
 0x1d8   :  { %466 = vst.msk [vmem:[%s777_s5] sm:$0xff] %vm465_vm2, %v460_v60  ;;  %v574_v63 = vpop.f32.mrb[7].mxu0 }

</bundles_post_ra>
